<compile_context>
chip_gen: v5e
topology: v5e:2x2
jax: 0.10.0
libtpu: 0.0.40
codegen_flags: <defaults>
</compile_context>

<pallas_src>
import functools

import jax
import jax.numpy as jnp
from jax.experimental import pallas as pl
from jax.experimental.pallas import tpu as pltpu

# Matmul operands are cast to this dtype (accumulation stays f32 on the MXU).
MATMUL_DTYPE = jnp.bfloat16

VMEM_SPEC = pl.BlockSpec(memory_space=pltpu.MemorySpace.VMEM)


def _round_up(x, m):
    return (x + m - 1) // m * m


def _pick_tile(m, target):
    """Largest multiple-of-8 divisor of m that is <= target (else m itself)."""
    if m <= target:
        return m
    for t in range(target - target % 8, 7, -8):
        if m % t == 0:
            return t
    return m


# --------------------------- generic tiled matmul -----------------------------

def _matmul_bias_act_kernel(x_ref, w_ref, b_ref, o_ref, *, act):
    y = jnp.dot(x_ref[...], w_ref[...], preferred_element_type=jnp.float32)
    y = y + b_ref[...]
    if act == "relu":
        y = jnp.maximum(y, 0.0)
    elif act == "sigmoid":
        y = jax.nn.sigmoid(y)
    o_ref[...] = y.astype(o_ref.dtype)


def matmul_bias_act(x, w, b, act="none", tm_target=512):
    """Tiled (M,K)@(K,N) + bias + activation.

    M is tiled on a 1-D "parallel" grid; the (small) weight and bias blocks use
    a constant index map so they stay resident in VMEM across grid steps."""
    M, K = x.shape
    N = w.shape[1]
    tm = min(_round_up(M, 8), tm_target)
    Mp = _round_up(M, tm)
    if Mp != M:
        x = jnp.pad(x, ((0, Mp - M), (0, 0)))
    out = pl.pallas_call(
        functools.partial(_matmul_bias_act_kernel, act=act),
        out_shape=jax.ShapeDtypeStruct((Mp, N), jnp.float32),
        grid_spec=pltpu.PrefetchScalarGridSpec(
            num_scalar_prefetch=0,
            grid=(Mp // tm,),
            in_specs=[
                pl.BlockSpec((tm, K), lambda i: (i, 0)),
                pl.BlockSpec((K, N), lambda i: (0, 0)),
                pl.BlockSpec((1, N), lambda i: (0, 0)),
            ],
            out_specs=pl.BlockSpec((tm, N), lambda i: (i, 0)),
        ),
        compiler_params=pltpu.CompilerParams(
            dimension_semantics=("parallel",)),
    )(x.astype(MATMUL_DTYPE), w.astype(MATMUL_DTYPE),
      b.reshape(1, N).astype(jnp.float32))
    return out[:M] if Mp != M else out


# ----------------------- depthwise 3x3 + BN + ReLU ----------------------------

def _dw3x3_s1_kernel(x_ref, w_ref, b_ref, o_ref):
    _, Ho, Wo, _ = o_ref.shape
    acc = None
    for kh in range(3):
        for kw in range(3):
            tap = x_ref[0, kh:kh + Ho, kw:kw + Wo, :]
            term = tap * w_ref[3 * kh + kw]
            acc = term if acc is None else acc + term
    o_ref[0] = jnp.maximum(acc + b_ref[...], 0.0)


def _dw3x3_s2_kernel(p00_ref, p01_ref, p10_ref, p11_ref, w_ref, b_ref, o_ref):
    _, Ho, Wo, _ = o_ref.shape
    phases = ((p00_ref, p01_ref), (p10_ref, p11_ref))
    acc = None
    for kh in range(3):
        for kw in range(3):
            p_ref = phases[kh % 2][kw % 2]
            tap = p_ref[0, kh // 2:kh // 2 + Ho, kw // 2:kw // 2 + Wo, :]
            term = tap * w_ref[3 * kh + kw]
            acc = term if acc is None else acc + term
    o_ref[0] = jnp.maximum(acc + b_ref[...], 0.0)


def dwconv3x3_bn_relu(x_nhwc, w9, scale, bias, stride):
    """Depthwise 3x3 conv (pad=1) with folded BN + ReLU.

    Taps are formed in-kernel from the padded (or phase-split) input, so the
    9x patch blow-up never touches HBM.  Grid is over the batch dimension.
    TODO(synk): add halo'd row tiling for very large spatial sizes."""
    N, H, W, C = x_nhwc.shape
    Ho = (H + 2 - 3) // stride + 1
    Wo = (W + 2 - 3) // stride + 1
    w_eff = (w9 * scale.reshape(1, 1, 1, C)).astype(jnp.float32)   # fold BN scale
    b = bias.reshape(1, 1, C).astype(jnp.float32)
    xp = jnp.pad(x_nhwc, ((0, 0), (1, 1), (1, 1), (0, 0)))

    w_spec = pl.BlockSpec((9, 1, 1, C), lambda n: (0, 0, 0, 0))
    b_spec = pl.BlockSpec((1, 1, C), lambda n: (0, 0, 0))
    out_spec = pl.BlockSpec((1, Ho, Wo, C), lambda n: (n, 0, 0, 0))

    if stride == 1:
        kernel = _dw3x3_s1_kernel
        inputs = (xp,)
        in_specs = [pl.BlockSpec((1, H + 2, W + 2, C), lambda n: (n, 0, 0, 0))]
    else:
        # Split the padded input into its 4 stride-2 phases in plain JAX so the
        # in-kernel tap slices are contiguous (no strided VMEM access).
        kernel = _dw3x3_s2_kernel
        inputs = tuple(xp[:, a::2, b_::2, :] for a in (0, 1) for b_ in (0, 1))
        in_specs = [pl.BlockSpec((1,) + ph.shape[1:], lambda n: (n, 0, 0, 0))
                    for ph in inputs]

    return pl.pallas_call(
        kernel,
        out_shape=jax.ShapeDtypeStruct((N, Ho, Wo, C), jnp.float32),
        grid_spec=pltpu.PrefetchScalarGridSpec(
            num_scalar_prefetch=0,
            grid=(N,),
            in_specs=in_specs + [w_spec, b_spec],
            out_specs=out_spec,
        ),
        compiler_params=pltpu.CompilerParams(
            dimension_semantics=("parallel",)),
    )(*inputs, w_eff, b)


# ------------- pointwise 1x1 + BN + ReLU fused with SE avg-pool ----------------

def _pw_bn_relu_pool_kernel(x_ref, w_ref, b_ref, feat_ref, pool_ref, *, inv_hw):
    j = pl.program_id(1)

    @pl.when(j == 0)
    def _():
        pool_ref[...] = jnp.zeros_like(pool_ref)

    y = jnp.dot(x_ref[0], w_ref[...], preferred_element_type=jnp.float32)
    y = jnp.maximum(y + b_ref[...], 0.0)
    feat_ref[0] = y
    pool_ref[...] += (jnp.sum(y, axis=0, keepdims=True) * inv_hw)[None]


def pointwise_bn_relu_pool(x_nhwc, w_eff, bias, tm_target=512):
    """1x1 conv with folded BN + ReLU, fused with the SE global average pool
    (accumulated across spatial tiles via an output-revisit accumulator)."""
    N, H, W, Cin = x_nhwc.shape
    Cout = w_eff.shape[1]
    HW = H * W
    t = _pick_tile(HW, tm_target)
    x2 = x_nhwc.reshape(N, HW, Cin).astype(MATMUL_DTYPE)
    feat, pooled = pl.pallas_call(
        functools.partial(_pw_bn_relu_pool_kernel, inv_hw=1.0 / HW),
        out_shape=(jax.ShapeDtypeStruct((N, HW, Cout), jnp.float32),
                   jax.ShapeDtypeStruct((N, 1, Cout), jnp.float32)),
        grid_spec=pltpu.PrefetchScalarGridSpec(
            num_scalar_prefetch=0,
            grid=(N, HW // t),
            in_specs=[
                pl.BlockSpec((1, t, Cin), lambda n, j: (n, j, 0)),
                pl.BlockSpec((Cin, Cout), lambda n, j: (0, 0)),
                pl.BlockSpec((1, Cout), lambda n, j: (0, 0)),
            ],
            out_specs=[
                pl.BlockSpec((1, t, Cout), lambda n, j: (n, j, 0)),
                pl.BlockSpec((1, 1, Cout), lambda n, j: (n, 0, 0)),
            ],
        ),
        compiler_params=pltpu.CompilerParams(
            dimension_semantics=("parallel", "arbitrary")),
    )(x2, w_eff.astype(MATMUL_DTYPE), bias.reshape(1, Cout).astype(jnp.float32))
    return feat.reshape(N, H, W, Cout), pooled.reshape(N, Cout)


# ------------------------------ SE gate / scale --------------------------------

def _se_kernel(y_ref, w1_ref, b1_ref, w2_ref, b2_ref, o_ref):
    h = jnp.dot(y_ref[...], w1_ref[...], preferred_element_type=jnp.float32)
    h = jnp.maximum(h + b1_ref[...], 0.0)
    g = jnp.dot(h, w2_ref[...], preferred_element_type=jnp.float32)
    o_ref[...] = jax.nn.sigmoid(g + b2_ref[...])


def se_gate(pooled, w1, b1, w2, b2):
    """Fused SE MLP: relu(fc1) -> sigmoid(fc2).  Tiny; single gridless call."""
    N, C = pooled.shape
    cr = w1.shape[1]
    return pl.pallas_call(
        _se_kernel,
        out_shape=jax.ShapeDtypeStruct((N, C), jnp.float32),
        in_specs=[VMEM_SPEC] * 5,
        out_specs=VMEM_SPEC,
    )(pooled, w1, b1.reshape(1, cr), w2, b2.reshape(1, C))


def _scale_kernel(x_ref, g_ref, o_ref):
    o_ref[0] = x_ref[0] * g_ref[0]


def channel_scale(x_nhwc, gate, tm_target=1024):
    N, H, W, C = x_nhwc.shape
    HW = H * W
    t = _pick_tile(HW, tm_target)
    out = pl.pallas_call(
        _scale_kernel,
        out_shape=jax.ShapeDtypeStruct((N, HW, C), jnp.float32),
        grid_spec=pltpu.PrefetchScalarGridSpec(
            num_scalar_prefetch=0,
            grid=(N, HW // t),
            in_specs=[
                pl.BlockSpec((1, t, C), lambda n, j: (n, j, 0)),
                pl.BlockSpec((1, 1, C), lambda n, j: (n, 0, 0)),
            ],
            out_specs=pl.BlockSpec((1, t, C), lambda n, j: (n, j, 0)),
        ),
        compiler_params=pltpu.CompilerParams(
            dimension_semantics=("parallel", "parallel")),
    )(x_nhwc.reshape(N, HW, C), gate.reshape(N, 1, C))
    return out.reshape(N, H, W, C)


# ------------------------------- glue / layers ----------------------------------

def im2col(x_nhwc, ksize, pad):
    """Stride-1 im2col: (N*Ho*Wo, ksize*ksize*C) ordered (kh, kw, c)."""
    N, H, W, C = x_nhwc.shape
    Ho = H + 2 * pad - ksize + 1
    Wo = W + 2 * pad - ksize + 1
    xp = jnp.pad(x_nhwc, ((0, 0), (pad, pad), (pad, pad), (0, 0)))
    cols = []
    for kh in range(ksize):
        for kw in range(ksize):
            cols.append(xp[:, kh:kh + Ho, kw:kw + Wo, :])
    cols = jnp.stack(cols, axis=3)              # (N, Ho, Wo, K*K, C)
    return cols.reshape(N * Ho * Wo, ksize * ksize * C), Ho, Wo


def conv3x3_relu(x_nhwc, w, b):
    # TODO(synk): fuse the im2col into the matmul kernel via halo'd row tiles
    # to avoid the 9x HBM intermediate on the decoder convs.
    N = x_nhwc.shape[0]
    Cout, Cin = w.shape[0], w.shape[1]
    cols, Ho, Wo = im2col(x_nhwc, 3, 1)
    wm = w.transpose(2, 3, 1, 0).reshape(9 * Cin, Cout)
    y = matmul_bias_act(cols, wm, b, act="relu")
    return y.reshape(N, Ho, Wo, Cout)


def _phase_weight_4x4_s2(w_t):
    """ConvTranspose2d(k=4,s=2,p=1) weight -> (9*Cin, 4*Cout) sub-pixel matrix.

    Each output phase (even/odd row x even/odd col) is a 2x2 conv on the
    1-padded input; packing the 4 phases side by side lets a single lane-dense
    matmul on a 3x3 im2col of the *un-dilated* input produce all of them."""
    Cin, Cout = w_t.shape[0], w_t.shape[1]
    wc = jnp.zeros((3, 3, Cin, 2, 2, Cout), jnp.float32)
    # (tap index, phase) -> kernel index along one spatial axis.
    tap_map = {(0, 0): 3, (1, 0): 1, (1, 1): 2, (2, 1): 0}
    for (th, ph), kh in tap_map.items():
        for (tw, pw), kw in tap_map.items():
            wc = wc.at[th, tw, :, ph, pw, :].set(w_t[:, :, kh, kw])
    return wc.reshape(9 * Cin, 4 * Cout)


def conv_transpose_4x4_s2(x_nhwc, w_t, b):
    """ConvTranspose2d(k=4, s=2, p=1) via sub-pixel phase decomposition."""
    N, H, W, Cin = x_nhwc.shape
    Cout = w_t.shape[1]
    cols, _, _ = im2col(x_nhwc, 3, 1)                        # (N*H*W, 9*Cin)
    y = matmul_bias_act(cols, _phase_weight_4x4_s2(w_t), jnp.tile(b, 4))
    y = y.reshape(N, H, W, 2, 2, Cout).transpose(0, 1, 3, 2, 4, 5)
    return y.reshape(N, 2 * H, 2 * W, Cout)


def conv1x1(x_nhwc, w, b):
    """Final 1x1 head; output channels zero-padded to a lane-dense width (128)
    for unmasked stores, sliced back afterwards."""
    N, H, W, C = x_nhwc.shape
    Cout = w.shape[0]
    n_pad = max(_round_up(Cout, 128), 128)
    wm = jnp.pad(w.reshape(Cout, C).T, ((0, 0), (0, n_pad - Cout)))
    bp = jnp.pad(b, (0, n_pad - Cout))
    y = matmul_bias_act(x_nhwc.reshape(N * H * W, C), wm, bp, act="none")
    return y[:, :Cout].reshape(N, H, W, Cout)


def ds_conv_block(x_nhwc, p, stride):
    dw = dwconv3x3_bn_relu(x_nhwc, p["dw_w"], p["bn1_scale"], p["bn1_bias"],
                           stride)
    w_eff = p["pw_w"] * p["bn2_scale"][None, :]          # fold BN2 scale into W
    feat, pooled = pointwise_bn_relu_pool(dw, w_eff, p["bn2_bias"])
    gate = se_gate(pooled, p["se_w1"], p["se_b1"], p["se_w2"], p["se_b2"])
    return channel_scale(feat, gate)


def efficient_lite_seg(x_nchw, params):
    x = jnp.transpose(x_nchw, (0, 2, 3, 1)).astype(jnp.float32)       # NHWC
    e1 = ds_conv_block(x, params["enc1"], stride=2)
    e2 = ds_conv_block(e1, params["enc2"], stride=2)
    e3 = ds_conv_block(e2, params["enc3"], stride=2)
    e4 = ds_conv_block(e3, params["enc4"], stride=1)
    d3 = conv_transpose_4x4_s2(e4, params["up3_w"], params["up3_b"])
    d3 = jnp.concatenate([d3, e2], axis=-1)
    d3 = conv3x3_relu(d3, params["dec3_w"], params["dec3_b"])
    d2 = conv_transpose_4x4_s2(d3, params["up2_w"], params["up2_b"])
    d2 = jnp.concatenate([d2, e1], axis=-1)
    d2 = conv3x3_relu(d2, params["dec2_w"], params["dec2_b"])
    d1 = conv_transpose_4x4_s2(d2, params["up1_w"], params["up1_b"])
    d1 = jnp.concatenate([d1, x], axis=-1)
    d1 = conv3x3_relu(d1, params["dec1_w"], params["dec1_b"])
    out = conv1x1(d1, params["last_w"], params["last_b"])
    return jnp.transpose(out, (0, 3, 1, 2))                           # NCHW


# --------------------------- parameter init -----------------------------------

def init_params(key, in_channels=3, out_channels=1):
    keys = iter(jax.random.split(key, 128))

    def nrm(shape, s=0.1):
        return jax.random.normal(next(keys), shape, jnp.float32) * s

    def fold_bn(c):
        gamma = 1.0 + nrm((c,))
        beta = nrm((c,))
        mean = nrm((c,))
        var = 1.0 + jnp.abs(nrm((c,)))
        scale = gamma / jnp.sqrt(var + 1e-5)
        return scale, beta - mean * scale

    def ds_block(cin, cout):
        dw = nrm((cin, 1, 3, 3))                       # PyTorch depthwise layout
        dw9 = dw[:, 0].transpose(1, 2, 0).reshape(9, 1, 1, cin)   # (tap,1,1,c)
        bn1_s, bn1_b = fold_bn(cin)
        pw = nrm((cout, cin, 1, 1)).reshape(cout, cin).T          # (cin, cout)
        bn2_s, bn2_b = fold_bn(cout)
        cr = cout // 4
        se_w1 = nrm((cr, cout)).T                                 # (cout, cr)
        se_b1 = nrm((cr,))
        se_w2 = nrm((cout, cr)).T                                 # (cr, cout)
        se_b2 = nrm((cout,))
        return dict(dw_w=dw9, bn1_scale=bn1_s, bn1_bias=bn1_b, pw_w=pw,
                    bn2_scale=bn2_s, bn2_bias=bn2_b,
                    se_w1=se_w1, se_b1=se_b1, se_w2=se_w2, se_b2=se_b2)

    params = {
        "enc1": ds_block(in_channels, 16),
        "enc2": ds_block(16, 32),
        "enc3": ds_block(32, 64),
        "enc4": ds_block(64, 128),
        # ConvTranspose2d weights kept in PyTorch layout (Cin, Cout, 4, 4)
        "up3_w": nrm((128, 64, 4, 4)), "up3_b": nrm((64,)),
        "dec3_w": nrm((64, 64 + 32, 3, 3)), "dec3_b": nrm((64,)),
        "up2_w": nrm((64, 32, 4, 4)), "up2_b": nrm((32,)),
        "dec2_w": nrm((32, 32 + 16, 3, 3)), "dec2_b": nrm((32,)),
        "up1_w": nrm((32, 16, 4, 4)), "up1_b": nrm((16,)),
        "dec1_w": nrm((16, 16 + in_channels, 3, 3)), "dec1_b": nrm((16,)),
        "last_w": nrm((out_channels, 16, 1, 1)), "last_b": nrm((out_channels,)),
    }
    return params


# ---------------------------------- main --------------------------------------

if __name__ == "__main__":
    key = jax.random.PRNGKey(0)
    k_x, k_p = jax.random.split(key)

    in_channels, out_channels = 3, 1
    x = jax.random.normal(k_x, (2, in_channels, 16, 16), jnp.float32)  # NCHW
    params = init_params(k_p, in_channels, out_channels)

    fwd = jax.jit(efficient_lite_seg)
    out = jax.block_until_ready(fwd(x, params))

    assert out.shape == (2, out_channels, 16, 16), out.shape
    assert bool(jnp.all(jnp.isfinite(out)))
    print("KERNEL_OK")
</pallas_src>

<mosaic_0001>
module attributes {stable_mosaic.version = 11 : i64} {
  func.func @_dw3x3_s2_kernel(%arg0: i32, %arg1: memref<1x9x9x3xf32, #tpu.memory_space<vmem>>, %arg2: memref<1x9x9x3xf32, #tpu.memory_space<vmem>>, %arg3: memref<1x9x9x3xf32, #tpu.memory_space<vmem>>, %arg4: memref<1x9x9x3xf32, #tpu.memory_space<vmem>>, %arg5: memref<9x1x1x3xf32, #tpu.memory_space<vmem>>, %arg6: memref<1x1x3xf32, #tpu.memory_space<vmem>>, %arg7: memref<1x8x8x3xf32, #tpu.memory_space<vmem>>) attributes {dimension_semantics = [#tpu.dimension_semantics<parallel>], iteration_bounds = array<i64: 2>, scalar_prefetch = 0 : i64, scratch_operands = 0 : i64, tpu.core_type = #tpu.core_type<tc>, window_params = [{transform_indices = @transform_0, window_bounds = array<i64: 1, 9, 9, 3>}, {transform_indices = @transform_1, window_bounds = array<i64: 1, 9, 9, 3>}, {transform_indices = @transform_2, window_bounds = array<i64: 1, 9, 9, 3>}, {transform_indices = @transform_3, window_bounds = array<i64: 1, 9, 9, 3>}, {pipeline_mode = #tpu.pipeline_mode<synchronous>, transform_indices = @transform_4, window_bounds = array<i64: 9, 1, 1, 3>}, {pipeline_mode = #tpu.pipeline_mode<synchronous>, transform_indices = @transform_5, window_bounds = array<i64: 1, 1, 3>}, {transform_indices = @transform_6, window_bounds = array<i64: 1, 8, 8, 3>}]} {
    %c0 = arith.constant 0 : index
    %c0_0 = arith.constant 0 : index
    %c0_1 = arith.constant 0 : index
    %c0_2 = arith.constant 0 : index
    %0 = vector.load %arg1[%c0, %c0_0, %c0_1, %c0_2] : memref<1x9x9x3xf32, #tpu.memory_space<vmem>>, vector<1x8x8x3xf32>
    %1 = vector.shape_cast %0 : vector<1x8x8x3xf32> to vector<8x8x3xf32>
    %c0_3 = arith.constant 0 : index
    %c0_4 = arith.constant 0 : index
    %c0_5 = arith.constant 0 : index
    %c0_6 = arith.constant 0 : index
    %2 = vector.load %arg5[%c0_3, %c0_4, %c0_5, %c0_6] : memref<9x1x1x3xf32, #tpu.memory_space<vmem>>, vector<1x1x1x3xf32>
    %3 = vector.shape_cast %2 : vector<1x1x1x3xf32> to vector<1x1x3xf32>
    %4 = vector.broadcast %3 : vector<1x1x3xf32> to vector<8x8x3xf32>
    %5 = arith.mulf %1, %4 : vector<8x8x3xf32>
    %c0_7 = arith.constant 0 : index
    %c0_8 = arith.constant 0 : index
    %c0_9 = arith.constant 0 : index
    %c0_10 = arith.constant 0 : index
    %6 = vector.load %arg2[%c0_7, %c0_8, %c0_9, %c0_10] : memref<1x9x9x3xf32, #tpu.memory_space<vmem>>, vector<1x8x8x3xf32>
    %7 = vector.shape_cast %6 : vector<1x8x8x3xf32> to vector<8x8x3xf32>
    %c1 = arith.constant 1 : index
    %c0_11 = arith.constant 0 : index
    %c0_12 = arith.constant 0 : index
    %c0_13 = arith.constant 0 : index
    %8 = vector.load %arg5[%c1, %c0_11, %c0_12, %c0_13] : memref<9x1x1x3xf32, #tpu.memory_space<vmem>>, vector<1x1x1x3xf32>
    %9 = vector.shape_cast %8 : vector<1x1x1x3xf32> to vector<1x1x3xf32>
    %10 = vector.broadcast %9 : vector<1x1x3xf32> to vector<8x8x3xf32>
    %11 = arith.mulf %7, %10 : vector<8x8x3xf32>
    %12 = arith.addf %5, %11 : vector<8x8x3xf32>
    %c0_14 = arith.constant 0 : index
    %c0_15 = arith.constant 0 : index
    %c1_16 = arith.constant 1 : index
    %c0_17 = arith.constant 0 : index
    %13 = vector.load %arg1[%c0_14, %c0_15, %c1_16, %c0_17] : memref<1x9x9x3xf32, #tpu.memory_space<vmem>>, vector<1x8x8x3xf32>
    %14 = vector.shape_cast %13 : vector<1x8x8x3xf32> to vector<8x8x3xf32>
    %c2 = arith.constant 2 : index
    %c0_18 = arith.constant 0 : index
    %c0_19 = arith.constant 0 : index
    %c0_20 = arith.constant 0 : index
    %15 = vector.load %arg5[%c2, %c0_18, %c0_19, %c0_20] : memref<9x1x1x3xf32, #tpu.memory_space<vmem>>, vector<1x1x1x3xf32>
    %16 = vector.shape_cast %15 : vector<1x1x1x3xf32> to vector<1x1x3xf32>
    %17 = vector.broadcast %16 : vector<1x1x3xf32> to vector<8x8x3xf32>
    %18 = arith.mulf %14, %17 : vector<8x8x3xf32>
    %19 = arith.addf %12, %18 : vector<8x8x3xf32>
    %c0_21 = arith.constant 0 : index
    %c0_22 = arith.constant 0 : index
    %c0_23 = arith.constant 0 : index
    %c0_24 = arith.constant 0 : index
    %20 = vector.load %arg3[%c0_21, %c0_22, %c0_23, %c0_24] : memref<1x9x9x3xf32, #tpu.memory_space<vmem>>, vector<1x8x8x3xf32>
    %21 = vector.shape_cast %20 : vector<1x8x8x3xf32> to vector<8x8x3xf32>
    %c3 = arith.constant 3 : index
    %c0_25 = arith.constant 0 : index
    %c0_26 = arith.constant 0 : index
    %c0_27 = arith.constant 0 : index
    %22 = vector.load %arg5[%c3, %c0_25, %c0_26, %c0_27] : memref<9x1x1x3xf32, #tpu.memory_space<vmem>>, vector<1x1x1x3xf32>
    %23 = vector.shape_cast %22 : vector<1x1x1x3xf32> to vector<1x1x3xf32>
    %24 = vector.broadcast %23 : vector<1x1x3xf32> to vector<8x8x3xf32>
    %25 = arith.mulf %21, %24 : vector<8x8x3xf32>
    %26 = arith.addf %19, %25 : vector<8x8x3xf32>
    %c0_28 = arith.constant 0 : index
    %c0_29 = arith.constant 0 : index
    %c0_30 = arith.constant 0 : index
    %c0_31 = arith.constant 0 : index
    %27 = vector.load %arg4[%c0_28, %c0_29, %c0_30, %c0_31] : memref<1x9x9x3xf32, #tpu.memory_space<vmem>>, vector<1x8x8x3xf32>
    %28 = vector.shape_cast %27 : vector<1x8x8x3xf32> to vector<8x8x3xf32>
    %c4 = arith.constant 4 : index
    %c0_32 = arith.constant 0 : index
    %c0_33 = arith.constant 0 : index
    %c0_34 = arith.constant 0 : index
    %29 = vector.load %arg5[%c4, %c0_32, %c0_33, %c0_34] : memref<9x1x1x3xf32, #tpu.memory_space<vmem>>, vector<1x1x1x3xf32>
    %30 = vector.shape_cast %29 : vector<1x1x1x3xf32> to vector<1x1x3xf32>
    %31 = vector.broadcast %30 : vector<1x1x3xf32> to vector<8x8x3xf32>
    %32 = arith.mulf %28, %31 : vector<8x8x3xf32>
    %33 = arith.addf %26, %32 : vector<8x8x3xf32>
    %c0_35 = arith.constant 0 : index
    %c0_36 = arith.constant 0 : index
    %c1_37 = arith.constant 1 : index
    %c0_38 = arith.constant 0 : index
    %34 = vector.load %arg3[%c0_35, %c0_36, %c1_37, %c0_38] : memref<1x9x9x3xf32, #tpu.memory_space<vmem>>, vector<1x8x8x3xf32>
    %35 = vector.shape_cast %34 : vector<1x8x8x3xf32> to vector<8x8x3xf32>
    %c5 = arith.constant 5 : index
    %c0_39 = arith.constant 0 : index
    %c0_40 = arith.constant 0 : index
    %c0_41 = arith.constant 0 : index
    %36 = vector.load %arg5[%c5, %c0_39, %c0_40, %c0_41] : memref<9x1x1x3xf32, #tpu.memory_space<vmem>>, vector<1x1x1x3xf32>
    %37 = vector.shape_cast %36 : vector<1x1x1x3xf32> to vector<1x1x3xf32>
    %38 = vector.broadcast %37 : vector<1x1x3xf32> to vector<8x8x3xf32>
    %39 = arith.mulf %35, %38 : vector<8x8x3xf32>
    %40 = arith.addf %33, %39 : vector<8x8x3xf32>
    %c0_42 = arith.constant 0 : index
    %c1_43 = arith.constant 1 : index
    %c0_44 = arith.constant 0 : index
    %c0_45 = arith.constant 0 : index
    %41 = vector.load %arg1[%c0_42, %c1_43, %c0_44, %c0_45] : memref<1x9x9x3xf32, #tpu.memory_space<vmem>>, vector<1x8x8x3xf32>
    %42 = vector.shape_cast %41 : vector<1x8x8x3xf32> to vector<8x8x3xf32>
    %c6 = arith.constant 6 : index
    %c0_46 = arith.constant 0 : index
    %c0_47 = arith.constant 0 : index
    %c0_48 = arith.constant 0 : index
    %43 = vector.load %arg5[%c6, %c0_46, %c0_47, %c0_48] : memref<9x1x1x3xf32, #tpu.memory_space<vmem>>, vector<1x1x1x3xf32>
    %44 = vector.shape_cast %43 : vector<1x1x1x3xf32> to vector<1x1x3xf32>
    %45 = vector.broadcast %44 : vector<1x1x3xf32> to vector<8x8x3xf32>
    %46 = arith.mulf %42, %45 : vector<8x8x3xf32>
    %47 = arith.addf %40, %46 : vector<8x8x3xf32>
    %c0_49 = arith.constant 0 : index
    %c1_50 = arith.constant 1 : index
    %c0_51 = arith.constant 0 : index
    %c0_52 = arith.constant 0 : index
    %48 = vector.load %arg2[%c0_49, %c1_50, %c0_51, %c0_52] : memref<1x9x9x3xf32, #tpu.memory_space<vmem>>, vector<1x8x8x3xf32>
    %49 = vector.shape_cast %48 : vector<1x8x8x3xf32> to vector<8x8x3xf32>
    %c7 = arith.constant 7 : index
    %c0_53 = arith.constant 0 : index
    %c0_54 = arith.constant 0 : index
    %c0_55 = arith.constant 0 : index
    %50 = vector.load %arg5[%c7, %c0_53, %c0_54, %c0_55] : memref<9x1x1x3xf32, #tpu.memory_space<vmem>>, vector<1x1x1x3xf32>
    %51 = vector.shape_cast %50 : vector<1x1x1x3xf32> to vector<1x1x3xf32>
    %52 = vector.broadcast %51 : vector<1x1x3xf32> to vector<8x8x3xf32>
    %53 = arith.mulf %49, %52 : vector<8x8x3xf32>
    %54 = arith.addf %47, %53 : vector<8x8x3xf32>
    %c0_56 = arith.constant 0 : index
    %c1_57 = arith.constant 1 : index
    %c1_58 = arith.constant 1 : index
    %c0_59 = arith.constant 0 : index
    %55 = vector.load %arg1[%c0_56, %c1_57, %c1_58, %c0_59] : memref<1x9x9x3xf32, #tpu.memory_space<vmem>>, vector<1x8x8x3xf32>
    %56 = vector.shape_cast %55 : vector<1x8x8x3xf32> to vector<8x8x3xf32>
    %c8 = arith.constant 8 : index
    %c0_60 = arith.constant 0 : index
    %c0_61 = arith.constant 0 : index
    %c0_62 = arith.constant 0 : index
    %57 = vector.load %arg5[%c8, %c0_60, %c0_61, %c0_62] : memref<9x1x1x3xf32, #tpu.memory_space<vmem>>, vector<1x1x1x3xf32>
    %58 = vector.shape_cast %57 : vector<1x1x1x3xf32> to vector<1x1x3xf32>
    %59 = vector.broadcast %58 : vector<1x1x3xf32> to vector<8x8x3xf32>
    %60 = arith.mulf %56, %59 : vector<8x8x3xf32>
    %61 = arith.addf %54, %60 : vector<8x8x3xf32>
    %c0_63 = arith.constant 0 : index
    %c0_64 = arith.constant 0 : index
    %c0_65 = arith.constant 0 : index
    %62 = vector.load %arg6[%c0_63, %c0_64, %c0_65] : memref<1x1x3xf32, #tpu.memory_space<vmem>>, vector<1x1x3xf32>
    %63 = vector.broadcast %62 : vector<1x1x3xf32> to vector<8x8x3xf32>
    %64 = arith.addf %61, %63 : vector<8x8x3xf32>
    %cst = arith.constant 0.000000e+00 : f32
    %65 = vector.broadcast %cst : f32 to vector<8x8x3xf32>
    %66 = arith.maximumf %64, %65 : vector<8x8x3xf32>
    %c0_66 = arith.constant 0 : index
    %c0_67 = arith.constant 0 : index
    %c0_68 = arith.constant 0 : index
    %c0_69 = arith.constant 0 : index
    %67 = vector.load %arg7[%c0_66, %c0_67, %c0_68, %c0_69] : memref<1x8x8x3xf32, #tpu.memory_space<vmem>>, vector<1x8x8x3xf32>
    %68 = vector.shape_cast %67 : vector<1x8x8x3xf32> to vector<8x8x3xf32>
    %69 = vector.shape_cast %66 : vector<8x8x3xf32> to vector<1x8x8x3xf32>
    tpu.vector_store %arg7[%c0_66, %c0_67, %c0_68, %c0_69], %69 {strides = array<i32>} : memref<1x8x8x3xf32, #tpu.memory_space<vmem>>, vector<1x8x8x3xf32>,
    return
  }
  func.func @transform_0(%arg0: i32) -> (i32, i32, i32, i32) {
    %c0_i32 = arith.constant 0 : i32
    %c0_i32_0 = arith.constant 0 : i32
    %c0_i32_1 = arith.constant 0 : i32
    %c0_i32_2 = arith.constant 0 : i32
    return %arg0, %c0_i32, %c0_i32_0, %c0_i32_1 : i32, i32, i32, i32
  }
  func.func @transform_1(%arg0: i32) -> (i32, i32, i32, i32) {
    %c0_i32 = arith.constant 0 : i32
    %c0_i32_0 = arith.constant 0 : i32
    %c0_i32_1 = arith.constant 0 : i32
    %c0_i32_2 = arith.constant 0 : i32
    return %arg0, %c0_i32, %c0_i32_0, %c0_i32_1 : i32, i32, i32, i32
  }
  func.func @transform_2(%arg0: i32) -> (i32, i32, i32, i32) {
    %c0_i32 = arith.constant 0 : i32
    %c0_i32_0 = arith.constant 0 : i32
    %c0_i32_1 = arith.constant 0 : i32
    %c0_i32_2 = arith.constant 0 : i32
    return %arg0, %c0_i32, %c0_i32_0, %c0_i32_1 : i32, i32, i32, i32
  }
  func.func @transform_3(%arg0: i32) -> (i32, i32, i32, i32) {
    %c0_i32 = arith.constant 0 : i32
    %c0_i32_0 = arith.constant 0 : i32
    %c0_i32_1 = arith.constant 0 : i32
    %c0_i32_2 = arith.constant 0 : i32
    return %arg0, %c0_i32, %c0_i32_0, %c0_i32_1 : i32, i32, i32, i32
  }
  func.func @transform_4(%arg0: i32) -> (i32, i32, i32, i32) {
    %c0_i32 = arith.constant 0 : i32
    %c0_i32_0 = arith.constant 0 : i32
    %c0_i32_1 = arith.constant 0 : i32
    %c0_i32_2 = arith.constant 0 : i32
    %c0_i32_3 = arith.constant 0 : i32
    return %c0_i32, %c0_i32_0, %c0_i32_1, %c0_i32_2 : i32, i32, i32, i32
  }
  func.func @transform_5(%arg0: i32) -> (i32, i32, i32) {
    %c0_i32 = arith.constant 0 : i32
    %c0_i32_0 = arith.constant 0 : i32
    %c0_i32_1 = arith.constant 0 : i32
    %c0_i32_2 = arith.constant 0 : i32
    return %c0_i32, %c0_i32_0, %c0_i32_1 : i32, i32, i32
  }
  func.func @transform_6(%arg0: i32) -> (i32, i32, i32, i32) {
    %c0_i32 = arith.constant 0 : i32
    %c0_i32_0 = arith.constant 0 : i32
    %c0_i32_1 = arith.constant 0 : i32
    %c0_i32_2 = arith.constant 0 : i32
    return %arg0, %c0_i32, %c0_i32_0, %c0_i32_1 : i32, i32, i32, i32
  }
}

module attributes {stable_mosaic.version = 11 : i64} {
  func.func @_pw_bn_relu_pool_kernel(%arg0: i32, %arg1: i32, %arg2: memref<1x64x3xbf16, #tpu.memory_space<vmem>>, %arg3: memref<3x16xbf16, #tpu.memory_space<vmem>>, %arg4: memref<1x16xf32, #tpu.memory_space<vmem>>, %arg5: memref<1x64x16xf32, #tpu.memory_space<vmem>>, %arg6: memref<1x1x16xf32, #tpu.memory_space<vmem>>) attributes {dimension_semantics = [#tpu.dimension_semantics<parallel>, #tpu.dimension_semantics<arbitrary>], iteration_bounds = array<i64: 2, 1>, scalar_prefetch = 0 : i64, scratch_operands = 0 : i64, tpu.core_type = #tpu.core_type<tc>, window_params = [{transform_indices = @transform_0, window_bounds = array<i64: 1, 64, 3>}, {pipeline_mode = #tpu.pipeline_mode<synchronous>, transform_indices = @transform_1, window_bounds = array<i64: 3, 16>}, {pipeline_mode = #tpu.pipeline_mode<synchronous>, transform_indices = @transform_2, window_bounds = array<i64: 1, 16>}, {transform_indices = @transform_3, window_bounds = array<i64: 1, 64, 16>}, {transform_indices = @transform_4, window_bounds = array<i64: 1, 1, 16>}]} {
    %c0_i32 = arith.constant 0 : i32
    %0 = arith.cmpi eq, %arg1, %c0_i32 : i32
    %1 = arith.extui %0 : i1 to i32
    %c0_i32_0 = arith.constant 0 : i32
    %2 = arith.cmpi ne, %1, %c0_i32_0 : i32
    scf.if %2 {
      %cst_19 = arith.constant 0.000000e+00 : f32
      %23 = vector.broadcast %cst_19 : f32 to vector<1x1x16xf32>
      %c0_20 = arith.constant 0 : index
      %c0_21 = arith.constant 0 : index
      %c0_22 = arith.constant 0 : index
      %24 = vector.load %arg6[%c0_20, %c0_21, %c0_22] : memref<1x1x16xf32, #tpu.memory_space<vmem>>, vector<1x1x16xf32>
      tpu.vector_store %arg6[%c0_20, %c0_21, %c0_22], %23 {strides = array<i32>} : memref<1x1x16xf32, #tpu.memory_space<vmem>>, vector<1x1x16xf32>,
    } else {
    }
    %c0 = arith.constant 0 : index
    %c0_1 = arith.constant 0 : index
    %c0_2 = arith.constant 0 : index
    %3 = vector.load %arg2[%c0, %c0_1, %c0_2] : memref<1x64x3xbf16, #tpu.memory_space<vmem>>, vector<1x64x3xbf16>
    %4 = vector.shape_cast %3 : vector<1x64x3xbf16> to vector<64x3xbf16>
    %c0_3 = arith.constant 0 : index
    %c0_4 = arith.constant 0 : index
    %5 = vector.load %arg3[%c0_3, %c0_4] : memref<3x16xbf16, #tpu.memory_space<vmem>>, vector<3x16xbf16>
    %cst = arith.constant dense<0.000000e+00> : vector<64x16xf32>
    %6 = tpu.matmul %4, %5, %cst {dimension_numbers = #tpu.dot_dimension_numbers<[1], [0], [0], [1], [0, 0, 1, 1], [], []>} : vector<64x3xbf16>, vector<3x16xbf16>, vector<64x16xf32> -> vector<64x16xf32>
    %c0_5 = arith.constant 0 : index
    %c0_6 = arith.constant 0 : index
    %7 = vector.load %arg4[%c0_5, %c0_6] : memref<1x16xf32, #tpu.memory_space<vmem>>, vector<1x16xf32>
    %8 = vector.broadcast %7 : vector<1x16xf32> to vector<64x16xf32>
    %9 = arith.addf %6, %8 : vector<64x16xf32>
    %cst_7 = arith.constant 0.000000e+00 : f32
    %10 = vector.broadcast %cst_7 : f32 to vector<64x16xf32>
    %11 = arith.maximumf %9, %10 : vector<64x16xf32>
    %c0_8 = arith.constant 0 : index
    %c0_9 = arith.constant 0 : index
    %c0_10 = arith.constant 0 : index
    %12 = vector.load %arg5[%c0_8, %c0_9, %c0_10] : memref<1x64x16xf32, #tpu.memory_space<vmem>>, vector<1x64x16xf32>
    %13 = vector.shape_cast %12 : vector<1x64x16xf32> to vector<64x16xf32>
    %14 = vector.shape_cast %11 : vector<64x16xf32> to vector<1x64x16xf32>
    tpu.vector_store %arg5[%c0_8, %c0_9, %c0_10], %14 {strides = array<i32>} : memref<1x64x16xf32, #tpu.memory_space<vmem>>, vector<1x64x16xf32>,
    %c0_11 = arith.constant 0 : index
    %c0_12 = arith.constant 0 : index
    %c0_13 = arith.constant 0 : index
    %15 = vector.load %arg6[%c0_11, %c0_12, %c0_13] : memref<1x1x16xf32, #tpu.memory_space<vmem>>, vector<1x1x16xf32>
    %cst_14 = arith.constant dense<0.000000e+00> : vector<16xf32>
    %16 = vector.multi_reduction <add>, %11, %cst_14 [0] : vector<64x16xf32> to vector<16xf32>
    %17 = vector.shape_cast %16 : vector<16xf32> to vector<1x16xf32>
    %cst_15 = arith.constant 1.562500e-02 : f32
    %18 = vector.broadcast %cst_15 : f32 to vector<1x16xf32>
    %19 = arith.mulf %17, %18 : vector<1x16xf32>
    %20 = vector.shape_cast %19 : vector<1x16xf32> to vector<1x1x16xf32>
    %21 = arith.addf %15, %20 : vector<1x1x16xf32>
    %c0_16 = arith.constant 0 : index
    %c0_17 = arith.constant 0 : index
    %c0_18 = arith.constant 0 : index
    %22 = vector.load %arg6[%c0_16, %c0_17, %c0_18] : memref<1x1x16xf32, #tpu.memory_space<vmem>>, vector<1x1x16xf32>
    tpu.vector_store %arg6[%c0_16, %c0_17, %c0_18], %21 {strides = array<i32>} : memref<1x1x16xf32, #tpu.memory_space<vmem>>, vector<1x1x16xf32>,
    return
  }
  func.func @transform_0(%arg0: i32, %arg1: i32) -> (i32, i32, i32) {
    %c0_i32 = arith.constant 0 : i32
    %c0_i32_0 = arith.constant 0 : i32
    return %arg0, %arg1, %c0_i32 : i32, i32, i32
  }
  func.func @transform_1(%arg0: i32, %arg1: i32) -> (i32, i32) {
    %c0_i32 = arith.constant 0 : i32
    %c0_i32_0 = arith.constant 0 : i32
    %c0_i32_1 = arith.constant 0 : i32
    return %c0_i32, %c0_i32_0 : i32, i32
  }
  func.func @transform_2(%arg0: i32, %arg1: i32) -> (i32, i32) {
    %c0_i32 = arith.constant 0 : i32
    %c0_i32_0 = arith.constant 0 : i32
    %c0_i32_1 = arith.constant 0 : i32
    return %c0_i32, %c0_i32_0 : i32, i32
  }
  func.func @transform_3(%arg0: i32, %arg1: i32) -> (i32, i32, i32) {
    %c0_i32 = arith.constant 0 : i32
    %c0_i32_0 = arith.constant 0 : i32
    return %arg0, %arg1, %c0_i32 : i32, i32, i32
  }
  func.func @transform_4(%arg0: i32, %arg1: i32) -> (i32, i32, i32) {
    %c0_i32 = arith.constant 0 : i32
    %c0_i32_0 = arith.constant 0 : i32
    %c0_i32_1 = arith.constant 0 : i32
    return %arg0, %c0_i32, %c0_i32_0 : i32, i32, i32
  }
}

module attributes {stable_mosaic.version = 11 : i64} {
  func.func @_se_kernel(%arg0: memref<2x16xf32, #tpu.memory_space<vmem>>, %arg1: memref<16x4xf32, #tpu.memory_space<vmem>>, %arg2: memref<1x4xf32, #tpu.memory_space<vmem>>, %arg3: memref<4x16xf32, #tpu.memory_space<vmem>>, %arg4: memref<1x16xf32, #tpu.memory_space<vmem>>, %arg5: memref<2x16xf32, #tpu.memory_space<vmem>>) attributes {dimension_semantics = [], scalar_prefetch = 0 : i64, scratch_operands = 0 : i64, tpu.core_type = #tpu.core_type<tc>} {
    %c0 = arith.constant 0 : index
    %c0_0 = arith.constant 0 : index
    %0 = vector.load %arg0[%c0, %c0_0] : memref<2x16xf32, #tpu.memory_space<vmem>>, vector<2x16xf32>
    %c0_1 = arith.constant 0 : index
    %c0_2 = arith.constant 0 : index
    %1 = vector.load %arg1[%c0_1, %c0_2] : memref<16x4xf32, #tpu.memory_space<vmem>>, vector<16x4xf32>
    %cst = arith.constant dense<0.000000e+00> : vector<2x4xf32>
    %2 = tpu.matmul %0, %1, %cst {dimension_numbers = #tpu.dot_dimension_numbers<[1], [0], [0], [1], [0, 0, 1, 1], [], []>} : vector<2x16xf32>, vector<16x4xf32>, vector<2x4xf32> -> vector<2x4xf32>
    %c0_3 = arith.constant 0 : index
    %c0_4 = arith.constant 0 : index
    %3 = vector.load %arg2[%c0_3, %c0_4] : memref<1x4xf32, #tpu.memory_space<vmem>>, vector<1x4xf32>
    %4 = vector.broadcast %3 : vector<1x4xf32> to vector<2x4xf32>
    %5 = arith.addf %2, %4 : vector<2x4xf32>
    %cst_5 = arith.constant 0.000000e+00 : f32
    %6 = vector.broadcast %cst_5 : f32 to vector<2x4xf32>
    %7 = arith.maximumf %5, %6 : vector<2x4xf32>
    %c0_6 = arith.constant 0 : index
    %c0_7 = arith.constant 0 : index
    %8 = vector.load %arg3[%c0_6, %c0_7] : memref<4x16xf32, #tpu.memory_space<vmem>>, vector<4x16xf32>
    %cst_8 = arith.constant dense<0.000000e+00> : vector<2x16xf32>
    %9 = tpu.matmul %7, %8, %cst_8 {dimension_numbers = #tpu.dot_dimension_numbers<[1], [0], [0], [1], [0, 0, 1, 1], [], []>} : vector<2x4xf32>, vector<4x16xf32>, vector<2x16xf32> -> vector<2x16xf32>
    %c0_9 = arith.constant 0 : index
    %c0_10 = arith.constant 0 : index
    %10 = vector.load %arg4[%c0_9, %c0_10] : memref<1x16xf32, #tpu.memory_space<vmem>>, vector<1x16xf32>
    %11 = vector.broadcast %10 : vector<1x16xf32> to vector<2x16xf32>
    %12 = arith.addf %9, %11 : vector<2x16xf32>
    %13 = arith.negf %12 : vector<2x16xf32>
    %14 = math.exp %13 : vector<2x16xf32>
    %cst_11 = arith.constant 1.000000e+00 : f32
    %15 = vector.broadcast %cst_11 : f32 to vector<2x16xf32>
    %16 = arith.addf %15, %14 : vector<2x16xf32>
    %17 = arith.divf %15, %16 : vector<2x16xf32>
    %c0_12 = arith.constant 0 : index
    %c0_13 = arith.constant 0 : index
    %18 = vector.load %arg5[%c0_12, %c0_13] : memref<2x16xf32, #tpu.memory_space<vmem>>, vector<2x16xf32>
    tpu.vector_store %arg5[%c0_12, %c0_13], %17 {strides = array<i32>} : memref<2x16xf32, #tpu.memory_space<vmem>>, vector<2x16xf32>,
    return
  }
}

module attributes {stable_mosaic.version = 11 : i64} {
  func.func @_scale_kernel(%arg0: i32, %arg1: i32, %arg2: memref<1x64x16xf32, #tpu.memory_space<vmem>>, %arg3: memref<1x1x16xf32, #tpu.memory_space<vmem>>, %arg4: memref<1x64x16xf32, #tpu.memory_space<vmem>>) attributes {dimension_semantics = [#tpu.dimension_semantics<parallel>, #tpu.dimension_semantics<parallel>], iteration_bounds = array<i64: 2, 1>, scalar_prefetch = 0 : i64, scratch_operands = 0 : i64, tpu.core_type = #tpu.core_type<tc>, window_params = [{transform_indices = @transform_0, window_bounds = array<i64: 1, 64, 16>}, {transform_indices = @transform_1, window_bounds = array<i64: 1, 1, 16>}, {transform_indices = @transform_2, window_bounds = array<i64: 1, 64, 16>}]} {
    %c0 = arith.constant 0 : index
    %c0_0 = arith.constant 0 : index
    %c0_1 = arith.constant 0 : index
    %0 = vector.load %arg2[%c0, %c0_0, %c0_1] : memref<1x64x16xf32, #tpu.memory_space<vmem>>, vector<1x64x16xf32>
    %1 = vector.shape_cast %0 : vector<1x64x16xf32> to vector<64x16xf32>
    %c0_2 = arith.constant 0 : index
    %c0_3 = arith.constant 0 : index
    %c0_4 = arith.constant 0 : index
    %2 = vector.load %arg3[%c0_2, %c0_3, %c0_4] : memref<1x1x16xf32, #tpu.memory_space<vmem>>, vector<1x1x16xf32>
    %3 = vector.shape_cast %2 : vector<1x1x16xf32> to vector<1x16xf32>
    %4 = vector.broadcast %3 : vector<1x16xf32> to vector<64x16xf32>
    %5 = arith.mulf %1, %4 : vector<64x16xf32>
    %c0_5 = arith.constant 0 : index
    %c0_6 = arith.constant 0 : index
    %c0_7 = arith.constant 0 : index
    %6 = vector.load %arg4[%c0_5, %c0_6, %c0_7] : memref<1x64x16xf32, #tpu.memory_space<vmem>>, vector<1x64x16xf32>
    %7 = vector.shape_cast %6 : vector<1x64x16xf32> to vector<64x16xf32>
    %8 = vector.shape_cast %5 : vector<64x16xf32> to vector<1x64x16xf32>
    tpu.vector_store %arg4[%c0_5, %c0_6, %c0_7], %8 {strides = array<i32>} : memref<1x64x16xf32, #tpu.memory_space<vmem>>, vector<1x64x16xf32>,
    return
  }
  func.func @transform_0(%arg0: i32, %arg1: i32) -> (i32, i32, i32) {
    %c0_i32 = arith.constant 0 : i32
    %c0_i32_0 = arith.constant 0 : i32
    return %arg0, %arg1, %c0_i32 : i32, i32, i32
  }
  func.func @transform_1(%arg0: i32, %arg1: i32) -> (i32, i32, i32) {
    %c0_i32 = arith.constant 0 : i32
    %c0_i32_0 = arith.constant 0 : i32
    %c0_i32_1 = arith.constant 0 : i32
    return %arg0, %c0_i32, %c0_i32_0 : i32, i32, i32
  }
  func.func @transform_2(%arg0: i32, %arg1: i32) -> (i32, i32, i32) {
    %c0_i32 = arith.constant 0 : i32
    %c0_i32_0 = arith.constant 0 : i32
    return %arg0, %arg1, %c0_i32 : i32, i32, i32
  }
}

module attributes {stable_mosaic.version = 11 : i64} {
  func.func @_pw_bn_relu_pool_kernel(%arg0: i32, %arg1: i32, %arg2: memref<1x16x16xbf16, #tpu.memory_space<vmem>>, %arg3: memref<16x32xbf16, #tpu.memory_space<vmem>>, %arg4: memref<1x32xf32, #tpu.memory_space<vmem>>, %arg5: memref<1x16x32xf32, #tpu.memory_space<vmem>>, %arg6: memref<1x1x32xf32, #tpu.memory_space<vmem>>) attributes {dimension_semantics = [#tpu.dimension_semantics<parallel>, #tpu.dimension_semantics<arbitrary>], iteration_bounds = array<i64: 2, 1>, scalar_prefetch = 0 : i64, scratch_operands = 0 : i64, tpu.core_type = #tpu.core_type<tc>, window_params = [{transform_indices = @transform_0, window_bounds = array<i64: 1, 16, 16>}, {pipeline_mode = #tpu.pipeline_mode<synchronous>, transform_indices = @transform_1, window_bounds = array<i64: 16, 32>}, {pipeline_mode = #tpu.pipeline_mode<synchronous>, transform_indices = @transform_2, window_bounds = array<i64: 1, 32>}, {transform_indices = @transform_3, window_bounds = array<i64: 1, 16, 32>}, {transform_indices = @transform_4, window_bounds = array<i64: 1, 1, 32>}]} {
    %c0_i32 = arith.constant 0 : i32
    %0 = arith.cmpi eq, %arg1, %c0_i32 : i32
    %1 = arith.extui %0 : i1 to i32
    %c0_i32_0 = arith.constant 0 : i32
    %2 = arith.cmpi ne, %1, %c0_i32_0 : i32
    scf.if %2 {
      %cst_19 = arith.constant 0.000000e+00 : f32
      %23 = vector.broadcast %cst_19 : f32 to vector<1x1x32xf32>
      %c0_20 = arith.constant 0 : index
      %c0_21 = arith.constant 0 : index
      %c0_22 = arith.constant 0 : index
      %24 = vector.load %arg6[%c0_20, %c0_21, %c0_22] : memref<1x1x32xf32, #tpu.memory_space<vmem>>, vector<1x1x32xf32>
      tpu.vector_store %arg6[%c0_20, %c0_21, %c0_22], %23 {strides = array<i32>} : memref<1x1x32xf32, #tpu.memory_space<vmem>>, vector<1x1x32xf32>,
    } else {
    }
    %c0 = arith.constant 0 : index
    %c0_1 = arith.constant 0 : index
    %c0_2 = arith.constant 0 : index
    %3 = vector.load %arg2[%c0, %c0_1, %c0_2] : memref<1x16x16xbf16, #tpu.memory_space<vmem>>, vector<1x16x16xbf16>
    %4 = vector.shape_cast %3 : vector<1x16x16xbf16> to vector<16x16xbf16>
    %c0_3 = arith.constant 0 : index
    %c0_4 = arith.constant 0 : index
    %5 = vector.load %arg3[%c0_3, %c0_4] : memref<16x32xbf16, #tpu.memory_space<vmem>>, vector<16x32xbf16>
    %cst = arith.constant dense<0.000000e+00> : vector<16x32xf32>
    %6 = tpu.matmul %4, %5, %cst {dimension_numbers = #tpu.dot_dimension_numbers<[1], [0], [0], [1], [0, 0, 1, 1], [], []>} : vector<16x16xbf16>, vector<16x32xbf16>, vector<16x32xf32> -> vector<16x32xf32>
    %c0_5 = arith.constant 0 : index
    %c0_6 = arith.constant 0 : index
    %7 = vector.load %arg4[%c0_5, %c0_6] : memref<1x32xf32, #tpu.memory_space<vmem>>, vector<1x32xf32>
    %8 = vector.broadcast %7 : vector<1x32xf32> to vector<16x32xf32>
    %9 = arith.addf %6, %8 : vector<16x32xf32>
    %cst_7 = arith.constant 0.000000e+00 : f32
    %10 = vector.broadcast %cst_7 : f32 to vector<16x32xf32>
    %11 = arith.maximumf %9, %10 : vector<16x32xf32>
    %c0_8 = arith.constant 0 : index
    %c0_9 = arith.constant 0 : index
    %c0_10 = arith.constant 0 : index
    %12 = vector.load %arg5[%c0_8, %c0_9, %c0_10] : memref<1x16x32xf32, #tpu.memory_space<vmem>>, vector<1x16x32xf32>
    %13 = vector.shape_cast %12 : vector<1x16x32xf32> to vector<16x32xf32>
    %14 = vector.shape_cast %11 : vector<16x32xf32> to vector<1x16x32xf32>
    tpu.vector_store %arg5[%c0_8, %c0_9, %c0_10], %14 {strides = array<i32>} : memref<1x16x32xf32, #tpu.memory_space<vmem>>, vector<1x16x32xf32>,
    %c0_11 = arith.constant 0 : index
    %c0_12 = arith.constant 0 : index
    %c0_13 = arith.constant 0 : index
    %15 = vector.load %arg6[%c0_11, %c0_12, %c0_13] : memref<1x1x32xf32, #tpu.memory_space<vmem>>, vector<1x1x32xf32>
    %cst_14 = arith.constant dense<0.000000e+00> : vector<32xf32>
    %16 = vector.multi_reduction <add>, %11, %cst_14 [0] : vector<16x32xf32> to vector<32xf32>
    %17 = vector.shape_cast %16 : vector<32xf32> to vector<1x32xf32>
    %cst_15 = arith.constant 6.250000e-02 : f32
    %18 = vector.broadcast %cst_15 : f32 to vector<1x32xf32>
    %19 = arith.mulf %17, %18 : vector<1x32xf32>
    %20 = vector.shape_cast %19 : vector<1x32xf32> to vector<1x1x32xf32>
    %21 = arith.addf %15, %20 : vector<1x1x32xf32>
    %c0_16 = arith.constant 0 : index
    %c0_17 = arith.constant 0 : index
    %c0_18 = arith.constant 0 : index
    %22 = vector.load %arg6[%c0_16, %c0_17, %c0_18] : memref<1x1x32xf32, #tpu.memory_space<vmem>>, vector<1x1x32xf32>
    tpu.vector_store %arg6[%c0_16, %c0_17, %c0_18], %21 {strides = array<i32>} : memref<1x1x32xf32, #tpu.memory_space<vmem>>, vector<1x1x32xf32>,
    return
  }
  func.func @transform_0(%arg0: i32, %arg1: i32) -> (i32, i32, i32) {
    %c0_i32 = arith.constant 0 : i32
    %c0_i32_0 = arith.constant 0 : i32
    return %arg0, %arg1, %c0_i32 : i32, i32, i32
  }
  func.func @transform_1(%arg0: i32, %arg1: i32) -> (i32, i32) {
    %c0_i32 = arith.constant 0 : i32
    %c0_i32_0 = arith.constant 0 : i32
    %c0_i32_1 = arith.constant 0 : i32
    return %c0_i32, %c0_i32_0 : i32, i32
  }
  func.func @transform_2(%arg0: i32, %arg1: i32) -> (i32, i32) {
    %c0_i32 = arith.constant 0 : i32
    %c0_i32_0 = arith.constant 0 : i32
    %c0_i32_1 = arith.constant 0 : i32
    return %c0_i32, %c0_i32_0 : i32, i32
  }
  func.func @transform_3(%arg0: i32, %arg1: i32) -> (i32, i32, i32) {
    %c0_i32 = arith.constant 0 : i32
    %c0_i32_0 = arith.constant 0 : i32
    return %arg0, %arg1, %c0_i32 : i32, i32, i32
  }
  func.func @transform_4(%arg0: i32, %arg1: i32) -> (i32, i32, i32) {
    %c0_i32 = arith.constant 0 : i32
    %c0_i32_0 = arith.constant 0 : i32
    %c0_i32_1 = arith.constant 0 : i32
    return %arg0, %c0_i32, %c0_i32_0 : i32, i32, i32
  }
}

module attributes {stable_mosaic.version = 11 : i64} {
  func.func @_dw3x3_s2_kernel(%arg0: i32, %arg1: memref<1x5x5x16xf32, #tpu.memory_space<vmem>>, %arg2: memref<1x5x5x16xf32, #tpu.memory_space<vmem>>, %arg3: memref<1x5x5x16xf32, #tpu.memory_space<vmem>>, %arg4: memref<1x5x5x16xf32, #tpu.memory_space<vmem>>, %arg5: memref<9x1x1x16xf32, #tpu.memory_space<vmem>>, %arg6: memref<1x1x16xf32, #tpu.memory_space<vmem>>, %arg7: memref<1x4x4x16xf32, #tpu.memory_space<vmem>>) attributes {dimension_semantics = [#tpu.dimension_semantics<parallel>], iteration_bounds = array<i64: 2>, scalar_prefetch = 0 : i64, scratch_operands = 0 : i64, tpu.core_type = #tpu.core_type<tc>, window_params = [{transform_indices = @transform_0, window_bounds = array<i64: 1, 5, 5, 16>}, {transform_indices = @transform_1, window_bounds = array<i64: 1, 5, 5, 16>}, {transform_indices = @transform_2, window_bounds = array<i64: 1, 5, 5, 16>}, {transform_indices = @transform_3, window_bounds = array<i64: 1, 5, 5, 16>}, {pipeline_mode = #tpu.pipeline_mode<synchronous>, transform_indices = @transform_4, window_bounds = array<i64: 9, 1, 1, 16>}, {pipeline_mode = #tpu.pipeline_mode<synchronous>, transform_indices = @transform_5, window_bounds = array<i64: 1, 1, 16>}, {transform_indices = @transform_6, window_bounds = array<i64: 1, 4, 4, 16>}]} {
    %c0 = arith.constant 0 : index
    %c0_0 = arith.constant 0 : index
    %c0_1 = arith.constant 0 : index
    %c0_2 = arith.constant 0 : index
    %0 = vector.load %arg1[%c0, %c0_0, %c0_1, %c0_2] : memref<1x5x5x16xf32, #tpu.memory_space<vmem>>, vector<1x4x4x16xf32>
    %1 = vector.shape_cast %0 : vector<1x4x4x16xf32> to vector<4x4x16xf32>
    %c0_3 = arith.constant 0 : index
    %c0_4 = arith.constant 0 : index
    %c0_5 = arith.constant 0 : index
    %c0_6 = arith.constant 0 : index
    %2 = vector.load %arg5[%c0_3, %c0_4, %c0_5, %c0_6] : memref<9x1x1x16xf32, #tpu.memory_space<vmem>>, vector<1x1x1x16xf32>
    %3 = vector.shape_cast %2 : vector<1x1x1x16xf32> to vector<1x1x16xf32>
    %4 = vector.broadcast %3 : vector<1x1x16xf32> to vector<4x4x16xf32>
    %5 = arith.mulf %1, %4 : vector<4x4x16xf32>
    %c0_7 = arith.constant 0 : index
    %c0_8 = arith.constant 0 : index
    %c0_9 = arith.constant 0 : index
    %c0_10 = arith.constant 0 : index
    %6 = vector.load %arg2[%c0_7, %c0_8, %c0_9, %c0_10] : memref<1x5x5x16xf32, #tpu.memory_space<vmem>>, vector<1x4x4x16xf32>
    %7 = vector.shape_cast %6 : vector<1x4x4x16xf32> to vector<4x4x16xf32>
    %c1 = arith.constant 1 : index
    %c0_11 = arith.constant 0 : index
    %c0_12 = arith.constant 0 : index
    %c0_13 = arith.constant 0 : index
    %8 = vector.load %arg5[%c1, %c0_11, %c0_12, %c0_13] : memref<9x1x1x16xf32, #tpu.memory_space<vmem>>, vector<1x1x1x16xf32>
    %9 = vector.shape_cast %8 : vector<1x1x1x16xf32> to vector<1x1x16xf32>
    %10 = vector.broadcast %9 : vector<1x1x16xf32> to vector<4x4x16xf32>
    %11 = arith.mulf %7, %10 : vector<4x4x16xf32>
    %12 = arith.addf %5, %11 : vector<4x4x16xf32>
    %c0_14 = arith.constant 0 : index
    %c0_15 = arith.constant 0 : index
    %c1_16 = arith.constant 1 : index
    %c0_17 = arith.constant 0 : index
    %13 = vector.load %arg1[%c0_14, %c0_15, %c1_16, %c0_17] : memref<1x5x5x16xf32, #tpu.memory_space<vmem>>, vector<1x4x4x16xf32>
    %14 = vector.shape_cast %13 : vector<1x4x4x16xf32> to vector<4x4x16xf32>
    %c2 = arith.constant 2 : index
    %c0_18 = arith.constant 0 : index
    %c0_19 = arith.constant 0 : index
    %c0_20 = arith.constant 0 : index
    %15 = vector.load %arg5[%c2, %c0_18, %c0_19, %c0_20] : memref<9x1x1x16xf32, #tpu.memory_space<vmem>>, vector<1x1x1x16xf32>
    %16 = vector.shape_cast %15 : vector<1x1x1x16xf32> to vector<1x1x16xf32>
    %17 = vector.broadcast %16 : vector<1x1x16xf32> to vector<4x4x16xf32>
    %18 = arith.mulf %14, %17 : vector<4x4x16xf32>
    %19 = arith.addf %12, %18 : vector<4x4x16xf32>
    %c0_21 = arith.constant 0 : index
    %c0_22 = arith.constant 0 : index
    %c0_23 = arith.constant 0 : index
    %c0_24 = arith.constant 0 : index
    %20 = vector.load %arg3[%c0_21, %c0_22, %c0_23, %c0_24] : memref<1x5x5x16xf32, #tpu.memory_space<vmem>>, vector<1x4x4x16xf32>
    %21 = vector.shape_cast %20 : vector<1x4x4x16xf32> to vector<4x4x16xf32>
    %c3 = arith.constant 3 : index
    %c0_25 = arith.constant 0 : index
    %c0_26 = arith.constant 0 : index
    %c0_27 = arith.constant 0 : index
    %22 = vector.load %arg5[%c3, %c0_25, %c0_26, %c0_27] : memref<9x1x1x16xf32, #tpu.memory_space<vmem>>, vector<1x1x1x16xf32>
    %23 = vector.shape_cast %22 : vector<1x1x1x16xf32> to vector<1x1x16xf32>
    %24 = vector.broadcast %23 : vector<1x1x16xf32> to vector<4x4x16xf32>
    %25 = arith.mulf %21, %24 : vector<4x4x16xf32>
    %26 = arith.addf %19, %25 : vector<4x4x16xf32>
    %c0_28 = arith.constant 0 : index
    %c0_29 = arith.constant 0 : index
    %c0_30 = arith.constant 0 : index
    %c0_31 = arith.constant 0 : index
    %27 = vector.load %arg4[%c0_28, %c0_29, %c0_30, %c0_31] : memref<1x5x5x16xf32, #tpu.memory_space<vmem>>, vector<1x4x4x16xf32>
    %28 = vector.shape_cast %27 : vector<1x4x4x16xf32> to vector<4x4x16xf32>
    %c4 = arith.constant 4 : index
    %c0_32 = arith.constant 0 : index
    %c0_33 = arith.constant 0 : index
    %c0_34 = arith.constant 0 : index
    %29 = vector.load %arg5[%c4, %c0_32, %c0_33, %c0_34] : memref<9x1x1x16xf32, #tpu.memory_space<vmem>>, vector<1x1x1x16xf32>
    %30 = vector.shape_cast %29 : vector<1x1x1x16xf32> to vector<1x1x16xf32>
    %31 = vector.broadcast %30 : vector<1x1x16xf32> to vector<4x4x16xf32>
    %32 = arith.mulf %28, %31 : vector<4x4x16xf32>
    %33 = arith.addf %26, %32 : vector<4x4x16xf32>
    %c0_35 = arith.constant 0 : index
    %c0_36 = arith.constant 0 : index
    %c1_37 = arith.constant 1 : index
    %c0_38 = arith.constant 0 : index
    %34 = vector.load %arg3[%c0_35, %c0_36, %c1_37, %c0_38] : memref<1x5x5x16xf32, #tpu.memory_space<vmem>>, vector<1x4x4x16xf32>
    %35 = vector.shape_cast %34 : vector<1x4x4x16xf32> to vector<4x4x16xf32>
    %c5 = arith.constant 5 : index
    %c0_39 = arith.constant 0 : index
    %c0_40 = arith.constant 0 : index
    %c0_41 = arith.constant 0 : index
    %36 = vector.load %arg5[%c5, %c0_39, %c0_40, %c0_41] : memref<9x1x1x16xf32, #tpu.memory_space<vmem>>, vector<1x1x1x16xf32>
    %37 = vector.shape_cast %36 : vector<1x1x1x16xf32> to vector<1x1x16xf32>
    %38 = vector.broadcast %37 : vector<1x1x16xf32> to vector<4x4x16xf32>
    %39 = arith.mulf %35, %38 : vector<4x4x16xf32>
    %40 = arith.addf %33, %39 : vector<4x4x16xf32>
    %c0_42 = arith.constant 0 : index
    %c1_43 = arith.constant 1 : index
    %c0_44 = arith.constant 0 : index
    %c0_45 = arith.constant 0 : index
    %41 = vector.load %arg1[%c0_42, %c1_43, %c0_44, %c0_45] : memref<1x5x5x16xf32, #tpu.memory_space<vmem>>, vector<1x4x4x16xf32>
    %42 = vector.shape_cast %41 : vector<1x4x4x16xf32> to vector<4x4x16xf32>
    %c6 = arith.constant 6 : index
    %c0_46 = arith.constant 0 : index
    %c0_47 = arith.constant 0 : index
    %c0_48 = arith.constant 0 : index
    %43 = vector.load %arg5[%c6, %c0_46, %c0_47, %c0_48] : memref<9x1x1x16xf32, #tpu.memory_space<vmem>>, vector<1x1x1x16xf32>
    %44 = vector.shape_cast %43 : vector<1x1x1x16xf32> to vector<1x1x16xf32>
    %45 = vector.broadcast %44 : vector<1x1x16xf32> to vector<4x4x16xf32>
    %46 = arith.mulf %42, %45 : vector<4x4x16xf32>
    %47 = arith.addf %40, %46 : vector<4x4x16xf32>
    %c0_49 = arith.constant 0 : index
    %c1_50 = arith.constant 1 : index
    %c0_51 = arith.constant 0 : index
    %c0_52 = arith.constant 0 : index
    %48 = vector.load %arg2[%c0_49, %c1_50, %c0_51, %c0_52] : memref<1x5x5x16xf32, #tpu.memory_space<vmem>>, vector<1x4x4x16xf32>
    %49 = vector.shape_cast %48 : vector<1x4x4x16xf32> to vector<4x4x16xf32>
    %c7 = arith.constant 7 : index
    %c0_53 = arith.constant 0 : index
    %c0_54 = arith.constant 0 : index
    %c0_55 = arith.constant 0 : index
    %50 = vector.load %arg5[%c7, %c0_53, %c0_54, %c0_55] : memref<9x1x1x16xf32, #tpu.memory_space<vmem>>, vector<1x1x1x16xf32>
    %51 = vector.shape_cast %50 : vector<1x1x1x16xf32> to vector<1x1x16xf32>
    %52 = vector.broadcast %51 : vector<1x1x16xf32> to vector<4x4x16xf32>
    %53 = arith.mulf %49, %52 : vector<4x4x16xf32>
    %54 = arith.addf %47, %53 : vector<4x4x16xf32>
    %c0_56 = arith.constant 0 : index
    %c1_57 = arith.constant 1 : index
    %c1_58 = arith.constant 1 : index
    %c0_59 = arith.constant 0 : index
    %55 = vector.load %arg1[%c0_56, %c1_57, %c1_58, %c0_59] : memref<1x5x5x16xf32, #tpu.memory_space<vmem>>, vector<1x4x4x16xf32>
    %56 = vector.shape_cast %55 : vector<1x4x4x16xf32> to vector<4x4x16xf32>
    %c8 = arith.constant 8 : index
    %c0_60 = arith.constant 0 : index
    %c0_61 = arith.constant 0 : index
    %c0_62 = arith.constant 0 : index
    %57 = vector.load %arg5[%c8, %c0_60, %c0_61, %c0_62] : memref<9x1x1x16xf32, #tpu.memory_space<vmem>>, vector<1x1x1x16xf32>
    %58 = vector.shape_cast %57 : vector<1x1x1x16xf32> to vector<1x1x16xf32>
    %59 = vector.broadcast %58 : vector<1x1x16xf32> to vector<4x4x16xf32>
    %60 = arith.mulf %56, %59 : vector<4x4x16xf32>
    %61 = arith.addf %54, %60 : vector<4x4x16xf32>
    %c0_63 = arith.constant 0 : index
    %c0_64 = arith.constant 0 : index
    %c0_65 = arith.constant 0 : index
    %62 = vector.load %arg6[%c0_63, %c0_64, %c0_65] : memref<1x1x16xf32, #tpu.memory_space<vmem>>, vector<1x1x16xf32>
    %63 = vector.broadcast %62 : vector<1x1x16xf32> to vector<4x4x16xf32>
    %64 = arith.addf %61, %63 : vector<4x4x16xf32>
    %cst = arith.constant 0.000000e+00 : f32
    %65 = vector.broadcast %cst : f32 to vector<4x4x16xf32>
    %66 = arith.maximumf %64, %65 : vector<4x4x16xf32>
    %c0_66 = arith.constant 0 : index
    %c0_67 = arith.constant 0 : index
    %c0_68 = arith.constant 0 : index
    %c0_69 = arith.constant 0 : index
    %67 = vector.load %arg7[%c0_66, %c0_67, %c0_68, %c0_69] : memref<1x4x4x16xf32, #tpu.memory_space<vmem>>, vector<1x4x4x16xf32>
    %68 = vector.shape_cast %67 : vector<1x4x4x16xf32> to vector<4x4x16xf32>
    %69 = vector.shape_cast %66 : vector<4x4x16xf32> to vector<1x4x4x16xf32>
    tpu.vector_store %arg7[%c0_66, %c0_67, %c0_68, %c0_69], %69 {strides = array<i32>} : memref<1x4x4x16xf32, #tpu.memory_space<vmem>>, vector<1x4x4x16xf32>,
    return
  }
  func.func @transform_0(%arg0: i32) -> (i32, i32, i32, i32) {
    %c0_i32 = arith.constant 0 : i32
    %c0_i32_0 = arith.constant 0 : i32
    %c0_i32_1 = arith.constant 0 : i32
    %c0_i32_2 = arith.constant 0 : i32
    return %arg0, %c0_i32, %c0_i32_0, %c0_i32_1 : i32, i32, i32, i32
  }
  func.func @transform_1(%arg0: i32) -> (i32, i32, i32, i32) {
    %c0_i32 = arith.constant 0 : i32
    %c0_i32_0 = arith.constant 0 : i32
    %c0_i32_1 = arith.constant 0 : i32
    %c0_i32_2 = arith.constant 0 : i32
    return %arg0, %c0_i32, %c0_i32_0, %c0_i32_1 : i32, i32, i32, i32
  }
  func.func @transform_2(%arg0: i32) -> (i32, i32, i32, i32) {
    %c0_i32 = arith.constant 0 : i32
    %c0_i32_0 = arith.constant 0 : i32
    %c0_i32_1 = arith.constant 0 : i32
    %c0_i32_2 = arith.constant 0 : i32
    return %arg0, %c0_i32, %c0_i32_0, %c0_i32_1 : i32, i32, i32, i32
  }
  func.func @transform_3(%arg0: i32) -> (i32, i32, i32, i32) {
    %c0_i32 = arith.constant 0 : i32
    %c0_i32_0 = arith.constant 0 : i32
    %c0_i32_1 = arith.constant 0 : i32
    %c0_i32_2 = arith.constant 0 : i32
    return %arg0, %c0_i32, %c0_i32_0, %c0_i32_1 : i32, i32, i32, i32
  }
  func.func @transform_4(%arg0: i32) -> (i32, i32, i32, i32) {
    %c0_i32 = arith.constant 0 : i32
    %c0_i32_0 = arith.constant 0 : i32
    %c0_i32_1 = arith.constant 0 : i32
    %c0_i32_2 = arith.constant 0 : i32
    %c0_i32_3 = arith.constant 0 : i32
    return %c0_i32, %c0_i32_0, %c0_i32_1, %c0_i32_2 : i32, i32, i32, i32
  }
  func.func @transform_5(%arg0: i32) -> (i32, i32, i32) {
    %c0_i32 = arith.constant 0 : i32
    %c0_i32_0 = arith.constant 0 : i32
    %c0_i32_1 = arith.constant 0 : i32
    %c0_i32_2 = arith.constant 0 : i32
    return %c0_i32, %c0_i32_0, %c0_i32_1 : i32, i32, i32
  }
  func.func @transform_6(%arg0: i32) -> (i32, i32, i32, i32) {
    %c0_i32 = arith.constant 0 : i32
    %c0_i32_0 = arith.constant 0 : i32
    %c0_i32_1 = arith.constant 0 : i32
    %c0_i32_2 = arith.constant 0 : i32
    return %arg0, %c0_i32, %c0_i32_0, %c0_i32_1 : i32, i32, i32, i32
  }
}

module attributes {stable_mosaic.version = 11 : i64} {
  func.func @_se_kernel(%arg0: memref<2x32xf32, #tpu.memory_space<vmem>>, %arg1: memref<32x8xf32, #tpu.memory_space<vmem>>, %arg2: memref<1x8xf32, #tpu.memory_space<vmem>>, %arg3: memref<8x32xf32, #tpu.memory_space<vmem>>, %arg4: memref<1x32xf32, #tpu.memory_space<vmem>>, %arg5: memref<2x32xf32, #tpu.memory_space<vmem>>) attributes {dimension_semantics = [], scalar_prefetch = 0 : i64, scratch_operands = 0 : i64, tpu.core_type = #tpu.core_type<tc>} {
    %c0 = arith.constant 0 : index
    %c0_0 = arith.constant 0 : index
    %0 = vector.load %arg0[%c0, %c0_0] : memref<2x32xf32, #tpu.memory_space<vmem>>, vector<2x32xf32>
    %c0_1 = arith.constant 0 : index
    %c0_2 = arith.constant 0 : index
    %1 = vector.load %arg1[%c0_1, %c0_2] : memref<32x8xf32, #tpu.memory_space<vmem>>, vector<32x8xf32>
    %cst = arith.constant dense<0.000000e+00> : vector<2x8xf32>
    %2 = tpu.matmul %0, %1, %cst {dimension_numbers = #tpu.dot_dimension_numbers<[1], [0], [0], [1], [0, 0, 1, 1], [], []>} : vector<2x32xf32>, vector<32x8xf32>, vector<2x8xf32> -> vector<2x8xf32>
    %c0_3 = arith.constant 0 : index
    %c0_4 = arith.constant 0 : index
    %3 = vector.load %arg2[%c0_3, %c0_4] : memref<1x8xf32, #tpu.memory_space<vmem>>, vector<1x8xf32>
    %4 = vector.broadcast %3 : vector<1x8xf32> to vector<2x8xf32>
    %5 = arith.addf %2, %4 : vector<2x8xf32>
    %cst_5 = arith.constant 0.000000e+00 : f32
    %6 = vector.broadcast %cst_5 : f32 to vector<2x8xf32>
    %7 = arith.maximumf %5, %6 : vector<2x8xf32>
    %c0_6 = arith.constant 0 : index
    %c0_7 = arith.constant 0 : index
    %8 = vector.load %arg3[%c0_6, %c0_7] : memref<8x32xf32, #tpu.memory_space<vmem>>, vector<8x32xf32>
    %cst_8 = arith.constant dense<0.000000e+00> : vector<2x32xf32>
    %9 = tpu.matmul %7, %8, %cst_8 {dimension_numbers = #tpu.dot_dimension_numbers<[1], [0], [0], [1], [0, 0, 1, 1], [], []>} : vector<2x8xf32>, vector<8x32xf32>, vector<2x32xf32> -> vector<2x32xf32>
    %c0_9 = arith.constant 0 : index
    %c0_10 = arith.constant 0 : index
    %10 = vector.load %arg4[%c0_9, %c0_10] : memref<1x32xf32, #tpu.memory_space<vmem>>, vector<1x32xf32>
    %11 = vector.broadcast %10 : vector<1x32xf32> to vector<2x32xf32>
    %12 = arith.addf %9, %11 : vector<2x32xf32>
    %13 = arith.negf %12 : vector<2x32xf32>
    %14 = math.exp %13 : vector<2x32xf32>
    %cst_11 = arith.constant 1.000000e+00 : f32
    %15 = vector.broadcast %cst_11 : f32 to vector<2x32xf32>
    %16 = arith.addf %15, %14 : vector<2x32xf32>
    %17 = arith.divf %15, %16 : vector<2x32xf32>
    %c0_12 = arith.constant 0 : index
    %c0_13 = arith.constant 0 : index
    %18 = vector.load %arg5[%c0_12, %c0_13] : memref<2x32xf32, #tpu.memory_space<vmem>>, vector<2x32xf32>
    tpu.vector_store %arg5[%c0_12, %c0_13], %17 {strides = array<i32>} : memref<2x32xf32, #tpu.memory_space<vmem>>, vector<2x32xf32>,
    return
  }
}

module attributes {stable_mosaic.version = 11 : i64} {
  func.func @_scale_kernel(%arg0: i32, %arg1: i32, %arg2: memref<1x16x32xf32, #tpu.memory_space<vmem>>, %arg3: memref<1x1x32xf32, #tpu.memory_space<vmem>>, %arg4: memref<1x16x32xf32, #tpu.memory_space<vmem>>) attributes {dimension_semantics = [#tpu.dimension_semantics<parallel>, #tpu.dimension_semantics<parallel>], iteration_bounds = array<i64: 2, 1>, scalar_prefetch = 0 : i64, scratch_operands = 0 : i64, tpu.core_type = #tpu.core_type<tc>, window_params = [{transform_indices = @transform_0, window_bounds = array<i64: 1, 16, 32>}, {transform_indices = @transform_1, window_bounds = array<i64: 1, 1, 32>}, {transform_indices = @transform_2, window_bounds = array<i64: 1, 16, 32>}]} {
    %c0 = arith.constant 0 : index
    %c0_0 = arith.constant 0 : index
    %c0_1 = arith.constant 0 : index
    %0 = vector.load %arg2[%c0, %c0_0, %c0_1] : memref<1x16x32xf32, #tpu.memory_space<vmem>>, vector<1x16x32xf32>
    %1 = vector.shape_cast %0 : vector<1x16x32xf32> to vector<16x32xf32>
    %c0_2 = arith.constant 0 : index
    %c0_3 = arith.constant 0 : index
    %c0_4 = arith.constant 0 : index
    %2 = vector.load %arg3[%c0_2, %c0_3, %c0_4] : memref<1x1x32xf32, #tpu.memory_space<vmem>>, vector<1x1x32xf32>
    %3 = vector.shape_cast %2 : vector<1x1x32xf32> to vector<1x32xf32>
    %4 = vector.broadcast %3 : vector<1x32xf32> to vector<16x32xf32>
    %5 = arith.mulf %1, %4 : vector<16x32xf32>
    %c0_5 = arith.constant 0 : index
    %c0_6 = arith.constant 0 : index
    %c0_7 = arith.constant 0 : index
    %6 = vector.load %arg4[%c0_5, %c0_6, %c0_7] : memref<1x16x32xf32, #tpu.memory_space<vmem>>, vector<1x16x32xf32>
    %7 = vector.shape_cast %6 : vector<1x16x32xf32> to vector<16x32xf32>
    %8 = vector.shape_cast %5 : vector<16x32xf32> to vector<1x16x32xf32>
    tpu.vector_store %arg4[%c0_5, %c0_6, %c0_7], %8 {strides = array<i32>} : memref<1x16x32xf32, #tpu.memory_space<vmem>>, vector<1x16x32xf32>,
    return
  }
  func.func @transform_0(%arg0: i32, %arg1: i32) -> (i32, i32, i32) {
    %c0_i32 = arith.constant 0 : i32
    %c0_i32_0 = arith.constant 0 : i32
    return %arg0, %arg1, %c0_i32 : i32, i32, i32
  }
  func.func @transform_1(%arg0: i32, %arg1: i32) -> (i32, i32, i32) {
    %c0_i32 = arith.constant 0 : i32
    %c0_i32_0 = arith.constant 0 : i32
    %c0_i32_1 = arith.constant 0 : i32
    return %arg0, %c0_i32, %c0_i32_0 : i32, i32, i32
  }
  func.func @transform_2(%arg0: i32, %arg1: i32) -> (i32, i32, i32) {
    %c0_i32 = arith.constant 0 : i32
    %c0_i32_0 = arith.constant 0 : i32
    return %arg0, %arg1, %c0_i32 : i32, i32, i32
  }
}

module attributes {stable_mosaic.version = 11 : i64} {
  func.func @_dw3x3_s2_kernel(%arg0: i32, %arg1: memref<1x3x3x32xf32, #tpu.memory_space<vmem>>, %arg2: memref<1x3x3x32xf32, #tpu.memory_space<vmem>>, %arg3: memref<1x3x3x32xf32, #tpu.memory_space<vmem>>, %arg4: memref<1x3x3x32xf32, #tpu.memory_space<vmem>>, %arg5: memref<9x1x1x32xf32, #tpu.memory_space<vmem>>, %arg6: memref<1x1x32xf32, #tpu.memory_space<vmem>>, %arg7: memref<1x2x2x32xf32, #tpu.memory_space<vmem>>) attributes {dimension_semantics = [#tpu.dimension_semantics<parallel>], iteration_bounds = array<i64: 2>, scalar_prefetch = 0 : i64, scratch_operands = 0 : i64, tpu.core_type = #tpu.core_type<tc>, window_params = [{transform_indices = @transform_0, window_bounds = array<i64: 1, 3, 3, 32>}, {transform_indices = @transform_1, window_bounds = array<i64: 1, 3, 3, 32>}, {transform_indices = @transform_2, window_bounds = array<i64: 1, 3, 3, 32>}, {transform_indices = @transform_3, window_bounds = array<i64: 1, 3, 3, 32>}, {pipeline_mode = #tpu.pipeline_mode<synchronous>, transform_indices = @transform_4, window_bounds = array<i64: 9, 1, 1, 32>}, {pipeline_mode = #tpu.pipeline_mode<synchronous>, transform_indices = @transform_5, window_bounds = array<i64: 1, 1, 32>}, {transform_indices = @transform_6, window_bounds = array<i64: 1, 2, 2, 32>}]} {
    %c0 = arith.constant 0 : index
    %c0_0 = arith.constant 0 : index
    %c0_1 = arith.constant 0 : index
    %c0_2 = arith.constant 0 : index
    %0 = vector.load %arg1[%c0, %c0_0, %c0_1, %c0_2] : memref<1x3x3x32xf32, #tpu.memory_space<vmem>>, vector<1x2x2x32xf32>
    %1 = vector.shape_cast %0 : vector<1x2x2x32xf32> to vector<2x2x32xf32>
    %c0_3 = arith.constant 0 : index
    %c0_4 = arith.constant 0 : index
    %c0_5 = arith.constant 0 : index
    %c0_6 = arith.constant 0 : index
    %2 = vector.load %arg5[%c0_3, %c0_4, %c0_5, %c0_6] : memref<9x1x1x32xf32, #tpu.memory_space<vmem>>, vector<1x1x1x32xf32>
    %3 = vector.shape_cast %2 : vector<1x1x1x32xf32> to vector<1x1x32xf32>
    %4 = vector.broadcast %3 : vector<1x1x32xf32> to vector<2x2x32xf32>
    %5 = arith.mulf %1, %4 : vector<2x2x32xf32>
    %c0_7 = arith.constant 0 : index
    %c0_8 = arith.constant 0 : index
    %c0_9 = arith.constant 0 : index
    %c0_10 = arith.constant 0 : index
    %6 = vector.load %arg2[%c0_7, %c0_8, %c0_9, %c0_10] : memref<1x3x3x32xf32, #tpu.memory_space<vmem>>, vector<1x2x2x32xf32>
    %7 = vector.shape_cast %6 : vector<1x2x2x32xf32> to vector<2x2x32xf32>
    %c1 = arith.constant 1 : index
    %c0_11 = arith.constant 0 : index
    %c0_12 = arith.constant 0 : index
    %c0_13 = arith.constant 0 : index
    %8 = vector.load %arg5[%c1, %c0_11, %c0_12, %c0_13] : memref<9x1x1x32xf32, #tpu.memory_space<vmem>>, vector<1x1x1x32xf32>
    %9 = vector.shape_cast %8 : vector<1x1x1x32xf32> to vector<1x1x32xf32>
    %10 = vector.broadcast %9 : vector<1x1x32xf32> to vector<2x2x32xf32>
    %11 = arith.mulf %7, %10 : vector<2x2x32xf32>
    %12 = arith.addf %5, %11 : vector<2x2x32xf32>
    %c0_14 = arith.constant 0 : index
    %c0_15 = arith.constant 0 : index
    %c1_16 = arith.constant 1 : index
    %c0_17 = arith.constant 0 : index
    %13 = vector.load %arg1[%c0_14, %c0_15, %c1_16, %c0_17] : memref<1x3x3x32xf32, #tpu.memory_space<vmem>>, vector<1x2x2x32xf32>
    %14 = vector.shape_cast %13 : vector<1x2x2x32xf32> to vector<2x2x32xf32>
    %c2 = arith.constant 2 : index
    %c0_18 = arith.constant 0 : index
    %c0_19 = arith.constant 0 : index
    %c0_20 = arith.constant 0 : index
    %15 = vector.load %arg5[%c2, %c0_18, %c0_19, %c0_20] : memref<9x1x1x32xf32, #tpu.memory_space<vmem>>, vector<1x1x1x32xf32>
    %16 = vector.shape_cast %15 : vector<1x1x1x32xf32> to vector<1x1x32xf32>
    %17 = vector.broadcast %16 : vector<1x1x32xf32> to vector<2x2x32xf32>
    %18 = arith.mulf %14, %17 : vector<2x2x32xf32>
    %19 = arith.addf %12, %18 : vector<2x2x32xf32>
    %c0_21 = arith.constant 0 : index
    %c0_22 = arith.constant 0 : index
    %c0_23 = arith.constant 0 : index
    %c0_24 = arith.constant 0 : index
    %20 = vector.load %arg3[%c0_21, %c0_22, %c0_23, %c0_24] : memref<1x3x3x32xf32, #tpu.memory_space<vmem>>, vector<1x2x2x32xf32>
    %21 = vector.shape_cast %20 : vector<1x2x2x32xf32> to vector<2x2x32xf32>
    %c3 = arith.constant 3 : index
    %c0_25 = arith.constant 0 : index
    %c0_26 = arith.constant 0 : index
    %c0_27 = arith.constant 0 : index
    %22 = vector.load %arg5[%c3, %c0_25, %c0_26, %c0_27] : memref<9x1x1x32xf32, #tpu.memory_space<vmem>>, vector<1x1x1x32xf32>
    %23 = vector.shape_cast %22 : vector<1x1x1x32xf32> to vector<1x1x32xf32>
    %24 = vector.broadcast %23 : vector<1x1x32xf32> to vector<2x2x32xf32>
    %25 = arith.mulf %21, %24 : vector<2x2x32xf32>
    %26 = arith.addf %19, %25 : vector<2x2x32xf32>
    %c0_28 = arith.constant 0 : index
    %c0_29 = arith.constant 0 : index
    %c0_30 = arith.constant 0 : index
    %c0_31 = arith.constant 0 : index
    %27 = vector.load %arg4[%c0_28, %c0_29, %c0_30, %c0_31] : memref<1x3x3x32xf32, #tpu.memory_space<vmem>>, vector<1x2x2x32xf32>
    %28 = vector.shape_cast %27 : vector<1x2x2x32xf32> to vector<2x2x32xf32>
    %c4 = arith.constant 4 : index
    %c0_32 = arith.constant 0 : index
    %c0_33 = arith.constant 0 : index
    %c0_34 = arith.constant 0 : index
    %29 = vector.load %arg5[%c4, %c0_32, %c0_33, %c0_34] : memref<9x1x1x32xf32, #tpu.memory_space<vmem>>, vector<1x1x1x32xf32>
    %30 = vector.shape_cast %29 : vector<1x1x1x32xf32> to vector<1x1x32xf32>
    %31 = vector.broadcast %30 : vector<1x1x32xf32> to vector<2x2x32xf32>
    %32 = arith.mulf %28, %31 : vector<2x2x32xf32>
    %33 = arith.addf %26, %32 : vector<2x2x32xf32>
    %c0_35 = arith.constant 0 : index
    %c0_36 = arith.constant 0 : index
    %c1_37 = arith.constant 1 : index
    %c0_38 = arith.constant 0 : index
    %34 = vector.load %arg3[%c0_35, %c0_36, %c1_37, %c0_38] : memref<1x3x3x32xf32, #tpu.memory_space<vmem>>, vector<1x2x2x32xf32>
    %35 = vector.shape_cast %34 : vector<1x2x2x32xf32> to vector<2x2x32xf32>
    %c5 = arith.constant 5 : index
    %c0_39 = arith.constant 0 : index
    %c0_40 = arith.constant 0 : index
    %c0_41 = arith.constant 0 : index
    %36 = vector.load %arg5[%c5, %c0_39, %c0_40, %c0_41] : memref<9x1x1x32xf32, #tpu.memory_space<vmem>>, vector<1x1x1x32xf32>
    %37 = vector.shape_cast %36 : vector<1x1x1x32xf32> to vector<1x1x32xf32>
    %38 = vector.broadcast %37 : vector<1x1x32xf32> to vector<2x2x32xf32>
    %39 = arith.mulf %35, %38 : vector<2x2x32xf32>
    %40 = arith.addf %33, %39 : vector<2x2x32xf32>
    %c0_42 = arith.constant 0 : index
    %c1_43 = arith.constant 1 : index
    %c0_44 = arith.constant 0 : index
    %c0_45 = arith.constant 0 : index
    %41 = vector.load %arg1[%c0_42, %c1_43, %c0_44, %c0_45] : memref<1x3x3x32xf32, #tpu.memory_space<vmem>>, vector<1x2x2x32xf32>
    %42 = vector.shape_cast %41 : vector<1x2x2x32xf32> to vector<2x2x32xf32>
    %c6 = arith.constant 6 : index
    %c0_46 = arith.constant 0 : index
    %c0_47 = arith.constant 0 : index
    %c0_48 = arith.constant 0 : index
    %43 = vector.load %arg5[%c6, %c0_46, %c0_47, %c0_48] : memref<9x1x1x32xf32, #tpu.memory_space<vmem>>, vector<1x1x1x32xf32>
    %44 = vector.shape_cast %43 : vector<1x1x1x32xf32> to vector<1x1x32xf32>
    %45 = vector.broadcast %44 : vector<1x1x32xf32> to vector<2x2x32xf32>
    %46 = arith.mulf %42, %45 : vector<2x2x32xf32>
    %47 = arith.addf %40, %46 : vector<2x2x32xf32>
    %c0_49 = arith.constant 0 : index
    %c1_50 = arith.constant 1 : index
    %c0_51 = arith.constant 0 : index
    %c0_52 = arith.constant 0 : index
    %48 = vector.load %arg2[%c0_49, %c1_50, %c0_51, %c0_52] : memref<1x3x3x32xf32, #tpu.memory_space<vmem>>, vector<1x2x2x32xf32>
    %49 = vector.shape_cast %48 : vector<1x2x2x32xf32> to vector<2x2x32xf32>
    %c7 = arith.constant 7 : index
    %c0_53 = arith.constant 0 : index
    %c0_54 = arith.constant 0 : index
    %c0_55 = arith.constant 0 : index
    %50 = vector.load %arg5[%c7, %c0_53, %c0_54, %c0_55] : memref<9x1x1x32xf32, #tpu.memory_space<vmem>>, vector<1x1x1x32xf32>
    %51 = vector.shape_cast %50 : vector<1x1x1x32xf32> to vector<1x1x32xf32>
    %52 = vector.broadcast %51 : vector<1x1x32xf32> to vector<2x2x32xf32>
    %53 = arith.mulf %49, %52 : vector<2x2x32xf32>
    %54 = arith.addf %47, %53 : vector<2x2x32xf32>
    %c0_56 = arith.constant 0 : index
    %c1_57 = arith.constant 1 : index
    %c1_58 = arith.constant 1 : index
    %c0_59 = arith.constant 0 : index
    %55 = vector.load %arg1[%c0_56, %c1_57, %c1_58, %c0_59] : memref<1x3x3x32xf32, #tpu.memory_space<vmem>>, vector<1x2x2x32xf32>
    %56 = vector.shape_cast %55 : vector<1x2x2x32xf32> to vector<2x2x32xf32>
    %c8 = arith.constant 8 : index
    %c0_60 = arith.constant 0 : index
    %c0_61 = arith.constant 0 : index
    %c0_62 = arith.constant 0 : index
    %57 = vector.load %arg5[%c8, %c0_60, %c0_61, %c0_62] : memref<9x1x1x32xf32, #tpu.memory_space<vmem>>, vector<1x1x1x32xf32>
    %58 = vector.shape_cast %57 : vector<1x1x1x32xf32> to vector<1x1x32xf32>
    %59 = vector.broadcast %58 : vector<1x1x32xf32> to vector<2x2x32xf32>
    %60 = arith.mulf %56, %59 : vector<2x2x32xf32>
    %61 = arith.addf %54, %60 : vector<2x2x32xf32>
    %c0_63 = arith.constant 0 : index
    %c0_64 = arith.constant 0 : index
    %c0_65 = arith.constant 0 : index
    %62 = vector.load %arg6[%c0_63, %c0_64, %c0_65] : memref<1x1x32xf32, #tpu.memory_space<vmem>>, vector<1x1x32xf32>
    %63 = vector.broadcast %62 : vector<1x1x32xf32> to vector<2x2x32xf32>
    %64 = arith.addf %61, %63 : vector<2x2x32xf32>
    %cst = arith.constant 0.000000e+00 : f32
    %65 = vector.broadcast %cst : f32 to vector<2x2x32xf32>
    %66 = arith.maximumf %64, %65 : vector<2x2x32xf32>
    %c0_66 = arith.constant 0 : index
    %c0_67 = arith.constant 0 : index
    %c0_68 = arith.constant 0 : index
    %c0_69 = arith.constant 0 : index
    %67 = vector.load %arg7[%c0_66, %c0_67, %c0_68, %c0_69] : memref<1x2x2x32xf32, #tpu.memory_space<vmem>>, vector<1x2x2x32xf32>
    %68 = vector.shape_cast %67 : vector<1x2x2x32xf32> to vector<2x2x32xf32>
    %69 = vector.shape_cast %66 : vector<2x2x32xf32> to vector<1x2x2x32xf32>
    tpu.vector_store %arg7[%c0_66, %c0_67, %c0_68, %c0_69], %69 {strides = array<i32>} : memref<1x2x2x32xf32, #tpu.memory_space<vmem>>, vector<1x2x2x32xf32>,
    return
  }
  func.func @transform_0(%arg0: i32) -> (i32, i32, i32, i32) {
    %c0_i32 = arith.constant 0 : i32
    %c0_i32_0 = arith.constant 0 : i32
    %c0_i32_1 = arith.constant 0 : i32
    %c0_i32_2 = arith.constant 0 : i32
    return %arg0, %c0_i32, %c0_i32_0, %c0_i32_1 : i32, i32, i32, i32
  }
  func.func @transform_1(%arg0: i32) -> (i32, i32, i32, i32) {
    %c0_i32 = arith.constant 0 : i32
    %c0_i32_0 = arith.constant 0 : i32
    %c0_i32_1 = arith.constant 0 : i32
    %c0_i32_2 = arith.constant 0 : i32
    return %arg0, %c0_i32, %c0_i32_0, %c0_i32_1 : i32, i32, i32, i32
  }
  func.func @transform_2(%arg0: i32) -> (i32, i32, i32, i32) {
    %c0_i32 = arith.constant 0 : i32
    %c0_i32_0 = arith.constant 0 : i32
    %c0_i32_1 = arith.constant 0 : i32
    %c0_i32_2 = arith.constant 0 : i32
    return %arg0, %c0_i32, %c0_i32_0, %c0_i32_1 : i32, i32, i32, i32
  }
  func.func @transform_3(%arg0: i32) -> (i32, i32, i32, i32) {
    %c0_i32 = arith.constant 0 : i32
    %c0_i32_0 = arith.constant 0 : i32
    %c0_i32_1 = arith.constant 0 : i32
    %c0_i32_2 = arith.constant 0 : i32
    return %arg0, %c0_i32, %c0_i32_0, %c0_i32_1 : i32, i32, i32, i32
  }
  func.func @transform_4(%arg0: i32) -> (i32, i32, i32, i32) {
    %c0_i32 = arith.constant 0 : i32
    %c0_i32_0 = arith.constant 0 : i32
    %c0_i32_1 = arith.constant 0 : i32
    %c0_i32_2 = arith.constant 0 : i32
    %c0_i32_3 = arith.constant 0 : i32
    return %c0_i32, %c0_i32_0, %c0_i32_1, %c0_i32_2 : i32, i32, i32, i32
  }
  func.func @transform_5(%arg0: i32) -> (i32, i32, i32) {
    %c0_i32 = arith.constant 0 : i32
    %c0_i32_0 = arith.constant 0 : i32
    %c0_i32_1 = arith.constant 0 : i32
    %c0_i32_2 = arith.constant 0 : i32
    return %c0_i32, %c0_i32_0, %c0_i32_1 : i32, i32, i32
  }
  func.func @transform_6(%arg0: i32) -> (i32, i32, i32, i32) {
    %c0_i32 = arith.constant 0 : i32
    %c0_i32_0 = arith.constant 0 : i32
    %c0_i32_1 = arith.constant 0 : i32
    %c0_i32_2 = arith.constant 0 : i32
    return %arg0, %c0_i32, %c0_i32_0, %c0_i32_1 : i32, i32, i32, i32
  }
}

module attributes {stable_mosaic.version = 11 : i64} {
  func.func @_pw_bn_relu_pool_kernel(%arg0: i32, %arg1: i32, %arg2: memref<1x4x32xbf16, #tpu.memory_space<vmem>>, %arg3: memref<32x64xbf16, #tpu.memory_space<vmem>>, %arg4: memref<1x64xf32, #tpu.memory_space<vmem>>, %arg5: memref<1x4x64xf32, #tpu.memory_space<vmem>>, %arg6: memref<1x1x64xf32, #tpu.memory_space<vmem>>) attributes {dimension_semantics = [#tpu.dimension_semantics<parallel>, #tpu.dimension_semantics<arbitrary>], iteration_bounds = array<i64: 2, 1>, scalar_prefetch = 0 : i64, scratch_operands = 0 : i64, tpu.core_type = #tpu.core_type<tc>, window_params = [{transform_indices = @transform_0, window_bounds = array<i64: 1, 4, 32>}, {pipeline_mode = #tpu.pipeline_mode<synchronous>, transform_indices = @transform_1, window_bounds = array<i64: 32, 64>}, {pipeline_mode = #tpu.pipeline_mode<synchronous>, transform_indices = @transform_2, window_bounds = array<i64: 1, 64>}, {transform_indices = @transform_3, window_bounds = array<i64: 1, 4, 64>}, {transform_indices = @transform_4, window_bounds = array<i64: 1, 1, 64>}]} {
    %c0_i32 = arith.constant 0 : i32
    %0 = arith.cmpi eq, %arg1, %c0_i32 : i32
    %1 = arith.extui %0 : i1 to i32
    %c0_i32_0 = arith.constant 0 : i32
    %2 = arith.cmpi ne, %1, %c0_i32_0 : i32
    scf.if %2 {
      %cst_19 = arith.constant 0.000000e+00 : f32
      %23 = vector.broadcast %cst_19 : f32 to vector<1x1x64xf32>
      %c0_20 = arith.constant 0 : index
      %c0_21 = arith.constant 0 : index
      %c0_22 = arith.constant 0 : index
      %24 = vector.load %arg6[%c0_20, %c0_21, %c0_22] : memref<1x1x64xf32, #tpu.memory_space<vmem>>, vector<1x1x64xf32>
      tpu.vector_store %arg6[%c0_20, %c0_21, %c0_22], %23 {strides = array<i32>} : memref<1x1x64xf32, #tpu.memory_space<vmem>>, vector<1x1x64xf32>,
    } else {
    }
    %c0 = arith.constant 0 : index
    %c0_1 = arith.constant 0 : index
    %c0_2 = arith.constant 0 : index
    %3 = vector.load %arg2[%c0, %c0_1, %c0_2] : memref<1x4x32xbf16, #tpu.memory_space<vmem>>, vector<1x4x32xbf16>
    %4 = vector.shape_cast %3 : vector<1x4x32xbf16> to vector<4x32xbf16>
    %c0_3 = arith.constant 0 : index
    %c0_4 = arith.constant 0 : index
    %5 = vector.load %arg3[%c0_3, %c0_4] : memref<32x64xbf16, #tpu.memory_space<vmem>>, vector<32x64xbf16>
    %cst = arith.constant dense<0.000000e+00> : vector<4x64xf32>
    %6 = tpu.matmul %4, %5, %cst {dimension_numbers = #tpu.dot_dimension_numbers<[1], [0], [0], [1], [0, 0, 1, 1], [], []>} : vector<4x32xbf16>, vector<32x64xbf16>, vector<4x64xf32> -> vector<4x64xf32>
    %c0_5 = arith.constant 0 : index
    %c0_6 = arith.constant 0 : index
    %7 = vector.load %arg4[%c0_5, %c0_6] : memref<1x64xf32, #tpu.memory_space<vmem>>, vector<1x64xf32>
    %8 = vector.broadcast %7 : vector<1x64xf32> to vector<4x64xf32>
    %9 = arith.addf %6, %8 : vector<4x64xf32>
    %cst_7 = arith.constant 0.000000e+00 : f32
    %10 = vector.broadcast %cst_7 : f32 to vector<4x64xf32>
    %11 = arith.maximumf %9, %10 : vector<4x64xf32>
    %c0_8 = arith.constant 0 : index
    %c0_9 = arith.constant 0 : index
    %c0_10 = arith.constant 0 : index
    %12 = vector.load %arg5[%c0_8, %c0_9, %c0_10] : memref<1x4x64xf32, #tpu.memory_space<vmem>>, vector<1x4x64xf32>
    %13 = vector.shape_cast %12 : vector<1x4x64xf32> to vector<4x64xf32>
    %14 = vector.shape_cast %11 : vector<4x64xf32> to vector<1x4x64xf32>
    tpu.vector_store %arg5[%c0_8, %c0_9, %c0_10], %14 {strides = array<i32>} : memref<1x4x64xf32, #tpu.memory_space<vmem>>, vector<1x4x64xf32>,
    %c0_11 = arith.constant 0 : index
    %c0_12 = arith.constant 0 : index
    %c0_13 = arith.constant 0 : index
    %15 = vector.load %arg6[%c0_11, %c0_12, %c0_13] : memref<1x1x64xf32, #tpu.memory_space<vmem>>, vector<1x1x64xf32>
    %cst_14 = arith.constant dense<0.000000e+00> : vector<64xf32>
    %16 = vector.multi_reduction <add>, %11, %cst_14 [0] : vector<4x64xf32> to vector<64xf32>
    %17 = vector.shape_cast %16 : vector<64xf32> to vector<1x64xf32>
    %cst_15 = arith.constant 2.500000e-01 : f32
    %18 = vector.broadcast %cst_15 : f32 to vector<1x64xf32>
    %19 = arith.mulf %17, %18 : vector<1x64xf32>
    %20 = vector.shape_cast %19 : vector<1x64xf32> to vector<1x1x64xf32>
    %21 = arith.addf %15, %20 : vector<1x1x64xf32>
    %c0_16 = arith.constant 0 : index
    %c0_17 = arith.constant 0 : index
    %c0_18 = arith.constant 0 : index
    %22 = vector.load %arg6[%c0_16, %c0_17, %c0_18] : memref<1x1x64xf32, #tpu.memory_space<vmem>>, vector<1x1x64xf32>
    tpu.vector_store %arg6[%c0_16, %c0_17, %c0_18], %21 {strides = array<i32>} : memref<1x1x64xf32, #tpu.memory_space<vmem>>, vector<1x1x64xf32>,
    return
  }
  func.func @transform_0(%arg0: i32, %arg1: i32) -> (i32, i32, i32) {
    %c0_i32 = arith.constant 0 : i32
    %c0_i32_0 = arith.constant 0 : i32
    return %arg0, %arg1, %c0_i32 : i32, i32, i32
  }
  func.func @transform_1(%arg0: i32, %arg1: i32) -> (i32, i32) {
    %c0_i32 = arith.constant 0 : i32
    %c0_i32_0 = arith.constant 0 : i32
    %c0_i32_1 = arith.constant 0 : i32
    return %c0_i32, %c0_i32_0 : i32, i32
  }
  func.func @transform_2(%arg0: i32, %arg1: i32) -> (i32, i32) {
    %c0_i32 = arith.constant 0 : i32
    %c0_i32_0 = arith.constant 0 : i32
    %c0_i32_1 = arith.constant 0 : i32
    return %c0_i32, %c0_i32_0 : i32, i32
  }
  func.func @transform_3(%arg0: i32, %arg1: i32) -> (i32, i32, i32) {
    %c0_i32 = arith.constant 0 : i32
    %c0_i32_0 = arith.constant 0 : i32
    return %arg0, %arg1, %c0_i32 : i32, i32, i32
  }
  func.func @transform_4(%arg0: i32, %arg1: i32) -> (i32, i32, i32) {
    %c0_i32 = arith.constant 0 : i32
    %c0_i32_0 = arith.constant 0 : i32
    %c0_i32_1 = arith.constant 0 : i32
    return %arg0, %c0_i32, %c0_i32_0 : i32, i32, i32
  }
}

module attributes {stable_mosaic.version = 11 : i64} {
  func.func @_se_kernel(%arg0: memref<2x64xf32, #tpu.memory_space<vmem>>, %arg1: memref<64x16xf32, #tpu.memory_space<vmem>>, %arg2: memref<1x16xf32, #tpu.memory_space<vmem>>, %arg3: memref<16x64xf32, #tpu.memory_space<vmem>>, %arg4: memref<1x64xf32, #tpu.memory_space<vmem>>, %arg5: memref<2x64xf32, #tpu.memory_space<vmem>>) attributes {dimension_semantics = [], scalar_prefetch = 0 : i64, scratch_operands = 0 : i64, tpu.core_type = #tpu.core_type<tc>} {
    %c0 = arith.constant 0 : index
    %c0_0 = arith.constant 0 : index
    %0 = vector.load %arg0[%c0, %c0_0] : memref<2x64xf32, #tpu.memory_space<vmem>>, vector<2x64xf32>
    %c0_1 = arith.constant 0 : index
    %c0_2 = arith.constant 0 : index
    %1 = vector.load %arg1[%c0_1, %c0_2] : memref<64x16xf32, #tpu.memory_space<vmem>>, vector<64x16xf32>
    %cst = arith.constant dense<0.000000e+00> : vector<2x16xf32>
    %2 = tpu.matmul %0, %1, %cst {dimension_numbers = #tpu.dot_dimension_numbers<[1], [0], [0], [1], [0, 0, 1, 1], [], []>} : vector<2x64xf32>, vector<64x16xf32>, vector<2x16xf32> -> vector<2x16xf32>
    %c0_3 = arith.constant 0 : index
    %c0_4 = arith.constant 0 : index
    %3 = vector.load %arg2[%c0_3, %c0_4] : memref<1x16xf32, #tpu.memory_space<vmem>>, vector<1x16xf32>
    %4 = vector.broadcast %3 : vector<1x16xf32> to vector<2x16xf32>
    %5 = arith.addf %2, %4 : vector<2x16xf32>
    %cst_5 = arith.constant 0.000000e+00 : f32
    %6 = vector.broadcast %cst_5 : f32 to vector<2x16xf32>
    %7 = arith.maximumf %5, %6 : vector<2x16xf32>
    %c0_6 = arith.constant 0 : index
    %c0_7 = arith.constant 0 : index
    %8 = vector.load %arg3[%c0_6, %c0_7] : memref<16x64xf32, #tpu.memory_space<vmem>>, vector<16x64xf32>
    %cst_8 = arith.constant dense<0.000000e+00> : vector<2x64xf32>
    %9 = tpu.matmul %7, %8, %cst_8 {dimension_numbers = #tpu.dot_dimension_numbers<[1], [0], [0], [1], [0, 0, 1, 1], [], []>} : vector<2x16xf32>, vector<16x64xf32>, vector<2x64xf32> -> vector<2x64xf32>
    %c0_9 = arith.constant 0 : index
    %c0_10 = arith.constant 0 : index
    %10 = vector.load %arg4[%c0_9, %c0_10] : memref<1x64xf32, #tpu.memory_space<vmem>>, vector<1x64xf32>
    %11 = vector.broadcast %10 : vector<1x64xf32> to vector<2x64xf32>
    %12 = arith.addf %9, %11 : vector<2x64xf32>
    %13 = arith.negf %12 : vector<2x64xf32>
    %14 = math.exp %13 : vector<2x64xf32>
    %cst_11 = arith.constant 1.000000e+00 : f32
    %15 = vector.broadcast %cst_11 : f32 to vector<2x64xf32>
    %16 = arith.addf %15, %14 : vector<2x64xf32>
    %17 = arith.divf %15, %16 : vector<2x64xf32>
    %c0_12 = arith.constant 0 : index
    %c0_13 = arith.constant 0 : index
    %18 = vector.load %arg5[%c0_12, %c0_13] : memref<2x64xf32, #tpu.memory_space<vmem>>, vector<2x64xf32>
    tpu.vector_store %arg5[%c0_12, %c0_13], %17 {strides = array<i32>} : memref<2x64xf32, #tpu.memory_space<vmem>>, vector<2x64xf32>,
    return
  }
}

module attributes {stable_mosaic.version = 11 : i64} {
  func.func @_scale_kernel(%arg0: i32, %arg1: i32, %arg2: memref<1x4x64xf32, #tpu.memory_space<vmem>>, %arg3: memref<1x1x64xf32, #tpu.memory_space<vmem>>, %arg4: memref<1x4x64xf32, #tpu.memory_space<vmem>>) attributes {dimension_semantics = [#tpu.dimension_semantics<parallel>, #tpu.dimension_semantics<parallel>], iteration_bounds = array<i64: 2, 1>, scalar_prefetch = 0 : i64, scratch_operands = 0 : i64, tpu.core_type = #tpu.core_type<tc>, window_params = [{transform_indices = @transform_0, window_bounds = array<i64: 1, 4, 64>}, {transform_indices = @transform_1, window_bounds = array<i64: 1, 1, 64>}, {transform_indices = @transform_2, window_bounds = array<i64: 1, 4, 64>}]} {
    %c0 = arith.constant 0 : index
    %c0_0 = arith.constant 0 : index
    %c0_1 = arith.constant 0 : index
    %0 = vector.load %arg2[%c0, %c0_0, %c0_1] : memref<1x4x64xf32, #tpu.memory_space<vmem>>, vector<1x4x64xf32>
    %1 = vector.shape_cast %0 : vector<1x4x64xf32> to vector<4x64xf32>
    %c0_2 = arith.constant 0 : index
    %c0_3 = arith.constant 0 : index
    %c0_4 = arith.constant 0 : index
    %2 = vector.load %arg3[%c0_2, %c0_3, %c0_4] : memref<1x1x64xf32, #tpu.memory_space<vmem>>, vector<1x1x64xf32>
    %3 = vector.shape_cast %2 : vector<1x1x64xf32> to vector<1x64xf32>
    %4 = vector.broadcast %3 : vector<1x64xf32> to vector<4x64xf32>
    %5 = arith.mulf %1, %4 : vector<4x64xf32>
    %c0_5 = arith.constant 0 : index
    %c0_6 = arith.constant 0 : index
    %c0_7 = arith.constant 0 : index
    %6 = vector.load %arg4[%c0_5, %c0_6, %c0_7] : memref<1x4x64xf32, #tpu.memory_space<vmem>>, vector<1x4x64xf32>
    %7 = vector.shape_cast %6 : vector<1x4x64xf32> to vector<4x64xf32>
    %8 = vector.shape_cast %5 : vector<4x64xf32> to vector<1x4x64xf32>
    tpu.vector_store %arg4[%c0_5, %c0_6, %c0_7], %8 {strides = array<i32>} : memref<1x4x64xf32, #tpu.memory_space<vmem>>, vector<1x4x64xf32>,
    return
  }
  func.func @transform_0(%arg0: i32, %arg1: i32) -> (i32, i32, i32) {
    %c0_i32 = arith.constant 0 : i32
    %c0_i32_0 = arith.constant 0 : i32
    return %arg0, %arg1, %c0_i32 : i32, i32, i32
  }
  func.func @transform_1(%arg0: i32, %arg1: i32) -> (i32, i32, i32) {
    %c0_i32 = arith.constant 0 : i32
    %c0_i32_0 = arith.constant 0 : i32
    %c0_i32_1 = arith.constant 0 : i32
    return %arg0, %c0_i32, %c0_i32_0 : i32, i32, i32
  }
  func.func @transform_2(%arg0: i32, %arg1: i32) -> (i32, i32, i32) {
    %c0_i32 = arith.constant 0 : i32
    %c0_i32_0 = arith.constant 0 : i32
    return %arg0, %arg1, %c0_i32 : i32, i32, i32
  }
}

module attributes {stable_mosaic.version = 11 : i64} {
  func.func @_dw3x3_s1_kernel(%arg0: i32, %arg1: memref<1x4x4x64xf32, #tpu.memory_space<vmem>>, %arg2: memref<9x1x1x64xf32, #tpu.memory_space<vmem>>, %arg3: memref<1x1x64xf32, #tpu.memory_space<vmem>>, %arg4: memref<1x2x2x64xf32, #tpu.memory_space<vmem>>) attributes {dimension_semantics = [#tpu.dimension_semantics<parallel>], iteration_bounds = array<i64: 2>, scalar_prefetch = 0 : i64, scratch_operands = 0 : i64, tpu.core_type = #tpu.core_type<tc>, window_params = [{transform_indices = @transform_0, window_bounds = array<i64: 1, 4, 4, 64>}, {pipeline_mode = #tpu.pipeline_mode<synchronous>, transform_indices = @transform_1, window_bounds = array<i64: 9, 1, 1, 64>}, {pipeline_mode = #tpu.pipeline_mode<synchronous>, transform_indices = @transform_2, window_bounds = array<i64: 1, 1, 64>}, {transform_indices = @transform_3, window_bounds = array<i64: 1, 2, 2, 64>}]} {
    %c0 = arith.constant 0 : index
    %c0_0 = arith.constant 0 : index
    %c0_1 = arith.constant 0 : index
    %c0_2 = arith.constant 0 : index
    %0 = vector.load %arg1[%c0, %c0_0, %c0_1, %c0_2] : memref<1x4x4x64xf32, #tpu.memory_space<vmem>>, vector<1x2x2x64xf32>
    %1 = vector.shape_cast %0 : vector<1x2x2x64xf32> to vector<2x2x64xf32>
    %c0_3 = arith.constant 0 : index
    %c0_4 = arith.constant 0 : index
    %c0_5 = arith.constant 0 : index
    %c0_6 = arith.constant 0 : index
    %2 = vector.load %arg2[%c0_3, %c0_4, %c0_5, %c0_6] : memref<9x1x1x64xf32, #tpu.memory_space<vmem>>, vector<1x1x1x64xf32>
    %3 = vector.shape_cast %2 : vector<1x1x1x64xf32> to vector<1x1x64xf32>
    %4 = vector.broadcast %3 : vector<1x1x64xf32> to vector<2x2x64xf32>
    %5 = arith.mulf %1, %4 : vector<2x2x64xf32>
    %c0_7 = arith.constant 0 : index
    %c0_8 = arith.constant 0 : index
    %c1 = arith.constant 1 : index
    %c0_9 = arith.constant 0 : index
    %6 = vector.load %arg1[%c0_7, %c0_8, %c1, %c0_9] : memref<1x4x4x64xf32, #tpu.memory_space<vmem>>, vector<1x2x2x64xf32>
    %7 = vector.shape_cast %6 : vector<1x2x2x64xf32> to vector<2x2x64xf32>
    %c1_10 = arith.constant 1 : index
    %c0_11 = arith.constant 0 : index
    %c0_12 = arith.constant 0 : index
    %c0_13 = arith.constant 0 : index
    %8 = vector.load %arg2[%c1_10, %c0_11, %c0_12, %c0_13] : memref<9x1x1x64xf32, #tpu.memory_space<vmem>>, vector<1x1x1x64xf32>
    %9 = vector.shape_cast %8 : vector<1x1x1x64xf32> to vector<1x1x64xf32>
    %10 = vector.broadcast %9 : vector<1x1x64xf32> to vector<2x2x64xf32>
    %11 = arith.mulf %7, %10 : vector<2x2x64xf32>
    %12 = arith.addf %5, %11 : vector<2x2x64xf32>
    %c0_14 = arith.constant 0 : index
    %c0_15 = arith.constant 0 : index
    %c2 = arith.constant 2 : index
    %c0_16 = arith.constant 0 : index
    %13 = vector.load %arg1[%c0_14, %c0_15, %c2, %c0_16] : memref<1x4x4x64xf32, #tpu.memory_space<vmem>>, vector<1x2x2x64xf32>
    %14 = vector.shape_cast %13 : vector<1x2x2x64xf32> to vector<2x2x64xf32>
    %c2_17 = arith.constant 2 : index
    %c0_18 = arith.constant 0 : index
    %c0_19 = arith.constant 0 : index
    %c0_20 = arith.constant 0 : index
    %15 = vector.load %arg2[%c2_17, %c0_18, %c0_19, %c0_20] : memref<9x1x1x64xf32, #tpu.memory_space<vmem>>, vector<1x1x1x64xf32>
    %16 = vector.shape_cast %15 : vector<1x1x1x64xf32> to vector<1x1x64xf32>
    %17 = vector.broadcast %16 : vector<1x1x64xf32> to vector<2x2x64xf32>
    %18 = arith.mulf %14, %17 : vector<2x2x64xf32>
    %19 = arith.addf %12, %18 : vector<2x2x64xf32>
    %c0_21 = arith.constant 0 : index
    %c1_22 = arith.constant 1 : index
    %c0_23 = arith.constant 0 : index
    %c0_24 = arith.constant 0 : index
    %20 = vector.load %arg1[%c0_21, %c1_22, %c0_23, %c0_24] : memref<1x4x4x64xf32, #tpu.memory_space<vmem>>, vector<1x2x2x64xf32>
    %21 = vector.shape_cast %20 : vector<1x2x2x64xf32> to vector<2x2x64xf32>
    %c3 = arith.constant 3 : index
    %c0_25 = arith.constant 0 : index
    %c0_26 = arith.constant 0 : index
    %c0_27 = arith.constant 0 : index
    %22 = vector.load %arg2[%c3, %c0_25, %c0_26, %c0_27] : memref<9x1x1x64xf32, #tpu.memory_space<vmem>>, vector<1x1x1x64xf32>
    %23 = vector.shape_cast %22 : vector<1x1x1x64xf32> to vector<1x1x64xf32>
    %24 = vector.broadcast %23 : vector<1x1x64xf32> to vector<2x2x64xf32>
    %25 = arith.mulf %21, %24 : vector<2x2x64xf32>
    %26 = arith.addf %19, %25 : vector<2x2x64xf32>
    %c0_28 = arith.constant 0 : index
    %c1_29 = arith.constant 1 : index
    %c1_30 = arith.constant 1 : index
    %c0_31 = arith.constant 0 : index
    %27 = vector.load %arg1[%c0_28, %c1_29, %c1_30, %c0_31] : memref<1x4x4x64xf32, #tpu.memory_space<vmem>>, vector<1x2x2x64xf32>
    %28 = vector.shape_cast %27 : vector<1x2x2x64xf32> to vector<2x2x64xf32>
    %c4 = arith.constant 4 : index
    %c0_32 = arith.constant 0 : index
    %c0_33 = arith.constant 0 : index
    %c0_34 = arith.constant 0 : index
    %29 = vector.load %arg2[%c4, %c0_32, %c0_33, %c0_34] : memref<9x1x1x64xf32, #tpu.memory_space<vmem>>, vector<1x1x1x64xf32>
    %30 = vector.shape_cast %29 : vector<1x1x1x64xf32> to vector<1x1x64xf32>
    %31 = vector.broadcast %30 : vector<1x1x64xf32> to vector<2x2x64xf32>
    %32 = arith.mulf %28, %31 : vector<2x2x64xf32>
    %33 = arith.addf %26, %32 : vector<2x2x64xf32>
    %c0_35 = arith.constant 0 : index
    %c1_36 = arith.constant 1 : index
    %c2_37 = arith.constant 2 : index
    %c0_38 = arith.constant 0 : index
    %34 = vector.load %arg1[%c0_35, %c1_36, %c2_37, %c0_38] : memref<1x4x4x64xf32, #tpu.memory_space<vmem>>, vector<1x2x2x64xf32>
    %35 = vector.shape_cast %34 : vector<1x2x2x64xf32> to vector<2x2x64xf32>
    %c5 = arith.constant 5 : index
    %c0_39 = arith.constant 0 : index
    %c0_40 = arith.constant 0 : index
    %c0_41 = arith.constant 0 : index
    %36 = vector.load %arg2[%c5, %c0_39, %c0_40, %c0_41] : memref<9x1x1x64xf32, #tpu.memory_space<vmem>>, vector<1x1x1x64xf32>
    %37 = vector.shape_cast %36 : vector<1x1x1x64xf32> to vector<1x1x64xf32>
    %38 = vector.broadcast %37 : vector<1x1x64xf32> to vector<2x2x64xf32>
    %39 = arith.mulf %35, %38 : vector<2x2x64xf32>
    %40 = arith.addf %33, %39 : vector<2x2x64xf32>
    %c0_42 = arith.constant 0 : index
    %c2_43 = arith.constant 2 : index
    %c0_44 = arith.constant 0 : index
    %c0_45 = arith.constant 0 : index
    %41 = vector.load %arg1[%c0_42, %c2_43, %c0_44, %c0_45] : memref<1x4x4x64xf32, #tpu.memory_space<vmem>>, vector<1x2x2x64xf32>
    %42 = vector.shape_cast %41 : vector<1x2x2x64xf32> to vector<2x2x64xf32>
    %c6 = arith.constant 6 : index
    %c0_46 = arith.constant 0 : index
    %c0_47 = arith.constant 0 : index
    %c0_48 = arith.constant 0 : index
    %43 = vector.load %arg2[%c6, %c0_46, %c0_47, %c0_48] : memref<9x1x1x64xf32, #tpu.memory_space<vmem>>, vector<1x1x1x64xf32>
    %44 = vector.shape_cast %43 : vector<1x1x1x64xf32> to vector<1x1x64xf32>
    %45 = vector.broadcast %44 : vector<1x1x64xf32> to vector<2x2x64xf32>
    %46 = arith.mulf %42, %45 : vector<2x2x64xf32>
    %47 = arith.addf %40, %46 : vector<2x2x64xf32>
    %c0_49 = arith.constant 0 : index
    %c2_50 = arith.constant 2 : index
    %c1_51 = arith.constant 1 : index
    %c0_52 = arith.constant 0 : index
    %48 = vector.load %arg1[%c0_49, %c2_50, %c1_51, %c0_52] : memref<1x4x4x64xf32, #tpu.memory_space<vmem>>, vector<1x2x2x64xf32>
    %49 = vector.shape_cast %48 : vector<1x2x2x64xf32> to vector<2x2x64xf32>
    %c7 = arith.constant 7 : index
    %c0_53 = arith.constant 0 : index
    %c0_54 = arith.constant 0 : index
    %c0_55 = arith.constant 0 : index
    %50 = vector.load %arg2[%c7, %c0_53, %c0_54, %c0_55] : memref<9x1x1x64xf32, #tpu.memory_space<vmem>>, vector<1x1x1x64xf32>
    %51 = vector.shape_cast %50 : vector<1x1x1x64xf32> to vector<1x1x64xf32>
    %52 = vector.broadcast %51 : vector<1x1x64xf32> to vector<2x2x64xf32>
    %53 = arith.mulf %49, %52 : vector<2x2x64xf32>
    %54 = arith.addf %47, %53 : vector<2x2x64xf32>
    %c0_56 = arith.constant 0 : index
    %c2_57 = arith.constant 2 : index
    %c2_58 = arith.constant 2 : index
    %c0_59 = arith.constant 0 : index
    %55 = vector.load %arg1[%c0_56, %c2_57, %c2_58, %c0_59] : memref<1x4x4x64xf32, #tpu.memory_space<vmem>>, vector<1x2x2x64xf32>
    %56 = vector.shape_cast %55 : vector<1x2x2x64xf32> to vector<2x2x64xf32>
    %c8 = arith.constant 8 : index
    %c0_60 = arith.constant 0 : index
    %c0_61 = arith.constant 0 : index
    %c0_62 = arith.constant 0 : index
    %57 = vector.load %arg2[%c8, %c0_60, %c0_61, %c0_62] : memref<9x1x1x64xf32, #tpu.memory_space<vmem>>, vector<1x1x1x64xf32>
    %58 = vector.shape_cast %57 : vector<1x1x1x64xf32> to vector<1x1x64xf32>
    %59 = vector.broadcast %58 : vector<1x1x64xf32> to vector<2x2x64xf32>
    %60 = arith.mulf %56, %59 : vector<2x2x64xf32>
    %61 = arith.addf %54, %60 : vector<2x2x64xf32>
    %c0_63 = arith.constant 0 : index
    %c0_64 = arith.constant 0 : index
    %c0_65 = arith.constant 0 : index
    %62 = vector.load %arg3[%c0_63, %c0_64, %c0_65] : memref<1x1x64xf32, #tpu.memory_space<vmem>>, vector<1x1x64xf32>
    %63 = vector.broadcast %62 : vector<1x1x64xf32> to vector<2x2x64xf32>
    %64 = arith.addf %61, %63 : vector<2x2x64xf32>
    %cst = arith.constant 0.000000e+00 : f32
    %65 = vector.broadcast %cst : f32 to vector<2x2x64xf32>
    %66 = arith.maximumf %64, %65 : vector<2x2x64xf32>
    %c0_66 = arith.constant 0 : index
    %c0_67 = arith.constant 0 : index
    %c0_68 = arith.constant 0 : index
    %c0_69 = arith.constant 0 : index
    %67 = vector.load %arg4[%c0_66, %c0_67, %c0_68, %c0_69] : memref<1x2x2x64xf32, #tpu.memory_space<vmem>>, vector<1x2x2x64xf32>
    %68 = vector.shape_cast %67 : vector<1x2x2x64xf32> to vector<2x2x64xf32>
    %69 = vector.shape_cast %66 : vector<2x2x64xf32> to vector<1x2x2x64xf32>
    tpu.vector_store %arg4[%c0_66, %c0_67, %c0_68, %c0_69], %69 {strides = array<i32>} : memref<1x2x2x64xf32, #tpu.memory_space<vmem>>, vector<1x2x2x64xf32>,
    return
  }
  func.func @transform_0(%arg0: i32) -> (i32, i32, i32, i32) {
    %c0_i32 = arith.constant 0 : i32
    %c0_i32_0 = arith.constant 0 : i32
    %c0_i32_1 = arith.constant 0 : i32
    %c0_i32_2 = arith.constant 0 : i32
    return %arg0, %c0_i32, %c0_i32_0, %c0_i32_1 : i32, i32, i32, i32
  }
  func.func @transform_1(%arg0: i32) -> (i32, i32, i32, i32) {
    %c0_i32 = arith.constant 0 : i32
    %c0_i32_0 = arith.constant 0 : i32
    %c0_i32_1 = arith.constant 0 : i32
    %c0_i32_2 = arith.constant 0 : i32
    %c0_i32_3 = arith.constant 0 : i32
    return %c0_i32, %c0_i32_0, %c0_i32_1, %c0_i32_2 : i32, i32, i32, i32
  }
  func.func @transform_2(%arg0: i32) -> (i32, i32, i32) {
    %c0_i32 = arith.constant 0 : i32
    %c0_i32_0 = arith.constant 0 : i32
    %c0_i32_1 = arith.constant 0 : i32
    %c0_i32_2 = arith.constant 0 : i32
    return %c0_i32, %c0_i32_0, %c0_i32_1 : i32, i32, i32
  }
  func.func @transform_3(%arg0: i32) -> (i32, i32, i32, i32) {
    %c0_i32 = arith.constant 0 : i32
    %c0_i32_0 = arith.constant 0 : i32
    %c0_i32_1 = arith.constant 0 : i32
    %c0_i32_2 = arith.constant 0 : i32
    return %arg0, %c0_i32, %c0_i32_0, %c0_i32_1 : i32, i32, i32, i32
  }
}

module attributes {stable_mosaic.version = 11 : i64} {
  func.func @_pw_bn_relu_pool_kernel(%arg0: i32, %arg1: i32, %arg2: memref<1x4x64xbf16, #tpu.memory_space<vmem>>, %arg3: memref<64x128xbf16, #tpu.memory_space<vmem>>, %arg4: memref<1x128xf32, #tpu.memory_space<vmem>>, %arg5: memref<1x4x128xf32, #tpu.memory_space<vmem>>, %arg6: memref<1x1x128xf32, #tpu.memory_space<vmem>>) attributes {dimension_semantics = [#tpu.dimension_semantics<parallel>, #tpu.dimension_semantics<arbitrary>], iteration_bounds = array<i64: 2, 1>, scalar_prefetch = 0 : i64, scratch_operands = 0 : i64, tpu.core_type = #tpu.core_type<tc>, window_params = [{transform_indices = @transform_0, window_bounds = array<i64: 1, 4, 64>}, {pipeline_mode = #tpu.pipeline_mode<synchronous>, transform_indices = @transform_1, window_bounds = array<i64: 64, 128>}, {pipeline_mode = #tpu.pipeline_mode<synchronous>, transform_indices = @transform_2, window_bounds = array<i64: 1, 128>}, {transform_indices = @transform_3, window_bounds = array<i64: 1, 4, 128>}, {transform_indices = @transform_4, window_bounds = array<i64: 1, 1, 128>}]} {
    %c0_i32 = arith.constant 0 : i32
    %0 = arith.cmpi eq, %arg1, %c0_i32 : i32
    %1 = arith.extui %0 : i1 to i32
    %c0_i32_0 = arith.constant 0 : i32
    %2 = arith.cmpi ne, %1, %c0_i32_0 : i32
    scf.if %2 {
      %cst_19 = arith.constant 0.000000e+00 : f32
      %23 = vector.broadcast %cst_19 : f32 to vector<1x1x128xf32>
      %c0_20 = arith.constant 0 : index
      %c0_21 = arith.constant 0 : index
      %c0_22 = arith.constant 0 : index
      %24 = vector.load %arg6[%c0_20, %c0_21, %c0_22] : memref<1x1x128xf32, #tpu.memory_space<vmem>>, vector<1x1x128xf32>
      tpu.vector_store %arg6[%c0_20, %c0_21, %c0_22], %23 {strides = array<i32>} : memref<1x1x128xf32, #tpu.memory_space<vmem>>, vector<1x1x128xf32>,
    } else {
    }
    %c0 = arith.constant 0 : index
    %c0_1 = arith.constant 0 : index
    %c0_2 = arith.constant 0 : index
    %3 = vector.load %arg2[%c0, %c0_1, %c0_2] : memref<1x4x64xbf16, #tpu.memory_space<vmem>>, vector<1x4x64xbf16>
    %4 = vector.shape_cast %3 : vector<1x4x64xbf16> to vector<4x64xbf16>
    %c0_3 = arith.constant 0 : index
    %c0_4 = arith.constant 0 : index
    %5 = vector.load %arg3[%c0_3, %c0_4] : memref<64x128xbf16, #tpu.memory_space<vmem>>, vector<64x128xbf16>
    %cst = arith.constant dense<0.000000e+00> : vector<4x128xf32>
    %6 = tpu.matmul %4, %5, %cst {dimension_numbers = #tpu.dot_dimension_numbers<[1], [0], [0], [1], [0, 0, 1, 1], [], []>} : vector<4x64xbf16>, vector<64x128xbf16>, vector<4x128xf32> -> vector<4x128xf32>
    %c0_5 = arith.constant 0 : index
    %c0_6 = arith.constant 0 : index
    %7 = vector.load %arg4[%c0_5, %c0_6] : memref<1x128xf32, #tpu.memory_space<vmem>>, vector<1x128xf32>
    %8 = vector.broadcast %7 : vector<1x128xf32> to vector<4x128xf32>
    %9 = arith.addf %6, %8 : vector<4x128xf32>
    %cst_7 = arith.constant 0.000000e+00 : f32
    %10 = vector.broadcast %cst_7 : f32 to vector<4x128xf32>
    %11 = arith.maximumf %9, %10 : vector<4x128xf32>
    %c0_8 = arith.constant 0 : index
    %c0_9 = arith.constant 0 : index
    %c0_10 = arith.constant 0 : index
    %12 = vector.load %arg5[%c0_8, %c0_9, %c0_10] : memref<1x4x128xf32, #tpu.memory_space<vmem>>, vector<1x4x128xf32>
    %13 = vector.shape_cast %12 : vector<1x4x128xf32> to vector<4x128xf32>
    %14 = vector.shape_cast %11 : vector<4x128xf32> to vector<1x4x128xf32>
    tpu.vector_store %arg5[%c0_8, %c0_9, %c0_10], %14 {strides = array<i32>} : memref<1x4x128xf32, #tpu.memory_space<vmem>>, vector<1x4x128xf32>,
    %c0_11 = arith.constant 0 : index
    %c0_12 = arith.constant 0 : index
    %c0_13 = arith.constant 0 : index
    %15 = vector.load %arg6[%c0_11, %c0_12, %c0_13] : memref<1x1x128xf32, #tpu.memory_space<vmem>>, vector<1x1x128xf32>
    %cst_14 = arith.constant dense<0.000000e+00> : vector<128xf32>
    %16 = vector.multi_reduction <add>, %11, %cst_14 [0] : vector<4x128xf32> to vector<128xf32>
    %17 = vector.shape_cast %16 : vector<128xf32> to vector<1x128xf32>
    %cst_15 = arith.constant 2.500000e-01 : f32
    %18 = vector.broadcast %cst_15 : f32 to vector<1x128xf32>
    %19 = arith.mulf %17, %18 : vector<1x128xf32>
    %20 = vector.shape_cast %19 : vector<1x128xf32> to vector<1x1x128xf32>
    %21 = arith.addf %15, %20 : vector<1x1x128xf32>
    %c0_16 = arith.constant 0 : index
    %c0_17 = arith.constant 0 : index
    %c0_18 = arith.constant 0 : index
    %22 = vector.load %arg6[%c0_16, %c0_17, %c0_18] : memref<1x1x128xf32, #tpu.memory_space<vmem>>, vector<1x1x128xf32>
    tpu.vector_store %arg6[%c0_16, %c0_17, %c0_18], %21 {strides = array<i32>} : memref<1x1x128xf32, #tpu.memory_space<vmem>>, vector<1x1x128xf32>,
    return
  }
  func.func @transform_0(%arg0: i32, %arg1: i32) -> (i32, i32, i32) {
    %c0_i32 = arith.constant 0 : i32
    %c0_i32_0 = arith.constant 0 : i32
    return %arg0, %arg1, %c0_i32 : i32, i32, i32
  }
  func.func @transform_1(%arg0: i32, %arg1: i32) -> (i32, i32) {
    %c0_i32 = arith.constant 0 : i32
    %c0_i32_0 = arith.constant 0 : i32
    %c0_i32_1 = arith.constant 0 : i32
    return %c0_i32, %c0_i32_0 : i32, i32
  }
  func.func @transform_2(%arg0: i32, %arg1: i32) -> (i32, i32) {
    %c0_i32 = arith.constant 0 : i32
    %c0_i32_0 = arith.constant 0 : i32
    %c0_i32_1 = arith.constant 0 : i32
    return %c0_i32, %c0_i32_0 : i32, i32
  }
  func.func @transform_3(%arg0: i32, %arg1: i32) -> (i32, i32, i32) {
    %c0_i32 = arith.constant 0 : i32
    %c0_i32_0 = arith.constant 0 : i32
    return %arg0, %arg1, %c0_i32 : i32, i32, i32
  }
  func.func @transform_4(%arg0: i32, %arg1: i32) -> (i32, i32, i32) {
    %c0_i32 = arith.constant 0 : i32
    %c0_i32_0 = arith.constant 0 : i32
    %c0_i32_1 = arith.constant 0 : i32
    return %arg0, %c0_i32, %c0_i32_0 : i32, i32, i32
  }
}

module attributes {stable_mosaic.version = 11 : i64} {
  func.func @_scale_kernel(%arg0: i32, %arg1: i32, %arg2: memref<1x4x128xf32, #tpu.memory_space<vmem>>, %arg3: memref<1x1x128xf32, #tpu.memory_space<vmem>>, %arg4: memref<1x4x128xf32, #tpu.memory_space<vmem>>) attributes {dimension_semantics = [#tpu.dimension_semantics<parallel>, #tpu.dimension_semantics<parallel>], iteration_bounds = array<i64: 2, 1>, scalar_prefetch = 0 : i64, scratch_operands = 0 : i64, tpu.core_type = #tpu.core_type<tc>, window_params = [{transform_indices = @transform_0, window_bounds = array<i64: 1, 4, 128>}, {transform_indices = @transform_1, window_bounds = array<i64: 1, 1, 128>}, {transform_indices = @transform_2, window_bounds = array<i64: 1, 4, 128>}]} {
    %c0 = arith.constant 0 : index
    %c0_0 = arith.constant 0 : index
    %c0_1 = arith.constant 0 : index
    %0 = vector.load %arg2[%c0, %c0_0, %c0_1] : memref<1x4x128xf32, #tpu.memory_space<vmem>>, vector<1x4x128xf32>
    %1 = vector.shape_cast %0 : vector<1x4x128xf32> to vector<4x128xf32>
    %c0_2 = arith.constant 0 : index
    %c0_3 = arith.constant 0 : index
    %c0_4 = arith.constant 0 : index
    %2 = vector.load %arg3[%c0_2, %c0_3, %c0_4] : memref<1x1x128xf32, #tpu.memory_space<vmem>>, vector<1x1x128xf32>
    %3 = vector.shape_cast %2 : vector<1x1x128xf32> to vector<1x128xf32>
    %4 = vector.broadcast %3 : vector<1x128xf32> to vector<4x128xf32>
    %5 = arith.mulf %1, %4 : vector<4x128xf32>
    %c0_5 = arith.constant 0 : index
    %c0_6 = arith.constant 0 : index
    %c0_7 = arith.constant 0 : index
    %6 = vector.load %arg4[%c0_5, %c0_6, %c0_7] : memref<1x4x128xf32, #tpu.memory_space<vmem>>, vector<1x4x128xf32>
    %7 = vector.shape_cast %6 : vector<1x4x128xf32> to vector<4x128xf32>
    %8 = vector.shape_cast %5 : vector<4x128xf32> to vector<1x4x128xf32>
    tpu.vector_store %arg4[%c0_5, %c0_6, %c0_7], %8 {strides = array<i32>} : memref<1x4x128xf32, #tpu.memory_space<vmem>>, vector<1x4x128xf32>,
    return
  }
  func.func @transform_0(%arg0: i32, %arg1: i32) -> (i32, i32, i32) {
    %c0_i32 = arith.constant 0 : i32
    %c0_i32_0 = arith.constant 0 : i32
    return %arg0, %arg1, %c0_i32 : i32, i32, i32
  }
  func.func @transform_1(%arg0: i32, %arg1: i32) -> (i32, i32, i32) {
    %c0_i32 = arith.constant 0 : i32
    %c0_i32_0 = arith.constant 0 : i32
    %c0_i32_1 = arith.constant 0 : i32
    return %arg0, %c0_i32, %c0_i32_0 : i32, i32, i32
  }
  func.func @transform_2(%arg0: i32, %arg1: i32) -> (i32, i32, i32) {
    %c0_i32 = arith.constant 0 : i32
    %c0_i32_0 = arith.constant 0 : i32
    return %arg0, %arg1, %c0_i32 : i32, i32, i32
  }
}

module attributes {stable_mosaic.version = 11 : i64} {
  func.func @_se_kernel(%arg0: memref<2x128xf32, #tpu.memory_space<vmem>>, %arg1: memref<128x32xf32, #tpu.memory_space<vmem>>, %arg2: memref<1x32xf32, #tpu.memory_space<vmem>>, %arg3: memref<32x128xf32, #tpu.memory_space<vmem>>, %arg4: memref<1x128xf32, #tpu.memory_space<vmem>>, %arg5: memref<2x128xf32, #tpu.memory_space<vmem>>) attributes {dimension_semantics = [], scalar_prefetch = 0 : i64, scratch_operands = 0 : i64, tpu.core_type = #tpu.core_type<tc>} {
    %c0 = arith.constant 0 : index
    %c0_0 = arith.constant 0 : index
    %0 = vector.load %arg0[%c0, %c0_0] : memref<2x128xf32, #tpu.memory_space<vmem>>, vector<2x128xf32>
    %c0_1 = arith.constant 0 : index
    %c0_2 = arith.constant 0 : index
    %1 = vector.load %arg1[%c0_1, %c0_2] : memref<128x32xf32, #tpu.memory_space<vmem>>, vector<128x32xf32>
    %cst = arith.constant dense<0.000000e+00> : vector<2x32xf32>
    %2 = tpu.matmul %0, %1, %cst {dimension_numbers = #tpu.dot_dimension_numbers<[1], [0], [0], [1], [0, 0, 1, 1], [], []>} : vector<2x128xf32>, vector<128x32xf32>, vector<2x32xf32> -> vector<2x32xf32>
    %c0_3 = arith.constant 0 : index
    %c0_4 = arith.constant 0 : index
    %3 = vector.load %arg2[%c0_3, %c0_4] : memref<1x32xf32, #tpu.memory_space<vmem>>, vector<1x32xf32>
    %4 = vector.broadcast %3 : vector<1x32xf32> to vector<2x32xf32>
    %5 = arith.addf %2, %4 : vector<2x32xf32>
    %cst_5 = arith.constant 0.000000e+00 : f32
    %6 = vector.broadcast %cst_5 : f32 to vector<2x32xf32>
    %7 = arith.maximumf %5, %6 : vector<2x32xf32>
    %c0_6 = arith.constant 0 : index
    %c0_7 = arith.constant 0 : index
    %8 = vector.load %arg3[%c0_6, %c0_7] : memref<32x128xf32, #tpu.memory_space<vmem>>, vector<32x128xf32>
    %cst_8 = arith.constant dense<0.000000e+00> : vector<2x128xf32>
    %9 = tpu.matmul %7, %8, %cst_8 {dimension_numbers = #tpu.dot_dimension_numbers<[1], [0], [0], [1], [0, 0, 1, 1], [], []>} : vector<2x32xf32>, vector<32x128xf32>, vector<2x128xf32> -> vector<2x128xf32>
    %c0_9 = arith.constant 0 : index
    %c0_10 = arith.constant 0 : index
    %10 = vector.load %arg4[%c0_9, %c0_10] : memref<1x128xf32, #tpu.memory_space<vmem>>, vector<1x128xf32>
    %11 = vector.broadcast %10 : vector<1x128xf32> to vector<2x128xf32>
    %12 = arith.addf %9, %11 : vector<2x128xf32>
    %13 = arith.negf %12 : vector<2x128xf32>
    %14 = math.exp %13 : vector<2x128xf32>
    %cst_11 = arith.constant 1.000000e+00 : f32
    %15 = vector.broadcast %cst_11 : f32 to vector<2x128xf32>
    %16 = arith.addf %15, %14 : vector<2x128xf32>
    %17 = arith.divf %15, %16 : vector<2x128xf32>
    %c0_12 = arith.constant 0 : index
    %c0_13 = arith.constant 0 : index
    %18 = vector.load %arg5[%c0_12, %c0_13] : memref<2x128xf32, #tpu.memory_space<vmem>>, vector<2x128xf32>
    tpu.vector_store %arg5[%c0_12, %c0_13], %17 {strides = array<i32>} : memref<2x128xf32, #tpu.memory_space<vmem>>, vector<2x128xf32>,
    return
  }
}

module attributes {stable_mosaic.version = 11 : i64} {
  func.func @_matmul_bias_act_kernel(%arg0: i32, %arg1: memref<8x1152xbf16, #tpu.memory_space<vmem>>, %arg2: memref<1152x256xbf16, #tpu.memory_space<vmem>>, %arg3: memref<1x256xf32, #tpu.memory_space<vmem>>, %arg4: memref<8x256xf32, #tpu.memory_space<vmem>>) attributes {dimension_semantics = [#tpu.dimension_semantics<parallel>], iteration_bounds = array<i64: 1>, scalar_prefetch = 0 : i64, scratch_operands = 0 : i64, tpu.core_type = #tpu.core_type<tc>, window_params = [{transform_indices = @transform_0, window_bounds = array<i64: 8, 1152>}, {pipeline_mode = #tpu.pipeline_mode<synchronous>, transform_indices = @transform_1, window_bounds = array<i64: 1152, 256>}, {pipeline_mode = #tpu.pipeline_mode<synchronous>, transform_indices = @transform_2, window_bounds = array<i64: 1, 256>}, {transform_indices = @transform_3, window_bounds = array<i64: 8, 256>}]} {
    %c0 = arith.constant 0 : index
    %c0_0 = arith.constant 0 : index
    %0 = vector.load %arg1[%c0, %c0_0] : memref<8x1152xbf16, #tpu.memory_space<vmem>>, vector<8x1152xbf16>
    %c0_1 = arith.constant 0 : index
    %c0_2 = arith.constant 0 : index
    %1 = vector.load %arg2[%c0_1, %c0_2] : memref<1152x256xbf16, #tpu.memory_space<vmem>>, vector<1152x256xbf16>
    %cst = arith.constant dense<0.000000e+00> : vector<8x256xf32>
    %2 = tpu.matmul %0, %1, %cst {dimension_numbers = #tpu.dot_dimension_numbers<[1], [0], [0], [1], [0, 0, 1, 1], [], []>} : vector<8x1152xbf16>, vector<1152x256xbf16>, vector<8x256xf32> -> vector<8x256xf32>
    %c0_3 = arith.constant 0 : index
    %c0_4 = arith.constant 0 : index
    %3 = vector.load %arg3[%c0_3, %c0_4] : memref<1x256xf32, #tpu.memory_space<vmem>>, vector<1x256xf32>
    %4 = vector.broadcast %3 : vector<1x256xf32> to vector<8x256xf32>
    %5 = arith.addf %2, %4 : vector<8x256xf32>
    %c0_5 = arith.constant 0 : index
    %c0_6 = arith.constant 0 : index
    %6 = vector.load %arg4[%c0_5, %c0_6] : memref<8x256xf32, #tpu.memory_space<vmem>>, vector<8x256xf32>
    tpu.vector_store %arg4[%c0_5, %c0_6], %5 {strides = array<i32>} : memref<8x256xf32, #tpu.memory_space<vmem>>, vector<8x256xf32>,
    return
  }
  func.func @transform_0(%arg0: i32) -> (i32, i32) {
    %c0_i32 = arith.constant 0 : i32
    %c0_i32_0 = arith.constant 0 : i32
    return %arg0, %c0_i32 : i32, i32
  }
  func.func @transform_1(%arg0: i32) -> (i32, i32) {
    %c0_i32 = arith.constant 0 : i32
    %c0_i32_0 = arith.constant 0 : i32
    %c0_i32_1 = arith.constant 0 : i32
    return %c0_i32, %c0_i32_0 : i32, i32
  }
  func.func @transform_2(%arg0: i32) -> (i32, i32) {
    %c0_i32 = arith.constant 0 : i32
    %c0_i32_0 = arith.constant 0 : i32
    %c0_i32_1 = arith.constant 0 : i32
    return %c0_i32, %c0_i32_0 : i32, i32
  }
  func.func @transform_3(%arg0: i32) -> (i32, i32) {
    %c0_i32 = arith.constant 0 : i32
    %c0_i32_0 = arith.constant 0 : i32
    return %arg0, %c0_i32 : i32, i32
  }
}

module attributes {stable_mosaic.version = 11 : i64} {
  func.func @_matmul_bias_act_kernel(%arg0: i32, %arg1: memref<32x864xbf16, #tpu.memory_space<vmem>>, %arg2: memref<864x64xbf16, #tpu.memory_space<vmem>>, %arg3: memref<1x64xf32, #tpu.memory_space<vmem>>, %arg4: memref<32x64xf32, #tpu.memory_space<vmem>>) attributes {dimension_semantics = [#tpu.dimension_semantics<parallel>], iteration_bounds = array<i64: 1>, scalar_prefetch = 0 : i64, scratch_operands = 0 : i64, tpu.core_type = #tpu.core_type<tc>, window_params = [{transform_indices = @transform_0, window_bounds = array<i64: 32, 864>}, {pipeline_mode = #tpu.pipeline_mode<synchronous>, transform_indices = @transform_1, window_bounds = array<i64: 864, 64>}, {pipeline_mode = #tpu.pipeline_mode<synchronous>, transform_indices = @transform_2, window_bounds = array<i64: 1, 64>}, {transform_indices = @transform_3, window_bounds = array<i64: 32, 64>}]} {
    %c0 = arith.constant 0 : index
    %c0_0 = arith.constant 0 : index
    %0 = vector.load %arg1[%c0, %c0_0] : memref<32x864xbf16, #tpu.memory_space<vmem>>, vector<32x864xbf16>
    %c0_1 = arith.constant 0 : index
    %c0_2 = arith.constant 0 : index
    %1 = vector.load %arg2[%c0_1, %c0_2] : memref<864x64xbf16, #tpu.memory_space<vmem>>, vector<864x64xbf16>
    %cst = arith.constant dense<0.000000e+00> : vector<32x64xf32>
    %2 = tpu.matmul %0, %1, %cst {dimension_numbers = #tpu.dot_dimension_numbers<[1], [0], [0], [1], [0, 0, 1, 1], [], []>} : vector<32x864xbf16>, vector<864x64xbf16>, vector<32x64xf32> -> vector<32x64xf32>
    %c0_3 = arith.constant 0 : index
    %c0_4 = arith.constant 0 : index
    %3 = vector.load %arg3[%c0_3, %c0_4] : memref<1x64xf32, #tpu.memory_space<vmem>>, vector<1x64xf32>
    %4 = vector.broadcast %3 : vector<1x64xf32> to vector<32x64xf32>
    %5 = arith.addf %2, %4 : vector<32x64xf32>
    %cst_5 = arith.constant 0.000000e+00 : f32
    %6 = vector.broadcast %cst_5 : f32 to vector<32x64xf32>
    %7 = arith.maximumf %5, %6 : vector<32x64xf32>
    %c0_6 = arith.constant 0 : index
    %c0_7 = arith.constant 0 : index
    %8 = vector.load %arg4[%c0_6, %c0_7] : memref<32x64xf32, #tpu.memory_space<vmem>>, vector<32x64xf32>
    tpu.vector_store %arg4[%c0_6, %c0_7], %7 {strides = array<i32>} : memref<32x64xf32, #tpu.memory_space<vmem>>, vector<32x64xf32>,
    return
  }
  func.func @transform_0(%arg0: i32) -> (i32, i32) {
    %c0_i32 = arith.constant 0 : i32
    %c0_i32_0 = arith.constant 0 : i32
    return %arg0, %c0_i32 : i32, i32
  }
  func.func @transform_1(%arg0: i32) -> (i32, i32) {
    %c0_i32 = arith.constant 0 : i32
    %c0_i32_0 = arith.constant 0 : i32
    %c0_i32_1 = arith.constant 0 : i32
    return %c0_i32, %c0_i32_0 : i32, i32
  }
  func.func @transform_2(%arg0: i32) -> (i32, i32) {
    %c0_i32 = arith.constant 0 : i32
    %c0_i32_0 = arith.constant 0 : i32
    %c0_i32_1 = arith.constant 0 : i32
    return %c0_i32, %c0_i32_0 : i32, i32
  }
  func.func @transform_3(%arg0: i32) -> (i32, i32) {
    %c0_i32 = arith.constant 0 : i32
    %c0_i32_0 = arith.constant 0 : i32
    return %arg0, %c0_i32 : i32, i32
  }
}

module attributes {stable_mosaic.version = 11 : i64} {
  func.func @_matmul_bias_act_kernel(%arg0: i32, %arg1: memref<32x576xbf16, #tpu.memory_space<vmem>>, %arg2: memref<576x128xbf16, #tpu.memory_space<vmem>>, %arg3: memref<1x128xf32, #tpu.memory_space<vmem>>, %arg4: memref<32x128xf32, #tpu.memory_space<vmem>>) attributes {dimension_semantics = [#tpu.dimension_semantics<parallel>], iteration_bounds = array<i64: 1>, scalar_prefetch = 0 : i64, scratch_operands = 0 : i64, tpu.core_type = #tpu.core_type<tc>, window_params = [{transform_indices = @transform_0, window_bounds = array<i64: 32, 576>}, {pipeline_mode = #tpu.pipeline_mode<synchronous>, transform_indices = @transform_1, window_bounds = array<i64: 576, 128>}, {pipeline_mode = #tpu.pipeline_mode<synchronous>, transform_indices = @transform_2, window_bounds = array<i64: 1, 128>}, {transform_indices = @transform_3, window_bounds = array<i64: 32, 128>}]} {
    %c0 = arith.constant 0 : index
    %c0_0 = arith.constant 0 : index
    %0 = vector.load %arg1[%c0, %c0_0] : memref<32x576xbf16, #tpu.memory_space<vmem>>, vector<32x576xbf16>
    %c0_1 = arith.constant 0 : index
    %c0_2 = arith.constant 0 : index
    %1 = vector.load %arg2[%c0_1, %c0_2] : memref<576x128xbf16, #tpu.memory_space<vmem>>, vector<576x128xbf16>
    %cst = arith.constant dense<0.000000e+00> : vector<32x128xf32>
    %2 = tpu.matmul %0, %1, %cst {dimension_numbers = #tpu.dot_dimension_numbers<[1], [0], [0], [1], [0, 0, 1, 1], [], []>} : vector<32x576xbf16>, vector<576x128xbf16>, vector<32x128xf32> -> vector<32x128xf32>
    %c0_3 = arith.constant 0 : index
    %c0_4 = arith.constant 0 : index
    %3 = vector.load %arg3[%c0_3, %c0_4] : memref<1x128xf32, #tpu.memory_space<vmem>>, vector<1x128xf32>
    %4 = vector.broadcast %3 : vector<1x128xf32> to vector<32x128xf32>
    %5 = arith.addf %2, %4 : vector<32x128xf32>
    %c0_5 = arith.constant 0 : index
    %c0_6 = arith.constant 0 : index
    %6 = vector.load %arg4[%c0_5, %c0_6] : memref<32x128xf32, #tpu.memory_space<vmem>>, vector<32x128xf32>
    tpu.vector_store %arg4[%c0_5, %c0_6], %5 {strides = array<i32>} : memref<32x128xf32, #tpu.memory_space<vmem>>, vector<32x128xf32>,
    return
  }
  func.func @transform_0(%arg0: i32) -> (i32, i32) {
    %c0_i32 = arith.constant 0 : i32
    %c0_i32_0 = arith.constant 0 : i32
    return %arg0, %c0_i32 : i32, i32
  }
  func.func @transform_1(%arg0: i32) -> (i32, i32) {
    %c0_i32 = arith.constant 0 : i32
    %c0_i32_0 = arith.constant 0 : i32
    %c0_i32_1 = arith.constant 0 : i32
    return %c0_i32, %c0_i32_0 : i32, i32
  }
  func.func @transform_2(%arg0: i32) -> (i32, i32) {
    %c0_i32 = arith.constant 0 : i32
    %c0_i32_0 = arith.constant 0 : i32
    %c0_i32_1 = arith.constant 0 : i32
    return %c0_i32, %c0_i32_0 : i32, i32
  }
  func.func @transform_3(%arg0: i32) -> (i32, i32) {
    %c0_i32 = arith.constant 0 : i32
    %c0_i32_0 = arith.constant 0 : i32
    return %arg0, %c0_i32 : i32, i32
  }
}

module attributes {stable_mosaic.version = 11 : i64} {
  func.func @_matmul_bias_act_kernel(%arg0: i32, %arg1: memref<128x432xbf16, #tpu.memory_space<vmem>>, %arg2: memref<432x32xbf16, #tpu.memory_space<vmem>>, %arg3: memref<1x32xf32, #tpu.memory_space<vmem>>, %arg4: memref<128x32xf32, #tpu.memory_space<vmem>>) attributes {dimension_semantics = [#tpu.dimension_semantics<parallel>], iteration_bounds = array<i64: 1>, scalar_prefetch = 0 : i64, scratch_operands = 0 : i64, tpu.core_type = #tpu.core_type<tc>, window_params = [{transform_indices = @transform_0, window_bounds = array<i64: 128, 432>}, {pipeline_mode = #tpu.pipeline_mode<synchronous>, transform_indices = @transform_1, window_bounds = array<i64: 432, 32>}, {pipeline_mode = #tpu.pipeline_mode<synchronous>, transform_indices = @transform_2, window_bounds = array<i64: 1, 32>}, {transform_indices = @transform_3, window_bounds = array<i64: 128, 32>}]} {
    %c0 = arith.constant 0 : index
    %c0_0 = arith.constant 0 : index
    %0 = vector.load %arg1[%c0, %c0_0] : memref<128x432xbf16, #tpu.memory_space<vmem>>, vector<128x432xbf16>
    %c0_1 = arith.constant 0 : index
    %c0_2 = arith.constant 0 : index
    %1 = vector.load %arg2[%c0_1, %c0_2] : memref<432x32xbf16, #tpu.memory_space<vmem>>, vector<432x32xbf16>
    %cst = arith.constant dense<0.000000e+00> : vector<128x32xf32>
    %2 = tpu.matmul %0, %1, %cst {dimension_numbers = #tpu.dot_dimension_numbers<[1], [0], [0], [1], [0, 0, 1, 1], [], []>} : vector<128x432xbf16>, vector<432x32xbf16>, vector<128x32xf32> -> vector<128x32xf32>
    %c0_3 = arith.constant 0 : index
    %c0_4 = arith.constant 0 : index
    %3 = vector.load %arg3[%c0_3, %c0_4] : memref<1x32xf32, #tpu.memory_space<vmem>>, vector<1x32xf32>
    %4 = vector.broadcast %3 : vector<1x32xf32> to vector<128x32xf32>
    %5 = arith.addf %2, %4 : vector<128x32xf32>
    %cst_5 = arith.constant 0.000000e+00 : f32
    %6 = vector.broadcast %cst_5 : f32 to vector<128x32xf32>
    %7 = arith.maximumf %5, %6 : vector<128x32xf32>
    %c0_6 = arith.constant 0 : index
    %c0_7 = arith.constant 0 : index
    %8 = vector.load %arg4[%c0_6, %c0_7] : memref<128x32xf32, #tpu.memory_space<vmem>>, vector<128x32xf32>
    tpu.vector_store %arg4[%c0_6, %c0_7], %7 {strides = array<i32>} : memref<128x32xf32, #tpu.memory_space<vmem>>, vector<128x32xf32>,
    return
  }
  func.func @transform_0(%arg0: i32) -> (i32, i32) {
    %c0_i32 = arith.constant 0 : i32
    %c0_i32_0 = arith.constant 0 : i32
    return %arg0, %c0_i32 : i32, i32
  }
  func.func @transform_1(%arg0: i32) -> (i32, i32) {
    %c0_i32 = arith.constant 0 : i32
    %c0_i32_0 = arith.constant 0 : i32
    %c0_i32_1 = arith.constant 0 : i32
    return %c0_i32, %c0_i32_0 : i32, i32
  }
  func.func @transform_2(%arg0: i32) -> (i32, i32) {
    %c0_i32 = arith.constant 0 : i32
    %c0_i32_0 = arith.constant 0 : i32
    %c0_i32_1 = arith.constant 0 : i32
    return %c0_i32, %c0_i32_0 : i32, i32
  }
  func.func @transform_3(%arg0: i32) -> (i32, i32) {
    %c0_i32 = arith.constant 0 : i32
    %c0_i32_0 = arith.constant 0 : i32
    return %arg0, %c0_i32 : i32, i32
  }
}

module attributes {stable_mosaic.version = 11 : i64} {
  func.func @_matmul_bias_act_kernel(%arg0: i32, %arg1: memref<128x288xbf16, #tpu.memory_space<vmem>>, %arg2: memref<288x64xbf16, #tpu.memory_space<vmem>>, %arg3: memref<1x64xf32, #tpu.memory_space<vmem>>, %arg4: memref<128x64xf32, #tpu.memory_space<vmem>>) attributes {dimension_semantics = [#tpu.dimension_semantics<parallel>], iteration_bounds = array<i64: 1>, scalar_prefetch = 0 : i64, scratch_operands = 0 : i64, tpu.core_type = #tpu.core_type<tc>, window_params = [{transform_indices = @transform_0, window_bounds = array<i64: 128, 288>}, {pipeline_mode = #tpu.pipeline_mode<synchronous>, transform_indices = @transform_1, window_bounds = array<i64: 288, 64>}, {pipeline_mode = #tpu.pipeline_mode<synchronous>, transform_indices = @transform_2, window_bounds = array<i64: 1, 64>}, {transform_indices = @transform_3, window_bounds = array<i64: 128, 64>}]} {
    %c0 = arith.constant 0 : index
    %c0_0 = arith.constant 0 : index
    %0 = vector.load %arg1[%c0, %c0_0] : memref<128x288xbf16, #tpu.memory_space<vmem>>, vector<128x288xbf16>
    %c0_1 = arith.constant 0 : index
    %c0_2 = arith.constant 0 : index
    %1 = vector.load %arg2[%c0_1, %c0_2] : memref<288x64xbf16, #tpu.memory_space<vmem>>, vector<288x64xbf16>
    %cst = arith.constant dense<0.000000e+00> : vector<128x64xf32>
    %2 = tpu.matmul %0, %1, %cst {dimension_numbers = #tpu.dot_dimension_numbers<[1], [0], [0], [1], [0, 0, 1, 1], [], []>} : vector<128x288xbf16>, vector<288x64xbf16>, vector<128x64xf32> -> vector<128x64xf32>
    %c0_3 = arith.constant 0 : index
    %c0_4 = arith.constant 0 : index
    %3 = vector.load %arg3[%c0_3, %c0_4] : memref<1x64xf32, #tpu.memory_space<vmem>>, vector<1x64xf32>
    %4 = vector.broadcast %3 : vector<1x64xf32> to vector<128x64xf32>
    %5 = arith.addf %2, %4 : vector<128x64xf32>
    %c0_5 = arith.constant 0 : index
    %c0_6 = arith.constant 0 : index
    %6 = vector.load %arg4[%c0_5, %c0_6] : memref<128x64xf32, #tpu.memory_space<vmem>>, vector<128x64xf32>
    tpu.vector_store %arg4[%c0_5, %c0_6], %5 {strides = array<i32>} : memref<128x64xf32, #tpu.memory_space<vmem>>, vector<128x64xf32>,
    return
  }
  func.func @transform_0(%arg0: i32) -> (i32, i32) {
    %c0_i32 = arith.constant 0 : i32
    %c0_i32_0 = arith.constant 0 : i32
    return %arg0, %c0_i32 : i32, i32
  }
  func.func @transform_1(%arg0: i32) -> (i32, i32) {
    %c0_i32 = arith.constant 0 : i32
    %c0_i32_0 = arith.constant 0 : i32
    %c0_i32_1 = arith.constant 0 : i32
    return %c0_i32, %c0_i32_0 : i32, i32
  }
  func.func @transform_2(%arg0: i32) -> (i32, i32) {
    %c0_i32 = arith.constant 0 : i32
    %c0_i32_0 = arith.constant 0 : i32
    %c0_i32_1 = arith.constant 0 : i32
    return %c0_i32, %c0_i32_0 : i32, i32
  }
  func.func @transform_3(%arg0: i32) -> (i32, i32) {
    %c0_i32 = arith.constant 0 : i32
    %c0_i32_0 = arith.constant 0 : i32
    return %arg0, %c0_i32 : i32, i32
  }
}

module attributes {stable_mosaic.version = 11 : i64} {
  func.func @_matmul_bias_act_kernel(%arg0: i32, %arg1: memref<512x171xbf16, #tpu.memory_space<vmem>>, %arg2: memref<171x16xbf16, #tpu.memory_space<vmem>>, %arg3: memref<1x16xf32, #tpu.memory_space<vmem>>, %arg4: memref<512x16xf32, #tpu.memory_space<vmem>>) attributes {dimension_semantics = [#tpu.dimension_semantics<parallel>], iteration_bounds = array<i64: 1>, scalar_prefetch = 0 : i64, scratch_operands = 0 : i64, tpu.core_type = #tpu.core_type<tc>, window_params = [{transform_indices = @transform_0, window_bounds = array<i64: 512, 171>}, {pipeline_mode = #tpu.pipeline_mode<synchronous>, transform_indices = @transform_1, window_bounds = array<i64: 171, 16>}, {pipeline_mode = #tpu.pipeline_mode<synchronous>, transform_indices = @transform_2, window_bounds = array<i64: 1, 16>}, {transform_indices = @transform_3, window_bounds = array<i64: 512, 16>}]} {
    %c0 = arith.constant 0 : index
    %c0_0 = arith.constant 0 : index
    %0 = vector.load %arg1[%c0, %c0_0] : memref<512x171xbf16, #tpu.memory_space<vmem>>, vector<512x171xbf16>
    %c0_1 = arith.constant 0 : index
    %c0_2 = arith.constant 0 : index
    %1 = vector.load %arg2[%c0_1, %c0_2] : memref<171x16xbf16, #tpu.memory_space<vmem>>, vector<171x16xbf16>
    %cst = arith.constant dense<0.000000e+00> : vector<512x16xf32>
    %2 = tpu.matmul %0, %1, %cst {dimension_numbers = #tpu.dot_dimension_numbers<[1], [0], [0], [1], [0, 0, 1, 1], [], []>} : vector<512x171xbf16>, vector<171x16xbf16>, vector<512x16xf32> -> vector<512x16xf32>
    %c0_3 = arith.constant 0 : index
    %c0_4 = arith.constant 0 : index
    %3 = vector.load %arg3[%c0_3, %c0_4] : memref<1x16xf32, #tpu.memory_space<vmem>>, vector<1x16xf32>
    %4 = vector.broadcast %3 : vector<1x16xf32> to vector<512x16xf32>
    %5 = arith.addf %2, %4 : vector<512x16xf32>
    %cst_5 = arith.constant 0.000000e+00 : f32
    %6 = vector.broadcast %cst_5 : f32 to vector<512x16xf32>
    %7 = arith.maximumf %5, %6 : vector<512x16xf32>
    %c0_6 = arith.constant 0 : index
    %c0_7 = arith.constant 0 : index
    %8 = vector.load %arg4[%c0_6, %c0_7] : memref<512x16xf32, #tpu.memory_space<vmem>>, vector<512x16xf32>
    tpu.vector_store %arg4[%c0_6, %c0_7], %7 {strides = array<i32>} : memref<512x16xf32, #tpu.memory_space<vmem>>, vector<512x16xf32>,
    return
  }
  func.func @transform_0(%arg0: i32) -> (i32, i32) {
    %c0_i32 = arith.constant 0 : i32
    %c0_i32_0 = arith.constant 0 : i32
    return %arg0, %c0_i32 : i32, i32
  }
  func.func @transform_1(%arg0: i32) -> (i32, i32) {
    %c0_i32 = arith.constant 0 : i32
    %c0_i32_0 = arith.constant 0 : i32
    %c0_i32_1 = arith.constant 0 : i32
    return %c0_i32, %c0_i32_0 : i32, i32
  }
  func.func @transform_2(%arg0: i32) -> (i32, i32) {
    %c0_i32 = arith.constant 0 : i32
    %c0_i32_0 = arith.constant 0 : i32
    %c0_i32_1 = arith.constant 0 : i32
    return %c0_i32, %c0_i32_0 : i32, i32
  }
  func.func @transform_3(%arg0: i32) -> (i32, i32) {
    %c0_i32 = arith.constant 0 : i32
    %c0_i32_0 = arith.constant 0 : i32
    return %arg0, %c0_i32 : i32, i32
  }
}

module attributes {stable_mosaic.version = 11 : i64} {
  func.func @_matmul_bias_act_kernel(%arg0: i32, %arg1: memref<512x16xbf16, #tpu.memory_space<vmem>>, %arg2: memref<16x128xbf16, #tpu.memory_space<vmem>>, %arg3: memref<1x128xf32, #tpu.memory_space<vmem>>, %arg4: memref<512x128xf32, #tpu.memory_space<vmem>>) attributes {dimension_semantics = [#tpu.dimension_semantics<parallel>], iteration_bounds = array<i64: 1>, scalar_prefetch = 0 : i64, scratch_operands = 0 : i64, tpu.core_type = #tpu.core_type<tc>, window_params = [{transform_indices = @transform_0, window_bounds = array<i64: 512, 16>}, {pipeline_mode = #tpu.pipeline_mode<synchronous>, transform_indices = @transform_1, window_bounds = array<i64: 16, 128>}, {pipeline_mode = #tpu.pipeline_mode<synchronous>, transform_indices = @transform_2, window_bounds = array<i64: 1, 128>}, {transform_indices = @transform_3, window_bounds = array<i64: 512, 128>}]} {
    %c0 = arith.constant 0 : index
    %c0_0 = arith.constant 0 : index
    %0 = vector.load %arg1[%c0, %c0_0] : memref<512x16xbf16, #tpu.memory_space<vmem>>, vector<512x16xbf16>
    %c0_1 = arith.constant 0 : index
    %c0_2 = arith.constant 0 : index
    %1 = vector.load %arg2[%c0_1, %c0_2] : memref<16x128xbf16, #tpu.memory_space<vmem>>, vector<16x128xbf16>
    %cst = arith.constant dense<0.000000e+00> : vector<512x128xf32>
    %2 = tpu.matmul %0, %1, %cst {dimension_numbers = #tpu.dot_dimension_numbers<[1], [0], [0], [1], [0, 0, 1, 1], [], []>} : vector<512x16xbf16>, vector<16x128xbf16>, vector<512x128xf32> -> vector<512x128xf32>
    %c0_3 = arith.constant 0 : index
    %c0_4 = arith.constant 0 : index
    %3 = vector.load %arg3[%c0_3, %c0_4] : memref<1x128xf32, #tpu.memory_space<vmem>>, vector<1x128xf32>
    %4 = vector.broadcast %3 : vector<1x128xf32> to vector<512x128xf32>
    %5 = arith.addf %2, %4 : vector<512x128xf32>
    %c0_5 = arith.constant 0 : index
    %c0_6 = arith.constant 0 : index
    %6 = vector.load %arg4[%c0_5, %c0_6] : memref<512x128xf32, #tpu.memory_space<vmem>>, vector<512x128xf32>
    tpu.vector_store %arg4[%c0_5, %c0_6], %5 {strides = array<i32>} : memref<512x128xf32, #tpu.memory_space<vmem>>, vector<512x128xf32>,
    return
  }
  func.func @transform_0(%arg0: i32) -> (i32, i32) {
    %c0_i32 = arith.constant 0 : i32
    %c0_i32_0 = arith.constant 0 : i32
    return %arg0, %c0_i32 : i32, i32
  }
  func.func @transform_1(%arg0: i32) -> (i32, i32) {
    %c0_i32 = arith.constant 0 : i32
    %c0_i32_0 = arith.constant 0 : i32
    %c0_i32_1 = arith.constant 0 : i32
    return %c0_i32, %c0_i32_0 : i32, i32
  }
  func.func @transform_2(%arg0: i32) -> (i32, i32) {
    %c0_i32 = arith.constant 0 : i32
    %c0_i32_0 = arith.constant 0 : i32
    %c0_i32_1 = arith.constant 0 : i32
    return %c0_i32, %c0_i32_0 : i32, i32
  }
  func.func @transform_3(%arg0: i32) -> (i32, i32) {
    %c0_i32 = arith.constant 0 : i32
    %c0_i32_0 = arith.constant 0 : i32
    return %arg0, %c0_i32 : i32, i32
  }
}

</mosaic_0001>

<bundles_post_ra>
// kernel: efficient_lite_seg.23
= control target key start
LH: loop header
LB: loop body
LE: loop exit
PB: predicated region body
PF: predicated region fallthrough
CT: control target
= control target key end

     0   :  { %s794_s21 = smov 0   ;;  %s1043_s0 = inlined_call_operand.vmem [shape: f32[2,9,9,3], index: 0, kind: input, shape index: {}]   ;;  %s1044_s1 = inlined_call_operand.vmem [shape: f32[2,9,9,3], index: 1, kind: input, shape index: {}]   ;;  %s1045_s2 = inlined_call_operand.vmem [shape: f32[2,9,9,3], index: 2, kind: input, shape index: {}]   ;;  %s1046_s3 = inlined_call_operand.vmem [shape: f32[2,9,9,3], index: 3, kind: input, shape index: {}]   ;;  %s1047_s4 = inlined_call_operand.vmem [shape: f32[9,1,1,3], index: 4, kind: input, shape index: {}]   ;;  %s1048_s5 = inlined_call_operand.vmem [shape: f32[1,1,3], index: 5, kind: input, shape index: {}]   ;;  %s1049_s6 = inlined_call_operand.vmem [shape: f32[2,8,8,3], index: 6, kind: output, shape index: {}]  }
   0x1 LB: > { %s686_s22 = sadd.s32 4294967295, %s757_s21   ;;  %p690_p0 = scmp.ge.s32.totalorder %s757_s21, 1  ;;  %s757_s21 = sphi %s794_s21, %s16_s21  }
   0x2   : > { %p242_p1 = scmp.lt.s32.totalorder %s757_s21, 3 }
   0x4   : > { %p243_p2 = pnand %p690_p0, %p242_p1 }
   0x5   : > { %p287_p3 = scmp.lt.s32.totalorder (!%p243_p2), %s686_s22, 1 }
   0x6   : > { %246 = sbr.rel (%p243_p2) target bundleno = 68 (0x44), region = 44 }
   0xb   : > { %s1051_s22 = smov (!%p287_p3, %s686_s22), 1  ;;  %v807_v0 = vld [vmem:[%s1047_s4] ss:$0 sm:$0xff]  ;;  %v812_v1 = vld [vmem:[%s1047_s4 + $0x1] ss:$0 sm:$0xff]  ;;  %vm586_vm0 = vcmask 23552  }
   0xc   : > { %v817_v2 = vld [vmem:[%s1047_s4 + $0x2] ss:$0 sm:$0xff]  ;;  %v822_v3 = vld [vmem:[%s1047_s4 + $0x3] ss:$0 sm:$0xff]  ;;  %s732_s7 = smul.u32 144, %s1051_s22  ;;  %s731_s10 = sshll.u32 %s1051_s22, 6 }
   0xd   : > { %v828_v4 = vld [vmem:[%s1047_s4 + $0x4] ss:$0 sm:$0xff]  ;;  %v833_v5 = vld [vmem:[%s1047_s4 + $0x5] ss:$0 sm:$0xff]  ;;  %v838_v6 = vld [vmem:[%s1047_s4 + $0x6] ss:$0 sm:$0xff]  ;;  %s968_s12 = scalar_lea.vmem %s1049_s6, %s731_s10 }
   0xe   : > { %s843_s16 = scalar_lea.vmem %s1043_s0, %s732_s7  ;;  %s848_s19 = scalar_lea.vmem %s1044_s1, %s732_s7  ;;  %v853_v7 = vld [vmem:[%s1047_s4 + $0x7] ss:$0 sm:$0xff]  ;;  %v858_v8 = vld [vmem:[%s1047_s4 + $0x8] ss:$0 sm:$0xff] }
   0xf   : > { %s863_s28 = scalar_lea.vmem %s1045_s2, %s732_s7  ;;  %s868_s8 = scalar_lea.vmem %s1046_s3, %s732_s7  ;;  %v312_v9 = vld [vmem:[%s843_s16] sm:$0xff]  ;;  %v702_v19 = vld [vmem:[%s843_s16 + $0x10] sm:$0xff] }
  0x10   : > { %v332_v10 = vld [vmem:[%s848_s19] sm:$0xff]  ;;  %v324_v12 = vmul.f32 %v807_v0, %v312_v9  ;;  %v711_v20 = vld [vmem:[%s848_s19 + $0x10] sm:$0xff]  ;;  %v491_v25 = vmul.f32 %v838_v6, %v702_v19  ;;  %v325_v28 = vmul.f32 %v807_v0, %v702_v19 }
  0x11   : > { %v361_v11 = vld [vmem:[%s843_s16 + $0x1] sm:$0xff]  ;;  %v345_v13 = vmul.f32 %v812_v1, %v332_v10  ;;  %v720_v21 = vld [vmem:[%s843_s16 + $0x11] sm:$0xff]  ;;  %v888_v27 = vmul.f32 %v853_v7, %v711_v20  ;;  %v346_v29 = vmul.f32 %v812_v1, %v711_v20 }
  0x12   : > { %v374_v14 = vmul.f32 %v817_v2, %v361_v11  ;;  %v390_v15 = vld [vmem:[%s863_s28] sm:$0xff]  ;;  %v391_v26 = vld [vmem:[%s863_s28 + $0x10] sm:$0xff]  ;;  %v375_v30 = vmul.f32 %v817_v2, %v720_v21  ;;  %v897_v35 = vmul.f32 %v858_v8, %v720_v21 }
  0x13   : > { %v419_v16 = vld [vmem:[%s868_s8] sm:$0xff]  ;;  %v403_v18 = vmul.f32 %v822_v3, %v390_v15  ;;  %v353_v22 = vadd.f32 %v345_v13, %v324_v12  ;;  %v420_v31 = vld [vmem:[%s868_s8 + $0x10] sm:$0xff]  ;;  %v404_v36 = vmul.f32 %v822_v3, %v391_v26  ;;  %v354_v41 = vadd.f32 %v346_v29, %v325_v28 }
  0x14   : > { %v448_v17 = vld [vmem:[%s863_s28 + $0x1] sm:$0xff]  ;;  %v432_v23 = vmul.f32 %v828_v4, %v419_v16  ;;  %v449_v32 = vld [vmem:[%s863_s28 + $0x11] sm:$0xff]  ;;  %v433_v37 = vmul.f32 %v828_v4, %v420_v31 }
  0x15   : > { %v461_v24 = vmul.f32 %v833_v5, %v448_v17  ;;  %v703_v33 = vld [vmem:[%s843_s16 + $0x20] sm:$0xff]  ;;  %v382_v34 = vadd.f32 %v374_v14, %v353_v22  ;;  %v462_v42 = vmul.f32 %v833_v5, %v449_v32  ;;  %v704_v51 = vld [vmem:[%s843_s16 + $0x30] sm:$0xff]  ;;  %v383_v54 = vadd.f32 %v375_v30, %v354_v41 }
  0x16   : > { %v712_v38 = vld [vmem:[%s848_s19 + $0x20] sm:$0xff]  ;;  %v492_v43 = vmul.f32 %v838_v6, %v703_v33  ;;  %v326_v44 = vmul.f32 %v807_v0, %v703_v33  ;;  %v713_v52 = vld [vmem:[%s848_s19 + $0x30] sm:$0xff]  ;;  %v493_v61 = vmul.f32 %v838_v6, %v704_v51  ;;  %v327_v10 = vmul.f32 %v807_v0, %v704_v51 }
  0x17   : > { %v721_v39 = vld [vmem:[%s843_s16 + $0x21] sm:$0xff]  ;;  %v411_v47 = vadd.f32 %v403_v18, %v382_v34  ;;  %v522_v48 = vmul.f32 %v853_v7, %v712_v38  ;;  %v347_v49 = vmul.f32 %v812_v1, %v712_v38  ;;  %v722_v53 = vld [vmem:[%s843_s16 + $0x31] sm:$0xff]  ;;  %v412_v9 = vadd.f32 %v404_v36, %v383_v54 }
  0x18   : > { %v392_v40 = vld [vmem:[%s863_s28 + $0x20] sm:$0xff]  ;;  %v376_v50 = vmul.f32 %v817_v2, %v721_v39  ;;  %v916_v55 = vmul.f32 %v858_v8, %v721_v39  ;;  %v393_v62 = vld [vmem:[%s863_s28 + $0x30] sm:$0xff]  ;;  %v348_v11 = vmul.f32 %v812_v1, %v713_v52  ;;  %v377_v12 = vmul.f32 %v817_v2, %v722_v53 }
  0x19   : > { %v421_v45 = vld [vmem:[%s868_s8 + $0x20] sm:$0xff]  ;;  %v405_v56 = vmul.f32 %v822_v3, %v392_v40  ;;  %v440_v58 = vadd.f32 %v432_v23, %v411_v47  ;;  %v355_v59 = vadd.f32 %v347_v49, %v326_v44  ;;  %v422_v63 = vld [vmem:[%s868_s8 + $0x30] sm:$0xff]  ;;  %v523_v16 = vmul.f32 %v853_v7, %v713_v52 }
  0x1a   : > { %v450_v46 = vld [vmem:[%s863_s28 + $0x21] sm:$0xff]  ;;  %v434_v57 = vmul.f32 %v828_v4, %v421_v45  ;;  %v451_v13 = vld [vmem:[%s863_s28 + $0x31] sm:$0xff]  ;;  %v930_v17 = vmul.f32 %v858_v8, %v722_v53  ;;  %v441_v20 = vadd.f32 %v433_v37, %v412_v9  ;;  %v356_v21 = vadd.f32 %v348_v11, %v327_v10 }
  0x1b   : > { %v463_v60 = vmul.f32 %v833_v5, %v450_v46  ;;  %v469_v14 = vadd.f32 %v461_v24, %v440_v58  ;;  %v384_v15 = vadd.f32 %v376_v50, %v355_v59  ;;  %v705_v18 = vld [vmem:[%s843_s16 + $0x40] sm:$0xff]  ;;  %v406_v22 = vmul.f32 %v822_v3, %v393_v62  ;;  %v715_v53 = vld [vmem:[%s848_s19 + $0x50] sm:$0xff] }
  0x1c   : > { %v714_v19 = vld [vmem:[%s848_s19 + $0x40] sm:$0xff]  ;;  %v435_v23 = vmul.f32 %v828_v4, %v422_v63  ;;  %v464_v29 = vmul.f32 %v833_v5, %v451_v13  ;;  %v494_v30 = vmul.f32 %v838_v6, %v705_v18  ;;  %v470_v32 = vadd.f32 %v462_v42, %v441_v20  ;;  %v724_v58 = vld [vmem:[%s843_s16 + $0x51] sm:$0xff] }
  0x1d   : > { %v723_v26 = vld [vmem:[%s843_s16 + $0x41] sm:$0xff]  ;;  %v499_v24 = vadd.f32 %v491_v25, %v469_v14  ;;  %v413_v28 = vadd.f32 %v405_v56, %v384_v15  ;;  %v385_v33 = vadd.f32 %v377_v12, %v356_v21  ;;  %v328_v34 = vmul.f32 %v807_v0, %v705_v18  ;;  %v947_v25 = vld [vmem:[%s1048_s5] ss:$0 sm:$0xff]  ;;  %v395_v59 = vld [vmem:[%s863_s28 + $0x50] sm:$0xff] }
  0x1e   : > { %v394_v31 = vld [vmem:[%s863_s28 + $0x40] sm:$0xff]  ;;  %v349_v36 = vmul.f32 %v812_v1, %v714_v19  ;;  %v524_v40 = vmul.f32 %v853_v7, %v714_v19  ;;  %v378_v41 = vmul.f32 %v817_v2, %v723_v26  ;;  %v500_v44 = vadd.f32 %v492_v43, %v470_v32 }
  0x1f   : > { %v423_v37 = vld [vmem:[%s868_s8 + $0x40] sm:$0xff]  ;;  %v529_v38 = vadd.f32 %v888_v27, %v499_v24  ;;  %v442_v39 = vadd.f32 %v434_v57, %v413_v28  ;;  %v414_v45 = vadd.f32 %v406_v22, %v385_v33  ;;  %v407_v47 = vmul.f32 %v822_v3, %v394_v31  ;;  %v706_v27 = vld [vmem:[%s843_s16 + $0x50] sm:$0xff] }
  0x20   : > { %v452_v42 = vld [vmem:[%s863_s28 + $0x41] sm:$0xff]  ;;  %v357_v46 = vadd.f32 %v349_v36, %v328_v34  ;;  %v553_v51 = vmul.f32 %v858_v8, %v723_v26  ;;  %v436_v52 = vmul.f32 %v828_v4, %v423_v37  ;;  %v530_v54 = vadd.f32 %v522_v48, %v500_v44 }
  0x21   : > { %v558_v49 = vadd.f32 %v897_v35, %v529_v38  ;;  %v471_v50 = vadd.f32 %v463_v60, %v442_v39  ;;  %v443_v56 = vadd.f32 %v435_v23, %v414_v45  ;;  %v465_v43 = vmul.f32 %v833_v5, %v452_v42  ;;  %v707_v22 = vld [vmem:[%s843_s16 + $0x60] sm:$0xff] }
  0x22   : > { %v386_v57 = vadd.f32 %v378_v41, %v357_v46  ;;  %v495_v9 = vmul.f32 %v838_v6, %v706_v27  ;;  %v329_v35 = vmul.f32 %v807_v0, %v706_v27  ;;  %v559_v48 = vadd.f32 %v916_v55, %v530_v54  ;;  %v453_v55 = vld [vmem:[%s863_s28 + $0x51] sm:$0xff]  ;;  %v716_v24 = vld [vmem:[%s848_s19 + $0x60] sm:$0xff] }
  0x23   : > { %v570_v62 = vadd.f32 %v947_v25, %v558_v49  ;;  %v501_v63 = vadd.f32 %v493_v61, %v471_v50  ;;  %v472_v60 = vadd.f32 %v464_v29, %v443_v56  ;;  %v350_v11 = vmul.f32 %v812_v1, %v715_v53  ;;  %v424_v61 = vld [vmem:[%s868_s8 + $0x50] sm:$0xff]  ;;  %v396_v33 = vld [vmem:[%s863_s28 + $0x60] sm:$0xff] }
  0x24   : > { %v415_v10 = vadd.f32 %v407_v47, %v386_v57  ;;  %v379_v14 = vmul.f32 %v817_v2, %v724_v58  ;;  %v408_v15 = vmul.f32 %v822_v3, %v395_v59  ;;  %v571_v18 = vadd.f32 %v947_v25, %v559_v48  ;;  %v425_v42 = vld [vmem:[%s868_s8 + $0x60] sm:$0xff]  ;;  %v726_v54 = vld [vmem:[%s843_s16 + $0x71] sm:$0xff] }
  0x25   : > { %v578_v12 = vmax.f32 %v570_v62, 0.0  ;;  %v531_v13 = vadd.f32 %v523_v16, %v501_v63  ;;  %v502_v19 = vadd.f32 %v494_v30, %v472_v60  ;;  %v358_v21 = vadd.f32 %v350_v11, %v329_v35  ;;  %v725_v30 = vld [vmem:[%s843_s16 + $0x61] sm:$0xff] }
  0x26   : > { %v444_v20 = vadd.f32 %v436_v52, %v415_v10  ;;  %v525_v16 = vmul.f32 %v853_v7, %v715_v53  ;;  %v437_v26 = vmul.f32 %v828_v4, %v424_v61  ;;  %v579_v28 = vmax.f32 %v571_v18, 0.0  ;;  %v708_v52 = vld [vmem:[%s843_s16 + $0x70] sm:$0xff] }
  0x27   : > { %587 = vst.msk [vmem:[%s968_s12] sm:$0xff] %vm586_vm0, %v578_v12  ;;  %v560_v23 = vadd.f32 %v930_v17, %v531_v13  ;;  %v532_v29 = vadd.f32 %v524_v40, %v502_v19  ;;  %v387_v32 = vadd.f32 %v379_v14, %v358_v21  ;;  %v554_v36 = vmul.f32 %v858_v8, %v724_v58  ;;  %v717_v53 = vld [vmem:[%s848_s19 + $0x70] sm:$0xff] }
  0x28   : > { %v473_v31 = vadd.f32 %v465_v43, %v444_v20  ;;  %v466_v37 = vmul.f32 %v833_v5, %v453_v55  ;;  %v330_v17 = vmul.f32 %v807_v0, %v707_v22  ;;  %588 = vst.msk [vmem:[%s968_s12 + $0x8] sm:$0xff] %vm586_vm0, %v579_v28  ;;  %v351_v41 = vmul.f32 %v812_v1, %v716_v24  ;;  %v454_v43 = vld [vmem:[%s863_s28 + $0x61] sm:$0xff]  ;;  %v426_v14 = vld [vmem:[%s868_s8 + $0x70] sm:$0xff] }
  0x29   : > { %v572_v34 = vadd.f32 %v947_v25, %v560_v23  ;;  %v561_v38 = vadd.f32 %v553_v51, %v532_v29  ;;  %v416_v40 = vadd.f32 %v408_v15, %v387_v32  ;;  %v496_v45 = vmul.f32 %v838_v6, %v707_v22  ;;  %v455_v20 = vld [vmem:[%s863_s28 + $0x71] sm:$0xff]  ;;  %v718_v32 = vld [vmem:[%s848_s19 + $0x80] sm:$0xff] }
  0x2a   : > { %v503_v39 = vadd.f32 %v495_v9, %v473_v31  ;;  %v380_v46 = vmul.f32 %v817_v2, %v725_v30  ;;  %v409_v47 = vmul.f32 %v822_v3, %v396_v33  ;;  %v359_v51 = vadd.f32 %v351_v41, %v330_v17  ;;  %v397_v9 = vld [vmem:[%s863_s28 + $0x70] sm:$0xff] }
  0x2b   : > { %v580_v44 = vmax.f32 %v572_v34, 0.0  ;;  %v573_v27 = vadd.f32 %v947_v25, %v561_v38  ;;  %v445_v50 = vadd.f32 %v437_v26, %v416_v40  ;;  %v526_v56 = vmul.f32 %v853_v7, %v716_v24  ;;  %v709_v26 = vld [vmem:[%s843_s16 + $0x80] sm:$0xff] }
  0x2c   : > { %v533_v49 = vadd.f32 %v525_v16, %v503_v39  ;;  %v438_v57 = vmul.f32 %v828_v4, %v425_v42  ;;  %v388_v63 = vadd.f32 %v380_v46, %v359_v51  ;;  %v555_v35 = vmul.f32 %v858_v8, %v725_v30 }
  0x2d   : > { %589 = vst.msk [vmem:[%s968_s12 + $0x10] sm:$0xff] %vm586_vm0, %v580_v44  ;;  %v581_v58 = vmax.f32 %v573_v27, 0.0  ;;  %v474_v62 = vadd.f32 %v466_v37, %v445_v50  ;;  %v331_v48 = vmul.f32 %v807_v0, %v708_v52  ;;  %v352_v60 = vmul.f32 %v812_v1, %v717_v53 }
  0x2e   : > { %v562_v59 = vadd.f32 %v554_v36, %v533_v49  ;;  %v381_v10 = vmul.f32 %v817_v2, %v726_v54  ;;  %v417_v12 = vadd.f32 %v409_v47, %v388_v63  ;;  %v467_v13 = vmul.f32 %v833_v5, %v454_v43  ;;  %v727_v36 = vld [vmem:[%s843_s16 + $0x81] sm:$0xff] }
  0x2f   : > { %590 = vst.msk [vmem:[%s968_s12 + $0x18] sm:$0xff] %vm586_vm0, %v581_v58  ;;  %v504_v61 = vadd.f32 %v496_v45, %v474_v62  ;;  %v360_v15 = vadd.f32 %v352_v60, %v331_v48  ;;  %v410_v18 = vmul.f32 %v822_v3, %v397_v9  ;;  %v497_v2 = vmul.f32 %v838_v6, %v708_v52 }
  0x30   : > { %v574_v11 = vadd.f32 %v947_v25, %v562_v59  ;;  %v446_v1 = vadd.f32 %v438_v57, %v417_v12  ;;  %v439_v55 = vmul.f32 %v828_v4, %v426_v14  ;;  %v527_v16 = vmul.f32 %v853_v7, %v717_v53 }
  0x31   : > { %v534_v0 = vadd.f32 %v526_v56, %v504_v61  ;;  %v389_v21 = vadd.f32 %v381_v10, %v360_v15  ;;  %v468_v24 = vmul.f32 %v833_v5, %v455_v20  ;;  %v556_v31 = vmul.f32 %v858_v8, %v726_v54 }
  0x32   : > { %v582_v19 = vmax.f32 %v574_v11, 0.0  ;;  %v475_v23 = vadd.f32 %v467_v13, %v446_v1  ;;  %v498_v30 = vmul.f32 %v838_v6, %v709_v26  ;;  %v528_v17 = vmul.f32 %v853_v7, %v718_v32 }
  0x33   : > { %v563_v22 = vadd.f32 %v555_v35, %v534_v0  ;;  %v418_v3 = vadd.f32 %v410_v18, %v389_v21  ;;  %v557_v39 = vmul.f32 %v858_v8, %v727_v36 }
  0x34   : > { %591 = vst.msk [vmem:[%s968_s12 + $0x20] sm:$0xff] %vm586_vm0, %v582_v19  ;;  %v505_v29 = vadd.f32 %v497_v2, %v475_v23 }
  0x35   : > { %v575_v28 = vadd.f32 %v947_v25, %v563_v22  ;;  %v447_v4 = vadd.f32 %v439_v55, %v418_v3 }
  0x36   : > { %v535_v34 = vadd.f32 %v527_v16, %v505_v29 }
  0x37   : > { %v583_v33 = vmax.f32 %v575_v28, 0.0  ;;  %v476_v37 = vadd.f32 %v468_v24, %v447_v4 }
  0x38   : > { %v564_v5 = vadd.f32 %v556_v31, %v535_v34 }
  0x39   : > { %592 = vst.msk [vmem:[%s968_s12 + $0x28] sm:$0xff] %vm586_vm0, %v583_v33  ;;  %v506_v38 = vadd.f32 %v498_v30, %v476_v37 }
  0x3a   : > { %v576_v40 = vadd.f32 %v947_v25, %v564_v5 }
  0x3b   : > { %v536_v41 = vadd.f32 %v528_v17, %v506_v38 }
  0x3c   : > { %v584_v42 = vmax.f32 %v576_v40, 0.0 }
  0x3d   : > { %v565_v44 = vadd.f32 %v557_v39, %v536_v41 }
  0x3e   : > { %593 = vst.msk [vmem:[%s968_s12 + $0x30] sm:$0xff] %vm586_vm0, %v584_v42 }
  0x3f   : > { %v577_v6 = vadd.f32 %v947_v25, %v565_v44 }
  0x41   : > { %v585_v45 = vmax.f32 %v577_v6, 0.0 }
  0x43   : > { %594 = vst.msk [vmem:[%s968_s12 + $0x38] sm:$0xff] %vm586_vm0, %v585_v45 }
  0x44 PF: > { %s16_s21 = sadd.s32 1, %s757_s21  }
  0x45   : > { %p13_p4 = scmp.ge.s32.totalorder %s16_s21, 4  }
  0x47   :  { %15 = sbr.rel (!%p13_p4) target bundleno = 1 (0x1), region = 93 }

// kernel: efficient_lite_seg.24
= control target key start
LH: loop header
LB: loop body
LE: loop exit
PB: predicated region body
PF: predicated region fallthrough
CT: control target
= control target key end

     0   :  { %s608_s15 = smov 0   ;;  %s610_s16 = smov 0   ;;  %s683_s0 = inlined_call_operand.vmem [shape: bf16[2,64,3], index: 0, kind: input, shape index: {}]   ;;  %s684_s1 = inlined_call_operand.vmem [shape: bf16[3,16], index: 1, kind: input, shape index: {}]   ;;  %s685_s2 = inlined_call_operand.vmem [shape: f32[1,16], index: 2, kind: input, shape index: {}]   ;;  %s686_s3 = inlined_call_operand.vmem [shape: f32[2,64,16], index: 3, kind: output, shape index: {0}]   ;;  %s687_s4 = inlined_call_operand.vmem [shape: f32[2,1,16], index: 4, kind: output, shape index: {1}]  }
   0x1   :  { %s612_s17 = smov 0  }
   0x2 LB: > { %s27_s18 = sadd.s32 1, %s575_s16  ;;  %p494_p0 = scmp.ge.s32.totalorder %s579_s17, 1  ;;  %s579_s17 = sphi %s612_s17, %s15_s17   ;;  %s575_s16 = sphi %s610_s16, %s689_s16   ;;  %s571_s15 = sphi %s608_s15, %s688_s15  }
   0x3   : > { %p29_p1 = scmp.ge.s32.totalorder %s27_s18, 2  ;;  %p186_p2 = scmp.lt.s32.totalorder %s579_s17, 3 }
   0x5   : > { %s691_s18 = smov (%p29_p1, %s27_s18), 0  ;;  %p187_p3 = pnand %p494_p0, %p186_p2 }
   0x6   : > { %p224_p4 = scmp.lt.s32.totalorder (!%p187_p3), %s571_s15, 1 }
   0x7   : > { %190 = sbr.rel (%p187_p3) target bundleno = 190 (0xbe), region = 32 }
   0xc   : > { %v261_v0 = vld [vmem:[%s684_s1] sm:$0x3]  ;;  %vm299_vm0 = vcmask 1040384   ;;  %vm300_vm1 = vcmask 1041408   ;;  %v581_v1 = vmov 65535   ;;  %s693_s15 = smov (!%p224_p4, %s571_s15), 1 }
   0xd   : > { %v301_v2 = vsel %vm299_vm0, 4294967295, %v581_v1  ;;  %s521_s21 = sshll.u32 %s693_s15, 5  ;;  %vm286_vm2 = vcmask 23552   ;;  %s635_s27 = scalar_lea.vmem %s687_s4, %s693_s15  ;;  %vm251_vm3 = vcmask 122880   ;;  %v582_v9 = vmov 0.0  }
   0xe   : > { %v302_v3 = vsel %vm300_vm1, %v301_v2, 0  ;;  %s231_s24 = scalar_lea.vmem %s683_s0, %s521_s21  ;;  %252 = vst.msk [vmem:[%s635_s27] sm:$0x1] %vm251_vm3, %v582_v9  ;;  %v556_v10 = vld [vmem:[%s685_s2] ss:$0 sm:$0xff]  ;;  %s522_s30 = sshll.u32 %s693_s15, 6 }
   0xf   : > { %v304_v4 = vand.u32 %v302_v3, %v261_v0  ;;  %v523_v5 = vld [vmem:[%s231_s24] sm:$0xff]  ;;  %v524_v6 = vld [vmem:[%s231_s24 + $0x8] sm:$0xff]  ;;  %v525_v7 = vld [vmem:[%s231_s24 + $0x10] sm:$0xff]  ;;  %s645_s7 = scalar_lea.vmem %s686_s3, %s522_s30  ;;  %vm343_vm4 = vcmask 130048  }
  0x10   : > { %v526_v8 = vld [vmem:[%s231_s24 + $0x18] sm:$0xff] }
  0x11   : > { %313 = vmatpush.bf16.msra.mxu0 %v304_v4  ;;  %527 = vmatpush.bf16.msra.mxu1 %v304_v4 }
  0x12   : > { %528 = vmatpush.bf16.msra.mxu2 %v304_v4  ;;  %529 = vmatpush.bf16.msra.mxu3 %v304_v4 }
  0x14   : > { %515 = vmatmul.msk.bf16.vlgmr.msra.gmra.mxu0 %vm286_vm2, %v523_v5  ;;  %516 = vmatmul.msk.bf16.vlgmr.msra.gmra.mxu1 %vm286_vm2, %v524_v6 }
  0x15   : > { %517 = vmatmul.msk.bf16.vlgmr.msra.gmra.mxu2 %vm286_vm2, %v525_v7  ;;  %518 = vmatmul.msk.bf16.vlgmr.msra.gmra.mxu3 %vm286_vm2, %v526_v8  ;;  %v352_v56 = vld [vmem:[%s635_s27] sm:$0x1] }
  0x91   : > { %v315_v11 = vpop.f32.mrf.mxu0  ;;  %v320_v12 = vpop.f32.mrf.mxu1 }
  0x92   : > { %v316_v13 = vadd.f32 %v556_v10, %v315_v11  ;;  %v321_v14 = vadd.f32 %v556_v10, %v320_v12 }
  0x94   : > { %v335_v15 = vmax.f32 %v316_v13, 0.0  ;;  %v337_v16 = vmax.f32 %v321_v14, 0.0 }
  0x96   : > { %344 = vst.msk [vmem:[%s645_s7] sm:$0xff] %vm343_vm4, %v335_v15  ;;  %v353_v29 = vsel %vm343_vm4, %v335_v15, 0.0  ;;  %v356_v32 = vsel %vm343_vm4, %v337_v16, 0.0 }
  0x97   : > { %346 = vst.msk [vmem:[%s645_s7 + $0x10] sm:$0xff] %vm343_vm4, %v337_v16 }
  0x98   : > { %v325_v17 = vpop.f32.mrf.mxu2  ;;  %v330_v18 = vpop.f32.mrf.mxu3 }
  0x99   : > { %v326_v19 = vadd.f32 %v556_v10, %v325_v17  ;;  %v331_v20 = vadd.f32 %v556_v10, %v330_v18  ;;  %v317_v21 = vpop.f32.mrf.mxu0  ;;  %v322_v22 = vpop.f32.mrf.mxu1 }
  0x9a   : > { %v318_v23 = vadd.f32 %v556_v10, %v317_v21  ;;  %v323_v24 = vadd.f32 %v556_v10, %v322_v22 }
  0x9b   : > { %v339_v25 = vmax.f32 %v326_v19, 0.0  ;;  %v341_v26 = vmax.f32 %v331_v20, 0.0 }
  0x9c   : > { %v336_v27 = vmax.f32 %v318_v23, 0.0  ;;  %v338_v28 = vmax.f32 %v323_v24, 0.0 }
  0x9d   : > { %348 = vst.msk [vmem:[%s645_s7 + $0x20] sm:$0xff] %vm343_vm4, %v339_v25  ;;  %v360_v42 = vsel %vm343_vm4, %v339_v25, 0.0  ;;  %v364_v46 = vsel %vm343_vm4, %v341_v26, 0.0 }
  0x9e   : > { %350 = vst.msk [vmem:[%s645_s7 + $0x30] sm:$0xff] %vm343_vm4, %v341_v26  ;;  %v354_v30 = vsel %vm343_vm4, %v336_v27, 0.0  ;;  %v358_v38 = vsel %vm343_vm4, %v338_v28, 0.0 }
  0x9f   : > { %345 = vst.msk [vmem:[%s645_s7 + $0x8] sm:$0xff] %vm343_vm4, %v336_v27  ;;  %v355_v31 = vadd.f32 %v354_v30, %v353_v29 }
  0xa0   : > { %347 = vst.msk [vmem:[%s645_s7 + $0x18] sm:$0xff] %vm343_vm4, %v338_v28  ;;  %v327_v33 = vpop.f32.mrf.mxu2  ;;  %v332_v34 = vpop.f32.mrf.mxu3 }
  0xa1   : > { %v357_v35 = vadd.f32 %v356_v32, %v355_v31  ;;  %v328_v36 = vadd.f32 %v556_v10, %v327_v33  ;;  %v333_v37 = vadd.f32 %v556_v10, %v332_v34 }
  0xa3   : > { %v359_v39 = vadd.f32 %v358_v38, %v357_v35  ;;  %v340_v40 = vmax.f32 %v328_v36, 0.0  ;;  %v342_v41 = vmax.f32 %v333_v37, 0.0 }
  0xa5   : > { %349 = vst.msk [vmem:[%s645_s7 + $0x28] sm:$0xff] %vm343_vm4, %v340_v40  ;;  %v361_v43 = vadd.f32 %v360_v42, %v359_v39  ;;  %v362_v44 = vsel %vm343_vm4, %v340_v40, 0.0  ;;  %v366_v48 = vsel %vm343_vm4, %v342_v41, 0.0 }
  0xa6   : > { %351 = vst.msk [vmem:[%s645_s7 + $0x38] sm:$0xff] %vm343_vm4, %v342_v41 }
  0xa7   : > { %v363_v45 = vadd.f32 %v362_v44, %v361_v43 }
  0xa9   : > { %v365_v47 = vadd.f32 %v364_v46, %v363_v45 }
  0xab   : > { %v367_v49 = vadd.f32 %v366_v48, %v365_v47 }
  0xad   : > { %v368_v50 = vrot.slane %v367_v49, 4 }
  0xaf   : > { %v369_v51 = vadd.f32 %v368_v50, %v367_v49 }
  0xb1   : > { %v370_v52 = vrot.slane %v369_v51, 2 }
  0xb3   : > { %v371_v53 = vadd.f32 %v370_v52, %v369_v51 }
  0xb5   : > { %v372_v54 = vrot.slane %v371_v53, 1 }
  0xb7   : > { %v373_v55 = vadd.f32 %v372_v54, %v371_v53 }
  0xb9   : > { %v374_v57 = vmul.f32 0.015625, %v373_v55 }
  0xbb   : > { %v375_v58 = vadd.f32 %v374_v57, %v352_v56 }
  0xbd   : > { %377 = vst.msk [vmem:[%s635_s27] sm:$0x1] %vm251_vm3, %v375_v58 }
  0xbe PF: > { %s15_s17 = sadd.s32 1, %s579_s17   ;;  %s688_s15 = smov %s575_s16 }
  0xbf   : > { %p12_p5 = scmp.ge.s32.totalorder %s15_s17, 4   ;;  %s689_s16 = smov %s691_s18 }
  0xc1   :  { %14 = sbr.rel (!%p12_p5) target bundleno = 2 (0x2), region = 78 }

// kernel: efficient_lite_seg.26
= control target key start
LH: loop header
LB: loop body
LE: loop exit
PB: predicated region body
PF: predicated region fallthrough
CT: control target
= control target key end

     0   :  { %s399_s9 = smov 0   ;;  %s401_s10 = smov 0   ;;  %s443_s0 = inlined_call_operand.vmem [shape: f32[2,64,16], index: 0, kind: input, shape index: {}]   ;;  %s444_s1 = inlined_call_operand.vmem [shape: f32[2,1,16], index: 1, kind: input, shape index: {}]   ;;  %s445_s2 = inlined_call_operand.vmem [shape: f32[2,64,16], index: 2, kind: output, shape index: {}]  }
   0x1   :  { %s403_s11 = smov 0  }
   0x2 LB: > { %s24_s12 = sadd.s32 1, %s378_s10  ;;  %p326_p0 = scmp.ge.s32.totalorder %s382_s11, 1  ;;  %s382_s11 = sphi %s403_s11, %s12_s11   ;;  %s378_s10 = sphi %s401_s10, %s447_s10   ;;  %s374_s9 = sphi %s399_s9, %s446_s9  }
   0x3   : > { %p26_p1 = scmp.ge.s32.totalorder %s24_s12, 2  ;;  %p141_p2 = scmp.lt.s32.totalorder %s382_s11, 3 }
   0x5   : > { %s449_s12 = smov (%p26_p1, %s24_s12), 0  ;;  %p142_p3 = pnand %p326_p0, %p141_p2 }
   0x6   : > { %p175_p4 = scmp.lt.s32.totalorder (!%p142_p3), %s374_s9, 1 }
   0x7   : > { %145 = sbr.rel (%p142_p3) target bundleno = 26 (0x1a), region = 28 }
   0xc   : > { %s451_s9 = smov (!%p175_p4, %s374_s9), 1  ;;  %vm217_vm0 = vcmask 130048  }
   0xd   : > { %s333_s13 = sshll.u32 %s451_s9, 6  ;;  %s186_s16 = scalar_lea.vmem %s444_s1, %s451_s9 }
   0xe   : > { %s182_s19 = scalar_lea.vmem %s443_s0, %s333_s13  ;;  %v359_v0 = vld [vmem:[%s186_s16] ss:$0 sm:$0xff]  ;;  %s195_s22 = scalar_lea.vmem %s445_s2, %s333_s13 }
   0xf   : > { %v197_v1 = vld [vmem:[%s182_s19] sm:$0xff]  ;;  %v198_v2 = vld [vmem:[%s182_s19 + $0x8] sm:$0xff]  ;;  %v199_v3 = vld [vmem:[%s182_s19 + $0x10] sm:$0xff] }
  0x10   : > { %v209_v4 = vmul.f32 %v359_v0, %v197_v1  ;;  %v210_v5 = vmul.f32 %v359_v0, %v198_v2  ;;  %v211_v6 = vmul.f32 %v359_v0, %v199_v3  ;;  %v200_v7 = vld [vmem:[%s182_s19 + $0x18] sm:$0xff]  ;;  %v201_v8 = vld [vmem:[%s182_s19 + $0x20] sm:$0xff]  ;;  %v202_v9 = vld [vmem:[%s182_s19 + $0x28] sm:$0xff] }
  0x11   : > { %v212_v10 = vmul.f32 %v359_v0, %v200_v7  ;;  %v203_v11 = vld [vmem:[%s182_s19 + $0x30] sm:$0xff]  ;;  %v213_v12 = vmul.f32 %v359_v0, %v201_v8  ;;  %v204_v13 = vld [vmem:[%s182_s19 + $0x38] sm:$0xff]  ;;  %v214_v14 = vmul.f32 %v359_v0, %v202_v9 }
  0x12   : > { %218 = vst.msk [vmem:[%s195_s22] sm:$0xff] %vm217_vm0, %v209_v4  ;;  %v215_v15 = vmul.f32 %v359_v0, %v203_v11  ;;  %v216_v16 = vmul.f32 %v359_v0, %v204_v13 }
  0x13   : > { %219 = vst.msk [vmem:[%s195_s22 + $0x8] sm:$0xff] %vm217_vm0, %v210_v5 }
  0x14   : > { %220 = vst.msk [vmem:[%s195_s22 + $0x10] sm:$0xff] %vm217_vm0, %v211_v6 }
  0x15   : > { %221 = vst.msk [vmem:[%s195_s22 + $0x18] sm:$0xff] %vm217_vm0, %v212_v10 }
  0x16   : > { %222 = vst.msk [vmem:[%s195_s22 + $0x20] sm:$0xff] %vm217_vm0, %v213_v12 }
  0x17   : > { %223 = vst.msk [vmem:[%s195_s22 + $0x28] sm:$0xff] %vm217_vm0, %v214_v14 }
  0x18   : > { %224 = vst.msk [vmem:[%s195_s22 + $0x30] sm:$0xff] %vm217_vm0, %v215_v15 }
  0x19   : > { %225 = vst.msk [vmem:[%s195_s22 + $0x38] sm:$0xff] %vm217_vm0, %v216_v16 }
  0x1a PF: > { %s12_s11 = sadd.s32 1, %s382_s11   ;;  %s446_s9 = smov %s378_s10 }
  0x1b   : > { %p9_p5 = scmp.ge.s32.totalorder %s12_s11, 4   ;;  %s447_s10 = smov %s449_s12 }
  0x1d   :  { %11 = sbr.rel (!%p9_p5) target bundleno = 2 (0x2), region = 61 }

// kernel: efficient_lite_seg.25
= control target key start
LH: loop header
LB: loop body
LE: loop exit
PB: predicated region body
PF: predicated region fallthrough
CT: control target
= control target key end

     0   :  { %vm27_vm0 = vcmask 130048   ;;  %vm61_vm1 = vcmask 1043456   ;;  %vm57_vm2 = vcmask 31744   ;;  %vm104_vm6 = vcmask 123904   ;;  %s171_s1 = inlined_call_operand.vmem [shape: f32[16,4], index: 1, kind: input, shape index: {}]   ;;  %s172_s0 = inlined_call_operand.vmem [shape: f32[2,16], index: 0, kind: input, shape index: {}]   ;;  %s173_s2 = inlined_call_operand.vmem [shape: f32[1,4], index: 2, kind: input, shape index: {}]   ;;  %s174_s4 = inlined_call_operand.vmem [shape: f32[1,16], index: 4, kind: input, shape index: {}]   ;;  %s175_s3 = inlined_call_operand.vmem [shape: f32[4,16], index: 3, kind: input, shape index: {}]   ;;  %s176_s5 = inlined_call_operand.vmem [shape: f32[2,16], index: 5, kind: output, shape index: {}]  }
   0x1   :  { %v22_v0 = vld [vmem:[%s171_s1 + $0x8] sm:$0xff]  ;;  %v21_v1 = vld [vmem:[%s171_s1] sm:$0xff] }
   0x2   :  { %45 = vmatpush.msra.mxu0 %v22_v0  ;;  %v20_v2 = vld [vmem:[%s172_s0] sm:$0x3] }
   0x3   :  { %v52_v3 = vld [vmem:[%s175_s3] sm:$0xf] }
   0x4   :  { %46 = vmatpush.msra.mxu0 %v21_v1  ;;  %111 = vmatpush.msk.msra.mxu1 %vm61_vm1, %v52_v3  ;;  %v114_v4 = vld [vmem:[%s173_s2] ss:$0 sm:$0xff] }
   0x5   :  { %110 = vmatmul.msk.f32.vlgmr.msra.gmra.mxu0 %vm27_vm0, %v20_v2  ;;  %v115_v8 = vld [vmem:[%s174_s4] ss:$0 sm:$0xff] }
  0x82   :  { %v48_v5 = vpop.f32.mrf.mxu0 }
  0x83   :  { %v49_v6 = vadd.f32 %v114_v4, %v48_v5 }
  0x85   :  { %v51_v7 = vmax.f32 %v49_v6, 0.0 }
  0x87   :  { %112 = vmatmul.msk.f32.vlgmr.msra.gmra.mxu1 %vm57_vm2, %v51_v7 }
 0x104   :  { %v82_v9 = vpop.f32.mrf.mxu1 }
 0x105   :  { %v83_v10 = vadd.f32 %v115_v8, %v82_v9 }
 0x107   :  { %v113_v11 = vmul.f32 -1.442695, %v83_v10 }
 0x109   :  { %116 = vpow2.f32 %v113_v11 }
 0x10f   :  { %v117_v12 = vpop.eup %116 }
 0x110   :  { %v88_v13 = vadd.f32 1.0, %v117_v12 }
 0x112   :  { %118 = vrcp.f32 %v88_v13  ;;  %v100_v17 = vand.u32 2147483648, %v88_v13  ;;  %v98_v19 = vand.u32 2147483647, %v88_v13  ;;  %vm94_vm4 = vweird.f32 %v88_v13 }
 0x114   :  { %v101_v21 = vor.u32 1.1754944e-38, %v100_v17  ;;  %vm99_vm7 = vcmp.eq.f32.partialorder %v98_v19, 8.507059e+37 }
 0x118   :  { %v119_v14 = vpop.eup %118 }
 0x119   :  { %v90_v15 = vmul.f32 %v119_v14, %v88_v13  ;;  %vm95_vm3 = vweird.f32 %v119_v14 }
 0x11a   :  { %vm96_vm5 = vmor %vm94_vm4, %vm95_vm3 }
 0x11b   :  { %v91_v16 = vsub.f32 1.0, %v90_v15 }
 0x11d   :  { %v92_v18 = vmul.f32 %v119_v14, %v91_v16 }
 0x11f   :  { %v93_v20 = vadd.f32 %v119_v14, %v92_v18 }
 0x121   :  { %v97_v22 = vsel %vm96_vm5, %v119_v14, %v93_v20 }
 0x122   :  { %v102_v23 = vsel %vm99_vm7, %v101_v21, %v97_v22 }
 0x123   :  { %105 = vst.msk [vmem:[%s176_s5] sm:$0x3] %vm104_vm6, %v102_v23 }

// kernel: efficient_lite_seg.28
= control target key start
LH: loop header
LB: loop body
LE: loop exit
PB: predicated region body
PF: predicated region fallthrough
CT: control target
= control target key end

     0   :  { %s521_s15 = smov 0   ;;  %s523_s16 = smov 0   ;;  %s570_s0 = inlined_call_operand.vmem [shape: bf16[2,16,16], index: 0, kind: input, shape index: {}]   ;;  %s571_s1 = inlined_call_operand.vmem [shape: bf16[16,32], index: 1, kind: input, shape index: {}]   ;;  %s572_s2 = inlined_call_operand.vmem [shape: f32[1,32], index: 2, kind: input, shape index: {}]   ;;  %s573_s3 = inlined_call_operand.vmem [shape: f32[2,16,32], index: 3, kind: output, shape index: {0}]   ;;  %s574_s4 = inlined_call_operand.vmem [shape: f32[2,1,32], index: 4, kind: output, shape index: {1}]  }
   0x1   :  { %s525_s17 = smov 0  }
   0x2 LB: > { %s27_s18 = sadd.s32 1, %s489_s16  ;;  %p425_p0 = scmp.ge.s32.totalorder %s493_s17, 1  ;;  %s493_s17 = sphi %s525_s17, %s15_s17   ;;  %s489_s16 = sphi %s523_s16, %s576_s16   ;;  %s485_s15 = sphi %s521_s15, %s575_s15  }
   0x3   : > { %p29_p1 = scmp.ge.s32.totalorder %s27_s18, 2  ;;  %p186_p2 = scmp.lt.s32.totalorder %s493_s17, 3 }
   0x5   : > { %s578_s18 = smov (%p29_p1, %s27_s18), 0  ;;  %p187_p3 = pnand %p425_p0, %p186_p2 }
   0x6   : > { %p224_p4 = scmp.lt.s32.totalorder (!%p187_p3), %s485_s15, 1 }
   0x7   : > { %190 = sbr.rel (%p187_p3) target bundleno = 174 (0xae), region = 32 }
   0xc   : > { %v444_v0 = vld [vmem:[%s571_s1] sm:$0xff]  ;;  %s580_s15 = smov (!%p224_p4, %s485_s15), 1  ;;  %vm251_vm0 = vcmask 253952   ;;  %v495_v1 = vmov 0.0   ;;  %vm272_vm1 = vcmask 130048   ;;  %vm292_vm2 = vcmask 261120  }
   0xd   : > { %283 = vmatpush.bf16.msra.mxu0 %v444_v0  ;;  %s441_s21 = sshll.u32 %s580_s15, 3  ;;  %s545_s24 = scalar_lea.vmem %s574_s4, %s580_s15  ;;  %v470_v3 = vld [vmem:[%s572_s2] ss:$0 sm:$0xff] }
   0xe   : > { %s231_s27 = scalar_lea.vmem %s570_s0, %s441_s21  ;;  %252 = vst.msk [vmem:[%s545_s24] sm:$0x1] %vm251_vm0, %v495_v1  ;;  %s442_s30 = sshll.u32 %s580_s15, 4 }
   0xf   : > { %v443_v2 = vld [vmem:[%s231_s27] sm:$0xff]  ;;  %s241_s7 = scalar_lea.vmem %s573_s3, %s442_s30 }
  0x10   : > { %438 = vmatmul.msk.bf16.vlgmr.msra.gmra.mxu0 %vm272_vm1, %v443_v2 }
  0x15   : > { %v295_v19 = vld [vmem:[%s545_s24] sm:$0x1] }
  0x8d   : > { %v285_v4 = vpop.f32.mrf.mxu0 }
  0x8e   : > { %v286_v5 = vadd.f32 %v470_v3, %v285_v4 }
  0x90   : > { %v290_v6 = vmax.f32 %v286_v5, 0.0 }
  0x92   : > { %293 = vst.msk [vmem:[%s241_s7] sm:$0xff] %vm292_vm2, %v290_v6  ;;  %v296_v10 = vsel %vm292_vm2, %v290_v6, 0.0 }
  0x95   : > { %v287_v7 = vpop.f32.mrf.mxu0 }
  0x96   : > { %v288_v8 = vadd.f32 %v470_v3, %v287_v7 }
  0x98   : > { %v291_v9 = vmax.f32 %v288_v8, 0.0 }
  0x9a   : > { %294 = vst.msk [vmem:[%s241_s7 + $0x8] sm:$0xff] %vm292_vm2, %v291_v9  ;;  %v297_v11 = vsel %vm292_vm2, %v291_v9, 0.0 }
  0x9b   : > { %v298_v12 = vadd.f32 %v297_v11, %v296_v10 }
  0x9d   : > { %v299_v13 = vrot.slane %v298_v12, 4 }
  0x9f   : > { %v300_v14 = vadd.f32 %v299_v13, %v298_v12 }
  0xa1   : > { %v301_v15 = vrot.slane %v300_v14, 2 }
  0xa3   : > { %v302_v16 = vadd.f32 %v301_v15, %v300_v14 }
  0xa5   : > { %v303_v17 = vrot.slane %v302_v16, 1 }
  0xa7   : > { %v304_v18 = vadd.f32 %v303_v17, %v302_v16 }
  0xa9   : > { %v305_v20 = vmul.f32 0.0625, %v304_v18 }
  0xab   : > { %v306_v21 = vadd.f32 %v305_v20, %v295_v19 }
  0xad   : > { %308 = vst.msk [vmem:[%s545_s24] sm:$0x1] %vm251_vm0, %v306_v21 }
  0xae PF: > { %s15_s17 = sadd.s32 1, %s493_s17   ;;  %s575_s15 = smov %s489_s16 }
  0xaf   : > { %p12_p5 = scmp.ge.s32.totalorder %s15_s17, 4   ;;  %s576_s16 = smov %s578_s18 }
  0xb1   :  { %14 = sbr.rel (!%p12_p5) target bundleno = 2 (0x2), region = 78 }

// kernel: efficient_lite_seg.27
= control target key start
LH: loop header
LB: loop body
LE: loop exit
PB: predicated region body
PF: predicated region fallthrough
CT: control target
= control target key end

     0   :  { %s666_s21 = smov 0   ;;  %s828_s0 = inlined_call_operand.vmem [shape: f32[2,5,5,16], index: 0, kind: input, shape index: {}]   ;;  %s829_s1 = inlined_call_operand.vmem [shape: f32[2,5,5,16], index: 1, kind: input, shape index: {}]   ;;  %s830_s2 = inlined_call_operand.vmem [shape: f32[2,5,5,16], index: 2, kind: input, shape index: {}]   ;;  %s831_s3 = inlined_call_operand.vmem [shape: f32[2,5,5,16], index: 3, kind: input, shape index: {}]   ;;  %s832_s4 = inlined_call_operand.vmem [shape: f32[9,1,1,16], index: 4, kind: input, shape index: {}]   ;;  %s833_s5 = inlined_call_operand.vmem [shape: f32[1,1,16], index: 5, kind: input, shape index: {}]   ;;  %s834_s6 = inlined_call_operand.vmem [shape: f32[2,4,4,16], index: 6, kind: output, shape index: {}]  }
   0x1 LB: > { %s570_s22 = sadd.s32 4294967295, %s629_s21   ;;  %p574_p0 = scmp.ge.s32.totalorder %s629_s21, 1  ;;  %s629_s21 = sphi %s666_s21, %s16_s21  }
   0x2   : > { %p242_p1 = scmp.lt.s32.totalorder %s629_s21, 3 }
   0x4   : > { %p243_p2 = pnand %p574_p0, %p242_p1 }
   0x5   : > { %p287_p3 = scmp.lt.s32.totalorder (!%p243_p2), %s570_s22, 1 }
   0x6   : > { %246 = sbr.rel (%p243_p2) target bundleno = 46 (0x2e), region = 44 }
   0xb   : > { %s836_s22 = smov (!%p287_p3, %s570_s22), 1  ;;  %v679_v0 = vld [vmem:[%s832_s4] ss:$0 sm:$0xff]  ;;  %v684_v1 = vld [vmem:[%s832_s4 + $0x1] ss:$0 sm:$0xff]  ;;  %vm474_vm0 = vcmask 125952  }
   0xc   : > { %s604_s27 = smul.u32 40, %s836_s22  ;;  %v690_v2 = vld [vmem:[%s832_s4 + $0x2] ss:$0 sm:$0xff]  ;;  %v705_v3 = vld [vmem:[%s832_s4 + $0x3] ss:$0 sm:$0xff]  ;;  %s603_s12 = sshll.u32 %s836_s22, 4 }
   0xd   : > { %v727_v11 = vld [vmem:[%s832_s4 + $0x4] ss:$0 sm:$0xff]  ;;  %v733_v13 = vld [vmem:[%s832_s4 + $0x5] ss:$0 sm:$0xff]  ;;  %v738_v14 = vld [vmem:[%s832_s4 + $0x6] ss:$0 sm:$0xff]  ;;  %s311_s22 = scalar_lea.vmem %s834_s6, %s603_s12 }
   0xe   : > { %s695_s8 = scalar_lea.vmem %s828_s0, %s604_s27  ;;  %s700_s11 = scalar_lea.vmem %s829_s1, %s604_s27  ;;  %v745_v18 = vld [vmem:[%s832_s4 + $0x7] ss:$0 sm:$0xff]  ;;  %v751_v20 = vld [vmem:[%s832_s4 + $0x8] ss:$0 sm:$0xff] }
   0xf   : > { %s710_s16 = scalar_lea.vmem %s830_s2, %s604_s27  ;;  %s715_s19 = scalar_lea.vmem %s831_s3, %s604_s27  ;;  %v312_v4 = vld [vmem:[%s695_s8] sm:$0xf]  ;;  %v313_v19 = vld [vmem:[%s695_s8 + $0x8] sm:$0xf]  ;;  %v314_v34 = vld [vmem:[%s695_s8 + $0x10] sm:$0xf] }
  0x10   : > { %v324_v5 = vld [vmem:[%s700_s11] sm:$0xf]  ;;  %v320_v7 = vmul.f32 %v679_v0, %v312_v4  ;;  %v321_v21 = vmul.f32 %v679_v0, %v313_v19  ;;  %v325_v22 = vld [vmem:[%s700_s11 + $0x8] sm:$0xf]  ;;  %v326_v39 = vld [vmem:[%s700_s11 + $0x10] sm:$0xf]  ;;  %v322_v43 = vmul.f32 %v679_v0, %v314_v34 }
  0x11   : > { %v341_v6 = vld [vmem:[%s695_s8 + $0x1] sm:$0xf]  ;;  %v333_v8 = vmul.f32 %v684_v1, %v324_v5  ;;  %v342_v23 = vld [vmem:[%s695_s8 + $0x9] sm:$0xf]  ;;  %v334_v30 = vmul.f32 %v684_v1, %v325_v22  ;;  %v343_v40 = vld [vmem:[%s695_s8 + $0x11] sm:$0xf]  ;;  %v335_v44 = vmul.f32 %v684_v1, %v326_v39 }
  0x12   : > { %v350_v9 = vmul.f32 %v690_v2, %v341_v6  ;;  %v358_v10 = vld [vmem:[%s710_s16] sm:$0xf]  ;;  %v359_v24 = vld [vmem:[%s710_s16 + $0x8] sm:$0xf]  ;;  %v351_v31 = vmul.f32 %v690_v2, %v342_v23  ;;  %v360_v41 = vld [vmem:[%s710_s16 + $0x10] sm:$0xf]  ;;  %v352_v45 = vmul.f32 %v690_v2, %v343_v40 }
  0x13   : > { %v375_v12 = vld [vmem:[%s715_s19] sm:$0xf]  ;;  %v337_v15 = vadd.f32 %v333_v8, %v320_v7  ;;  %v367_v16 = vmul.f32 %v705_v3, %v358_v10  ;;  %v586_v27 = vld [vmem:[%s695_s8 + $0x8] sm:$0xf]  ;;  %v338_v37 = vadd.f32 %v334_v30, %v321_v21  ;;  %v368_v38 = vmul.f32 %v705_v3, %v359_v24  ;;  %v587_v50 = vld [vmem:[%s695_s8 + $0x10] sm:$0xf] }
  0x14   : > { %v392_v17 = vld [vmem:[%s710_s16 + $0x1] sm:$0xf]  ;;  %v384_v26 = vmul.f32 %v727_v11, %v375_v12  ;;  %v591_v28 = vld [vmem:[%s700_s11 + $0x8] sm:$0xf]  ;;  %v419_v42 = vmul.f32 %v738_v14, %v586_v27  ;;  %v377_v51 = vld [vmem:[%s715_s19 + $0x10] sm:$0xf]  ;;  %v339_v55 = vadd.f32 %v335_v44, %v322_v43  ;;  %v369_v56 = vmul.f32 %v705_v3, %v360_v41 }
  0x15   : > { %v354_v25 = vadd.f32 %v350_v9, %v337_v15  ;;  %v596_v29 = vld [vmem:[%s695_s8 + $0x9] sm:$0xf]  ;;  %v401_v36 = vmul.f32 %v733_v13, %v392_v17  ;;  %v437_v47 = vmul.f32 %v745_v18, %v591_v28  ;;  %v355_v48 = vadd.f32 %v351_v31, %v338_v37  ;;  %v315_v52 = vld [vmem:[%s695_s8 + $0x18] sm:$0xf]  ;;  %v592_v62 = vld [vmem:[%s700_s11 + $0x10] sm:$0xf] }
  0x16   : > { %v376_v32 = vld [vmem:[%s715_s19 + $0x8] sm:$0xf]  ;;  %v454_v53 = vmul.f32 %v751_v20, %v596_v29  ;;  %v327_v57 = vld [vmem:[%s700_s11 + $0x18] sm:$0xf]  ;;  %v394_v63 = vld [vmem:[%s710_s16 + $0x11] sm:$0xf]  ;;  %v323_v4 = vmul.f32 %v679_v0, %v315_v52  ;;  %v420_v6 = vmul.f32 %v738_v14, %v587_v50  ;;  %v356_v7 = vadd.f32 %v352_v45, %v339_v55 }
  0x17   : > { %v393_v33 = vld [vmem:[%s710_s16 + $0x9] sm:$0xf]  ;;  %v371_v35 = vadd.f32 %v367_v16, %v354_v25  ;;  %v385_v49 = vmul.f32 %v727_v11, %v376_v32  ;;  %v344_v58 = vld [vmem:[%s695_s8 + $0x19] sm:$0xf]  ;;  %v372_v61 = vadd.f32 %v368_v38, %v355_v48  ;;  %v336_v5 = vmul.f32 %v684_v1, %v327_v57  ;;  %v597_v16 = vld [vmem:[%s695_s8 + $0x11] sm:$0xf] }
  0x18   : > { %v402_v54 = vmul.f32 %v733_v13, %v393_v33  ;;  %v361_v59 = vld [vmem:[%s710_s16 + $0x18] sm:$0xf]  ;;  %v386_v8 = vmul.f32 %v727_v11, %v377_v51  ;;  %v353_v9 = vmul.f32 %v690_v2, %v344_v58  ;;  %v438_v1 = vmul.f32 %v745_v18, %v592_v62  ;;  %v622_v2 = vld [vmem:[%s833_s5] ss:$0 sm:$0xff]  ;;  %v599_v45 = vld [vmem:[%s695_s8 + $0x21] sm:$0xf] }
  0x19   : > { %v388_v46 = vadd.f32 %v384_v26, %v371_v35  ;;  %v378_v10 = vld [vmem:[%s715_s19 + $0x18] sm:$0xf]  ;;  %v389_v15 = vadd.f32 %v385_v49, %v372_v61  ;;  %v340_v19 = vadd.f32 %v336_v5, %v323_v4  ;;  %v370_v0 = vmul.f32 %v705_v3, %v361_v59  ;;  %v589_v31 = vld [vmem:[%s695_s8 + $0x20] sm:$0xf] }
  0x1a   : > { %v588_v17 = vld [vmem:[%s695_s8 + $0x18] sm:$0xf]  ;;  %v373_v21 = vadd.f32 %v369_v56, %v356_v7  ;;  %v403_v22 = vmul.f32 %v733_v13, %v394_v63  ;;  %v387_v28 = vmul.f32 %v727_v11, %v378_v10  ;;  %v455_v3 = vmul.f32 %v751_v20, %v597_v16  ;;  %v594_v39 = vld [vmem:[%s700_s11 + $0x20] sm:$0xf] }
  0x1b   : > { %v405_v60 = vadd.f32 %v401_v36, %v388_v46  ;;  %v395_v23 = vld [vmem:[%s710_s16 + $0x19] sm:$0xf]  ;;  %v406_v25 = vadd.f32 %v402_v54, %v389_v15  ;;  %v357_v27 = vadd.f32 %v353_v9, %v340_v19  ;;  %v421_v30 = vmul.f32 %v738_v14, %v588_v17 }
  0x1c   : > { %v593_v26 = vld [vmem:[%s700_s11 + $0x18] sm:$0xf]  ;;  %v390_v29 = vadd.f32 %v386_v8, %v373_v21  ;;  %v404_v36 = vmul.f32 %v733_v13, %v395_v23  ;;  %v440_v48 = vmul.f32 %v745_v18, %v594_v39 }
  0x1d   : > { %v423_v12 = vadd.f32 %v419_v42, %v405_v60  ;;  %v424_v33 = vadd.f32 %v420_v6, %v406_v25  ;;  %v598_v34 = vld [vmem:[%s695_s8 + $0x19] sm:$0xf]  ;;  %v374_v35 = vadd.f32 %v370_v0, %v357_v27  ;;  %v439_v38 = vmul.f32 %v745_v18, %v593_v26 }
  0x1e   : > { %v407_v37 = vadd.f32 %v403_v22, %v390_v29  ;;  %v422_v42 = vmul.f32 %v738_v14, %v589_v31  ;;  %v456_v44 = vmul.f32 %v751_v20, %v598_v34  ;;  %v457_v14 = vmul.f32 %v751_v20, %v599_v45 }
  0x1f   : > { %v441_v24 = vadd.f32 %v437_v47, %v423_v12  ;;  %v442_v11 = vadd.f32 %v438_v1, %v424_v33  ;;  %v391_v41 = vadd.f32 %v387_v28, %v374_v35 }
  0x20   : > { %v425_v43 = vadd.f32 %v421_v30, %v407_v37 }
  0x21   : > { %v458_v32 = vadd.f32 %v454_v53, %v441_v24  ;;  %v459_v13 = vadd.f32 %v455_v3, %v442_v11  ;;  %v408_v47 = vadd.f32 %v404_v36, %v391_v41 }
  0x22   : > { %v443_v49 = vadd.f32 %v439_v38, %v425_v43 }
  0x23   : > { %v466_v40 = vadd.f32 %v622_v2, %v458_v32  ;;  %v467_v50 = vadd.f32 %v622_v2, %v459_v13  ;;  %v426_v51 = vadd.f32 %v422_v42, %v408_v47 }
  0x24   : > { %v460_v52 = vadd.f32 %v456_v44, %v443_v49 }
  0x25   : > { %v470_v46 = vmax.f32 %v466_v40, 0.0  ;;  %v471_v53 = vmax.f32 %v467_v50, 0.0  ;;  %v444_v54 = vadd.f32 %v440_v48, %v426_v51 }
  0x26   : > { %v468_v55 = vadd.f32 %v622_v2, %v460_v52 }
  0x27   : > { %475 = vst.msk [vmem:[%s311_s22] sm:$0xf] %vm474_vm0, %v470_v46  ;;  %v461_v56 = vadd.f32 %v457_v14, %v444_v54 }
  0x28   : > { %476 = vst.msk [vmem:[%s311_s22 + $0x4] sm:$0xf] %vm474_vm0, %v471_v53  ;;  %v472_v57 = vmax.f32 %v468_v55, 0.0 }
  0x29   : > { %v469_v58 = vadd.f32 %v622_v2, %v461_v56 }
  0x2a   : > { %477 = vst.msk [vmem:[%s311_s22 + $0x8] sm:$0xf] %vm474_vm0, %v472_v57 }
  0x2b   : > { %v473_v59 = vmax.f32 %v469_v58, 0.0 }
  0x2d   : > { %478 = vst.msk [vmem:[%s311_s22 + $0xc] sm:$0xf] %vm474_vm0, %v473_v59 }
  0x2e PF: > { %s16_s21 = sadd.s32 1, %s629_s21  }
  0x2f   : > { %p13_p4 = scmp.ge.s32.totalorder %s16_s21, 4  }
  0x31   :  { %15 = sbr.rel (!%p13_p4) target bundleno = 1 (0x1), region = 93 }

// kernel: efficient_lite_seg.30
= control target key start
LH: loop header
LB: loop body
LE: loop exit
PB: predicated region body
PF: predicated region fallthrough
CT: control target
= control target key end

     0   :  { %s381_s9 = smov 0   ;;  %s383_s10 = smov 0   ;;  %s405_s0 = inlined_call_operand.vmem [shape: f32[2,16,32], index: 0, kind: input, shape index: {}]   ;;  %s406_s1 = inlined_call_operand.vmem [shape: f32[2,1,32], index: 1, kind: input, shape index: {}]   ;;  %s407_s2 = inlined_call_operand.vmem [shape: f32[2,16,32], index: 2, kind: output, shape index: {}]  }
   0x1   :  { %s385_s11 = smov 0  }
   0x2 LB: > { %s24_s12 = sadd.s32 1, %s360_s10  ;;  %p308_p0 = scmp.ge.s32.totalorder %s364_s11, 1  ;;  %s364_s11 = sphi %s385_s11, %s12_s11   ;;  %s360_s10 = sphi %s383_s10, %s409_s10   ;;  %s356_s9 = sphi %s381_s9, %s408_s9  }
   0x3   : > { %p26_p1 = scmp.ge.s32.totalorder %s24_s12, 2  ;;  %p141_p2 = scmp.lt.s32.totalorder %s364_s11, 3 }
   0x5   : > { %s411_s12 = smov (%p26_p1, %s24_s12), 0  ;;  %p142_p3 = pnand %p308_p0, %p141_p2 }
   0x6   : > { %p175_p4 = scmp.lt.s32.totalorder (!%p142_p3), %s356_s9, 1 }
   0x7   : > { %145 = sbr.rel (%p142_p3) target bundleno = 20 (0x14), region = 28 }
   0xc   : > { %s413_s9 = smov (!%p175_p4, %s356_s9), 1  ;;  %vm205_vm0 = vcmask 261120  }
   0xd   : > { %s315_s13 = sshll.u32 %s413_s9, 4  ;;  %s186_s16 = scalar_lea.vmem %s406_s1, %s413_s9 }
   0xe   : > { %s182_s19 = scalar_lea.vmem %s405_s0, %s315_s13  ;;  %v341_v0 = vld [vmem:[%s186_s16] ss:$0 sm:$0xff]  ;;  %s195_s22 = scalar_lea.vmem %s407_s2, %s315_s13 }
   0xf   : > { %v197_v1 = vld [vmem:[%s182_s19] sm:$0xff]  ;;  %v198_v2 = vld [vmem:[%s182_s19 + $0x8] sm:$0xff] }
  0x10   : > { %v203_v3 = vmul.f32 %v341_v0, %v197_v1  ;;  %v204_v4 = vmul.f32 %v341_v0, %v198_v2 }
  0x12   : > { %206 = vst.msk [vmem:[%s195_s22] sm:$0xff] %vm205_vm0, %v203_v3 }
  0x13   : > { %207 = vst.msk [vmem:[%s195_s22 + $0x8] sm:$0xff] %vm205_vm0, %v204_v4 }
  0x14 PF: > { %s12_s11 = sadd.s32 1, %s364_s11   ;;  %s408_s9 = smov %s360_s10 }
  0x15   : > { %p9_p5 = scmp.ge.s32.totalorder %s12_s11, 4   ;;  %s409_s10 = smov %s411_s12 }
  0x17   :  { %11 = sbr.rel (!%p9_p5) target bundleno = 2 (0x2), region = 61 }

// kernel: efficient_lite_seg.29
= control target key start
LH: loop header
LB: loop body
LE: loop exit
PB: predicated region body
PF: predicated region fallthrough
CT: control target
= control target key end

     0   :  { %vm29_vm0 = vcmask 261120   ;;  %vm59_vm1 = vcmask 64512   ;;  %vm102_vm5 = vcmask 254976   ;;  %s174_s1 = inlined_call_operand.vmem [shape: f32[32,8], index: 1, kind: input, shape index: {}]   ;;  %s175_s2 = inlined_call_operand.vmem [shape: f32[1,8], index: 2, kind: input, shape index: {}]   ;;  %s176_s0 = inlined_call_operand.vmem [shape: f32[2,32], index: 0, kind: input, shape index: {}]   ;;  %s177_s4 = inlined_call_operand.vmem [shape: f32[1,32], index: 4, kind: input, shape index: {}]   ;;  %s178_s3 = inlined_call_operand.vmem [shape: f32[8,32], index: 3, kind: input, shape index: {}]   ;;  %s179_s5 = inlined_call_operand.vmem [shape: f32[2,32], index: 5, kind: output, shape index: {}]  }
   0x1   :  { %v24_v0 = vld [vmem:[%s174_s1 + $0x18] sm:$0xff]  ;;  %v23_v1 = vld [vmem:[%s174_s1 + $0x10] sm:$0xff]  ;;  %v22_v2 = vld [vmem:[%s174_s1 + $0x8] sm:$0xff] }
   0x2   :  { %45 = vmatpush.msra.mxu0 %v24_v0  ;;  %v21_v3 = vld [vmem:[%s174_s1] sm:$0xff] }
   0x3   :  { %v20_v4 = vld [vmem:[%s176_s0] sm:$0x3] }
   0x4   :  { %46 = vmatpush.msra.mxu0 %v23_v1  ;;  %v54_v5 = vld [vmem:[%s178_s3] sm:$0xff] }
   0x5   :  { %78 = vmatpush.msra.mxu1 %v54_v5  ;;  %v111_v6 = vld [vmem:[%s175_s2] ss:$0 sm:$0xff] }
   0x6   :  { %47 = vmatpush.msra.mxu0 %v22_v2  ;;  %v112_v10 = vld [vmem:[%s177_s4] ss:$0 sm:$0xff] }
   0x8   :  { %48 = vmatpush.msra.mxu0 %v21_v3 }
   0x9   :  { %108 = vmatmul.msk.f32.vlgmr.msra.gmra.mxu0 %vm29_vm0, %v20_v4 }
  0x86   :  { %v50_v7 = vpop.f32.mrf.mxu0 }
  0x87   :  { %v51_v8 = vadd.f32 %v111_v6, %v50_v7 }
  0x89   :  { %v53_v9 = vmax.f32 %v51_v8, 0.0 }
  0x8b   :  { %109 = vmatmul.msk.f32.vlgmr.msra.gmra.mxu1 %vm59_vm1, %v53_v9 }
 0x108   :  { %v80_v11 = vpop.f32.mrf.mxu1 }
 0x109   :  { %v81_v12 = vadd.f32 %v112_v10, %v80_v11 }
 0x10b   :  { %v110_v13 = vmul.f32 -1.442695, %v81_v12 }
 0x10d   :  { %113 = vpow2.f32 %v110_v13 }
 0x113   :  { %v114_v14 = vpop.eup %113 }
 0x114   :  { %v86_v15 = vadd.f32 1.0, %v114_v14 }
 0x116   :  { %115 = vrcp.f32 %v86_v15  ;;  %v98_v19 = vand.u32 2147483648, %v86_v15  ;;  %v96_v21 = vand.u32 2147483647, %v86_v15  ;;  %vm92_vm3 = vweird.f32 %v86_v15 }
 0x118   :  { %v99_v23 = vor.u32 1.1754944e-38, %v98_v19  ;;  %vm97_vm6 = vcmp.eq.f32.partialorder %v96_v21, 8.507059e+37 }
 0x11c   :  { %v116_v16 = vpop.eup %115 }
 0x11d   :  { %v88_v17 = vmul.f32 %v116_v16, %v86_v15  ;;  %vm93_vm2 = vweird.f32 %v116_v16 }
 0x11e   :  { %vm94_vm4 = vmor %vm92_vm3, %vm93_vm2 }
 0x11f   :  { %v89_v18 = vsub.f32 1.0, %v88_v17 }
 0x121   :  { %v90_v20 = vmul.f32 %v116_v16, %v89_v18 }
 0x123   :  { %v91_v22 = vadd.f32 %v116_v16, %v90_v20 }
 0x125   :  { %v95_v24 = vsel %vm94_vm4, %v116_v16, %v91_v22 }
 0x126   :  { %v100_v25 = vsel %vm97_vm6, %v99_v23, %v95_v24 }
 0x127   :  { %103 = vst.msk [vmem:[%s179_s5] sm:$0x3] %vm102_vm5, %v100_v25 }

// kernel: efficient_lite_seg.31
= control target key start
LH: loop header
LB: loop body
LE: loop exit
PB: predicated region body
PF: predicated region fallthrough
CT: control target
= control target key end

     0   :  { %s602_s21 = smov 0   ;;  %s684_s0 = inlined_call_operand.vmem [shape: f32[2,3,3,32], index: 0, kind: input, shape index: {}]   ;;  %s685_s1 = inlined_call_operand.vmem [shape: f32[2,3,3,32], index: 1, kind: input, shape index: {}]   ;;  %s686_s2 = inlined_call_operand.vmem [shape: f32[2,3,3,32], index: 2, kind: input, shape index: {}]   ;;  %s687_s3 = inlined_call_operand.vmem [shape: f32[2,3,3,32], index: 3, kind: input, shape index: {}]   ;;  %s688_s4 = inlined_call_operand.vmem [shape: f32[9,1,1,32], index: 4, kind: input, shape index: {}]   ;;  %s689_s5 = inlined_call_operand.vmem [shape: f32[1,1,32], index: 5, kind: input, shape index: {}]   ;;  %s690_s6 = inlined_call_operand.vmem [shape: f32[2,2,2,32], index: 6, kind: output, shape index: {}]  }
   0x1 LB: > { %s512_s22 = sadd.s32 4294967295, %s565_s21   ;;  %p516_p0 = scmp.ge.s32.totalorder %s565_s21, 1  ;;  %s565_s21 = sphi %s602_s21, %s16_s21  }
   0x2   : > { %p242_p1 = scmp.lt.s32.totalorder %s565_s21, 3 }
   0x4   : > { %p243_p2 = pnand %p516_p0, %p242_p1 }
   0x5   : > { %p287_p3 = scmp.lt.s32.totalorder (!%p243_p2), %s512_s22, 1 }
   0x6   : > { %246 = sbr.rel (%p243_p2) target bundleno = 41 (0x29), region = 44 }
   0xb   : > { %s692_s22 = smov (!%p287_p3, %s512_s22), 1  ;;  %v549_v0 = vld [vmem:[%s688_s4] ss:$0 sm:$0xff]  ;;  %v550_v1 = vld [vmem:[%s688_s4 + $0x1] ss:$0 sm:$0xff]  ;;  %vm418_vm0 = vcmask 254976  }
   0xc   : > { %s540_s25 = smul.u32 12, %s692_s22  ;;  %v551_v2 = vld [vmem:[%s688_s4 + $0x2] ss:$0 sm:$0xff]  ;;  %v552_v3 = vld [vmem:[%s688_s4 + $0x3] ss:$0 sm:$0xff]  ;;  %s539_s12 = sshll.u32 %s692_s22, 2 }
   0xd   : > { %v553_v11 = vld [vmem:[%s688_s4 + $0x4] ss:$0 sm:$0xff]  ;;  %v554_v18 = vld [vmem:[%s688_s4 + $0x5] ss:$0 sm:$0xff]  ;;  %v555_v23 = vld [vmem:[%s688_s4 + $0x6] ss:$0 sm:$0xff]  ;;  %s311_s14 = scalar_lea.vmem %s690_s6, %s539_s12 }
   0xe   : > { %s625_s8 = scalar_lea.vmem %s684_s0, %s540_s25  ;;  %s630_s11 = scalar_lea.vmem %s685_s1, %s540_s25  ;;  %v556_v31 = vld [vmem:[%s688_s4 + $0x7] ss:$0 sm:$0xff]  ;;  %v557_v39 = vld [vmem:[%s688_s4 + $0x8] ss:$0 sm:$0xff]  ;;  %v558_v54 = vld [vmem:[%s689_s5] ss:$0 sm:$0xff] }
   0xf   : > { %s638_s16 = scalar_lea.vmem %s686_s2, %s540_s25  ;;  %s306_s19 = scalar_lea.vmem %s687_s3, %s540_s25  ;;  %v312_v4 = vld [vmem:[%s625_s8] sm:$0x3]  ;;  %v321_v6 = vld [vmem:[%s630_s11 + $0x4] sm:$0x3]  ;;  %v529_v42 = vld [vmem:[%s625_s8 + $0x8] sm:$0x3] }
  0x10   : > { %v320_v5 = vld [vmem:[%s630_s11] sm:$0x3]  ;;  %v318_v7 = vmul.f32 %v549_v0, %v312_v4  ;;  %v328_v14 = vmul.f32 %v550_v1, %v321_v6  ;;  %v343_v16 = vld [vmem:[%s638_s16 + $0x4] sm:$0x3]  ;;  %v532_v47 = vld [vmem:[%s630_s11 + $0x8] sm:$0x3]  ;;  %v384_v51 = vmul.f32 %v555_v23, %v529_v42 }
  0x11   : > { %v327_v8 = vmul.f32 %v550_v1, %v320_v5  ;;  %v331_v9 = vld [vmem:[%s625_s8 + $0x1] sm:$0x3]  ;;  %v313_v20 = vld [vmem:[%s625_s8 + $0x4] sm:$0x3]  ;;  %v350_v33 = vmul.f32 %v552_v3, %v343_v16  ;;  %v535_v52 = vld [vmem:[%s625_s8 + $0x9] sm:$0x3]  ;;  %v396_v56 = vmul.f32 %v556_v31, %v532_v47 }
  0x12   : > { %v342_v10 = vld [vmem:[%s638_s16] sm:$0x3]  ;;  %v338_v12 = vmul.f32 %v551_v2, %v331_v9  ;;  %v319_v24 = vmul.f32 %v549_v0, %v313_v20  ;;  %v332_v25 = vld [vmem:[%s625_s8 + $0x5] sm:$0x3]  ;;  %v407_v59 = vmul.f32 %v557_v39, %v535_v52 }
  0x13   : > { %v353_v13 = vld [vmem:[%s306_s19] sm:$0x3]  ;;  %v329_v15 = vadd.f32 %v327_v8, %v318_v7  ;;  %v349_v17 = vmul.f32 %v552_v3, %v342_v10  ;;  %v354_v26 = vld [vmem:[%s306_s19 + $0x4] sm:$0x3]  ;;  %v339_v28 = vmul.f32 %v551_v2, %v332_v25 }
  0x14   : > { %v364_v19 = vld [vmem:[%s638_s16 + $0x1] sm:$0x3]  ;;  %v360_v22 = vmul.f32 %v553_v11, %v353_v13  ;;  %v528_v27 = vld [vmem:[%s625_s8 + $0x4] sm:$0x3]  ;;  %v330_v32 = vadd.f32 %v328_v14, %v319_v24  ;;  %v361_v36 = vmul.f32 %v553_v11, %v354_v26 }
  0x15   : > { %v340_v21 = vadd.f32 %v338_v12, %v329_v15  ;;  %v371_v30 = vmul.f32 %v554_v18, %v364_v19  ;;  %v531_v34 = vld [vmem:[%s630_s11 + $0x4] sm:$0x3]  ;;  %v383_v38 = vmul.f32 %v555_v23, %v528_v27 }
  0x16   : > { %v365_v35 = vld [vmem:[%s638_s16 + $0x5] sm:$0x3]  ;;  %v341_v40 = vadd.f32 %v339_v28, %v330_v32  ;;  %v395_v44 = vmul.f32 %v556_v31, %v531_v34 }
  0x17   : > { %v351_v29 = vadd.f32 %v349_v17, %v340_v21  ;;  %v534_v41 = vld [vmem:[%s625_s8 + $0x5] sm:$0x3]  ;;  %v372_v46 = vmul.f32 %v554_v18, %v365_v35 }
  0x18   : > { %v352_v45 = vadd.f32 %v350_v33, %v341_v40  ;;  %v406_v49 = vmul.f32 %v557_v39, %v534_v41 }
  0x19   : > { %v362_v37 = vadd.f32 %v360_v22, %v351_v29 }
  0x1a   : > { %v363_v50 = vadd.f32 %v361_v36, %v352_v45 }
  0x1b   : > { %v373_v43 = vadd.f32 %v371_v30, %v362_v37 }
  0x1c   : > { %v374_v55 = vadd.f32 %v372_v46, %v363_v50 }
  0x1d   : > { %v385_v48 = vadd.f32 %v383_v38, %v373_v43 }
  0x1e   : > { %v386_v58 = vadd.f32 %v384_v51, %v374_v55 }
  0x1f   : > { %v397_v53 = vadd.f32 %v395_v44, %v385_v48 }
  0x20   : > { %v398_v61 = vadd.f32 %v396_v56, %v386_v58 }
  0x21   : > { %v408_v57 = vadd.f32 %v406_v49, %v397_v53 }
  0x22   : > { %v409_v63 = vadd.f32 %v407_v59, %v398_v61 }
  0x23   : > { %v414_v60 = vadd.f32 %v558_v54, %v408_v57 }
  0x24   : > { %v415_v0 = vadd.f32 %v558_v54, %v409_v63 }
  0x25   : > { %v416_v62 = vmax.f32 %v414_v60, 0.0 }
  0x26   : > { %v417_v1 = vmax.f32 %v415_v0, 0.0 }
  0x27   : > { %419 = vst.msk [vmem:[%s311_s14] sm:$0x3] %vm418_vm0, %v416_v62 }
  0x28   : > { %420 = vst.msk [vmem:[%s311_s14 + $0x2] sm:$0x3] %vm418_vm0, %v417_v1 }
  0x29 PF: > { %s16_s21 = sadd.s32 1, %s565_s21  }
  0x2a   : > { %p13_p4 = scmp.ge.s32.totalorder %s16_s21, 4  }
  0x2c   :  { %15 = sbr.rel (!%p13_p4) target bundleno = 1 (0x1), region = 93 }

// kernel: efficient_lite_seg.32
= control target key start
LH: loop header
LB: loop body
LE: loop exit
PB: predicated region body
PF: predicated region fallthrough
CT: control target
= control target key end

     0   :  { %s488_s15 = smov 0   ;;  %s490_s16 = smov 0   ;;  %s535_s0 = inlined_call_operand.vmem [shape: bf16[2,4,32], index: 0, kind: input, shape index: {}]   ;;  %s536_s1 = inlined_call_operand.vmem [shape: bf16[32,64], index: 1, kind: input, shape index: {}]   ;;  %s537_s2 = inlined_call_operand.vmem [shape: f32[1,64], index: 2, kind: input, shape index: {}]   ;;  %s538_s3 = inlined_call_operand.vmem [shape: f32[2,4,64], index: 3, kind: output, shape index: {0}]   ;;  %s539_s4 = inlined_call_operand.vmem [shape: f32[2,1,64], index: 4, kind: output, shape index: {1}]  }
   0x1   :  { %s492_s17 = smov 0  }
   0x2 LB: > { %s27_s18 = sadd.s32 1, %s456_s16  ;;  %p396_p0 = scmp.ge.s32.totalorder %s460_s17, 1  ;;  %s460_s17 = sphi %s492_s17, %s15_s17   ;;  %s456_s16 = sphi %s490_s16, %s541_s16   ;;  %s452_s15 = sphi %s488_s15, %s540_s15  }
   0x3   : > { %p29_p1 = scmp.ge.s32.totalorder %s27_s18, 2  ;;  %p183_p2 = scmp.lt.s32.totalorder %s460_s17, 3 }
   0x5   : > { %s543_s18 = smov (%p29_p1, %s27_s18), 0  ;;  %p184_p3 = pnand %p396_p0, %p183_p2 }
   0x6   : > { %p216_p4 = scmp.lt.s32.totalorder (!%p184_p3), %s452_s15, 1 }
   0x7   : > { %187 = sbr.rel (%p184_p3) target bundleno = 168 (0xa8), region = 32 }
   0xc   : > { %v411_v0 = vld [vmem:[%s536_s1 + $0x8] sm:$0xff]  ;;  %v410_v1 = vld [vmem:[%s536_s1] sm:$0xff]  ;;  %s545_s15 = smov (!%p216_p4, %s452_s15), 1  ;;  %vm238_vm0 = vcmask 516096   ;;  %v462_v2 = vmov 0.0   ;;  %vm261_vm1 = vcmask 261120  }
   0xd   : > { %271 = vmatpush.bf16.msra.mxu0 %v411_v0  ;;  %s397_s23 = sshll.u32 %s545_s15, 1  ;;  %s232_s26 = scalar_lea.vmem %s539_s4, %s545_s15  ;;  %v437_v4 = vld [vmem:[%s537_s2] ss:$0 sm:$0xff]  ;;  %vm279_vm2 = vcmask 519168  }
   0xe   : > { %s222_s29 = scalar_lea.vmem %s535_s0, %s397_s23  ;;  %239 = vst.msk [vmem:[%s232_s26] sm:$0x1] %vm238_vm0, %v462_v2  ;;  %s398_s6 = sshll.u32 %s545_s15, 2 }
   0xf   : > { %v240_v3 = vld [vmem:[%s222_s29] sm:$0x3]  ;;  %s229_s9 = scalar_lea.vmem %s538_s3, %s398_s6 }
  0x11   : > { %272 = vmatpush.bf16.msra.mxu0 %v410_v1 }
  0x14   : > { %407 = vmatmul.msk.bf16.vlgmr.msra.gmra.mxu0 %vm261_vm1, %v240_v3 }
  0x15   : > { %v281_v16 = vld [vmem:[%s232_s26] sm:$0x1] }
  0x91   : > { %v274_v5 = vpop.f32.mrf.mxu0 }
  0x92   : > { %v275_v6 = vadd.f32 %v437_v4, %v274_v5 }
  0x94   : > { %v278_v7 = vmax.f32 %v275_v6, 0.0 }
  0x96   : > { %280 = vst.msk [vmem:[%s229_s9] sm:$0xf] %vm279_vm2, %v278_v7  ;;  %v282_v8 = vsel %vm279_vm2, %v278_v7, 0.0 }
  0x97   : > { %v283_v9 = vrot.slane %v282_v8, 4 }
  0x99   : > { %v284_v10 = vadd.f32 %v283_v9, %v282_v8  ;;  %v276_v11 = vpop.f32.mrf.mxu0 }
  0x9b   : > { %v285_v12 = vrot.slane %v284_v10, 2 }
  0x9d   : > { %v286_v13 = vadd.f32 %v285_v12, %v284_v10 }
  0x9f   : > { %v287_v14 = vrot.slane %v286_v13, 1 }
  0xa1   : > { %v288_v15 = vadd.f32 %v287_v14, %v286_v13 }
  0xa3   : > { %v289_v17 = vmul.f32 0.25, %v288_v15 }
  0xa5   : > { %v290_v18 = vadd.f32 %v289_v17, %v281_v16 }
  0xa7   : > { %292 = vst.msk [vmem:[%s232_s26] sm:$0x1] %vm238_vm0, %v290_v18 }
  0xa8 PF: > { %s15_s17 = sadd.s32 1, %s460_s17   ;;  %s540_s15 = smov %s456_s16 }
  0xa9   : > { %p12_p5 = scmp.ge.s32.totalorder %s15_s17, 4   ;;  %s541_s16 = smov %s543_s18 }
  0xab   :  { %14 = sbr.rel (!%p12_p5) target bundleno = 2 (0x2), region = 78 }

// kernel: efficient_lite_seg.34
= control target key start
LH: loop header
LB: loop body
LE: loop exit
PB: predicated region body
PF: predicated region fallthrough
CT: control target
= control target key end

     0   :  { %s348_s9 = smov 0   ;;  %s350_s10 = smov 0   ;;  %s372_s0 = inlined_call_operand.vmem [shape: f32[2,4,64], index: 0, kind: input, shape index: {}]   ;;  %s373_s1 = inlined_call_operand.vmem [shape: f32[2,1,64], index: 1, kind: input, shape index: {}]   ;;  %s374_s2 = inlined_call_operand.vmem [shape: f32[2,4,64], index: 2, kind: output, shape index: {}]  }
   0x1   :  { %s352_s11 = smov 0  }
   0x2 LB: > { %s24_s12 = sadd.s32 1, %s327_s10  ;;  %p279_p0 = scmp.ge.s32.totalorder %s331_s11, 1  ;;  %s331_s11 = sphi %s352_s11, %s12_s11   ;;  %s327_s10 = sphi %s350_s10, %s376_s10   ;;  %s323_s9 = sphi %s348_s9, %s375_s9  }
   0x3   : > { %p26_p1 = scmp.ge.s32.totalorder %s24_s12, 2  ;;  %p138_p2 = scmp.lt.s32.totalorder %s331_s11, 3 }
   0x5   : > { %s378_s12 = smov (%p26_p1, %s24_s12), 0  ;;  %p139_p3 = pnand %p279_p0, %p138_p2 }
   0x6   : > { %p167_p4 = scmp.lt.s32.totalorder (!%p139_p3), %s323_s9, 1 }
   0x7   : > { %142 = sbr.rel (%p139_p3) target bundleno = 19 (0x13), region = 28 }
   0xc   : > { %s380_s9 = smov (!%p167_p4, %s323_s9), 1  ;;  %vm190_vm0 = vcmask 519168  }
   0xd   : > { %s280_s13 = sshll.u32 %s380_s9, 2  ;;  %s176_s16 = scalar_lea.vmem %s373_s1, %s380_s9 }
   0xe   : > { %s173_s19 = scalar_lea.vmem %s372_s0, %s280_s13  ;;  %v308_v0 = vld [vmem:[%s176_s16] ss:$0 sm:$0xff]  ;;  %s183_s22 = scalar_lea.vmem %s374_s2, %s280_s13 }
   0xf   : > { %v184_v1 = vld [vmem:[%s173_s19] sm:$0xf] }
  0x10   : > { %v189_v2 = vmul.f32 %v308_v0, %v184_v1 }
  0x12   : > { %191 = vst.msk [vmem:[%s183_s22] sm:$0xf] %vm190_vm0, %v189_v2 }
  0x13 PF: > { %s12_s11 = sadd.s32 1, %s331_s11   ;;  %s375_s9 = smov %s327_s10 }
  0x14   : > { %p9_p5 = scmp.ge.s32.totalorder %s12_s11, 4   ;;  %s376_s10 = smov %s378_s12 }
  0x16   :  { %11 = sbr.rel (!%p9_p5) target bundleno = 2 (0x2), region = 61 }

// kernel: efficient_lite_seg.33
= control target key start
LH: loop header
LB: loop body
LE: loop exit
PB: predicated region body
PF: predicated region fallthrough
CT: control target
= control target key end

     0   :  { %vm33_vm0 = vcmask 523264   ;;  %vm64_vm1 = vcmask 130048   ;;  %vm107_vm5 = vcmask 517120   ;;  %s194_s1 = inlined_call_operand.vmem [shape: f32[64,16], index: 1, kind: input, shape index: {}]   ;;  %s195_s2 = inlined_call_operand.vmem [shape: f32[1,16], index: 2, kind: input, shape index: {}]   ;;  %s196_s0 = inlined_call_operand.vmem [shape: f32[2,64], index: 0, kind: input, shape index: {}]   ;;  %s197_s4 = inlined_call_operand.vmem [shape: f32[1,64], index: 4, kind: input, shape index: {}]   ;;  %s198_s3 = inlined_call_operand.vmem [shape: f32[16,64], index: 3, kind: input, shape index: {}]   ;;  %s199_s5 = inlined_call_operand.vmem [shape: f32[2,64], index: 5, kind: output, shape index: {}]  }
   0x1   :  { %v28_v0 = vld [vmem:[%s194_s1 + $0x38] sm:$0xff]  ;;  %v27_v1 = vld [vmem:[%s194_s1 + $0x30] sm:$0xff]  ;;  %v26_v2 = vld [vmem:[%s194_s1 + $0x28] sm:$0xff] }
   0x2   :  { %45 = vmatpush.msra.mxu0 %v28_v0  ;;  %v25_v3 = vld [vmem:[%s194_s1 + $0x20] sm:$0xff]  ;;  %v24_v4 = vld [vmem:[%s194_s1 + $0x18] sm:$0xff]  ;;  %v23_v5 = vld [vmem:[%s194_s1 + $0x10] sm:$0xff] }
   0x3   :  { %v22_v6 = vld [vmem:[%s194_s1 + $0x8] sm:$0xff]  ;;  %v21_v7 = vld [vmem:[%s194_s1] sm:$0xff] }
   0x4   :  { %46 = vmatpush.msra.mxu0 %v27_v1  ;;  %v20_v8 = vld [vmem:[%s196_s0] sm:$0x3]  ;;  %v59_v9 = vld [vmem:[%s198_s3 + $0x8] sm:$0xff] }
   0x5   :  { %82 = vmatpush.msra.mxu1 %v59_v9  ;;  %v58_v10 = vld [vmem:[%s198_s3] sm:$0xff] }
   0x6   :  { %47 = vmatpush.msra.mxu0 %v26_v2  ;;  %v116_v11 = vld [vmem:[%s195_s2] ss:$0 sm:$0xff] }
   0x7   :  { %83 = vmatpush.msra.mxu1 %v58_v10  ;;  %v117_v15 = vld [vmem:[%s197_s4] ss:$0 sm:$0xff] }
   0x8   :  { %48 = vmatpush.msra.mxu0 %v25_v3 }
   0xa   :  { %49 = vmatpush.msra.mxu0 %v24_v4 }
   0xc   :  { %50 = vmatpush.msra.mxu0 %v23_v5 }
   0xe   :  { %51 = vmatpush.msra.mxu0 %v22_v6 }
  0x10   :  { %52 = vmatpush.msra.mxu0 %v21_v7 }
  0x11   :  { %113 = vmatmul.msk.f32.vlgmr.msra.gmra.mxu0 %vm33_vm0, %v20_v8 }
  0x8e   :  { %v54_v12 = vpop.f32.mrf.mxu0 }
  0x8f   :  { %v55_v13 = vadd.f32 %v116_v11, %v54_v12 }
  0x91   :  { %v57_v14 = vmax.f32 %v55_v13, 0.0 }
  0x93   :  { %114 = vmatmul.msk.f32.vlgmr.msra.gmra.mxu1 %vm64_vm1, %v57_v14 }
 0x110   :  { %v85_v16 = vpop.f32.mrf.mxu1 }
 0x111   :  { %v86_v17 = vadd.f32 %v117_v15, %v85_v16 }
 0x113   :  { %v115_v18 = vmul.f32 -1.442695, %v86_v17 }
 0x115   :  { %118 = vpow2.f32 %v115_v18 }
 0x11b   :  { %v119_v19 = vpop.eup %118 }
 0x11c   :  { %v91_v20 = vadd.f32 1.0, %v119_v19 }
 0x11e   :  { %120 = vrcp.f32 %v91_v20  ;;  %v103_v24 = vand.u32 2147483648, %v91_v20  ;;  %v101_v26 = vand.u32 2147483647, %v91_v20  ;;  %vm97_vm3 = vweird.f32 %v91_v20 }
 0x120   :  { %v104_v28 = vor.u32 1.1754944e-38, %v103_v24  ;;  %vm102_vm6 = vcmp.eq.f32.partialorder %v101_v26, 8.507059e+37 }
 0x124   :  { %v121_v21 = vpop.eup %120 }
 0x125   :  { %v93_v22 = vmul.f32 %v121_v21, %v91_v20  ;;  %vm98_vm2 = vweird.f32 %v121_v21 }
 0x126   :  { %vm99_vm4 = vmor %vm97_vm3, %vm98_vm2 }
 0x127   :  { %v94_v23 = vsub.f32 1.0, %v93_v22 }
 0x129   :  { %v95_v25 = vmul.f32 %v121_v21, %v94_v23 }
 0x12b   :  { %v96_v27 = vadd.f32 %v121_v21, %v95_v25 }
 0x12d   :  { %v100_v29 = vsel %vm99_vm4, %v121_v21, %v96_v27 }
 0x12e   :  { %v105_v30 = vsel %vm102_vm6, %v104_v28, %v100_v29 }
 0x12f   :  { %108 = vst.msk [vmem:[%s199_s5] sm:$0x3] %vm107_vm5, %v105_v30 }

// kernel: efficient_lite_seg.35
= control target key start
LH: loop header
LB: loop body
LE: loop exit
PB: predicated region body
PF: predicated region fallthrough
CT: control target
= control target key end

     0   :  { %s414_s12 = smov 0   ;;  %s485_s0 = inlined_call_operand.vmem [shape: f32[2,4,4,64], index: 0, kind: input, shape index: {}]   ;;  %s486_s1 = inlined_call_operand.vmem [shape: f32[9,1,1,64], index: 1, kind: input, shape index: {}]   ;;  %s487_s2 = inlined_call_operand.vmem [shape: f32[1,1,64], index: 2, kind: input, shape index: {}]   ;;  %s488_s3 = inlined_call_operand.vmem [shape: f32[2,2,2,64], index: 3, kind: output, shape index: {}]  }
   0x1 LB: > { %s335_s13 = sadd.s32 4294967295, %s392_s12   ;;  %p339_p0 = scmp.ge.s32.totalorder %s392_s12, 1  ;;  %s392_s12 = sphi %s414_s12, %s13_s12  }
   0x2   : > { %p137_p1 = scmp.lt.s32.totalorder %s392_s12, 3 }
   0x4   : > { %p138_p2 = pnand %p339_p0, %p137_p1 }
   0x5   : > { %p161_p3 = scmp.lt.s32.totalorder (!%p138_p2), %s335_s13, 1 }
   0x6   : > { %141 = sbr.rel (%p138_p2) target bundleno = 41 (0x29), region = 32 }
   0xb   : > { %s490_s13 = smov (!%p161_p3, %s335_s13), 1  ;;  %v376_v0 = vld [vmem:[%s486_s1] ss:$0 sm:$0xff]  ;;  %v377_v1 = vld [vmem:[%s486_s1 + $0x1] ss:$0 sm:$0xff]  ;;  %vm277_vm0 = vcmask 517120  }
   0xc   : > { %v378_v2 = vld [vmem:[%s486_s1 + $0x2] ss:$0 sm:$0xff]  ;;  %s366_s20 = sshll.u32 %s490_s13, 4  ;;  %v379_v3 = vld [vmem:[%s486_s1 + $0x3] ss:$0 sm:$0xff]  ;;  %s367_s11 = sshll.u32 %s490_s13, 2 }
   0xd   : > { %s437_s23 = scalar_lea.vmem %s485_s0, %s366_s20  ;;  %v380_v11 = vld [vmem:[%s486_s1 + $0x4] ss:$0 sm:$0xff]  ;;  %v381_v15 = vld [vmem:[%s486_s1 + $0x5] ss:$0 sm:$0xff]  ;;  %v382_v16 = vld [vmem:[%s486_s1 + $0x6] ss:$0 sm:$0xff]  ;;  %s170_s16 = scalar_lea.vmem %s488_s3, %s367_s11 }
   0xe   : > { %v171_v4 = vld [vmem:[%s437_s23] sm:$0x3]  ;;  %v190_v6 = vld [vmem:[%s437_s23 + $0x2] sm:$0x3]  ;;  %v346_v10 = vld [vmem:[%s437_s23 + $0x4] sm:$0x3] }
   0xf   : > { %v179_v5 = vld [vmem:[%s437_s23 + $0x1] sm:$0x3]  ;;  %v177_v7 = vmul.f32 %v376_v0, %v171_v4  ;;  %v197_v9 = vmul.f32 %v378_v2, %v190_v6  ;;  %v349_v12 = vld [vmem:[%s437_s23 + $0x5] sm:$0x3]  ;;  %v209_v14 = vmul.f32 %v379_v3, %v346_v10  ;;  %v347_v24 = vld [vmem:[%s437_s23 + $0x8] sm:$0x3] }
  0x10   : > { %v186_v8 = vmul.f32 %v377_v1, %v179_v5  ;;  %v352_v17 = vld [vmem:[%s437_s23 + $0x6] sm:$0x3]  ;;  %v172_v18 = vld [vmem:[%s437_s23 + $0x4] sm:$0x3]  ;;  %v220_v20 = vmul.f32 %v380_v11, %v349_v12  ;;  %v355_v25 = vld [vmem:[%s437_s23 + $0x8] sm:$0x3]  ;;  %v210_v34 = vmul.f32 %v379_v3, %v347_v24 }
  0x11   : > { %v178_v21 = vmul.f32 %v376_v0, %v172_v18  ;;  %v180_v22 = vld [vmem:[%s437_s23 + $0x5] sm:$0x3]  ;;  %v231_v29 = vmul.f32 %v381_v15, %v352_v17  ;;  %v383_v30 = vld [vmem:[%s486_s1 + $0x7] ss:$0 sm:$0xff]  ;;  %v350_v31 = vld [vmem:[%s437_s23 + $0x9] sm:$0x3]  ;;  %v243_v36 = vmul.f32 %v382_v16, %v355_v25 }
  0x12   : > { %v188_v13 = vadd.f32 %v186_v8, %v177_v7  ;;  %v191_v23 = vld [vmem:[%s437_s23 + $0x6] sm:$0x3]  ;;  %v187_v26 = vmul.f32 %v377_v1, %v180_v22  ;;  %v358_v32 = vld [vmem:[%s437_s23 + $0x9] sm:$0x3]  ;;  %v384_v37 = vld [vmem:[%s486_s1 + $0x8] ss:$0 sm:$0xff]  ;;  %v221_v41 = vmul.f32 %v380_v11, %v350_v31 }
  0x13   : > { %v198_v27 = vmul.f32 %v378_v2, %v191_v23  ;;  %v353_v38 = vld [vmem:[%s437_s23 + $0xa] sm:$0x3]  ;;  %v254_v43 = vmul.f32 %v383_v30, %v358_v32  ;;  %v356_v44 = vld [vmem:[%s437_s23 + $0xc] sm:$0x3]  ;;  %v385_v53 = vld [vmem:[%s487_s2] ss:$0 sm:$0xff] }
  0x14   : > { %v199_v19 = vadd.f32 %v197_v9, %v188_v13  ;;  %v189_v33 = vadd.f32 %v187_v26, %v178_v21  ;;  %v361_v39 = vld [vmem:[%s437_s23 + $0xa] sm:$0x3]  ;;  %v232_v46 = vmul.f32 %v381_v15, %v353_v38  ;;  %v359_v49 = vld [vmem:[%s437_s23 + $0xd] sm:$0x3]  ;;  %v244_v51 = vmul.f32 %v382_v16, %v356_v44 }
  0x15   : > { %v265_v48 = vmul.f32 %v384_v37, %v361_v39  ;;  %v362_v54 = vld [vmem:[%s437_s23 + $0xe] sm:$0x3]  ;;  %v255_v56 = vmul.f32 %v383_v30, %v359_v49 }
  0x16   : > { %v211_v28 = vadd.f32 %v209_v14, %v199_v19  ;;  %v200_v40 = vadd.f32 %v198_v27, %v189_v33  ;;  %v266_v59 = vmul.f32 %v384_v37, %v362_v54 }
  0x18   : > { %v222_v35 = vadd.f32 %v220_v20, %v211_v28  ;;  %v212_v45 = vadd.f32 %v210_v34, %v200_v40 }
  0x1a   : > { %v233_v42 = vadd.f32 %v231_v29, %v222_v35  ;;  %v223_v50 = vadd.f32 %v221_v41, %v212_v45 }
  0x1c   : > { %v245_v47 = vadd.f32 %v243_v36, %v233_v42  ;;  %v234_v55 = vadd.f32 %v232_v46, %v223_v50 }
  0x1e   : > { %v256_v52 = vadd.f32 %v254_v43, %v245_v47  ;;  %v246_v58 = vadd.f32 %v244_v51, %v234_v55 }
  0x20   : > { %v267_v57 = vadd.f32 %v265_v48, %v256_v52  ;;  %v257_v61 = vadd.f32 %v255_v56, %v246_v58 }
  0x22   : > { %v273_v60 = vadd.f32 %v385_v53, %v267_v57  ;;  %v268_v63 = vadd.f32 %v266_v59, %v257_v61 }
  0x24   : > { %v275_v62 = vmax.f32 %v273_v60, 0.0  ;;  %v274_v0 = vadd.f32 %v385_v53, %v268_v63 }
  0x26   : > { %278 = vst.msk [vmem:[%s170_s16] sm:$0x3] %vm277_vm0, %v275_v62  ;;  %v276_v1 = vmax.f32 %v274_v0, 0.0 }
  0x28   : > { %279 = vst.msk [vmem:[%s170_s16 + $0x2] sm:$0x3] %vm277_vm0, %v276_v1 }
  0x29 PF: > { %s13_s12 = sadd.s32 1, %s392_s12  }
  0x2a   : > { %p10_p4 = scmp.ge.s32.totalorder %s13_s12, 4  }
  0x2c   :  { %12 = sbr.rel (!%p10_p4) target bundleno = 1 (0x1), region = 72 }

// kernel: efficient_lite_seg.36
= control target key start
LH: loop header
LB: loop body
LE: loop exit
PB: predicated region body
PF: predicated region fallthrough
CT: control target
= control target key end

     0   :  { %s512_s15 = smov 0   ;;  %s514_s16 = smov 0   ;;  %s568_s0 = inlined_call_operand.vmem [shape: bf16[2,4,64], index: 0, kind: input, shape index: {}]   ;;  %s569_s1 = inlined_call_operand.vmem [shape: bf16[64,128], index: 1, kind: input, shape index: {}]   ;;  %s570_s2 = inlined_call_operand.vmem [shape: f32[1,128], index: 2, kind: input, shape index: {}]   ;;  %s571_s3 = inlined_call_operand.vmem [shape: f32[2,4,128], index: 3, kind: output, shape index: {0}]   ;;  %s572_s4 = inlined_call_operand.vmem [shape: f32[2,1,128], index: 4, kind: output, shape index: {1}]  }
   0x1   :  { %s516_s17 = smov 0  }
   0x2 LB: > { %s27_s18 = sadd.s32 1, %s480_s16  ;;  %p410_p0 = scmp.ge.s32.totalorder %s484_s17, 1  ;;  %s484_s17 = sphi %s516_s17, %s15_s17   ;;  %s480_s16 = sphi %s514_s16, %s574_s16   ;;  %s476_s15 = sphi %s512_s15, %s573_s15  }
   0x3   : > { %p29_p1 = scmp.ge.s32.totalorder %s27_s18, 2  ;;  %p183_p2 = scmp.lt.s32.totalorder %s484_s17, 3 }
   0x5   : > { %s576_s18 = smov (%p29_p1, %s27_s18), 0  ;;  %p184_p3 = pnand %p410_p0, %p183_p2 }
   0x6   : > { %p216_p4 = scmp.lt.s32.totalorder (!%p184_p3), %s476_s15, 1 }
   0x7   : > { %187 = sbr.rel (%p184_p3) target bundleno = 176 (0xb0), region = 32 }
   0xc   : > { %v435_v0 = vld [vmem:[%s569_s1 + $0x18] sm:$0xff]  ;;  %v434_v1 = vld [vmem:[%s569_s1 + $0x10] sm:$0xff]  ;;  %s578_s15 = smov (!%p216_p4, %s476_s15), 1  ;;  %v486_v2 = vmov 0.0   ;;  %v433_v3 = vld [vmem:[%s569_s1 + $0x8] sm:$0xff]  ;;  %vm276_vm0 = vcmask 523264  }
   0xd   : > { %284 = vmatpush.bf16.msra.mxu0 %v435_v0  ;;  %s539_s25 = scalar_lea.vmem %s572_s4, %s578_s15  ;;  %s411_s28 = sshll.u32 %s578_s15, 1  ;;  %v432_v4 = vld [vmem:[%s569_s1] sm:$0xff]  ;;  %vm296_vm1 = vcmask 1043456  }
   0xe   : > { %238 = vst [vmem:[%s539_s25] sm:$0x1] %v486_v2  ;;  %s222_s7 = scalar_lea.vmem %s568_s0, %s411_s28  ;;  %v461_v6 = vld [vmem:[%s570_s2] ss:$0 sm:$0xff]  ;;  %s412_s10 = sshll.u32 %s578_s15, 2 }
   0xf   : > { %v239_v5 = vld [vmem:[%s222_s7] sm:$0x3]  ;;  %s229_s13 = scalar_lea.vmem %s571_s3, %s412_s10 }
  0x11   : > { %285 = vmatpush.bf16.msra.mxu0 %v434_v1 }
  0x15   : > { %286 = vmatpush.bf16.msra.mxu0 %v433_v3  ;;  %v295_v18 = vld [vmem:[%s539_s25] sm:$0x1] }
  0x19   : > { %287 = vmatpush.bf16.msra.mxu0 %v432_v4 }
  0x1c   : > { %429 = vmatmul.msk.bf16.vlgmr.msra.gmra.mxu0 %vm276_vm0, %v239_v5 }
  0x99   : > { %v289_v7 = vpop.f32.mrf.mxu0 }
  0x9a   : > { %v290_v8 = vadd.f32 %v461_v6, %v289_v7 }
  0x9c   : > { %v293_v9 = vmax.f32 %v290_v8, 0.0 }
  0x9e   : > { %294 = vst [vmem:[%s229_s13] sm:$0xf] %v293_v9  ;;  %v297_v10 = vsel %vm296_vm1, %v293_v9, 0.0 }
  0x9f   : > { %v298_v11 = vrot.slane %v297_v10, 4 }
  0xa1   : > { %v299_v12 = vadd.f32 %v298_v11, %v297_v10  ;;  %v291_v13 = vpop.f32.mrf.mxu0 }
  0xa3   : > { %v300_v14 = vrot.slane %v299_v12, 2 }
  0xa5   : > { %v301_v15 = vadd.f32 %v300_v14, %v299_v12 }
  0xa7   : > { %v302_v16 = vrot.slane %v301_v15, 1 }
  0xa9   : > { %v303_v17 = vadd.f32 %v302_v16, %v301_v15 }
  0xab   : > { %v304_v19 = vmul.f32 0.25, %v303_v17 }
  0xad   : > { %v305_v20 = vadd.f32 %v304_v19, %v295_v18 }
  0xaf   : > { %306 = vst [vmem:[%s539_s25] sm:$0x1] %v305_v20 }
  0xb0 PF: > { %s15_s17 = sadd.s32 1, %s484_s17   ;;  %s573_s15 = smov %s480_s16 }
  0xb1   : > { %p12_p5 = scmp.ge.s32.totalorder %s15_s17, 4   ;;  %s574_s16 = smov %s576_s18 }
  0xb3   :  { %14 = sbr.rel (!%p12_p5) target bundleno = 2 (0x2), region = 78 }

// kernel: efficient_lite_seg.38
= control target key start
LH: loop header
LB: loop body
LE: loop exit
PB: predicated region body
PF: predicated region fallthrough
CT: control target
= control target key end

     0   :  { %s347_s9 = smov 0   ;;  %s349_s10 = smov 0   ;;  %s366_s0 = inlined_call_operand.vmem [shape: f32[2,4,128], index: 0, kind: input, shape index: {}]   ;;  %s367_s1 = inlined_call_operand.vmem [shape: f32[2,1,128], index: 1, kind: input, shape index: {}]   ;;  %s368_s2 = inlined_call_operand.vmem [shape: f32[2,4,128], index: 2, kind: output, shape index: {}]  }
   0x1   :  { %s328_s11 = smov 0  }
   0x2 LB: > { %s24_s12 = sadd.s32 1, %s326_s10  ;;  %p278_p0 = scmp.ge.s32.totalorder %s330_s11, 1  ;;  %s330_s11 = sphi %s328_s11, %s12_s11   ;;  %s326_s10 = sphi %s349_s10, %s370_s10   ;;  %s322_s9 = sphi %s347_s9, %s369_s9  }
   0x3   : > { %p26_p1 = scmp.ge.s32.totalorder %s24_s12, 2  ;;  %p138_p2 = scmp.lt.s32.totalorder %s330_s11, 3 }
   0x5   : > { %s372_s12 = smov (%p26_p1, %s24_s12), 0  ;;  %p139_p3 = pnand %p278_p0, %p138_p2 }
   0x6   : > { %p167_p4 = scmp.lt.s32.totalorder (!%p139_p3), %s322_s9, 1 }
   0x7   : > { %142 = sbr.rel (%p139_p3) target bundleno = 19 (0x13), region = 28 }
   0xc   : > { %s374_s9 = smov (!%p167_p4, %s322_s9), 1 }
   0xd   : > { %s279_s13 = sshll.u32 %s374_s9, 2  ;;  %s176_s16 = scalar_lea.vmem %s367_s1, %s374_s9 }
   0xe   : > { %s173_s19 = scalar_lea.vmem %s366_s0, %s279_s13  ;;  %v307_v0 = vld [vmem:[%s176_s16] ss:$0 sm:$0xff]  ;;  %s183_s22 = scalar_lea.vmem %s368_s2, %s279_s13 }
   0xf   : > { %v184_v1 = vld [vmem:[%s173_s19] sm:$0xf] }
  0x10   : > { %v189_v2 = vmul.f32 %v307_v0, %v184_v1 }
  0x12   : > { %190 = vst [vmem:[%s183_s22] sm:$0xf] %v189_v2 }
  0x13 PF: > { %s12_s11 = sadd.s32 1, %s330_s11   ;;  %s369_s9 = smov %s326_s10 }
  0x14   : > { %p9_p5 = scmp.ge.s32.totalorder %s12_s11, 4   ;;  %s370_s10 = smov %s372_s12 }
  0x16   :  { %11 = sbr.rel (!%p9_p5) target bundleno = 2 (0x2), region = 61 }

// kernel: efficient_lite_seg.37
= control target key start
LH: loop header
LB: loop body
LE: loop exit
PB: predicated region body
PF: predicated region fallthrough
CT: control target
= control target key end

     0   :  { %10 = vsyncpa [#allocation3], 0  ;;  %s168_s21 = smov [#allocation2]   ;;  %s271_s0 = inlined_call_operand.vmem [shape: f32[2,128], index: 0, kind: input, shape index: {}]   ;;  %s272_s1 = inlined_call_operand.vmem [shape: f32[128,32], index: 1, kind: input, shape index: {}]   ;;  %s273_s2 = inlined_call_operand.vmem [shape: f32[1,32], index: 2, kind: input, shape index: {}]   ;;  %s274_s3 = inlined_call_operand.vmem [shape: f32[32,128], index: 3, kind: input, shape index: {}]   ;;  %s275_s4 = inlined_call_operand.hbm [shape: f32[1,128], index: 4, kind: input, shape index: {}]   ;;  %s276_s5 = inlined_call_operand.vmem [shape: f32[2,128], index: 5, kind: output, shape index: {}]  }
   0x1   :  { %s24_s20 = sshll.u32 %s275_s4, 4  ;;  %s26_s22 = sshll.u32 %s168_s21, 4  ;;  %s25_s20 = int_to_ptr.hbm [resolvable:$true] %s24_s20  ;;  %s27_s22 = int_to_ptr.vmem [resolvable:$true] %s26_s22 }
   0x2   :  { %29 = dma.hbm_to_vmem [thread:$0]  %s25_s20, 16, %s27_s22, [#allocation3]  }
   0x3   :  { %166 = dma.done.wait [#allocation3], 16  }
   0x4   :  { %167 = vsyncadd [#allocation3], 4294967280  ;;  %v50_v0 = vld [vmem:[%s272_s1 + $0x78] sm:$0xff]  ;;  %v49_v1 = vld [vmem:[%s272_s1 + $0x70] sm:$0xff]  ;;  %vm84_vm0 = vcmask 261120  }
   0x5   :  { %55 = vmatpush.msra.mxu0 %v50_v0  ;;  %v48_v2 = vld [vmem:[%s272_s1 + $0x68] sm:$0xff]  ;;  %v47_v3 = vld [vmem:[%s272_s1 + $0x60] sm:$0xff]  ;;  %v79_v4 = vld [vmem:[%s274_s3 + $0x18] sm:$0xff] }
   0x6   :  { %v46_v5 = vld [vmem:[%s272_s1 + $0x58] sm:$0xff]  ;;  %100 = vmatpush.msra.mxu1 %v79_v4  ;;  %v45_v6 = vld [vmem:[%s272_s1 + $0x50] sm:$0xff]  ;;  %v44_v7 = vld [vmem:[%s272_s1 + $0x48] sm:$0xff] }
   0x7   :  { %56 = vmatpush.msra.mxu0 %v49_v1  ;;  %v43_v8 = vld [vmem:[%s272_s1 + $0x40] sm:$0xff]  ;;  %v42_v9 = vld [vmem:[%s272_s1 + $0x38] sm:$0xff]  ;;  %v41_v10 = vld [vmem:[%s272_s1 + $0x30] sm:$0xff] }
   0x8   :  { %v40_v11 = vld [vmem:[%s272_s1 + $0x28] sm:$0xff]  ;;  %v39_v12 = vld [vmem:[%s272_s1 + $0x20] sm:$0xff]  ;;  %v38_v13 = vld [vmem:[%s272_s1 + $0x18] sm:$0xff] }
   0x9   :  { %57 = vmatpush.msra.mxu0 %v48_v2  ;;  %v37_v14 = vld [vmem:[%s272_s1 + $0x10] sm:$0xff]  ;;  %v36_v15 = vld [vmem:[%s272_s1 + $0x8] sm:$0xff]  ;;  %v35_v16 = vld [vmem:[%s272_s1] sm:$0xff] }
   0xa   :  { %v34_v17 = vld [vmem:[%s271_s0] sm:$0x3]  ;;  %v78_v18 = vld [vmem:[%s274_s3 + $0x10] sm:$0xff]  ;;  %v77_v19 = vld [vmem:[%s274_s3 + $0x8] sm:$0xff] }
   0xb   :  { %58 = vmatpush.msra.mxu0 %v47_v3  ;;  %101 = vmatpush.msra.mxu1 %v78_v18  ;;  %v76_v20 = vld [vmem:[%s274_s3] sm:$0xff] }
   0xc   :  { %v136_v21 = vld [vmem:[%s273_s2] ss:$0 sm:$0xff] }
   0xd   :  { %59 = vmatpush.msra.mxu0 %v46_v5  ;;  %102 = vmatpush.msra.mxu1 %v77_v19  ;;  %v137_v25 = vld [vmem:[#allocation2] ss:$0 sm:$0xff] }
   0xf   :  { %60 = vmatpush.msra.mxu0 %v45_v6  ;;  %103 = vmatpush.msra.mxu1 %v76_v20 }
  0x11   :  { %61 = vmatpush.msra.mxu0 %v44_v7 }
  0x13   :  { %62 = vmatpush.msra.mxu0 %v43_v8 }
  0x15   :  { %63 = vmatpush.msra.mxu0 %v42_v9 }
  0x17   :  { %64 = vmatpush.msra.mxu0 %v41_v10 }
  0x19   :  { %65 = vmatpush.msra.mxu0 %v40_v11 }
  0x1b   :  { %66 = vmatpush.msra.mxu0 %v39_v12 }
  0x1d   :  { %67 = vmatpush.msra.mxu0 %v38_v13 }
  0x1f   :  { %68 = vmatpush.msra.mxu0 %v37_v14 }
  0x21   :  { %69 = vmatpush.msra.mxu0 %v36_v15 }
  0x23   :  { %70 = vmatpush.msra.mxu0 %v35_v16 }
  0x24   :  { %71 = vmatmul.f32.vlgmr.msra.gmra.mxu0 %v34_v17 }
  0xa1   :  { %v72_v22 = vpop.f32.mrf.mxu0 }
  0xa2   :  { %v73_v23 = vadd.f32 %v136_v21, %v72_v22 }
  0xa4   :  { %v75_v24 = vmax.f32 %v73_v23, 0.0 }
  0xa6   :  { %133 = vmatmul.msk.f32.vlgmr.msra.gmra.mxu1 %vm84_vm0, %v75_v24 }
 0x123   :  { %v105_v26 = vpop.f32.mrf.mxu1 }
 0x124   :  { %v106_v27 = vadd.f32 %v137_v25, %v105_v26 }
 0x126   :  { %v134_v28 = vmul.f32 -1.442695, %v106_v27 }
 0x128   :  { %138 = vpow2.f32 %v134_v28 }
 0x12e   :  { %v139_v29 = vpop.eup %138 }
 0x12f   :  { %v111_v30 = vadd.f32 1.0, %v139_v29 }
 0x131   :  { %140 = vrcp.f32 %v111_v30  ;;  %v123_v34 = vand.u32 2147483648, %v111_v30  ;;  %v121_v36 = vand.u32 2147483647, %v111_v30  ;;  %vm117_vm2 = vweird.f32 %v111_v30 }
 0x133   :  { %v124_v38 = vor.u32 1.1754944e-38, %v123_v34  ;;  %vm122_vm4 = vcmp.eq.f32.partialorder %v121_v36, 8.507059e+37 }
 0x137   :  { %v141_v31 = vpop.eup %140 }
 0x138   :  { %v113_v32 = vmul.f32 %v141_v31, %v111_v30  ;;  %vm118_vm1 = vweird.f32 %v141_v31 }
 0x139   :  { %vm119_vm3 = vmor %vm117_vm2, %vm118_vm1 }
 0x13a   :  { %v114_v33 = vsub.f32 1.0, %v113_v32 }
 0x13c   :  { %v115_v35 = vmul.f32 %v141_v31, %v114_v33 }
 0x13e   :  { %v116_v37 = vadd.f32 %v141_v31, %v115_v35 }
 0x140   :  { %v120_v39 = vsel %vm119_vm3, %v141_v31, %v116_v37 }
 0x141   :  { %v125_v40 = vsel %vm122_vm4, %v124_v38, %v120_v39 }
 0x142   :  { %127 = vst [vmem:[%s276_s5] sm:$0x3] %v125_v40 }
 0x143   :  { %132 = vsyncpa [#allocation3], 1 }

// kernel: tile.18
= control target key start
LH: loop header
LB: loop body
LE: loop exit
PB: predicated region body
PF: predicated region fallthrough
CT: control target
= control target key end

     0   :  { %s22_s0 = inlined_call_operand.vmem [shape: f32[64], index: 0, kind: input, shape index: {}]   ;;  %s23_s1 = inlined_call_operand.vmem [shape: f32[4,64], index: 1, kind: output, shape index: {}]  }
   0x1   :  { %v4_v0 = vld [vmem:[%s22_s0] ss:$0 sm:$0xff] }
   0x2   :  { %5 = vst [vmem:[%s23_s1] sm:$0xf] %v4_v0 }

// kernel: tile.19
= control target key start
LH: loop header
LB: loop body
LE: loop exit
PB: predicated region body
PF: predicated region fallthrough
CT: control target
= control target key end

     0   :  { %s6_s8 = smov 3  ;;  %vm8_vm0 = vcmask 523264   ;;  %s31_s9 = smov 64   ;;  %vm15_vm1 = vcmask 1048064   ;;  %s51_s0 = inlined_call_operand.vmem [shape: f32[4,64], index: 0, kind: input, shape index: {}]   ;;  %s52_s1 = inlined_call_operand.vmem [shape: f32[1,256], index: 1, kind: output, shape index: {}]  }
   0x1   :  { %v4_v0 = vld [vmem:[%s51_s0] sm:$0xf]  ;;  %s11_s0 = smov 3 }
   0x2   :  { %5 = vst [vmem:[#allocation1] sm:$0xf] %v4_v0 }
   0x9   :  { %v12_v1 = vld [vmem:[#allocation1 + $0x1] ss:$2 sm:%s11_s0]   ;;  %v7_v2 = vld [vmem:[#allocation1] ss:$2 sm:%s6_s8]  }
   0xa   :  { %13 = vrot.lane.b32.xlu0 %v12_v1, %s31_s9  ;;  %9 = vst.msk [vmem:[#allocation0] ss:$8 sm:$0x3] %vm8_vm0, %v7_v2  }
  0x7c   :  { %v14_v3 = vpop.permute.xlu0 %13  }
  0x7d   :  { %16 = vst.msk [vmem:[#allocation0] ss:$8 sm:$0x3] %vm15_vm1, %v14_v3  }
  0x84   :  { %v19_v4 = vld [vmem:[#allocation0] sm:$0x1]  ;;  %v24_v5 = vld [vmem:[#allocation0 + $0x8] sm:$0x1] }
  0x85   :  { %22 = vst [vmem:[%s52_s1] sm:$0x1] %v19_v4 }
  0x86   :  { %29 = vst [vmem:[%s52_s1 + $0x1] sm:$0x1] %v24_v5 }

// kernel: efficient_lite_seg.39
= control target key start
LH: loop header
LB: loop body
LE: loop exit
PB: predicated region body
PF: predicated region fallthrough
CT: control target
= control target key end

     0   :  { %s2825_s1 = inlined_call_operand.vmem [shape: bf16[1152,256], index: 1, kind: input, shape index: {}]   ;;  %s2826_s0 = inlined_call_operand.vmem [shape: bf16[8,1152], index: 0, kind: input, shape index: {}]   ;;  %s2827_s2 = inlined_call_operand.vmem [shape: f32[1,256], index: 2, kind: input, shape index: {}]   ;;  %s2828_s3 = inlined_call_operand.vmem [shape: f32[8,256], index: 3, kind: output, shape index: {}]  }
   0x1   :  { %v1219_v0 = vld [vmem:[%s2825_s1 + $0x70] sm:$0xf]  ;;  %v1752_v1 = vld [vmem:[%s2825_s1 + $0x74] sm:$0xf0]  ;;  %v1211_v11 = vld [vmem:[%s2825_s1 + $0x60] sm:$0xf] }
   0x2   :  { %v1283_v2 = vld [vmem:[%s2825_s1 + $0xf0] sm:$0xf]  ;;  %v1220_v3 = vor.u32 %v1752_v1, %v1219_v0  ;;  %v1768_v4 = vld [vmem:[%s2825_s1 + $0xf4] sm:$0xf0]  ;;  %v1750_v13 = vld [vmem:[%s2825_s1 + $0x64] sm:$0xf0] }
   0x3   :  { %v1347_v5 = vld [vmem:[%s2825_s1 + $0x170] sm:$0xf]  ;;  %v1784_v6 = vld [vmem:[%s2825_s1 + $0x174] sm:$0xf0]  ;;  %v1284_v7 = vor.u32 %v1768_v4, %v1283_v2  ;;  %v1275_v14 = vld [vmem:[%s2825_s1 + $0xe0] sm:$0xf]  ;;  %v1212_v16 = vor.u32 %v1750_v13, %v1211_v11 }
   0x4   :  { %v1348_v8 = vor.u32 %v1784_v6, %v1347_v5  ;;  %v1411_v9 = vld [vmem:[%s2825_s1 + $0x1f0] sm:$0xf]  ;;  %v1800_v10 = vld [vmem:[%s2825_s1 + $0x1f4] sm:$0xf0]  ;;  %921 = vmatpush.bf16.msra.mxu0 %v1220_v3  ;;  %v1766_v15 = vld [vmem:[%s2825_s1 + $0xe4] sm:$0xf0] }
   0x5   :  { %v1412_v12 = vor.u32 %v1800_v10, %v1411_v9  ;;  %934 = vmatpush.bf16.msra.mxu1 %v1284_v7  ;;  %v1276_v17 = vor.u32 %v1766_v15, %v1275_v14  ;;  %v1339_v18 = vld [vmem:[%s2825_s1 + $0x160] sm:$0xf]  ;;  %v1782_v19 = vld [vmem:[%s2825_s1 + $0x164] sm:$0xf0]  ;;  %v1203_v23 = vld [vmem:[%s2825_s1 + $0x50] sm:$0xf] }
   0x6   :  { %947 = vmatpush.bf16.msra.mxu2 %v1348_v8  ;;  %v1403_v20 = vld [vmem:[%s2825_s1 + $0x1e0] sm:$0xf]  ;;  %v1340_v21 = vor.u32 %v1782_v19, %v1339_v18  ;;  %v1798_v22 = vld [vmem:[%s2825_s1 + $0x1e4] sm:$0xf0]  ;;  %v1748_v24 = vld [vmem:[%s2825_s1 + $0x54] sm:$0xf0] }
   0x7   :  { %960 = vmatpush.bf16.msra.mxu3 %v1412_v12  ;;  %v1404_v25 = vor.u32 %v1798_v22, %v1403_v20  ;;  %v1267_v26 = vld [vmem:[%s2825_s1 + $0xd0] sm:$0xf]  ;;  %v1764_v27 = vld [vmem:[%s2825_s1 + $0xd4] sm:$0xf0]  ;;  %v1204_v29 = vor.u32 %v1748_v24, %v1203_v23  ;;  %v1195_v35 = vld [vmem:[%s2825_s1 + $0x40] sm:$0xf] }
   0x8   :  { %v1331_v28 = vld [vmem:[%s2825_s1 + $0x150] sm:$0xf]  ;;  %922 = vmatpush.bf16.msra.mxu0 %v1212_v16  ;;  %v1780_v30 = vld [vmem:[%s2825_s1 + $0x154] sm:$0xf0]  ;;  %v1268_v33 = vor.u32 %v1764_v27, %v1267_v26  ;;  %v1746_v36 = vld [vmem:[%s2825_s1 + $0x44] sm:$0xf0] }
   0x9   :  { %v1395_v31 = vld [vmem:[%s2825_s1 + $0x1d0] sm:$0xf]  ;;  %v1796_v32 = vld [vmem:[%s2825_s1 + $0x1d4] sm:$0xf0]  ;;  %935 = vmatpush.bf16.msra.mxu1 %v1276_v17  ;;  %v1332_v34 = vor.u32 %v1780_v30, %v1331_v28  ;;  %v1259_v37 = vld [vmem:[%s2825_s1 + $0xc0] sm:$0xf]  ;;  %v1196_v44 = vor.u32 %v1746_v36, %v1195_v35 }
   0xa   :  { %948 = vmatpush.bf16.msra.mxu2 %v1340_v21  ;;  %v1396_v38 = vor.u32 %v1796_v32, %v1395_v31  ;;  %v1762_v39 = vld [vmem:[%s2825_s1 + $0xc4] sm:$0xf0]  ;;  %v1323_v40 = vld [vmem:[%s2825_s1 + $0x140] sm:$0xf]  ;;  %v1187_v47 = vld [vmem:[%s2825_s1 + $0x30] sm:$0xf] }
   0xb   :  { %961 = vmatpush.bf16.msra.mxu3 %v1404_v25  ;;  %v1778_v41 = vld [vmem:[%s2825_s1 + $0x144] sm:$0xf0]  ;;  %v1387_v42 = vld [vmem:[%s2825_s1 + $0x1c0] sm:$0xf]  ;;  %v1260_v45 = vor.u32 %v1762_v39, %v1259_v37  ;;  %v1744_v48 = vld [vmem:[%s2825_s1 + $0x34] sm:$0xf0] }
   0xc   :  { %v1794_v43 = vld [vmem:[%s2825_s1 + $0x1c4] sm:$0xf0]  ;;  %923 = vmatpush.bf16.msra.mxu0 %v1204_v29  ;;  %v1324_v46 = vor.u32 %v1778_v41, %v1323_v40  ;;  %v1251_v49 = vld [vmem:[%s2825_s1 + $0xb0] sm:$0xf]  ;;  %v1760_v51 = vld [vmem:[%s2825_s1 + $0xb4] sm:$0xf0]  ;;  %v1188_v56 = vor.u32 %v1744_v48, %v1187_v47 }
   0xd   :  { %936 = vmatpush.bf16.msra.mxu1 %v1268_v33  ;;  %v1388_v50 = vor.u32 %v1794_v43, %v1387_v42  ;;  %v1315_v52 = vld [vmem:[%s2825_s1 + $0x130] sm:$0xf]  ;;  %v1776_v53 = vld [vmem:[%s2825_s1 + $0x134] sm:$0xf0]  ;;  %v1252_v57 = vor.u32 %v1760_v51, %v1251_v49  ;;  %v1179_v59 = vld [vmem:[%s2825_s1 + $0x20] sm:$0xf] }
   0xe   :  { %949 = vmatpush.bf16.msra.mxu2 %v1332_v34  ;;  %v1379_v54 = vld [vmem:[%s2825_s1 + $0x1b0] sm:$0xf]  ;;  %v1792_v55 = vld [vmem:[%s2825_s1 + $0x1b4] sm:$0xf0]  ;;  %v1316_v58 = vor.u32 %v1776_v53, %v1315_v52  ;;  %v1742_v60 = vld [vmem:[%s2825_s1 + $0x24] sm:$0xf0] }
   0xf   :  { %962 = vmatpush.bf16.msra.mxu3 %v1396_v38  ;;  %v1243_v61 = vld [vmem:[%s2825_s1 + $0xa0] sm:$0xf]  ;;  %v1380_v62 = vor.u32 %v1792_v55, %v1379_v54  ;;  %v1758_v63 = vld [vmem:[%s2825_s1 + $0xa4] sm:$0xf0]  ;;  %v1180_v4 = vor.u32 %v1742_v60, %v1179_v59  ;;  %v1171_v7 = vld [vmem:[%s2825_s1 + $0x10] sm:$0xf] }
  0x10   :  { %924 = vmatpush.bf16.msra.mxu0 %v1196_v44  ;;  %v1307_v0 = vld [vmem:[%s2825_s1 + $0x120] sm:$0xf]  ;;  %v1774_v1 = vld [vmem:[%s2825_s1 + $0x124] sm:$0xf0]  ;;  %v1244_v5 = vor.u32 %v1758_v63, %v1243_v61  ;;  %v1740_v8 = vld [vmem:[%s2825_s1 + $0x14] sm:$0xf0] }
  0x11   :  { %937 = vmatpush.bf16.msra.mxu1 %v1260_v45  ;;  %v1371_v2 = vld [vmem:[%s2825_s1 + $0x1a0] sm:$0xf]  ;;  %v1790_v3 = vld [vmem:[%s2825_s1 + $0x1a4] sm:$0xf0]  ;;  %v1308_v6 = vor.u32 %v1774_v1, %v1307_v0  ;;  %v1235_v9 = vld [vmem:[%s2825_s1 + $0x90] sm:$0xf]  ;;  %v1172_v16 = vor.u32 %v1740_v8, %v1171_v7 }
  0x12   :  { %950 = vmatpush.bf16.msra.mxu2 %v1324_v46  ;;  %v1372_v10 = vor.u32 %v1790_v3, %v1371_v2  ;;  %v1756_v11 = vld [vmem:[%s2825_s1 + $0x94] sm:$0xf0]  ;;  %v1299_v12 = vld [vmem:[%s2825_s1 + $0x110] sm:$0xf]  ;;  %v1163_v17 = vld [vmem:[%s2825_s1] sm:$0xf] }
  0x13   :  { %963 = vmatpush.bf16.msra.mxu3 %v1388_v50  ;;  %v1772_v13 = vld [vmem:[%s2825_s1 + $0x114] sm:$0xf0]  ;;  %v1363_v14 = vld [vmem:[%s2825_s1 + $0x190] sm:$0xf]  ;;  %v1738_v18 = vld [vmem:[%s2825_s1 + $0x4] sm:$0xf0]  ;;  %v1236_v19 = vor.u32 %v1756_v11, %v1235_v9 }
  0x14   :  { %925 = vmatpush.bf16.msra.mxu0 %v1188_v56  ;;  %v1788_v15 = vld [vmem:[%s2825_s1 + $0x194] sm:$0xf0]  ;;  %v1300_v20 = vor.u32 %v1772_v13, %v1299_v12  ;;  %v1227_v21 = vld [vmem:[%s2825_s1 + $0x80] sm:$0xf]  ;;  %v1754_v22 = vld [vmem:[%s2825_s1 + $0x84] sm:$0xf0]  ;;  %v1164_v31 = vor.u32 %v1738_v18, %v1163_v17 }
  0x15   :  { %938 = vmatpush.bf16.msra.mxu1 %v1252_v57  ;;  %v1291_v23 = vld [vmem:[%s2825_s1 + $0x100] sm:$0xf]  ;;  %v1364_v24 = vor.u32 %v1788_v15, %v1363_v14  ;;  %v1770_v25 = vld [vmem:[%s2825_s1 + $0x104] sm:$0xf0]  ;;  %v1475_v26 = vld [vmem:[%s2825_s1 + $0x270] sm:$0xf]  ;;  %v1228_v35 = vor.u32 %v1754_v22, %v1227_v21 }
  0x16   :  { %951 = vmatpush.bf16.msra.mxu2 %v1316_v58  ;;  %v1816_v27 = vld [vmem:[%s2825_s1 + $0x274] sm:$0xf0]  ;;  %v1539_v28 = vld [vmem:[%s2825_s1 + $0x2f0] sm:$0xf]  ;;  %v1355_v33 = vld [vmem:[%s2825_s1 + $0x180] sm:$0xf]  ;;  %v1292_v36 = vor.u32 %v1770_v25, %v1291_v23 }
  0x17   :  { %964 = vmatpush.bf16.msra.mxu3 %v1380_v62  ;;  %v1832_v29 = vld [vmem:[%s2825_s1 + $0x2f4] sm:$0xf0]  ;;  %v1603_v30 = vld [vmem:[%s2825_s1 + $0x370] sm:$0xf]  ;;  %v1786_v34 = vld [vmem:[%s2825_s1 + $0x184] sm:$0xf0]  ;;  %v1476_v39 = vor.u32 %v1816_v27, %v1475_v26 }
  0x18   :  { %926 = vmatpush.bf16.msra.mxu0 %v1180_v4  ;;  %v1848_v32 = vld [vmem:[%s2825_s1 + $0x374] sm:$0xf0]  ;;  %v1667_v37 = vld [vmem:[%s2825_s1 + $0x3f0] sm:$0xf]  ;;  %v1540_v40 = vor.u32 %v1832_v29, %v1539_v28  ;;  %v1467_v41 = vld [vmem:[%s2825_s1 + $0x260] sm:$0xf]  ;;  %v1356_v43 = vor.u32 %v1786_v34, %v1355_v33 }
  0x19   :  { %939 = vmatpush.bf16.msra.mxu1 %v1244_v5  ;;  %v1864_v38 = vld [vmem:[%s2825_s1 + $0x3f4] sm:$0xf0]  ;;  %v1604_v42 = vor.u32 %v1848_v32, %v1603_v30  ;;  %v1814_v44 = vld [vmem:[%s2825_s1 + $0x264] sm:$0xf0]  ;;  %v1531_v45 = vld [vmem:[%s2825_s1 + $0x2e0] sm:$0xf] }
  0x1a   :  { %952 = vmatpush.bf16.msra.mxu2 %v1308_v6  ;;  %v1830_v46 = vld [vmem:[%s2825_s1 + $0x2e4] sm:$0xf0]  ;;  %v1668_v47 = vor.u32 %v1864_v38, %v1667_v37  ;;  %v1595_v48 = vld [vmem:[%s2825_s1 + $0x360] sm:$0xf]  ;;  %v1468_v52 = vor.u32 %v1814_v44, %v1467_v41  ;;  %v1459_v54 = vld [vmem:[%s2825_s1 + $0x250] sm:$0xf] }
  0x1b   :  { %965 = vmatpush.bf16.msra.mxu3 %v1372_v10  ;;  %v1846_v49 = vld [vmem:[%s2825_s1 + $0x364] sm:$0xf0]  ;;  %v1659_v50 = vld [vmem:[%s2825_s1 + $0x3e0] sm:$0xf]  ;;  %v1532_v53 = vor.u32 %v1830_v46, %v1531_v45  ;;  %v1812_v55 = vld [vmem:[%s2825_s1 + $0x254] sm:$0xf0] }
  0x1c   :  { %927 = vmatpush.bf16.msra.mxu0 %v1172_v16  ;;  %v1862_v51 = vld [vmem:[%s2825_s1 + $0x3e4] sm:$0xf0]  ;;  %v1596_v57 = vor.u32 %v1846_v49, %v1595_v48  ;;  %v1523_v58 = vld [vmem:[%s2825_s1 + $0x2d0] sm:$0xf]  ;;  %v1828_v59 = vld [vmem:[%s2825_s1 + $0x2d4] sm:$0xf0]  ;;  %v1460_v4 = vor.u32 %v1812_v55, %v1459_v54 }
  0x1d   :  { %940 = vmatpush.bf16.msra.mxu1 %v1236_v19  ;;  %v15_v56 = vld [vmem:[%s2826_s0 + $0x8] sm:$0xff]  ;;  %v14_v61 = vld [vmem:[%s2826_s0] sm:$0xff]  ;;  %v1660_v63 = vor.u32 %v1862_v51, %v1659_v50  ;;  %v1587_v0 = vld [vmem:[%s2825_s1 + $0x350] sm:$0xf]  ;;  %v1524_v9 = vor.u32 %v1828_v59, %v1523_v58 }
  0x1e   :  { %953 = vmatpush.bf16.msra.mxu2 %v1300_v20  ;;  %v176_v60 = vunpack.c.l.b16 %v15_v56  ;;  %v177_v62 = vunpack.c.h.b16 %v15_v56  ;;  %v1844_v1 = vld [vmem:[%s2825_s1 + $0x354] sm:$0xf0]  ;;  %v174_v2 = vunpack.c.l.b16 %v14_v61  ;;  %v175_v3 = vunpack.c.h.b16 %v14_v61  ;;  %v1651_v5 = vld [vmem:[%s2825_s1 + $0x3d0] sm:$0xf]  ;;  %v1451_v10 = vld [vmem:[%s2825_s1 + $0x240] sm:$0xf] }
  0x1f   :  { %966 = vmatpush.bf16.msra.mxu3 %v1364_v24  ;;  %v1860_v6 = vld [vmem:[%s2825_s1 + $0x3d4] sm:$0xf0]  ;;  %v1588_v13 = vor.u32 %v1844_v1, %v1587_v0  ;;  %v1810_v14 = vld [vmem:[%s2825_s1 + $0x244] sm:$0xf0]  ;;  %v1515_v15 = vld [vmem:[%s2825_s1 + $0x2c0] sm:$0xf] }
  0x20   :  { %928 = vmatpush.bf16.msra.mxu0 %v1164_v31  ;;  %v2171_v7 = vpack.c.b16 %v176_v60, %v176_v60  ;;  %v2173_v8 = vpack.c.b16 %v177_v62, %v177_v62  ;;  %v2178_v11 = vpack.c.b16 %v174_v2, %v174_v2  ;;  %v2180_v12 = vpack.c.b16 %v175_v3, %v175_v3  ;;  %v1826_v16 = vld [vmem:[%s2825_s1 + $0x2c4] sm:$0xf0]  ;;  %v1579_v18 = vld [vmem:[%s2825_s1 + $0x340] sm:$0xf]  ;;  %v1443_v24 = vld [vmem:[%s2825_s1 + $0x230] sm:$0xf] }
  0x21   :  { %941 = vmatpush.bf16.msra.mxu1 %v1228_v35  ;;  %v1652_v17 = vor.u32 %v1860_v6, %v1651_v5  ;;  %v1842_v19 = vld [vmem:[%s2825_s1 + $0x344] sm:$0xf0]  ;;  %v1643_v20 = vld [vmem:[%s2825_s1 + $0x3c0] sm:$0xf]  ;;  %v1452_v22 = vor.u32 %v1810_v14, %v1451_v10  ;;  %v1516_v23 = vor.u32 %v1826_v16, %v1515_v15  ;;  %v1808_v26 = vld [vmem:[%s2825_s1 + $0x234] sm:$0xf0] }
  0x22   :  { %954 = vmatpush.bf16.msra.mxu2 %v1292_v36  ;;  %v1858_v21 = vld [vmem:[%s2825_s1 + $0x3c4] sm:$0xf0]  ;;  %v1580_v25 = vor.u32 %v1842_v19, %v1579_v18  ;;  %v1507_v27 = vld [vmem:[%s2825_s1 + $0x2b0] sm:$0xf]  ;;  %v1824_v28 = vld [vmem:[%s2825_s1 + $0x2b4] sm:$0xf0]  ;;  %v1444_v34 = vor.u32 %v1808_v26, %v1443_v24 }
  0x23   :  { %967 = vmatpush.bf16.msra.mxu3 %v1356_v43  ;;  %929 = vmatmul.bf16.vlgmr.msra.gmra.mxu0 %v2178_v11  ;;  %v1644_v29 = vor.u32 %v1858_v21, %v1643_v20  ;;  %v1571_v30 = vld [vmem:[%s2825_s1 + $0x330] sm:$0xf]  ;;  %v1840_v31 = vld [vmem:[%s2825_s1 + $0x334] sm:$0xf0]  ;;  %v1508_v35 = vor.u32 %v1824_v28, %v1507_v27  ;;  %v1435_v36 = vld [vmem:[%s2825_s1 + $0x220] sm:$0xf] }
  0x24   :  { %973 = vmatpush.bf16.msrb.mxu0 %v1476_v39  ;;  %942 = vmatmul.bf16.vlgmr.msra.gmra.mxu1 %v2180_v12  ;;  %v1635_v32 = vld [vmem:[%s2825_s1 + $0x3b0] sm:$0xf]  ;;  %v1856_v33 = vld [vmem:[%s2825_s1 + $0x3b4] sm:$0xf0]  ;;  %v1572_v37 = vor.u32 %v1840_v31, %v1571_v30  ;;  %v1806_v38 = vld [vmem:[%s2825_s1 + $0x224] sm:$0xf0] }
  0x25   :  { %986 = vmatpush.bf16.msrb.mxu1 %v1540_v40  ;;  %955 = vmatmul.bf16.vlgmr.msra.gmra.mxu2 %v2171_v7  ;;  %v1499_v39 = vld [vmem:[%s2825_s1 + $0x2a0] sm:$0xf]  ;;  %v1822_v40 = vld [vmem:[%s2825_s1 + $0x2a4] sm:$0xf0]  ;;  %v1636_v41 = vor.u32 %v1856_v33, %v1635_v32  ;;  %v1436_v46 = vor.u32 %v1806_v38, %v1435_v36  ;;  %v1427_v48 = vld [vmem:[%s2825_s1 + $0x210] sm:$0xf] }
  0x26   :  { %999 = vmatpush.bf16.msrb.mxu2 %v1604_v42  ;;  %968 = vmatmul.bf16.vlgmr.msra.gmra.mxu3 %v2173_v8  ;;  %v1563_v42 = vld [vmem:[%s2825_s1 + $0x320] sm:$0xf]  ;;  %v1838_v43 = vld [vmem:[%s2825_s1 + $0x324] sm:$0xf0]  ;;  %v1804_v50 = vld [vmem:[%s2825_s1 + $0x214] sm:$0xf0] }
  0x27   :  { %1012 = vmatpush.bf16.msrb.mxu3 %v1668_v47  ;;  %v1627_v44 = vld [vmem:[%s2825_s1 + $0x3a0] sm:$0xf]  ;;  %v1854_v45 = vld [vmem:[%s2825_s1 + $0x3a4] sm:$0xf0]  ;;  %v1500_v47 = vor.u32 %v1822_v40, %v1499_v39  ;;  %v1564_v49 = vor.u32 %v1838_v43, %v1563_v42  ;;  %v1491_v51 = vld [vmem:[%s2825_s1 + $0x290] sm:$0xf]  ;;  %v1428_v60 = vor.u32 %v1804_v50, %v1427_v48 }
  0x28   :  { %974 = vmatpush.bf16.msrb.mxu0 %v1468_v52  ;;  %v1820_v52 = vld [vmem:[%s2825_s1 + $0x294] sm:$0xf0]  ;;  %v1555_v54 = vld [vmem:[%s2825_s1 + $0x310] sm:$0xf]  ;;  %v1419_v58 = vld [vmem:[%s2825_s1 + $0x200] sm:$0xf] }
  0x29   :  { %987 = vmatpush.bf16.msrb.mxu1 %v1532_v53  ;;  %v1628_v53 = vor.u32 %v1854_v45, %v1627_v44  ;;  %v1836_v55 = vld [vmem:[%s2825_s1 + $0x314] sm:$0xf0]  ;;  %v1619_v56 = vld [vmem:[%s2825_s1 + $0x390] sm:$0xf]  ;;  %v1802_v59 = vld [vmem:[%s2825_s1 + $0x204] sm:$0xf0]  ;;  %v1492_v61 = vor.u32 %v1820_v52, %v1491_v51 }
  0x2a   :  { %1000 = vmatpush.bf16.msrb.mxu2 %v1596_v57  ;;  %v1852_v57 = vld [vmem:[%s2825_s1 + $0x394] sm:$0xf0]  ;;  %v1483_v62 = vld [vmem:[%s2825_s1 + $0x280] sm:$0xf]  ;;  %v16_v0 = vld [vmem:[%s2826_s0 + $0x10] sm:$0xff]  ;;  %v1556_v1 = vor.u32 %v1836_v55, %v1555_v54 }
  0x2b   :  { %1013 = vmatpush.bf16.msrb.mxu3 %v1660_v63  ;;  %v1818_v63 = vld [vmem:[%s2825_s1 + $0x284] sm:$0xf0]  ;;  %v1547_v2 = vld [vmem:[%s2825_s1 + $0x300] sm:$0xf]  ;;  %v1620_v5 = vor.u32 %v1852_v57, %v1619_v56  ;;  %v1731_v6 = vld [vmem:[%s2825_s1 + $0x470] sm:$0xf]  ;;  %v178_v16 = vunpack.c.l.b16 %v16_v0  ;;  %v179_v26 = vunpack.c.h.b16 %v16_v0 }
  0x2c   :  { %975 = vmatpush.bf16.msrb.mxu0 %v1460_v4  ;;  %v1834_v3 = vld [vmem:[%s2825_s1 + $0x304] sm:$0xf0]  ;;  %v17_v4 = vld [vmem:[%s2826_s0 + $0x18] sm:$0xff]  ;;  %v1751_v10 = vld [vmem:[%s2825_s1 + $0x74] sm:$0xf]  ;;  %v1484_v18 = vor.u32 %v1818_v63, %v1483_v62 }
  0x2d   :  { %988 = vmatpush.bf16.msrb.mxu1 %v1524_v9  ;;  %v1880_v9 = vld [vmem:[%s2825_s1 + $0x474] sm:$0xf0]  ;;  %v1767_v14 = vld [vmem:[%s2825_s1 + $0xf4] sm:$0xf]  ;;  %v1285_v15 = vld [vmem:[%s2825_s1 + $0xf8] sm:$0xf0]  ;;  %v180_v21 = vunpack.c.l.b16 %v17_v4  ;;  %v2351_v36 = vpack.c.b16 %v178_v16, %v178_v16  ;;  %v2361_v43 = vpack.c.b16 %v179_v26, %v179_v26 }
  0x2e   :  { %1001 = vmatpush.bf16.msrb.mxu2 %v1588_v13  ;;  %v1221_v13 = vld [vmem:[%s2825_s1 + $0x78] sm:$0xf0]  ;;  %v1611_v19 = vld [vmem:[%s2825_s1 + $0x380] sm:$0xf]  ;;  %v1850_v20 = vld [vmem:[%s2825_s1 + $0x384] sm:$0xf0]  ;;  %v1288_v28 = vor.u32 %v1767_v14, %v1285_v15 }
  0x2f   :  { %1014 = vmatpush.bf16.msrb.mxu3 %v1652_v17  ;;  %v1420_v17 = vor.u32 %v1802_v59, %v1419_v58  ;;  %v1783_v24 = vld [vmem:[%s2825_s1 + $0x174] sm:$0xf]  ;;  %v1224_v27 = vor.u32 %v1751_v10, %v1221_v13  ;;  %v1878_v30 = vld [vmem:[%s2825_s1 + $0x464] sm:$0xf0]  ;;  %v1749_v31 = vld [vmem:[%s2825_s1 + $0x64] sm:$0xf]  ;;  %v1612_v32 = vor.u32 %v1850_v20, %v1611_v19  ;;  %v2353_v39 = vpack.c.b16 %v180_v21, %v180_v21 }
  0x30   :  { %976 = vmatpush.bf16.msrb.mxu0 %v1452_v22  ;;  %v1548_v22 = vor.u32 %v1834_v3, %v1547_v2  ;;  %v1213_v33 = vld [vmem:[%s2825_s1 + $0x68] sm:$0xf0]  ;;  %v1747_v48 = vld [vmem:[%s2825_s1 + $0x54] sm:$0xf]  ;;  %v1205_v50 = vld [vmem:[%s2825_s1 + $0x58] sm:$0xf0] }
  0x31   :  { %989 = vmatpush.bf16.msrb.mxu1 %v1516_v23  ;;  %v1732_v23 = vor.u32 %v1880_v9, %v1731_v6  ;;  %v1341_v42 = vld [vmem:[%s2825_s1 + $0x168] sm:$0xf0]  ;;  %v1216_v44 = vor.u32 %v1749_v31, %v1213_v33  ;;  %v1763_v51 = vld [vmem:[%s2825_s1 + $0xd4] sm:$0xf]  ;;  %v1269_v52 = vld [vmem:[%s2825_s1 + $0xd8] sm:$0xf0]  ;;  %v1208_v57 = vor.u32 %v1747_v48, %v1205_v50 }
  0x32   :  { %1002 = vmatpush.bf16.msrb.mxu2 %v1580_v25  ;;  %v1349_v25 = vld [vmem:[%s2825_s1 + $0x178] sm:$0xf0]  ;;  %v1779_v55 = vld [vmem:[%s2825_s1 + $0x154] sm:$0xf]  ;;  %v1272_v58 = vor.u32 %v1763_v51, %v1269_v52  ;;  %v1707_v59 = vld [vmem:[%s2825_s1 + $0x440] sm:$0xf] }
  0x33   :  { %1015 = vmatpush.bf16.msrb.mxu3 %v1644_v29  ;;  %v1723_v29 = vld [vmem:[%s2825_s1 + $0x460] sm:$0xf]  ;;  %v1352_v38 = vor.u32 %v1783_v24, %v1349_v25  ;;  %v1333_v56 = vld [vmem:[%s2825_s1 + $0x158] sm:$0xf0]  ;;  %v1197_v62 = vld [vmem:[%s2825_s1 + $0x48] sm:$0xf0] }
  0x34   :  { %977 = vmatpush.bf16.msrb.mxu0 %v1444_v34  ;;  %v1765_v34 = vld [vmem:[%s2825_s1 + $0xe4] sm:$0xf]  ;;  %v1724_v40 = vor.u32 %v1878_v30, %v1723_v29  ;;  %v1261_v0 = vld [vmem:[%s2825_s1 + $0xc8] sm:$0xf0]  ;;  %v1699_v9 = vld [vmem:[%s2825_s1 + $0x430] sm:$0xf] }
  0x35   :  { %990 = vmatpush.bf16.msrb.mxu1 %v1508_v35  ;;  %v1277_v35 = vld [vmem:[%s2825_s1 + $0xe8] sm:$0xf0]  ;;  %v1761_v63 = vld [vmem:[%s2825_s1 + $0xc4] sm:$0xf]  ;;  %v1872_v10 = vld [vmem:[%s2825_s1 + $0x434] sm:$0xf0] }
  0x36   :  { %1003 = vmatpush.bf16.msrb.mxu2 %v1572_v37  ;;  %v181_v37 = vunpack.c.h.b16 %v17_v4  ;;  %v1280_v45 = vor.u32 %v1765_v34, %v1277_v35  ;;  %v1777_v3 = vld [vmem:[%s2825_s1 + $0x144] sm:$0xf]  ;;  %v1325_v4 = vld [vmem:[%s2825_s1 + $0x148] sm:$0xf0]  ;;  %v1264_v6 = vor.u32 %v1761_v63, %v1261_v0  ;;  %v1743_v13 = vld [vmem:[%s2825_s1 + $0x34] sm:$0xf] }
  0x37   :  { %1016 = vmatpush.bf16.msrb.mxu3 %v1636_v41  ;;  %v1781_v41 = vld [vmem:[%s2825_s1 + $0x164] sm:$0xf]  ;;  %v1189_v14 = vld [vmem:[%s2825_s1 + $0x38] sm:$0xf0]  ;;  %v1759_v15 = vld [vmem:[%s2825_s1 + $0xb4] sm:$0xf] }
  0x38   :  { %978 = vmatpush.bf16.msrb.mxu0 %v1436_v46  ;;  %v1715_v46 = vld [vmem:[%s2825_s1 + $0x450] sm:$0xf]  ;;  %v1253_v16 = vld [vmem:[%s2825_s1 + $0xb8] sm:$0xf0]  ;;  %v1775_v19 = vld [vmem:[%s2825_s1 + $0x134] sm:$0xf]  ;;  %v1192_v21 = vor.u32 %v1743_v13, %v1189_v14 }
  0x39   :  { %991 = vmatpush.bf16.msrb.mxu1 %v1500_v47  ;;  %v1876_v47 = vld [vmem:[%s2825_s1 + $0x454] sm:$0xf0]  ;;  %v1317_v20 = vld [vmem:[%s2825_s1 + $0x138] sm:$0xf0]  ;;  %v1870_v24 = vld [vmem:[%s2825_s1 + $0x424] sm:$0xf0] }
  0x3a   :  { %1004 = vmatpush.bf16.msrb.mxu2 %v1564_v49  ;;  %v2373_v49 = vpack.c.b16 %v181_v37, %v181_v37  ;;  %v1716_v54 = vor.u32 %v1876_v47, %v1715_v46  ;;  %v1741_v25 = vld [vmem:[%s2825_s1 + $0x24] sm:$0xf]  ;;  %v1181_v26 = vld [vmem:[%s2825_s1 + $0x28] sm:$0xf0]  ;;  %v1320_v29 = vor.u32 %v1775_v19, %v1317_v20  ;;  %v1683_v35 = vld [vmem:[%s2825_s1 + $0x410] sm:$0xf] }
  0x3b   :  { %1017 = vmatpush.bf16.msrb.mxu3 %v1628_v53  ;;  %v1344_v53 = vor.u32 %v1781_v41, %v1341_v42  ;;  %v1773_v31 = vld [vmem:[%s2825_s1 + $0x124] sm:$0xf]  ;;  %v1184_v33 = vor.u32 %v1741_v25, %v1181_v26  ;;  %v1868_v37 = vld [vmem:[%s2825_s1 + $0x414] sm:$0xf0]  ;;  %v1755_v41 = vld [vmem:[%s2825_s1 + $0x94] sm:$0xf] }
  0x3c   :  { %979 = vmatpush.bf16.msrb.mxu0 %v1428_v60  ;;  %v1874_v60 = vld [vmem:[%s2825_s1 + $0x444] sm:$0xf0]  ;;  %v1237_v42 = vld [vmem:[%s2825_s1 + $0x98] sm:$0xf0]  ;;  %v1684_v46 = vor.u32 %v1868_v37, %v1683_v35  ;;  %v1675_v48 = vld [vmem:[%s2825_s1 + $0x400] sm:$0xf] }
  0x3d   :  { %992 = vmatpush.bf16.msrb.mxu1 %v1492_v61  ;;  %v1745_v61 = vld [vmem:[%s2825_s1 + $0x44] sm:$0xf]  ;;  %v1708_v2 = vor.u32 %v1874_v60, %v1707_v59  ;;  %v1301_v47 = vld [vmem:[%s2825_s1 + $0x118] sm:$0xf0]  ;;  %v18_v50 = vld [vmem:[%s2826_s0 + $0x20] sm:$0xf]  ;;  %v1240_v52 = vor.u32 %v1755_v41, %v1237_v42 }
  0x3e   :  { %1005 = vmatpush.bf16.msrb.mxu2 %v1556_v1  ;;  %v1336_v1 = vor.u32 %v1779_v55, %v1333_v56  ;;  %v1165_v55 = vld [vmem:[%s2825_s1 + $0x8] sm:$0xf0]  ;;  %v1753_v56 = vld [vmem:[%s2825_s1 + $0x84] sm:$0xf]  ;;  %v1413_v60 = vld [vmem:[%s2825_s1 + $0x1f8] sm:$0xf0]  ;;  %v182_v63 = vunpack.c.l.b16 %v18_v50 }
  0x3f   :  { %1018 = vmatpush.bf16.msrb.mxu3 %v1620_v5  ;;  %v1200_v5 = vor.u32 %v1745_v61, %v1197_v62  ;;  %v1815_v61 = vld [vmem:[%s2825_s1 + $0x274] sm:$0xf]  ;;  %v1477_v62 = vld [vmem:[%s2825_s1 + $0x278] sm:$0xf0]  ;;  %v1813_v19 = vld [vmem:[%s2825_s1 + $0x264] sm:$0xf] }
  0x40   :  { %980 = vmatpush.bf16.msrb.mxu0 %v1420_v17  ;;  %v1328_v17 = vor.u32 %v1777_v3, %v1325_v4  ;;  %v1847_v13 = vld [vmem:[%s2825_s1 + $0x374] sm:$0xf]  ;;  %v1605_v14 = vld [vmem:[%s2825_s1 + $0x378] sm:$0xf0]  ;;  %v1469_v20 = vld [vmem:[%s2825_s1 + $0x268] sm:$0xf0] }
  0x41   :  { %993 = vmatpush.bf16.msrb.mxu1 %v1484_v18  ;;  %v1700_v18 = vor.u32 %v1872_v10, %v1699_v9  ;;  %v1480_v10 = vor.u32 %v1815_v61, %v1477_v62  ;;  %v1472_v26 = vor.u32 %v1813_v19, %v1469_v20  ;;  %v1525_v35 = vld [vmem:[%s2825_s1 + $0x2d8] sm:$0xf0]  ;;  %v1843_v41 = vld [vmem:[%s2825_s1 + $0x354] sm:$0xf] }
  0x42   :  { %1006 = vmatpush.bf16.msrb.mxu2 %v1548_v22  ;;  %v1256_v22 = vor.u32 %v1759_v15, %v1253_v16  ;;  %v1797_v15 = vld [vmem:[%s2825_s1 + $0x1e4] sm:$0xf]  ;;  %v1589_v42 = vld [vmem:[%s2825_s1 + $0x358] sm:$0xf0]  ;;  %v1787_v19 = vld [vmem:[%s2825_s1 + $0x194] sm:$0xf] }
  0x43   :  { %1019 = vmatpush.bf16.msrb.mxu3 %v1612_v32  ;;  %981 = vmatmul.bf16.vlgmr.msrb.gmra.mxu0 %v2351_v36  ;;  %v1309_v32 = vld [vmem:[%s2825_s1 + $0x128] sm:$0xf0]  ;;  %v1592_v50 = vor.u32 %v1843_v41, %v1589_v42  ;;  %v1669_v41 = vld [vmem:[%s2825_s1 + $0x3f8] sm:$0xf0] }
  0x44   :  { %1025 = vmatpush.bf16.msra.mxu0 %v1732_v23  ;;  %994 = vmatmul.bf16.vlgmr.msrb.gmra.mxu1 %v2361_v43  ;;  %v1691_v23 = vld [vmem:[%s2825_s1 + $0x420] sm:$0xf] }
  0x45   :  { %1038 = vmatpush.bf16.msra.mxu1 %v1224_v27  ;;  %1007 = vmatmul.bf16.vlgmr.msrb.gmra.mxu2 %v2353_v39  ;;  %v1757_v27 = vld [vmem:[%s2825_s1 + $0xa4] sm:$0xf]  ;;  %v1692_v30 = vor.u32 %v1870_v24, %v1691_v23  ;;  %v1533_v23 = vld [vmem:[%s2825_s1 + $0x2e8] sm:$0xf0]  ;;  %v1608_v24 = vor.u32 %v1847_v13, %v1605_v14 }
  0x46   :  { %1051 = vmatpush.bf16.msra.mxu2 %v1288_v28  ;;  %1020 = vmatmul.bf16.vlgmr.msrb.gmra.mxu3 %v2373_v49  ;;  %v1245_v28 = vld [vmem:[%s2825_s1 + $0xa8] sm:$0xf0] }
  0x47   :  { %1064 = vmatpush.bf16.msra.mxu3 %v1352_v38  ;;  %v1248_v34 = vor.u32 %v1757_v27, %v1245_v28  ;;  %v1739_v38 = vld [vmem:[%s2825_s1 + $0x14] sm:$0xf]  ;;  %v1845_v27 = vld [vmem:[%s2825_s1 + $0x364] sm:$0xf]  ;;  %v1597_v28 = vld [vmem:[%s2825_s1 + $0x368] sm:$0xf0] }
  0x48   :  { %1026 = vmatpush.bf16.msra.mxu0 %v1724_v40  ;;  %v1173_v40 = vld [vmem:[%s2825_s1 + $0x18] sm:$0xf0]  ;;  %v1600_v37 = vor.u32 %v1845_v27, %v1597_v28  ;;  %v1835_v27 = vld [vmem:[%s2825_s1 + $0x314] sm:$0xf] }
  0x49   :  { %1039 = vmatpush.bf16.msra.mxu1 %v1216_v44  ;;  %v1312_v44 = vor.u32 %v1773_v31, %v1309_v32  ;;  %v1176_v51 = vor.u32 %v1739_v38, %v1173_v40  ;;  %v1397_v31 = vld [vmem:[%s2825_s1 + $0x1d8] sm:$0xf0]  ;;  %v1811_v32 = vld [vmem:[%s2825_s1 + $0x254] sm:$0xf] }
  0x4a   :  { %1052 = vmatpush.bf16.msra.mxu2 %v1280_v45  ;;  %v1771_v45 = vld [vmem:[%s2825_s1 + $0x114] sm:$0xf] }
  0x4b   :  { %1065 = vmatpush.bf16.msra.mxu3 %v1344_v53  ;;  %v1866_v53 = vld [vmem:[%s2825_s1 + $0x404] sm:$0xf0]  ;;  %v1304_v59 = vor.u32 %v1771_v45, %v1301_v47  ;;  %v1809_v45 = vld [vmem:[%s2825_s1 + $0x244] sm:$0xf] }
  0x4c   :  { %1027 = vmatpush.bf16.msra.mxu0 %v1716_v54  ;;  %v1737_v54 = vld [vmem:[%s2825_s1 + $0x4] sm:$0xf]  ;;  %v1676_v0 = vor.u32 %v1866_v53, %v1675_v48  ;;  %v1517_v48 = vld [vmem:[%s2825_s1 + $0x2c8] sm:$0xf0] }
  0x4d   :  { %1040 = vmatpush.bf16.msra.mxu1 %v1208_v57  ;;  %v1229_v57 = vld [vmem:[%s2825_s1 + $0x88] sm:$0xf0]  ;;  %v1168_v3 = vor.u32 %v1737_v54, %v1165_v55  ;;  %v1825_v47 = vld [vmem:[%s2825_s1 + $0x2c4] sm:$0xf]  ;;  %v1791_v54 = vld [vmem:[%s2825_s1 + $0x1b4] sm:$0xf] }
  0x4e   :  { %1053 = vmatpush.bf16.msra.mxu2 %v1272_v58  ;;  %v1799_v58 = vld [vmem:[%s2825_s1 + $0x1f4] sm:$0xf]  ;;  %v1232_v4 = vor.u32 %v1753_v56, %v1229_v57  ;;  %v1841_v53 = vld [vmem:[%s2825_s1 + $0x344] sm:$0xf]  ;;  %v1520_v55 = vor.u32 %v1825_v47, %v1517_v48  ;;  %v1381_v56 = vld [vmem:[%s2825_s1 + $0x1b8] sm:$0xf0] }
  0x4f   :  { %1066 = vmatpush.bf16.msra.mxu3 %v1336_v1  ;;  %v1831_v1 = vld [vmem:[%s2825_s1 + $0x2f4] sm:$0xf]  ;;  %v1416_v9 = vor.u32 %v1799_v58, %v1413_v60  ;;  %v1445_v58 = vld [vmem:[%s2825_s1 + $0x238] sm:$0xf0]  ;;  %v1384_v62 = vor.u32 %v1791_v54, %v1381_v56  ;;  %v1549_v47 = vld [vmem:[%s2825_s1 + $0x308] sm:$0xf0] }
  0x50   :  { %1028 = vmatpush.bf16.msra.mxu0 %v1708_v2  ;;  %v1541_v2 = vld [vmem:[%s2825_s1 + $0x2f8] sm:$0xf0]  ;;  %v1807_v57 = vld [vmem:[%s2825_s1 + $0x234] sm:$0xf]  ;;  %v1877_v54 = vld [vmem:[%s2825_s1 + $0x464] sm:$0xf] }
  0x51   :  { %1041 = vmatpush.bf16.msra.mxu1 %v1200_v5  ;;  %v1769_v5 = vld [vmem:[%s2825_s1 + $0x104] sm:$0xf]  ;;  %v1544_v16 = vor.u32 %v1831_v1, %v1541_v2  ;;  %v1509_v60 = vld [vmem:[%s2825_s1 + $0x2b8] sm:$0xf0] }
  0x52   :  { %1054 = vmatpush.bf16.msra.mxu2 %v1264_v6  ;;  %v1293_v6 = vld [vmem:[%s2825_s1 + $0x108] sm:$0xf0]  ;;  %v1573_v1 = vld [vmem:[%s2825_s1 + $0x338] sm:$0xf0]  ;;  %v1789_v2 = vld [vmem:[%s2825_s1 + $0x1a4] sm:$0xf] }
  0x53   :  { %1067 = vmatpush.bf16.msra.mxu3 %v1328_v17  ;;  %v2543_v17 = vpack.c.b16 %v182_v63, %v182_v63  ;;  %v1448_v63 = vor.u32 %v1807_v57, %v1445_v58  ;;  %v1859_v58 = vld [vmem:[%s2825_s1 + $0x3d4] sm:$0xf] }
  0x54   :  { %1029 = vmatpush.bf16.msra.mxu0 %v1700_v18  ;;  %v1405_v18 = vld [vmem:[%s2825_s1 + $0x1e8] sm:$0xf0] }
  0x55   :  { %1042 = vmatpush.bf16.msra.mxu1 %v1192_v21  ;;  %v1296_v21 = vor.u32 %v1769_v5, %v1293_v6  ;;  %v1408_v25 = vor.u32 %v1797_v15, %v1405_v18  ;;  %v1805_v5 = vld [vmem:[%s2825_s1 + $0x224] sm:$0xf]  ;;  %v1437_v6 = vld [vmem:[%s2825_s1 + $0x228] sm:$0xf0] }
  0x56   :  { %1055 = vmatpush.bf16.msra.mxu2 %v1256_v22  ;;  %v1829_v22 = vld [vmem:[%s2825_s1 + $0x2e4] sm:$0xf]  ;;  %v1440_v15 = vor.u32 %v1805_v5, %v1437_v6  ;;  %v1565_v18 = vld [vmem:[%s2825_s1 + $0x328] sm:$0xf0]  ;;  %v1701_v5 = vld [vmem:[%s2825_s1 + $0x438] sm:$0xf0] }
  0x57   :  { %1068 = vmatpush.bf16.msra.mxu3 %v1320_v29  ;;  %v1795_v29 = vld [vmem:[%s2825_s1 + $0x1d4] sm:$0xf] }
  0x58   :  { %1030 = vmatpush.bf16.msra.mxu0 %v1692_v30  ;;  %v1536_v30 = vor.u32 %v1829_v22, %v1533_v23  ;;  %v1400_v38 = vor.u32 %v1795_v29, %v1397_v31  ;;  %v1803_v22 = vld [vmem:[%s2825_s1 + $0x214] sm:$0xf]  ;;  %v1429_v23 = vld [vmem:[%s2825_s1 + $0x218] sm:$0xf0]  ;;  %v1785_v31 = vld [vmem:[%s2825_s1 + $0x184] sm:$0xf] }
  0x59   :  { %1043 = vmatpush.bf16.msra.mxu1 %v1184_v33  ;;  %v1461_v33 = vld [vmem:[%s2825_s1 + $0x258] sm:$0xf0]  ;;  %v1432_v29 = vor.u32 %v1803_v22, %v1429_v23 }
  0x5a   :  { %1056 = vmatpush.bf16.msra.mxu2 %v1248_v34  ;;  %v1827_v34 = vld [vmem:[%s2825_s1 + $0x2d4] sm:$0xf]  ;;  %v1464_v40 = vor.u32 %v1811_v32, %v1461_v33  ;;  %v1357_v32 = vld [vmem:[%s2825_s1 + $0x188] sm:$0xf0]  ;;  %v1685_v22 = vld [vmem:[%s2825_s1 + $0x418] sm:$0xf0] }
  0x5b   :  { %1069 = vmatpush.bf16.msra.mxu3 %v1312_v44  ;;  %v1528_v44 = vor.u32 %v1827_v34, %v1525_v35  ;;  %v1801_v34 = vld [vmem:[%s2825_s1 + $0x204] sm:$0xf]  ;;  %v1421_v35 = vld [vmem:[%s2825_s1 + $0x208] sm:$0xf0] }
  0x5c   :  { %1031 = vmatpush.bf16.msra.mxu0 %v1684_v46  ;;  %v1453_v46 = vld [vmem:[%s2825_s1 + $0x248] sm:$0xf0] }
  0x5d   :  { %1044 = vmatpush.bf16.msra.mxu1 %v1176_v51 }
  0x5e   :  { %1057 = vmatpush.bf16.msra.mxu2 %v1240_v52  ;;  %v1456_v52 = vor.u32 %v1809_v45, %v1453_v46  ;;  %v1424_v45 = vor.u32 %v1801_v34, %v1421_v35  ;;  %v1833_v46 = vld [vmem:[%s2825_s1 + $0x304] sm:$0xf] }
  0x5f   :  { %1070 = vmatpush.bf16.msra.mxu3 %v1304_v59  ;;  %v1823_v59 = vld [vmem:[%s2825_s1 + $0x2b4] sm:$0xf] }
  0x60   :  { %1032 = vmatpush.bf16.msra.mxu0 %v1676_v0  ;;  %v1839_v0 = vld [vmem:[%s2825_s1 + $0x334] sm:$0xf] }
  0x61   :  { %1045 = vmatpush.bf16.msra.mxu1 %v1168_v3  ;;  %v1512_v3 = vor.u32 %v1823_v59, %v1509_v60  ;;  %v1576_v13 = vor.u32 %v1839_v0, %v1573_v1  ;;  %v1653_v59 = vld [vmem:[%s2825_s1 + $0x3d8] sm:$0xf0]  ;;  %v1875_v60 = vld [vmem:[%s2825_s1 + $0x454] sm:$0xf]  ;;  %v1645_v0 = vld [vmem:[%s2825_s1 + $0x3c8] sm:$0xf0] }
  0x62   :  { %1058 = vmatpush.bf16.msra.mxu2 %v1232_v4  ;;  %v1373_v4 = vld [vmem:[%s2825_s1 + $0x1a8] sm:$0xf0] }
  0x63   :  { %1033 = vmatmul.bf16.vlgmr.msra.gmra.mxu0 %v2543_v17  ;;  %1071 = vmatpush.bf16.msra.mxu3 %v1296_v21  ;;  %v1376_v14 = vor.u32 %v1789_v2, %v1373_v4  ;;  %v1365_v21 = vld [vmem:[%s2825_s1 + $0x198] sm:$0xf0]  ;;  %v1855_v2 = vld [vmem:[%s2825_s1 + $0x3b4] sm:$0xf] }
  0x64   :  { %1077 = vmatpush.bf16.msrb.mxu0 %v1416_v9  ;;  %1046 = vmatmul.bf16.vlgmr.msra.gmra.mxu1 %v2178_v11  ;;  %v1389_v11 = vld [vmem:[%s2825_s1 + $0x1c8] sm:$0xf0]  ;;  %v1821_v9 = vld [vmem:[%s2825_s1 + $0x2a4] sm:$0xf]  ;;  %v1368_v28 = vor.u32 %v1787_v19, %v1365_v21  ;;  %v1871_v4 = vld [vmem:[%s2825_s1 + $0x434] sm:$0xf] }
  0x65   :  { %1090 = vmatpush.bf16.msrb.mxu1 %v1480_v10  ;;  %1059 = vmatmul.bf16.vlgmr.msra.gmra.mxu2 %v2180_v12  ;;  %v1793_v12 = vld [vmem:[%s2825_s1 + $0x1c4] sm:$0xf]  ;;  %v1501_v10 = vld [vmem:[%s2825_s1 + $0x2a8] sm:$0xf0]  ;;  %v1851_v19 = vld [vmem:[%s2825_s1 + $0x394] sm:$0xf] }
  0x66   :  { %1103 = vmatpush.bf16.msrb.mxu2 %v1544_v16  ;;  %1072 = vmatmul.bf16.vlgmr.msra.gmra.mxu3 %v2171_v7  ;;  %v1392_v51 = vor.u32 %v1793_v12, %v1389_v11  ;;  %v1581_v7 = vld [vmem:[%s2825_s1 + $0x348] sm:$0xf0]  ;;  %v1837_v16 = vld [vmem:[%s2825_s1 + $0x324] sm:$0xf]  ;;  %v1504_v20 = vor.u32 %v1821_v9, %v1501_v10  ;;  %v1879_v12 = vld [vmem:[%s2825_s1 + $0x474] sm:$0xf]  ;;  %v1360_v11 = vor.u32 %v1785_v31, %v1357_v32 }
  0x67   :  { %1116 = vmatpush.bf16.msrb.mxu3 %v1608_v24  ;;  %v1584_v61 = vor.u32 %v1841_v53, %v1581_v7  ;;  %v1819_v24 = vld [vmem:[%s2825_s1 + $0x294] sm:$0xf]  ;;  %v1661_v53 = vld [vmem:[%s2825_s1 + $0x3e8] sm:$0xf0]  ;;  %v1552_v7 = vor.u32 %v1833_v46, %v1549_v47  ;;  %v1704_v9 = vor.u32 %v1871_v4, %v1701_v5  ;;  %v1853_v10 = vld [vmem:[%s2825_s1 + $0x3a4] sm:$0xf] }
  0x68   :  { %1078 = vmatpush.bf16.msrb.mxu0 %v1408_v25  ;;  %v1493_v25 = vld [vmem:[%s2825_s1 + $0x298] sm:$0xf0]  ;;  %v1867_v21 = vld [vmem:[%s2825_s1 + $0x414] sm:$0xf] }
  0x69   :  { %1091 = vmatpush.bf16.msrb.mxu1 %v1472_v26  ;;  %v1568_v26 = vor.u32 %v1837_v16, %v1565_v18  ;;  %v1496_v33 = vor.u32 %v1819_v24, %v1493_v25  ;;  %v1688_v24 = vor.u32 %v1867_v21, %v1685_v22  ;;  %v1849_v25 = vld [vmem:[%s2825_s1 + $0x384] sm:$0xf] }
  0x6a   :  { %1104 = vmatpush.bf16.msrb.mxu2 %v1536_v30  ;;  %v1557_v30 = vld [vmem:[%s2825_s1 + $0x318] sm:$0xf0] }
  0x6b   :  { %1117 = vmatpush.bf16.msrb.mxu3 %v1600_v37  ;;  %v1817_v37 = vld [vmem:[%s2825_s1 + $0x284] sm:$0xf]  ;;  %v1560_v42 = vor.u32 %v1835_v27, %v1557_v30 }
  0x6c   :  { %1079 = vmatpush.bf16.msrb.mxu0 %v1400_v38  ;;  %v1485_v38 = vld [vmem:[%s2825_s1 + $0x288] sm:$0xf0]  ;;  %v1865_v27 = vld [vmem:[%s2825_s1 + $0x404] sm:$0xf] }
  0x6d   :  { %1092 = vmatpush.bf16.msrb.mxu1 %v1464_v40  ;;  %v1863_v40 = vld [vmem:[%s2825_s1 + $0x3f4] sm:$0xf]  ;;  %v1488_v48 = vor.u32 %v1817_v37, %v1485_v38 }
  0x6e   :  { %1105 = vmatpush.bf16.msrb.mxu2 %v1528_v44  ;;  %v1733_v44 = vld [vmem:[%s2825_s1 + $0x478] sm:$0xf0] }
  0x6f   :  { %1118 = vmatpush.bf16.msrb.mxu3 %v1592_v50  ;;  %v1672_v50 = vor.u32 %v1863_v40, %v1669_v41  ;;  %v163_v41 = vld [vmem:[%s2827_s2] sm:$0x3] }
  0x70   :  { %1080 = vmatpush.bf16.msrb.mxu0 %v1392_v51  ;;  %v1736_v51 = vor.u32 %v1879_v12, %v1733_v44 }
  0x71   :  { %1093 = vmatpush.bf16.msrb.mxu1 %v1456_v52  ;;  %v1861_v52 = vld [vmem:[%s2825_s1 + $0x3e4] sm:$0xf] }
  0x72   :  { %1106 = vmatpush.bf16.msrb.mxu2 %v1520_v55  ;;  %v1725_v55 = vld [vmem:[%s2825_s1 + $0x468] sm:$0xf0]  ;;  %v1664_v56 = vor.u32 %v1861_v52, %v1661_v53 }
  0x73   :  { %1119 = vmatpush.bf16.msrb.mxu3 %v1584_v61  ;;  %v1728_v57 = vor.u32 %v1877_v54, %v1725_v55  ;;  %v1717_v61 = vld [vmem:[%s2825_s1 + $0x458] sm:$0xf0] }
  0x74   :  { %1081 = vmatpush.bf16.msrb.mxu0 %v1384_v62  ;;  %v1656_v62 = vor.u32 %v1859_v58, %v1653_v59 }
  0x75   :  { %1094 = vmatpush.bf16.msrb.mxu1 %v1448_v63  ;;  %v1720_v63 = vor.u32 %v1875_v60, %v1717_v61 }
  0x76   :  { %1107 = vmatpush.bf16.msrb.mxu2 %v1512_v3  ;;  %v1637_v3 = vld [vmem:[%s2825_s1 + $0x3b8] sm:$0xf0] }
  0x77   :  { %1120 = vmatpush.bf16.msrb.mxu3 %v1576_v13  ;;  %v1640_v6 = vor.u32 %v1855_v2, %v1637_v3  ;;  %v1629_v13 = vld [vmem:[%s2825_s1 + $0x3a8] sm:$0xf0] }
  0x78   :  { %1082 = vmatpush.bf16.msrb.mxu0 %v1376_v14  ;;  %v1869_v14 = vld [vmem:[%s2825_s1 + $0x424] sm:$0xf]  ;;  %v1632_v16 = vor.u32 %v1853_v10, %v1629_v13 }
  0x79   :  { %1095 = vmatpush.bf16.msrb.mxu1 %v1440_v15  ;;  %v1693_v15 = vld [vmem:[%s2825_s1 + $0x428] sm:$0xf0] }
  0x7a   :  { %1108 = vmatpush.bf16.msrb.mxu2 %v1504_v20  ;;  %v1696_v18 = vor.u32 %v1869_v14, %v1693_v15  ;;  %v1621_v20 = vld [vmem:[%s2825_s1 + $0x398] sm:$0xf0] }
  0x7b   :  { %1121 = vmatpush.bf16.msrb.mxu3 %v1568_v26  ;;  %v1624_v23 = vor.u32 %v1851_v19, %v1621_v20  ;;  %v1613_v26 = vld [vmem:[%s2825_s1 + $0x388] sm:$0xf0] }
  0x7c   :  { %1083 = vmatpush.bf16.msrb.mxu0 %v1368_v28  ;;  %v1677_v28 = vld [vmem:[%s2825_s1 + $0x408] sm:$0xf0] }
  0x7d   :  { %1096 = vmatpush.bf16.msrb.mxu1 %v1432_v29  ;;  %v1616_v29 = vor.u32 %v1849_v25, %v1613_v26  ;;  %v1680_v30 = vor.u32 %v1865_v27, %v1677_v28 }
  0x7e   :  { %1109 = vmatpush.bf16.msrb.mxu2 %v1496_v33 }
  0x7f   :  { %1122 = vmatpush.bf16.msrb.mxu3 %v1560_v42  ;;  %v165_v42 = vperm.slane %v163_v41, 0 }
  0x80   :  { %1084 = vmatpush.bf16.msrb.mxu0 %v1360_v11 }
  0x81   :  { %1097 = vmatpush.bf16.msrb.mxu1 %v1424_v45 }
  0x82   :  { %1110 = vmatpush.bf16.msrb.mxu2 %v1488_v48 }
  0x83   :  { %1123 = vmatpush.bf16.msrb.mxu3 %v1552_v7  ;;  %1085 = vmatmul.bf16.vlgmr.msrb.gmra.mxu0 %v2173_v8  ;;  %v1857_v8 = vld [vmem:[%s2825_s1 + $0x3c4] sm:$0xf] }
  0x84   :  { %1129 = vmatpush.bf16.msra.mxu0 %v1672_v50  ;;  %1098 = vmatmul.bf16.vlgmr.msrb.gmra.mxu1 %v2351_v36  ;;  %v1709_v36 = vld [vmem:[%s2825_s1 + $0x448] sm:$0xf0]  ;;  %v1648_v1 = vor.u32 %v1857_v8, %v1645_v0  ;;  %v166_v0 = vperm.slane %v163_v41, 1 }
  0x85   :  { %1142 = vmatpush.bf16.msra.mxu1 %v1736_v51  ;;  %1111 = vmatmul.bf16.vlgmr.msrb.gmra.mxu2 %v2361_v43  ;;  %v1873_v43 = vld [vmem:[%s2825_s1 + $0x444] sm:$0xf] }
  0x86   :  { %1124 = vmatmul.bf16.vlgmr.msrb.gmra.mxu3 %v2353_v39  ;;  %v1712_v39 = vor.u32 %v1873_v43, %v1709_v36 }
  0x88   :  { %1130 = vmatpush.bf16.msra.mxu0 %v1664_v56 }
  0x89   :  { %1143 = vmatpush.bf16.msra.mxu1 %v1728_v57 }
  0x8c   :  { %1131 = vmatpush.bf16.msra.mxu0 %v1656_v62 }
  0x8d   :  { %1144 = vmatpush.bf16.msra.mxu1 %v1720_v63 }
  0x90   :  { %1132 = vmatpush.bf16.msra.mxu0 %v1648_v1 }
  0x91   :  { %1145 = vmatpush.bf16.msra.mxu1 %v1712_v39 }
  0x94   :  { %1133 = vmatpush.bf16.msra.mxu0 %v1640_v6 }
  0x95   :  { %1146 = vmatpush.bf16.msra.mxu1 %v1704_v9 }
  0x98   :  { %1134 = vmatpush.bf16.msra.mxu0 %v1632_v16 }
  0x99   :  { %1147 = vmatpush.bf16.msra.mxu1 %v1696_v18 }
  0x9c   :  { %1135 = vmatpush.bf16.msra.mxu0 %v1624_v23 }
  0x9d   :  { %1148 = vmatpush.bf16.msra.mxu1 %v1688_v24 }
  0xa0   :  { %1136 = vmatpush.bf16.msra.mxu0 %v1616_v29  ;;  %v930_v31 = vpop.f32.mrf.mxu0 }
  0xa1   :  { %1149 = vmatpush.bf16.msra.mxu1 %v1680_v30  ;;  %v943_v32 = vpop.f32.mrf.mxu1  ;;  %v931_v12 = vadd.f32 %v930_v31, %v165_v42 }
  0xa3   :  { %1137 = vmatmul.bf16.vlgmr.msra.gmra.mxu0 %v2373_v49  ;;  %v944_v45 = vadd.f32 %v943_v32, %v931_v12 }
  0xa4   :  { %1150 = vmatmul.bf16.vlgmr.msra.gmra.mxu1 %v2543_v17 }
  0xa8   :  { %v956_v34 = vpop.f32.mrf.mxu2  ;;  %v932_v35 = vpop.f32.mrf.mxu0 }
  0xa9   :  { %v969_v33 = vpop.f32.mrf.mxu3  ;;  %v945_v37 = vpop.f32.mrf.mxu1  ;;  %v957_v46 = vadd.f32 %v956_v34, %v944_v45 }
  0xab   :  { %v970_v50 = vadd.f32 %v969_v33, %v957_v46 }
  0xb0   :  { %v958_v40 = vpop.f32.mrf.mxu2 }
  0xb1   :  { %v971_v38 = vpop.f32.mrf.mxu3 }
  0xc0   :  { %v982_v44 = vpop.f32.mrf.mxu0 }
  0xc1   :  { %v995_v11 = vpop.f32.mrf.mxu1  ;;  %v983_v52 = vadd.f32 %v982_v44, %v970_v50 }
  0xc3   :  { %v996_v7 = vadd.f32 %v995_v11, %v983_v52 }
  0xc8   :  { %v1008_v49 = vpop.f32.mrf.mxu2  ;;  %v984_v17 = vpop.f32.mrf.mxu0 }
  0xc9   :  { %v1021_v47 = vpop.f32.mrf.mxu3  ;;  %v997_v48 = vpop.f32.mrf.mxu1  ;;  %v1009_v54 = vadd.f32 %v1008_v49, %v996_v7 }
  0xcb   :  { %v1022_v55 = vadd.f32 %v1021_v47, %v1009_v54 }
  0xd0   :  { %v1010_v51 = vpop.f32.mrf.mxu2 }
  0xd1   :  { %v1023_v53 = vpop.f32.mrf.mxu3 }
  0xe0   :  { %v1034_v56 = vpop.f32.mrf.mxu0 }
  0xe1   :  { %v1035_v57 = vadd.f32 %v1034_v56, %v1022_v55  ;;  %v1047_v58 = vpop.f32.mrf.mxu1 }
  0xe2   :  { %v1048_v1 = vadd.f32 %v1047_v58, %v166_v0 }
  0xe3   :  { %1155 = vst [vmem:[%s2828_s3] sm:$0xff] %v1035_v57 }
  0xe8   :  { %v1060_v59 = vpop.f32.mrf.mxu2  ;;  %v1036_v60 = vpop.f32.mrf.mxu0 }
  0xe9   :  { %v1073_v61 = vpop.f32.mrf.mxu3  ;;  %v1049_v62 = vpop.f32.mrf.mxu1  ;;  %v1061_v2 = vadd.f32 %v1060_v59, %v1048_v1 }
  0xeb   :  { %v1074_v6 = vadd.f32 %v1073_v61, %v1061_v2 }
  0xf0   :  { %v1062_v63 = vpop.f32.mrf.mxu2 }
  0xf1   :  { %v1075_v8 = vpop.f32.mrf.mxu3 }
 0x100   :  { %v1086_v43 = vpop.f32.mrf.mxu0 }
 0x101   :  { %v1099_v36 = vpop.f32.mrf.mxu1  ;;  %v1087_v10 = vadd.f32 %v1086_v43, %v1074_v6 }
 0x103   :  { %v1100_v14 = vadd.f32 %v1099_v36, %v1087_v10 }
 0x108   :  { %v1112_v39 = vpop.f32.mrf.mxu2  ;;  %v1088_v3 = vpop.f32.mrf.mxu0 }
 0x109   :  { %v1125_v4 = vpop.f32.mrf.mxu3  ;;  %v1101_v5 = vpop.f32.mrf.mxu1  ;;  %v1113_v15 = vadd.f32 %v1112_v39, %v1100_v14 }
 0x10b   :  { %v1126_v16 = vadd.f32 %v1125_v4, %v1113_v15 }
 0x110   :  { %v1114_v9 = vpop.f32.mrf.mxu2 }
 0x111   :  { %v1127_v13 = vpop.f32.mrf.mxu3 }
 0x120   :  { %v1138_v18 = vpop.f32.mrf.mxu0 }
 0x121   :  { %v1139_v19 = vadd.f32 %v1138_v18, %v1126_v16  ;;  %v1151_v20 = vpop.f32.mrf.mxu1 }
 0x123   :  { %v1152_v21 = vadd.f32 %v1151_v20, %v1139_v19 }
 0x125   :  { %1156 = vst [vmem:[%s2828_s3 + $0x8] sm:$0xff] %v1152_v21 }
 0x128   :  { %v1140_v22 = vpop.f32.mrf.mxu0 }
 0x129   :  { %v1153_v23 = vpop.f32.mrf.mxu1 }

// kernel: efficient_lite_seg.40
= control target key start
LH: loop header
LB: loop body
LE: loop exit
PB: predicated region body
PF: predicated region fallthrough
CT: control target
= control target key end

     0   :  { %vm537_vm0 = vcmask 785408   ;;  %vm681_vm1 = vcmask 523264   ;;  %s1326_s1 = inlined_call_operand.vmem [shape: bf16[864,64], index: 1, kind: input, shape index: {}]   ;;  %s1327_s2 = inlined_call_operand.vmem [shape: f32[1,64], index: 2, kind: input, shape index: {}]   ;;  %s1328_s0 = inlined_call_operand.vmem [shape: bf16[32,864], index: 0, kind: input, shape index: {}]   ;;  %s1329_s3 = inlined_call_operand.vmem [shape: f32[32,64], index: 3, kind: output, shape index: {}]  }
   0x1   :  { %v985_v0 = vld [vmem:[%s1326_s1 + $0x38] sm:$0xff]  ;;  %v984_v4 = vld [vmem:[%s1326_s1 + $0x30] sm:$0xff]  ;;  %v983_v8 = vld [vmem:[%s1326_s1 + $0x28] sm:$0xff] }
   0x2   :  { %v993_v1 = vld [vmem:[%s1326_s1 + $0x78] sm:$0xff]  ;;  %544 = vmatpush.bf16.msra.mxu0 %v985_v0  ;;  %v992_v5 = vld [vmem:[%s1326_s1 + $0x70] sm:$0xff]  ;;  %v991_v9 = vld [vmem:[%s1326_s1 + $0x68] sm:$0xff] }
   0x3   :  { %v1001_v2 = vld [vmem:[%s1326_s1 + $0xb8] sm:$0xff]  ;;  %563 = vmatpush.bf16.msra.mxu1 %v993_v1  ;;  %v1000_v6 = vld [vmem:[%s1326_s1 + $0xb0] sm:$0xff]  ;;  %v999_v10 = vld [vmem:[%s1326_s1 + $0xa8] sm:$0xff] }
   0x4   :  { %v1009_v3 = vld [vmem:[%s1326_s1 + $0xf8] sm:$0xff]  ;;  %582 = vmatpush.bf16.msra.mxu2 %v1001_v2  ;;  %v1008_v7 = vld [vmem:[%s1326_s1 + $0xf0] sm:$0xff]  ;;  %v1007_v11 = vld [vmem:[%s1326_s1 + $0xe8] sm:$0xff] }
   0x5   :  { %601 = vmatpush.bf16.msra.mxu3 %v1009_v3  ;;  %v982_v12 = vld [vmem:[%s1326_s1 + $0x20] sm:$0xff]  ;;  %v981_v16 = vld [vmem:[%s1326_s1 + $0x18] sm:$0xff]  ;;  %v980_v20 = vld [vmem:[%s1326_s1 + $0x10] sm:$0xff] }
   0x6   :  { %545 = vmatpush.bf16.msra.mxu0 %v984_v4  ;;  %v990_v13 = vld [vmem:[%s1326_s1 + $0x60] sm:$0xff]  ;;  %v989_v17 = vld [vmem:[%s1326_s1 + $0x58] sm:$0xff]  ;;  %v988_v21 = vld [vmem:[%s1326_s1 + $0x50] sm:$0xff] }
   0x7   :  { %564 = vmatpush.bf16.msra.mxu1 %v992_v5  ;;  %v998_v14 = vld [vmem:[%s1326_s1 + $0xa0] sm:$0xff]  ;;  %v997_v18 = vld [vmem:[%s1326_s1 + $0x98] sm:$0xff]  ;;  %v996_v22 = vld [vmem:[%s1326_s1 + $0x90] sm:$0xff] }
   0x8   :  { %583 = vmatpush.bf16.msra.mxu2 %v1000_v6  ;;  %v1006_v15 = vld [vmem:[%s1326_s1 + $0xe0] sm:$0xff]  ;;  %v1005_v19 = vld [vmem:[%s1326_s1 + $0xd8] sm:$0xff]  ;;  %v1004_v23 = vld [vmem:[%s1326_s1 + $0xd0] sm:$0xff] }
   0x9   :  { %602 = vmatpush.bf16.msra.mxu3 %v1008_v7  ;;  %v979_v24 = vld [vmem:[%s1326_s1 + $0x8] sm:$0xff]  ;;  %v978_v28 = vld [vmem:[%s1326_s1] sm:$0xff]  ;;  %v967_v33 = vld [vmem:[%s1328_s0 + $0x18] sm:$0xf0] }
   0xa   :  { %546 = vmatpush.bf16.msra.mxu0 %v983_v8  ;;  %v987_v25 = vld [vmem:[%s1326_s1 + $0x48] sm:$0xff]  ;;  %v986_v29 = vld [vmem:[%s1326_s1 + $0x40] sm:$0xff]  ;;  %v1017_v41 = vld [vmem:[%s1326_s1 + $0x138] sm:$0xff] }
   0xb   :  { %565 = vmatpush.bf16.msra.mxu1 %v991_v9  ;;  %v995_v26 = vld [vmem:[%s1326_s1 + $0x88] sm:$0xff]  ;;  %v994_v30 = vld [vmem:[%s1326_s1 + $0x80] sm:$0xff]  ;;  %v1025_v46 = vld [vmem:[%s1326_s1 + $0x178] sm:$0xff] }
   0xc   :  { %584 = vmatpush.bf16.msra.mxu2 %v999_v10  ;;  %v1003_v27 = vld [vmem:[%s1326_s1 + $0xc8] sm:$0xff]  ;;  %v1002_v31 = vld [vmem:[%s1326_s1 + $0xc0] sm:$0xff]  ;;  %v1016_v47 = vld [vmem:[%s1326_s1 + $0x130] sm:$0xff] }
   0xd   :  { %603 = vmatpush.bf16.msra.mxu3 %v1007_v11  ;;  %v692_v32 = vld [vmem:[%s1328_s0] sm:$0xf]  ;;  %v964_v34 = vld [vmem:[%s1328_s0 + $0x4] sm:$0xf]  ;;  %v700_v36 = vld [vmem:[%s1328_s0 + $0x8] sm:$0xf] }
   0xe   :  { %547 = vmatpush.bf16.msra.mxu0 %v982_v12  ;;  %v694_v35 = vld [vmem:[%s1328_s0 + $0x1c] sm:$0xf0]  ;;  %v968_v37 = vld [vmem:[%s1328_s0 + $0x20] sm:$0xf0]  ;;  %v965_v38 = vld [vmem:[%s1328_s0 + $0xc] sm:$0xf]  ;;  %v693_v42 = vor.u32 %v967_v33, %v692_v32 }
   0xf   :  { %566 = vmatpush.bf16.msra.mxu1 %v990_v13  ;;  %v702_v39 = vld [vmem:[%s1328_s0 + $0x24] sm:$0xf0]  ;;  %v697_v43 = vor.u32 %v964_v34, %v694_v35  ;;  %v701_v44 = vor.u32 %v968_v37, %v700_v36  ;;  %v1030_v48 = vld [vmem:[%s1326_s1 + $0x1a0] sm:$0xff]  ;;  %v1024_v49 = vld [vmem:[%s1326_s1 + $0x170] sm:$0xff] }
  0x10   :  { %585 = vmatpush.bf16.msra.mxu2 %v998_v14  ;;  %v1031_v40 = vld [vmem:[%s1326_s1 + $0x1a8] sm:$0xff]  ;;  %v705_v45 = vor.u32 %v965_v38, %v702_v39  ;;  %v1029_v51 = vld [vmem:[%s1326_s1 + $0x198] sm:$0xff]  ;;  %v1014_v53 = vld [vmem:[%s1326_s1 + $0x120] sm:$0xff] }
  0x11   :  { %604 = vmatpush.bf16.msra.mxu3 %v1006_v15  ;;  %v1015_v50 = vld [vmem:[%s1326_s1 + $0x128] sm:$0xff]  ;;  %v1028_v54 = vld [vmem:[%s1326_s1 + $0x190] sm:$0xff]  ;;  %v1022_v55 = vld [vmem:[%s1326_s1 + $0x160] sm:$0xff] }
  0x12   :  { %548 = vmatpush.bf16.msra.mxu0 %v981_v16  ;;  %v1023_v52 = vld [vmem:[%s1326_s1 + $0x168] sm:$0xff]  ;;  %v720_v56 = vld [vmem:[%s1328_s0 + $0x38] sm:$0xf]  ;;  %v974_v57 = vld [vmem:[%s1328_s0 + $0x50] sm:$0xf0] }
  0x13   :  { %567 = vmatpush.bf16.msra.mxu1 %v989_v17  ;;  %v971_v58 = vld [vmem:[%s1328_s0 + $0x3c] sm:$0xf]  ;;  %v722_v59 = vld [vmem:[%s1328_s0 + $0x54] sm:$0xf0]  ;;  %v728_v60 = vld [vmem:[%s1328_s0 + $0x40] sm:$0xf]  ;;  %v721_v2 = vor.u32 %v974_v57, %v720_v56 }
  0x14   :  { %586 = vmatpush.bf16.msra.mxu2 %v997_v18  ;;  %v975_v61 = vld [vmem:[%s1328_s0 + $0x58] sm:$0xf0]  ;;  %v972_v62 = vld [vmem:[%s1328_s0 + $0x44] sm:$0xf]  ;;  %v730_v63 = vld [vmem:[%s1328_s0 + $0x5c] sm:$0xf0]  ;;  %v725_v3 = vor.u32 %v971_v58, %v722_v59 }
  0x15   :  { %605 = vmatpush.bf16.msra.mxu3 %v1005_v19  ;;  %v1013_v0 = vld [vmem:[%s1326_s1 + $0x118] sm:$0xff]  ;;  %v1027_v1 = vld [vmem:[%s1326_s1 + $0x188] sm:$0xff]  ;;  %v729_v4 = vor.u32 %v975_v61, %v728_v60  ;;  %v733_v5 = vor.u32 %v972_v62, %v730_v63  ;;  %v1012_v7 = vld [vmem:[%s1326_s1 + $0x110] sm:$0xff] }
  0x16   :  { %549 = vmatpush.bf16.msra.mxu0 %v980_v20  ;;  %v1021_v6 = vld [vmem:[%s1326_s1 + $0x158] sm:$0xff]  ;;  %v1026_v8 = vld [vmem:[%s1326_s1 + $0x180] sm:$0xff]  ;;  %v1020_v9 = vld [vmem:[%s1326_s1 + $0x150] sm:$0xff] }
  0x17   :  { %568 = vmatpush.bf16.msra.mxu1 %v988_v21  ;;  %v1011_v10 = vld [vmem:[%s1326_s1 + $0x108] sm:$0xff]  ;;  %v1010_v12 = vld [vmem:[%s1326_s1 + $0x100] sm:$0xff]  ;;  %v708_v14 = vld [vmem:[%s1328_s0 + $0x10] sm:$0xf] }
  0x18   :  { %587 = vmatpush.bf16.msra.mxu2 %v996_v22  ;;  %v1019_v11 = vld [vmem:[%s1326_s1 + $0x148] sm:$0xff]  ;;  %v1018_v13 = vld [vmem:[%s1326_s1 + $0x140] sm:$0xff]  ;;  %v966_v18 = vld [vmem:[%s1328_s0 + $0x14] sm:$0xf] }
  0x19   :  { %606 = vmatpush.bf16.msra.mxu3 %v1004_v23  ;;  %v969_v15 = vld [vmem:[%s1328_s0 + $0x28] sm:$0xf0]  ;;  %v736_v16 = vld [vmem:[%s1328_s0 + $0x48] sm:$0xf]  ;;  %v976_v17 = vld [vmem:[%s1328_s0 + $0x60] sm:$0xf0] }
  0x1a   :  { %550 = vmatpush.bf16.msra.mxu0 %v979_v24  ;;  %v710_v19 = vld [vmem:[%s1328_s0 + $0x2c] sm:$0xf0]  ;;  %v716_v20 = vld [vmem:[%s1328_s0 + $0x18] sm:$0xf]  ;;  %v970_v21 = vld [vmem:[%s1328_s0 + $0x30] sm:$0xf0]  ;;  %v709_v22 = vor.u32 %v969_v15, %v708_v14  ;;  %v737_v23 = vor.u32 %v976_v17, %v736_v16 }
  0x1b   :  { %569 = vmatpush.bf16.msra.mxu1 %v987_v25  ;;  %v713_v24 = vor.u32 %v966_v18, %v710_v19  ;;  %v717_v25 = vor.u32 %v970_v21, %v716_v20 }
  0x1c   :  { %588 = vmatpush.bf16.msra.mxu2 %v995_v26  ;;  %v973_v26 = vld [vmem:[%s1328_s0 + $0x4c] sm:$0xf] }
  0x1d   :  { %607 = vmatpush.bf16.msra.mxu3 %v1003_v27  ;;  %v738_v27 = vld [vmem:[%s1328_s0 + $0x64] sm:$0xf0] }
  0x1e   :  { %551 = vmatpush.bf16.msra.mxu0 %v978_v28  ;;  %v744_v28 = vld [vmem:[%s1328_s0 + $0x50] sm:$0xf] }
  0x1f   :  { %570 = vmatpush.bf16.msra.mxu1 %v986_v29  ;;  %v977_v29 = vld [vmem:[%s1328_s0 + $0x68] sm:$0xf0] }
  0x20   :  { %589 = vmatpush.bf16.msra.mxu2 %v994_v30  ;;  %v741_v30 = vor.u32 %v973_v26, %v738_v27 }
  0x21   :  { %608 = vmatpush.bf16.msra.mxu3 %v1002_v31  ;;  %552 = vmatmul.bf16.vlgmr.msra.gmra.mxu0 %v693_v42  ;;  %v745_v31 = vor.u32 %v977_v29, %v744_v28 }
  0x22   :  { %620 = vmatpush.bf16.msrb.mxu0 %v1017_v41  ;;  %571 = vmatmul.bf16.vlgmr.msra.gmra.mxu1 %v697_v43 }
  0x23   :  { %590 = vmatmul.bf16.vlgmr.msra.gmra.mxu2 %v701_v44  ;;  %639 = vmatpush.bf16.msrb.mxu1 %v1025_v46 }
  0x24   :  { %660 = vmatpush.bf16.msrb.mxu2 %v1031_v40  ;;  %609 = vmatmul.bf16.vlgmr.msra.gmra.mxu3 %v705_v45 }
  0x25   :  { %1032 = vmatpush.bf16.msrb.mxu3 %v1017_v41  ;;  %v1040_v41 = vld [vmem:[%s1327_s2] ss:$0 sm:$0xff] }
  0x26   :  { %621 = vmatpush.bf16.msrb.mxu0 %v1016_v47 }
  0x27   :  { %640 = vmatpush.bf16.msrb.mxu1 %v1024_v49 }
  0x28   :  { %661 = vmatpush.bf16.msrb.mxu2 %v1030_v48 }
  0x29   :  { %1033 = vmatpush.bf16.msrb.mxu3 %v1016_v47 }
  0x2a   :  { %622 = vmatpush.bf16.msrb.mxu0 %v1015_v50 }
  0x2b   :  { %641 = vmatpush.bf16.msrb.mxu1 %v1023_v52 }
  0x2c   :  { %662 = vmatpush.bf16.msrb.mxu2 %v1029_v51 }
  0x2d   :  { %1034 = vmatpush.bf16.msrb.mxu3 %v1015_v50 }
  0x2e   :  { %623 = vmatpush.bf16.msrb.mxu0 %v1014_v53 }
  0x2f   :  { %642 = vmatpush.bf16.msrb.mxu1 %v1022_v55 }
  0x30   :  { %663 = vmatpush.bf16.msrb.mxu2 %v1028_v54 }
  0x31   :  { %1035 = vmatpush.bf16.msrb.mxu3 %v1014_v53  ;;  %557 = vmatmul.bf16.gmra.mxu0 %v721_v2 }
  0x32   :  { %624 = vmatpush.bf16.msrb.mxu0 %v1013_v0  ;;  %576 = vmatmul.bf16.gmra.mxu1 %v725_v3 }
  0x33   :  { %595 = vmatmul.bf16.gmra.mxu2 %v729_v4  ;;  %643 = vmatpush.bf16.msrb.mxu1 %v1021_v6 }
  0x34   :  { %664 = vmatpush.bf16.msrb.mxu2 %v1027_v1  ;;  %614 = vmatmul.bf16.gmra.mxu3 %v733_v5 }
  0x35   :  { %1036 = vmatpush.bf16.msrb.mxu3 %v1013_v0 }
  0x36   :  { %625 = vmatpush.bf16.msrb.mxu0 %v1012_v7 }
  0x37   :  { %644 = vmatpush.bf16.msrb.mxu1 %v1020_v9 }
  0x38   :  { %665 = vmatpush.bf16.msrb.mxu2 %v1026_v8 }
  0x39   :  { %1037 = vmatpush.bf16.msrb.mxu3 %v1012_v7 }
  0x3a   :  { %626 = vmatpush.bf16.msrb.mxu0 %v1011_v10 }
  0x3b   :  { %645 = vmatpush.bf16.msrb.mxu1 %v1019_v11 }
  0x3d   :  { %1038 = vmatpush.bf16.msrb.mxu3 %v1011_v10 }
  0x3e   :  { %627 = vmatpush.bf16.msrb.mxu0 %v1010_v12 }
  0x3f   :  { %646 = vmatpush.bf16.msrb.mxu1 %v1018_v13 }
  0x41   :  { %1039 = vmatpush.bf16.msrb.mxu3 %v1010_v12  ;;  %628 = vmatmul.bf16.vlgmr.msrb.gmra.mxu0 %v709_v22 }
  0x42   :  { %647 = vmatmul.bf16.vlgmr.msrb.gmra.mxu1 %v713_v24 }
  0x43   :  { %962 = vmatmul.msk.bf16.vlgmr.msrb.gmra.mxu2 %vm537_vm0, %v717_v25 }
  0x44   :  { %633 = vmatmul.bf16.vlgmr.msrb.gmra.mxu3 %v737_v23 }
  0x52   :  { %652 = vmatmul.bf16.gmra.mxu1 %v741_v30 }
  0x53   :  { %963 = vmatmul.msk.bf16.gmra.mxu2 %vm537_vm0, %v745_v31 }
  0x9e   :  { %v553_v32 = vpop.f32.mrf.mxu0 }
  0x9f   :  { %v572_v33 = vpop.f32.mrf.mxu1  ;;  %v554_v43 = vadd.f32 %v1040_v41, %v553_v32 }
  0xa1   :  { %v573_v47 = vadd.f32 %v572_v33, %v554_v43 }
  0xa6   :  { %v591_v34 = vpop.f32.mrf.mxu2  ;;  %v555_v36 = vpop.f32.mrf.mxu0 }
  0xa7   :  { %v610_v35 = vpop.f32.mrf.mxu3  ;;  %v574_v37 = vpop.f32.mrf.mxu1  ;;  %v592_v49 = vadd.f32 %v591_v34, %v573_v47  ;;  %v556_v50 = vadd.f32 %v1040_v41, %v555_v36 }
  0xa9   :  { %v611_v53 = vadd.f32 %v610_v35, %v592_v49  ;;  %v575_v55 = vadd.f32 %v574_v37, %v556_v50 }
  0xae   :  { %v593_v38 = vpop.f32.mrf.mxu2  ;;  %v558_v39 = vpop.f32.mrf.mxu0 }
  0xaf   :  { %v577_v40 = vpop.f32.mrf.mxu1  ;;  %v612_v42 = vpop.f32.mrf.mxu3  ;;  %v594_v57 = vadd.f32 %v593_v38, %v575_v55  ;;  %v559_v59 = vadd.f32 %v1040_v41, %v558_v39 }
  0xb1   :  { %v613_v63 = vadd.f32 %v612_v42, %v594_v57  ;;  %v578_v2 = vadd.f32 %v577_v40, %v559_v59 }
  0xb6   :  { %v596_v44 = vpop.f32.mrf.mxu2  ;;  %v560_v45 = vpop.f32.mrf.mxu0 }
  0xb7   :  { %v579_v46 = vpop.f32.mrf.mxu1  ;;  %v615_v48 = vpop.f32.mrf.mxu3  ;;  %v597_v5 = vadd.f32 %v596_v44, %v578_v2  ;;  %v561_v9 = vadd.f32 %v1040_v41, %v560_v45 }
  0xb9   :  { %v616_v12 = vadd.f32 %v615_v48, %v597_v5  ;;  %v580_v14 = vadd.f32 %v579_v46, %v561_v9 }
  0xbe   :  { %v598_v51 = vpop.f32.mrf.mxu2  ;;  %v629_v52 = vpop.f32.mrf.mxu0 }
  0xbf   :  { %v648_v54 = vpop.f32.mrf.mxu1  ;;  %v630_v56 = vadd.f32 %v629_v52, %v611_v53  ;;  %v617_v58 = vpop.f32.mrf.mxu3  ;;  %v599_v16 = vadd.f32 %v598_v51, %v580_v14 }
  0xc1   :  { %v649_v60 = vadd.f32 %v648_v54, %v630_v56  ;;  %v618_v21 = vadd.f32 %v617_v58, %v599_v16 }
  0xc6   :  { %v667_v61 = vpop.f32.mrf.mxu2  ;;  %v631_v62 = vpop.f32.mrf.mxu0 }
  0xc7   :  { %v668_v0 = vadd.f32 %v667_v61, %v649_v60  ;;  %v650_v1 = vpop.f32.mrf.mxu1  ;;  %v632_v4 = vadd.f32 %v631_v62, %v613_v63  ;;  %v634_v7 = vpop.f32.mrf.mxu3 }
  0xc8   :  { %v635_v15 = vadd.f32 %v634_v7, %v616_v12 }
  0xc9   :  { %v677_v3 = vmax.f32 %v668_v0, 0.0  ;;  %v651_v6 = vadd.f32 %v650_v1, %v632_v4 }
  0xcb   :  { %682 = vst.msk [vmem:[%s1329_s3] sm:$0xff] %vm681_vm1, %v677_v3 }
  0xce   :  { %v669_v8 = vpop.f32.mrf.mxu2 }
  0xcf   :  { %v670_v10 = vadd.f32 %v669_v8, %v651_v6  ;;  %v653_v11 = vpop.f32.mrf.mxu1  ;;  %v636_v20 = vpop.f32.mrf.mxu3 }
  0xd0   :  { %v654_v17 = vadd.f32 %v653_v11, %v635_v15  ;;  %v637_v24 = vadd.f32 %v636_v20, %v618_v21 }
  0xd1   :  { %v678_v13 = vmax.f32 %v670_v10, 0.0 }
  0xd3   :  { %683 = vst.msk [vmem:[%s1329_s3 + $0x8] sm:$0xff] %vm681_vm1, %v678_v13 }
  0xd6   :  { %v672_v18 = vpop.f32.mrf.mxu2 }
  0xd7   :  { %v673_v19 = vadd.f32 %v672_v18, %v654_v17  ;;  %v655_v23 = vpop.f32.mrf.mxu1 }
  0xd8   :  { %v656_v25 = vadd.f32 %v655_v23, %v637_v24 }
  0xd9   :  { %v679_v22 = vmax.f32 %v673_v19, 0.0 }
  0xdb   :  { %684 = vst.msk [vmem:[%s1329_s3 + $0x10] sm:$0xff] %vm681_vm1, %v679_v22 }
  0xde   :  { %v674_v26 = vpop.f32.mrf.mxu2 }
  0xdf   :  { %v675_v27 = vadd.f32 %v674_v26, %v656_v25 }
  0xe1   :  { %v680_v28 = vmax.f32 %v675_v27, 0.0 }
  0xe3   :  { %685 = vst.msk [vmem:[%s1329_s3 + $0x18] sm:$0xff] %vm681_vm1, %v680_v28 }

// kernel: tile.23
= control target key start
LH: loop header
LB: loop body
LE: loop exit
PB: predicated region body
PF: predicated region fallthrough
CT: control target
= control target key end

     0   :  { %s22_s0 = inlined_call_operand.vmem [shape: f32[32], index: 0, kind: input, shape index: {}]   ;;  %s23_s1 = inlined_call_operand.vmem [shape: f32[4,32], index: 1, kind: output, shape index: {}]  }
   0x1   :  { %v4_v0 = vld [vmem:[%s22_s0] ss:$0 sm:$0xff] }
   0x2   :  { %5 = vst [vmem:[%s23_s1] sm:$0xf] %v4_v0 }

// kernel: tile.24
= control target key start
LH: loop header
LB: loop body
LE: loop exit
PB: predicated region body
PF: predicated region fallthrough
CT: control target
= control target key end

     0   :  { %s37_s8 = smov 32   ;;  %s38_s9 = smov 64   ;;  %vm7_vm0 = vcmask 261120   ;;  %vm13_vm1 = vcmask 1048320   ;;  %vm19_vm2 = vcmask 785920   ;;  %vm25_vm3 = vcmask 523520   ;;  %s55_s0 = inlined_call_operand.vmem [shape: f32[4,32], index: 0, kind: input, shape index: {}]   ;;  %s56_s1 = inlined_call_operand.vmem [shape: f32[1,128], index: 1, kind: output, shape index: {}]  }
   0x1   :  { %v4_v0 = vld [vmem:[%s55_s0] sm:$0xf]  ;;  %s36_s0 = smov 96  }
   0x2   :  { %5 = vst [vmem:[#allocation1] sm:$0xf] %v4_v0 }
   0x9   :  { %v10_v1 = vld [vmem:[#allocation1 + $0x3] sm:$0x1]   ;;  %v22_v2 = vld [vmem:[#allocation1 + $0x1] sm:$0x1]   ;;  %v16_v3 = vld [vmem:[#allocation1 + $0x2] sm:$0x1]  }
   0xa   :  { %11 = vrot.lane.b32.xlu0 %v10_v1, %s36_s0  ;;  %23 = vrot.lane.b32.xlu1 %v22_v2, %s37_s8  ;;  %v6_v4 = vld [vmem:[#allocation1] sm:$0x1]  }
   0xb   :  { %8 = vst.msk [vmem:[#allocation0] sm:$0x1] %vm7_vm0, %v6_v4  }
  0x12   :  { %17 = vrot.lane.b32.xlu0 %v16_v3, %s38_s9 }
  0x7c   :  { %v12_v5 = vpop.permute.xlu0 %11   ;;  %v24_v6 = vpop.permute.xlu1 %23  }
  0x7d   :  { %14 = vst.msk [vmem:[#allocation0] sm:$0x1] %vm13_vm1, %v12_v5  }
  0x84   :  { %v18_v7 = vpop.permute.xlu0 %17  }
  0x85   :  { %20 = vst.msk [vmem:[#allocation0] sm:$0x1] %vm19_vm2, %v18_v7  }
  0x86   :  { %26 = vst.msk [vmem:[#allocation0] sm:$0x1] %vm25_vm3, %v24_v6  }
  0x8d   :  { %v29_v8 = vld [vmem:[#allocation0] sm:$0x1] }
  0x8e   :  { %32 = vst [vmem:[%s56_s1] sm:$0x1] %v29_v8 }

// kernel: efficient_lite_seg.41
= control target key start
LH: loop header
LB: loop body
LE: loop exit
PB: predicated region body
PF: predicated region fallthrough
CT: control target
= control target key end

     0   :  { %vm369_vm0 = vcmask 523264   ;;  %s919_s1 = inlined_call_operand.vmem [shape: bf16[576,128], index: 1, kind: input, shape index: {}]   ;;  %s920_s2 = inlined_call_operand.vmem [shape: f32[1,128], index: 2, kind: input, shape index: {}]   ;;  %s921_s0 = inlined_call_operand.vmem [shape: bf16[32,576], index: 0, kind: input, shape index: {}]   ;;  %s922_s3 = inlined_call_operand.vmem [shape: f32[32,128], index: 3, kind: output, shape index: {}]  }
   0x1   :  { %v682_v0 = vld [vmem:[%s919_s1 + $0x38] sm:$0xff]  ;;  %v681_v4 = vld [vmem:[%s919_s1 + $0x30] sm:$0xff]  ;;  %v680_v8 = vld [vmem:[%s919_s1 + $0x28] sm:$0xff] }
   0x2   :  { %v690_v1 = vld [vmem:[%s919_s1 + $0x78] sm:$0xff]  ;;  %376 = vmatpush.bf16.msra.mxu0 %v682_v0  ;;  %v689_v5 = vld [vmem:[%s919_s1 + $0x70] sm:$0xff]  ;;  %v688_v9 = vld [vmem:[%s919_s1 + $0x68] sm:$0xff] }
   0x3   :  { %v698_v2 = vld [vmem:[%s919_s1 + $0xb8] sm:$0xff]  ;;  %395 = vmatpush.bf16.msra.mxu1 %v690_v1  ;;  %v697_v6 = vld [vmem:[%s919_s1 + $0xb0] sm:$0xff]  ;;  %v696_v10 = vld [vmem:[%s919_s1 + $0xa8] sm:$0xff] }
   0x4   :  { %v706_v3 = vld [vmem:[%s919_s1 + $0xf8] sm:$0xff]  ;;  %414 = vmatpush.bf16.msra.mxu2 %v698_v2  ;;  %v705_v7 = vld [vmem:[%s919_s1 + $0xf0] sm:$0xff]  ;;  %v704_v11 = vld [vmem:[%s919_s1 + $0xe8] sm:$0xff] }
   0x5   :  { %433 = vmatpush.bf16.msra.mxu3 %v706_v3  ;;  %v679_v12 = vld [vmem:[%s919_s1 + $0x20] sm:$0xff]  ;;  %v678_v16 = vld [vmem:[%s919_s1 + $0x18] sm:$0xff]  ;;  %v677_v20 = vld [vmem:[%s919_s1 + $0x10] sm:$0xff] }
   0x6   :  { %377 = vmatpush.bf16.msra.mxu0 %v681_v4  ;;  %v687_v13 = vld [vmem:[%s919_s1 + $0x60] sm:$0xff]  ;;  %v686_v17 = vld [vmem:[%s919_s1 + $0x58] sm:$0xff]  ;;  %v685_v21 = vld [vmem:[%s919_s1 + $0x50] sm:$0xff] }
   0x7   :  { %396 = vmatpush.bf16.msra.mxu1 %v689_v5  ;;  %v695_v14 = vld [vmem:[%s919_s1 + $0xa0] sm:$0xff]  ;;  %v694_v18 = vld [vmem:[%s919_s1 + $0x98] sm:$0xff]  ;;  %v693_v22 = vld [vmem:[%s919_s1 + $0x90] sm:$0xff] }
   0x8   :  { %415 = vmatpush.bf16.msra.mxu2 %v697_v6  ;;  %v703_v15 = vld [vmem:[%s919_s1 + $0xe0] sm:$0xff]  ;;  %v702_v19 = vld [vmem:[%s919_s1 + $0xd8] sm:$0xff]  ;;  %v701_v23 = vld [vmem:[%s919_s1 + $0xd0] sm:$0xff] }
   0x9   :  { %434 = vmatpush.bf16.msra.mxu3 %v705_v7  ;;  %v676_v24 = vld [vmem:[%s919_s1 + $0x8] sm:$0xff]  ;;  %v675_v28 = vld [vmem:[%s919_s1] sm:$0xff]  ;;  %v667_v33 = vld [vmem:[%s921_s0 + $0x10] sm:$0xf0] }
   0xa   :  { %378 = vmatpush.bf16.msra.mxu0 %v680_v8  ;;  %v684_v25 = vld [vmem:[%s919_s1 + $0x48] sm:$0xff]  ;;  %v683_v29 = vld [vmem:[%s919_s1 + $0x40] sm:$0xff]  ;;  %v483_v35 = vld [vmem:[%s921_s0 + $0x14] sm:$0xf0] }
   0xb   :  { %397 = vmatpush.bf16.msra.mxu1 %v688_v9  ;;  %v692_v26 = vld [vmem:[%s919_s1 + $0x88] sm:$0xff]  ;;  %v691_v30 = vld [vmem:[%s919_s1 + $0x80] sm:$0xff]  ;;  %v668_v37 = vld [vmem:[%s921_s0 + $0x18] sm:$0xf0] }
   0xc   :  { %416 = vmatpush.bf16.msra.mxu2 %v696_v10  ;;  %v700_v27 = vld [vmem:[%s919_s1 + $0xc8] sm:$0xff]  ;;  %v699_v31 = vld [vmem:[%s919_s1 + $0xc0] sm:$0xff]  ;;  %v710_v40 = vld [vmem:[%s919_s1 + $0x118] sm:$0xff] }
   0xd   :  { %435 = vmatpush.bf16.msra.mxu3 %v704_v11  ;;  %v481_v32 = vld [vmem:[%s921_s0] sm:$0xf]  ;;  %v665_v34 = vld [vmem:[%s921_s0 + $0x4] sm:$0xf]  ;;  %v489_v36 = vld [vmem:[%s921_s0 + $0x8] sm:$0xf] }
   0xe   :  { %379 = vmatpush.bf16.msra.mxu0 %v679_v12  ;;  %v666_v38 = vld [vmem:[%s921_s0 + $0xc] sm:$0xf]  ;;  %v491_v39 = vld [vmem:[%s921_s0 + $0x1c] sm:$0xf0]  ;;  %v482_v41 = vor.u32 %v667_v33, %v481_v32  ;;  %v486_v42 = vor.u32 %v665_v34, %v483_v35  ;;  %v490_v43 = vor.u32 %v668_v37, %v489_v36  ;;  %v709_v45 = vld [vmem:[%s919_s1 + $0x110] sm:$0xff] }
   0xf   :  { %398 = vmatpush.bf16.msra.mxu1 %v687_v13  ;;  %v494_v44 = vor.u32 %v666_v38, %v491_v39  ;;  %v708_v46 = vld [vmem:[%s919_s1 + $0x108] sm:$0xff]  ;;  %v707_v47 = vld [vmem:[%s919_s1 + $0x100] sm:$0xff]  ;;  %v672_v49 = vld [vmem:[%s921_s0 + $0x38] sm:$0xf0] }
  0x10   :  { %417 = vmatpush.bf16.msra.mxu2 %v695_v14  ;;  %v501_v48 = vld [vmem:[%s921_s0 + $0x28] sm:$0xf]  ;;  %v670_v50 = vld [vmem:[%s921_s0 + $0x2c] sm:$0xf]  ;;  %v503_v51 = vld [vmem:[%s921_s0 + $0x3c] sm:$0xf0] }
  0x11   :  { %436 = vmatpush.bf16.msra.mxu3 %v703_v15  ;;  %v509_v52 = vld [vmem:[%s921_s0 + $0x30] sm:$0xf]  ;;  %v673_v53 = vld [vmem:[%s921_s0 + $0x40] sm:$0xf0]  ;;  %v671_v54 = vld [vmem:[%s921_s0 + $0x34] sm:$0xf]  ;;  %v502_v56 = vor.u32 %v672_v49, %v501_v48  ;;  %v506_v57 = vor.u32 %v670_v50, %v503_v51 }
  0x12   :  { %380 = vmatpush.bf16.msra.mxu0 %v678_v16  ;;  %v511_v55 = vld [vmem:[%s921_s0 + $0x44] sm:$0xf0]  ;;  %v510_v58 = vor.u32 %v673_v53, %v509_v52  ;;  %v497_v60 = vld [vmem:[%s921_s0 + $0x10] sm:$0xf]  ;;  %v669_v61 = vld [vmem:[%s921_s0 + $0x20] sm:$0xf0] }
  0x13   :  { %399 = vmatpush.bf16.msra.mxu1 %v686_v17  ;;  %v514_v59 = vor.u32 %v671_v54, %v511_v55  ;;  %v517_v62 = vld [vmem:[%s921_s0 + $0x38] sm:$0xf]  ;;  %v674_v63 = vld [vmem:[%s921_s0 + $0x48] sm:$0xf0]  ;;  %v498_v0 = vor.u32 %v669_v61, %v497_v60  ;;  %v715_v11 = vld [vmem:[%s920_s2] ss:$0 sm:$0xff] }
  0x14   :  { %418 = vmatpush.bf16.msra.mxu2 %v694_v18  ;;  %v518_v1 = vor.u32 %v674_v63, %v517_v62 }
  0x15   :  { %437 = vmatpush.bf16.msra.mxu3 %v702_v19 }
  0x16   :  { %381 = vmatpush.bf16.msra.mxu0 %v677_v20 }
  0x17   :  { %400 = vmatpush.bf16.msra.mxu1 %v685_v21 }
  0x18   :  { %419 = vmatpush.bf16.msra.mxu2 %v693_v22 }
  0x19   :  { %438 = vmatpush.bf16.msra.mxu3 %v701_v23 }
  0x1a   :  { %382 = vmatpush.bf16.msra.mxu0 %v676_v24 }
  0x1b   :  { %401 = vmatpush.bf16.msra.mxu1 %v684_v25 }
  0x1c   :  { %420 = vmatpush.bf16.msra.mxu2 %v692_v26 }
  0x1d   :  { %439 = vmatpush.bf16.msra.mxu3 %v700_v27 }
  0x1e   :  { %383 = vmatpush.bf16.msra.mxu0 %v675_v28 }
  0x1f   :  { %402 = vmatpush.bf16.msra.mxu1 %v683_v29 }
  0x20   :  { %421 = vmatpush.bf16.msra.mxu2 %v691_v30 }
  0x21   :  { %440 = vmatpush.bf16.msra.mxu3 %v699_v31  ;;  %384 = vmatmul.bf16.vlgmr.msra.gmra.mxu0 %v482_v41 }
  0x22   :  { %456 = vmatpush.bf16.msrb.mxu0 %v710_v40  ;;  %403 = vmatmul.bf16.vlgmr.msra.gmra.mxu1 %v486_v42 }
  0x23   :  { %711 = vmatpush.bf16.msrb.mxu1 %v710_v40  ;;  %422 = vmatmul.bf16.vlgmr.msra.gmra.mxu2 %v490_v43 }
  0x24   :  { %441 = vmatmul.bf16.vlgmr.msra.gmra.mxu3 %v494_v44 }
  0x26   :  { %457 = vmatpush.bf16.msrb.mxu0 %v709_v45 }
  0x27   :  { %712 = vmatpush.bf16.msrb.mxu1 %v709_v45 }
  0x2a   :  { %458 = vmatpush.bf16.msrb.mxu0 %v708_v46 }
  0x2b   :  { %713 = vmatpush.bf16.msrb.mxu1 %v708_v46 }
  0x2e   :  { %459 = vmatpush.bf16.msrb.mxu0 %v707_v47 }
  0x2f   :  { %714 = vmatpush.bf16.msrb.mxu1 %v707_v47 }
  0x31   :  { %389 = vmatmul.bf16.gmra.mxu0 %v502_v56 }
  0x32   :  { %408 = vmatmul.bf16.gmra.mxu1 %v506_v57 }
  0x33   :  { %427 = vmatmul.bf16.gmra.mxu2 %v510_v58 }
  0x34   :  { %446 = vmatmul.bf16.gmra.mxu3 %v514_v59 }
  0x41   :  { %663 = vmatmul.msk.bf16.vlgmr.msrb.gmra.mxu0 %vm369_vm0, %v498_v0 }
  0x42   :  { %664 = vmatmul.msk.bf16.vlgmr.msrb.gmra.mxu1 %vm369_vm0, %v518_v1 }
  0x9e   :  { %v385_v2 = vpop.f32.mrf.mxu0 }
  0x9f   :  { %v404_v3 = vpop.f32.mrf.mxu1  ;;  %v386_v13 = vadd.f32 %v715_v11, %v385_v2 }
  0xa1   :  { %v405_v18 = vadd.f32 %v404_v3, %v386_v13 }
  0xa6   :  { %v423_v4 = vpop.f32.mrf.mxu2  ;;  %v387_v6 = vpop.f32.mrf.mxu0 }
  0xa7   :  { %v442_v5 = vpop.f32.mrf.mxu3  ;;  %v406_v7 = vpop.f32.mrf.mxu1  ;;  %v424_v20 = vadd.f32 %v423_v4, %v405_v18  ;;  %v388_v23 = vadd.f32 %v715_v11, %v387_v6 }
  0xa9   :  { %v443_v25 = vadd.f32 %v442_v5, %v424_v20  ;;  %v407_v30 = vadd.f32 %v406_v7, %v388_v23 }
  0xae   :  { %v425_v8 = vpop.f32.mrf.mxu2  ;;  %v390_v9 = vpop.f32.mrf.mxu0 }
  0xaf   :  { %v409_v10 = vpop.f32.mrf.mxu1  ;;  %v444_v12 = vpop.f32.mrf.mxu3  ;;  %v391_v14 = vadd.f32 %v715_v11, %v390_v9  ;;  %v426_v34 = vadd.f32 %v425_v8, %v407_v30 }
  0xb1   :  { %v410_v19 = vadd.f32 %v409_v10, %v391_v14  ;;  %v445_v37 = vadd.f32 %v444_v12, %v426_v34 }
  0xb6   :  { %v428_v15 = vpop.f32.mrf.mxu2  ;;  %v392_v16 = vpop.f32.mrf.mxu0 }
  0xb7   :  { %v411_v17 = vpop.f32.mrf.mxu1  ;;  %v429_v21 = vadd.f32 %v428_v15, %v410_v19  ;;  %v447_v22 = vpop.f32.mrf.mxu3  ;;  %v393_v24 = vadd.f32 %v715_v11, %v392_v16 }
  0xb9   :  { %v448_v26 = vadd.f32 %v447_v22, %v429_v21  ;;  %v412_v31 = vadd.f32 %v411_v17, %v393_v24 }
  0xbe   :  { %v430_v27 = vpop.f32.mrf.mxu2  ;;  %v461_v28 = vpop.f32.mrf.mxu0 }
  0xbf   :  { %v466_v29 = vpop.f32.mrf.mxu1  ;;  %v462_v32 = vadd.f32 %v461_v28, %v443_v25  ;;  %v431_v35 = vadd.f32 %v430_v27, %v412_v31  ;;  %v449_v36 = vpop.f32.mrf.mxu3 }
  0xc0   :  { %v467_v33 = vadd.f32 %v466_v29, %v448_v26 }
  0xc1   :  { %471 = vst [vmem:[%s922_s3] sm:$0xff] %v462_v32  ;;  %v450_v38 = vadd.f32 %v449_v36, %v431_v35 }
  0xc2   :  { %473 = vst [vmem:[%s922_s3 + $0x10] sm:$0xff] %v467_v33 }
  0xc6   :  { %v463_v39 = vpop.f32.mrf.mxu0 }
  0xc7   :  { %v468_v40 = vpop.f32.mrf.mxu1  ;;  %v464_v41 = vadd.f32 %v463_v39, %v445_v37 }
  0xc8   :  { %v469_v42 = vadd.f32 %v468_v40, %v450_v38 }
  0xc9   :  { %472 = vst [vmem:[%s922_s3 + $0x8] sm:$0xff] %v464_v41 }
  0xca   :  { %474 = vst [vmem:[%s922_s3 + $0x18] sm:$0xff] %v469_v42 }

// kernel: efficient_lite_seg.42
= control target key start
LH: loop header
LB: loop body
LE: loop exit
PB: predicated region body
PF: predicated region fallthrough
CT: control target
= control target key end

     0   :  { %vm419_vm0 = vcmask 392192   ;;  %vm656_vm1 = vcmask 261120   ;;  %s1367_s1 = inlined_call_operand.vmem [shape: bf16[432,32], index: 1, kind: input, shape index: {}]   ;;  %s1368_s0 = inlined_call_operand.vmem [shape: bf16[128,432], index: 0, kind: input, shape index: {}]   ;;  %s1369_s2 = inlined_call_operand.vmem [shape: f32[1,32], index: 2, kind: input, shape index: {}]   ;;  %s1370_s3 = inlined_call_operand.vmem [shape: f32[128,32], index: 3, kind: output, shape index: {}]  }
   0x1   :  { %v960_v0 = vld [vmem:[%s1367_s1 + $0x38] sm:$0xff]  ;;  %v959_v3 = vld [vmem:[%s1367_s1 + $0x30] sm:$0xff]  ;;  %v958_v7 = vld [vmem:[%s1367_s1 + $0x28] sm:$0xff] }
   0x2   :  { %v968_v1 = vld [vmem:[%s1367_s1 + $0x78] sm:$0xff]  ;;  %444 = vmatpush.bf16.msra.mxu0 %v960_v0  ;;  %v967_v4 = vld [vmem:[%s1367_s1 + $0x70] sm:$0xff]  ;;  %v966_v8 = vld [vmem:[%s1367_s1 + $0x68] sm:$0xff] }
   0x3   :  { %v976_v2 = vld [vmem:[%s1367_s1 + $0xb8] sm:$0xff]  ;;  %493 = vmatpush.bf16.msra.mxu1 %v968_v1  ;;  %v975_v5 = vld [vmem:[%s1367_s1 + $0xb0] sm:$0xff]  ;;  %v974_v9 = vld [vmem:[%s1367_s1 + $0xa8] sm:$0xff] }
   0x4   :  { %542 = vmatpush.bf16.msra.mxu2 %v976_v2  ;;  %v979_v6 = vld [vmem:[%s1367_s1 + $0xd0] sm:$0xff]  ;;  %v978_v10 = vld [vmem:[%s1367_s1 + $0xc8] sm:$0xff]  ;;  %v957_v11 = vld [vmem:[%s1367_s1 + $0x20] sm:$0xff] }
   0x5   :  { %596 = vmatpush.bf16.msra.mxu3 %v979_v6  ;;  %v965_v12 = vld [vmem:[%s1367_s1 + $0x60] sm:$0xff]  ;;  %v922_v15 = vld [vmem:[%s1368_s0 + $0xc] sm:$0xf]  ;;  %v689_v16 = vld [vmem:[%s1368_s0 + $0x18] sm:$0xf0] }
   0x6   :  { %445 = vmatpush.bf16.msra.mxu0 %v959_v3  ;;  %v973_v13 = vld [vmem:[%s1367_s1 + $0xa0] sm:$0xff]  ;;  %v956_v17 = vld [vmem:[%s1367_s1 + $0x18] sm:$0xff]  ;;  %v692_v20 = vor.u32 %v922_v15, %v689_v16  ;;  %v955_v21 = vld [vmem:[%s1367_s1 + $0x10] sm:$0xff] }
   0x7   :  { %494 = vmatpush.bf16.msra.mxu1 %v967_v4  ;;  %v977_v14 = vld [vmem:[%s1367_s1 + $0xc0] sm:$0xff]  ;;  %v964_v18 = vld [vmem:[%s1367_s1 + $0x58] sm:$0xff]  ;;  %v963_v22 = vld [vmem:[%s1367_s1 + $0x50] sm:$0xff] }
   0x8   :  { %543 = vmatpush.bf16.msra.mxu2 %v975_v5  ;;  %v972_v19 = vld [vmem:[%s1367_s1 + $0x98] sm:$0xff]  ;;  %v971_v23 = vld [vmem:[%s1367_s1 + $0x90] sm:$0xff]  ;;  %v954_v24 = vld [vmem:[%s1367_s1 + $0x8] sm:$0xff] }
   0x9   :  { %597 = vmatpush.bf16.msra.mxu3 %v978_v10  ;;  %v962_v25 = vld [vmem:[%s1367_s1 + $0x48] sm:$0xff]  ;;  %v953_v27 = vld [vmem:[%s1367_s1] sm:$0xff]  ;;  %v923_v30 = vld [vmem:[%s1368_s0 + $0xc] sm:$0xf0] }
   0xa   :  { %446 = vmatpush.bf16.msra.mxu0 %v958_v7  ;;  %v970_v26 = vld [vmem:[%s1367_s1 + $0x88] sm:$0xff]  ;;  %v961_v28 = vld [vmem:[%s1367_s1 + $0x40] sm:$0xff]  ;;  %v681_v32 = vld [vmem:[%s1368_s0 + $0x10] sm:$0xf0] }
   0xb   :  { %495 = vmatpush.bf16.msra.mxu1 %v966_v8  ;;  %v679_v29 = vld [vmem:[%s1368_s0] sm:$0xf]  ;;  %v921_v31 = vld [vmem:[%s1368_s0 + $0x4] sm:$0xf]  ;;  %v687_v34 = vld [vmem:[%s1368_s0 + $0x8] sm:$0xf] }
   0xc   :  { %544 = vmatpush.bf16.msra.mxu2 %v974_v9  ;;  %v969_v33 = vld [vmem:[%s1367_s1 + $0x80] sm:$0xff]  ;;  %v924_v35 = vld [vmem:[%s1368_s0 + $0x14] sm:$0xf0]  ;;  %v926_v36 = vld [vmem:[%s1368_s0 + $0x2c] sm:$0xf]  ;;  %v680_v38 = vor.u32 %v923_v30, %v679_v29  ;;  %v684_v39 = vor.u32 %v921_v31, %v681_v32 }
   0xd   :  { %598 = vmatpush.bf16.msra.mxu3 %v977_v14  ;;  %v705_v37 = vld [vmem:[%s1368_s0 + $0x38] sm:$0xf0]  ;;  %v688_v40 = vor.u32 %v924_v35, %v687_v34  ;;  %v695_v42 = vld [vmem:[%s1368_s0 + $0x20] sm:$0xf]  ;;  %v927_v43 = vld [vmem:[%s1368_s0 + $0x2c] sm:$0xf0] }
   0xe   :  { %447 = vmatpush.bf16.msra.mxu0 %v957_v11  ;;  %v708_v41 = vor.u32 %v926_v36, %v705_v37  ;;  %v925_v44 = vld [vmem:[%s1368_s0 + $0x24] sm:$0xf]  ;;  %v697_v45 = vld [vmem:[%s1368_s0 + $0x30] sm:$0xf0]  ;;  %v703_v46 = vld [vmem:[%s1368_s0 + $0x28] sm:$0xf]  ;;  %v696_v50 = vor.u32 %v927_v43, %v695_v42 }
   0xf   :  { %496 = vmatpush.bf16.msra.mxu1 %v965_v12  ;;  %v928_v47 = vld [vmem:[%s1368_s0 + $0x34] sm:$0xf0]  ;;  %v930_v48 = vld [vmem:[%s1368_s0 + $0x4c] sm:$0xf]  ;;  %v721_v49 = vld [vmem:[%s1368_s0 + $0x58] sm:$0xf0]  ;;  %v700_v51 = vor.u32 %v925_v44, %v697_v45 }
  0x10   :  { %545 = vmatpush.bf16.msra.mxu2 %v973_v13  ;;  %913 = vmatmul.msk.bf16.vlgmr.msra.gmra.mxu3 %vm419_vm0, %v692_v20  ;;  %v704_v52 = vor.u32 %v928_v47, %v703_v46  ;;  %v724_v53 = vor.u32 %v930_v48, %v721_v49  ;;  %v711_v54 = vld [vmem:[%s1368_s0 + $0x40] sm:$0xf]  ;;  %v931_v55 = vld [vmem:[%s1368_s0 + $0x4c] sm:$0xf0]  ;;  %v929_v56 = vld [vmem:[%s1368_s0 + $0x44] sm:$0xf] }
  0x11   :  { %v713_v57 = vld [vmem:[%s1368_s0 + $0x50] sm:$0xf0]  ;;  %v719_v58 = vld [vmem:[%s1368_s0 + $0x48] sm:$0xf]  ;;  %v932_v59 = vld [vmem:[%s1368_s0 + $0x54] sm:$0xf0]  ;;  %v712_v62 = vor.u32 %v931_v55, %v711_v54 }
  0x12   :  { %448 = vmatpush.bf16.msra.mxu0 %v956_v17  ;;  %v934_v60 = vld [vmem:[%s1368_s0 + $0x6c] sm:$0xf]  ;;  %v737_v61 = vld [vmem:[%s1368_s0 + $0x78] sm:$0xf0]  ;;  %v716_v63 = vor.u32 %v929_v56, %v713_v57  ;;  %v720_v0 = vor.u32 %v932_v59, %v719_v58  ;;  %v727_v2 = vld [vmem:[%s1368_s0 + $0x60] sm:$0xf] }
  0x13   :  { %497 = vmatpush.bf16.msra.mxu1 %v964_v18  ;;  %v740_v1 = vor.u32 %v934_v60, %v737_v61  ;;  %v935_v3 = vld [vmem:[%s1368_s0 + $0x6c] sm:$0xf0]  ;;  %v933_v4 = vld [vmem:[%s1368_s0 + $0x64] sm:$0xf]  ;;  %v729_v5 = vld [vmem:[%s1368_s0 + $0x70] sm:$0xf0] }
  0x14   :  { %546 = vmatpush.bf16.msra.mxu2 %v972_v19  ;;  %v735_v6 = vld [vmem:[%s1368_s0 + $0x68] sm:$0xf]  ;;  %v936_v7 = vld [vmem:[%s1368_s0 + $0x74] sm:$0xf0]  ;;  %v938_v8 = vld [vmem:[%s1368_s0 + $0x8c] sm:$0xf]  ;;  %v728_v10 = vor.u32 %v935_v3, %v727_v2  ;;  %v732_v11 = vor.u32 %v933_v4, %v729_v5 }
  0x15   :  { %v753_v9 = vld [vmem:[%s1368_s0 + $0x98] sm:$0xf0]  ;;  %v736_v12 = vor.u32 %v936_v7, %v735_v6  ;;  %v743_v14 = vld [vmem:[%s1368_s0 + $0x80] sm:$0xf]  ;;  %v939_v15 = vld [vmem:[%s1368_s0 + $0x8c] sm:$0xf0] }
  0x16   :  { %449 = vmatpush.bf16.msra.mxu0 %v955_v21  ;;  %v756_v13 = vor.u32 %v938_v8, %v753_v9  ;;  %v937_v16 = vld [vmem:[%s1368_s0 + $0x84] sm:$0xf]  ;;  %v745_v17 = vld [vmem:[%s1368_s0 + $0x90] sm:$0xf0]  ;;  %v751_v18 = vld [vmem:[%s1368_s0 + $0x88] sm:$0xf] }
  0x17   :  { %498 = vmatpush.bf16.msra.mxu1 %v963_v22  ;;  %v940_v19 = vld [vmem:[%s1368_s0 + $0x94] sm:$0xf0]  ;;  %v942_v20 = vld [vmem:[%s1368_s0 + $0xac] sm:$0xf]  ;;  %v769_v21 = vld [vmem:[%s1368_s0 + $0xb8] sm:$0xf0]  ;;  %v744_v22 = vor.u32 %v939_v15, %v743_v14 }
  0x18   :  { %547 = vmatpush.bf16.msra.mxu2 %v971_v23  ;;  %v748_v23 = vor.u32 %v937_v16, %v745_v17  ;;  %v761_v29 = vld [vmem:[%s1368_s0 + $0xb0] sm:$0xf0]  ;;  %v767_v30 = vld [vmem:[%s1368_s0 + $0xa8] sm:$0xf]  ;;  %v944_v31 = vld [vmem:[%s1368_s0 + $0xb4] sm:$0xf0] }
  0x19   :  { %v946_v32 = vld [vmem:[%s1368_s0 + $0xcc] sm:$0xf]  ;;  %v768_v36 = vor.u32 %v944_v31, %v767_v30  ;;  %v783_v42 = vld [vmem:[%s1368_s0 + $0xc8] sm:$0xf]  ;;  %v948_v43 = vld [vmem:[%s1368_s0 + $0xd4] sm:$0xf0] }
  0x1a   :  { %450 = vmatpush.bf16.msra.mxu0 %v954_v24  ;;  %v752_v24 = vor.u32 %v940_v19, %v751_v18  ;;  %v950_v44 = vld [vmem:[%s1368_s0 + $0xec] sm:$0xf]  ;;  %v801_v45 = vld [vmem:[%s1368_s0 + $0xf8] sm:$0xf0]  ;;  %v784_v48 = vor.u32 %v948_v43, %v783_v42  ;;  %v799_v54 = vld [vmem:[%s1368_s0 + $0xe8] sm:$0xf] }
  0x1b   :  { %499 = vmatpush.bf16.msra.mxu1 %v962_v25  ;;  %v772_v25 = vor.u32 %v942_v20, %v769_v21  ;;  %v804_v49 = vor.u32 %v950_v44, %v801_v45  ;;  %v952_v55 = vld [vmem:[%s1368_s0 + $0xf4] sm:$0xf0]  ;;  %v1285_v60 = vld [vmem:[%s1369_s2] ss:$0 sm:$0xff] }
  0x1c   :  { %548 = vmatpush.bf16.msra.mxu2 %v970_v26  ;;  %v759_v26 = vld [vmem:[%s1368_s0 + $0xa0] sm:$0xf]  ;;  %v800_v58 = vor.u32 %v952_v55, %v799_v54 }
  0x1e   :  { %451 = vmatpush.bf16.msra.mxu0 %v953_v27  ;;  %v943_v27 = vld [vmem:[%s1368_s0 + $0xac] sm:$0xf0] }
  0x1f   :  { %500 = vmatpush.bf16.msra.mxu1 %v961_v28  ;;  %v941_v28 = vld [vmem:[%s1368_s0 + $0xa4] sm:$0xf]  ;;  %v760_v34 = vor.u32 %v943_v27, %v759_v26 }
  0x20   :  { %549 = vmatpush.bf16.msra.mxu2 %v969_v33  ;;  %914 = vmatmul.msk.bf16.gmra.mxu3 %vm419_vm0, %v708_v41  ;;  %v785_v33 = vld [vmem:[%s1368_s0 + $0xd8] sm:$0xf0]  ;;  %v764_v35 = vor.u32 %v941_v28, %v761_v29  ;;  %v777_v41 = vld [vmem:[%s1368_s0 + $0xd0] sm:$0xf0] }
  0x21   :  { %452 = vmatmul.bf16.vlgmr.msra.gmra.mxu0 %v680_v38  ;;  %v788_v37 = vor.u32 %v946_v32, %v785_v33  ;;  %v775_v38 = vld [vmem:[%s1368_s0 + $0xc0] sm:$0xf] }
  0x22   :  { %501 = vmatmul.bf16.vlgmr.msra.gmra.mxu1 %v684_v39  ;;  %v947_v39 = vld [vmem:[%s1368_s0 + $0xcc] sm:$0xf0] }
  0x23   :  { %550 = vmatmul.bf16.vlgmr.msra.gmra.mxu2 %v688_v40  ;;  %v945_v40 = vld [vmem:[%s1368_s0 + $0xc4] sm:$0xf]  ;;  %v776_v46 = vor.u32 %v947_v39, %v775_v38 }
  0x24   :  { %v780_v47 = vor.u32 %v945_v40, %v777_v41 }
  0x30   :  { %915 = vmatmul.msk.bf16.gmra.mxu3 %vm419_vm0, %v724_v53  ;;  %v793_v53 = vld [vmem:[%s1368_s0 + $0xf0] sm:$0xf0] }
  0x31   :  { %457 = vmatmul.bf16.gmra.mxu0 %v696_v50  ;;  %v791_v50 = vld [vmem:[%s1368_s0 + $0xe0] sm:$0xf] }
  0x32   :  { %506 = vmatmul.bf16.gmra.mxu1 %v700_v51  ;;  %v951_v51 = vld [vmem:[%s1368_s0 + $0xec] sm:$0xf0] }
  0x33   :  { %555 = vmatmul.bf16.gmra.mxu2 %v704_v52  ;;  %v949_v52 = vld [vmem:[%s1368_s0 + $0xe4] sm:$0xf]  ;;  %v792_v56 = vor.u32 %v951_v51, %v791_v50 }
  0x34   :  { %v796_v57 = vor.u32 %v949_v52, %v793_v53 }
  0x40   :  { %916 = vmatmul.msk.bf16.gmra.mxu3 %vm419_vm0, %v740_v1 }
  0x41   :  { %462 = vmatmul.bf16.gmra.mxu0 %v712_v62 }
  0x42   :  { %511 = vmatmul.bf16.gmra.mxu1 %v716_v63 }
  0x43   :  { %560 = vmatmul.bf16.gmra.mxu2 %v720_v0 }
  0x50   :  { %917 = vmatmul.msk.bf16.gmra.mxu3 %vm419_vm0, %v756_v13 }
  0x51   :  { %467 = vmatmul.bf16.gmra.mxu0 %v728_v10 }
  0x52   :  { %516 = vmatmul.bf16.gmra.mxu1 %v732_v11 }
  0x53   :  { %565 = vmatmul.bf16.gmra.mxu2 %v736_v12 }
  0x60   :  { %918 = vmatmul.msk.bf16.gmra.mxu3 %vm419_vm0, %v772_v25 }
  0x61   :  { %472 = vmatmul.bf16.gmra.mxu0 %v744_v22 }
  0x62   :  { %521 = vmatmul.bf16.gmra.mxu1 %v748_v23 }
  0x63   :  { %570 = vmatmul.bf16.gmra.mxu2 %v752_v24 }
  0x70   :  { %919 = vmatmul.msk.bf16.gmra.mxu3 %vm419_vm0, %v788_v37 }
  0x71   :  { %477 = vmatmul.bf16.gmra.mxu0 %v760_v34 }
  0x72   :  { %526 = vmatmul.bf16.gmra.mxu1 %v764_v35 }
  0x73   :  { %575 = vmatmul.bf16.gmra.mxu2 %v768_v36 }
  0x80   :  { %920 = vmatmul.msk.bf16.gmra.mxu3 %vm419_vm0, %v804_v49 }
  0x81   :  { %482 = vmatmul.bf16.gmra.mxu0 %v776_v46 }
  0x82   :  { %531 = vmatmul.bf16.gmra.mxu1 %v780_v47 }
  0x83   :  { %580 = vmatmul.bf16.gmra.mxu2 %v784_v48 }
  0x91   :  { %487 = vmatmul.bf16.gmra.mxu0 %v792_v56 }
  0x92   :  { %536 = vmatmul.bf16.gmra.mxu1 %v796_v57 }
  0x93   :  { %585 = vmatmul.bf16.gmra.mxu2 %v800_v58  ;;  %v600_v59 = vpop.f32.mrf.mxu3 }
  0x9b   :  { %v602_v0 = vpop.f32.mrf.mxu3 }
  0x9e   :  { %v453_v61 = vpop.f32.mrf.mxu0 }
  0x9f   :  { %v502_v62 = vpop.f32.mrf.mxu1  ;;  %v454_v63 = vadd.f32 %v1285_v60, %v453_v61 }
  0xa1   :  { %v503_v1 = vadd.f32 %v502_v62, %v454_v63 }
  0xa3   :  { %v605_v6 = vpop.f32.mrf.mxu3 }
  0xa6   :  { %v551_v2 = vpop.f32.mrf.mxu2  ;;  %v455_v4 = vpop.f32.mrf.mxu0 }
  0xa7   :  { %v552_v3 = vadd.f32 %v551_v2, %v503_v1  ;;  %v504_v5 = vpop.f32.mrf.mxu1  ;;  %v456_v8 = vadd.f32 %v1285_v60, %v455_v4 }
  0xa9   :  { %v601_v7 = vadd.f32 %v600_v59, %v552_v3  ;;  %v505_v10 = vadd.f32 %v504_v5, %v456_v8 }
  0xab   :  { %v640_v9 = vmax.f32 %v601_v7, 0.0  ;;  %v607_v16 = vpop.f32.mrf.mxu3 }
  0xad   :  { %657 = vst.msk [vmem:[%s1370_s3] sm:$0xff] %vm656_vm1, %v640_v9 }
  0xae   :  { %v553_v11 = vpop.f32.mrf.mxu2  ;;  %v458_v13 = vpop.f32.mrf.mxu0 }
  0xaf   :  { %v554_v12 = vadd.f32 %v553_v11, %v505_v10  ;;  %v507_v14 = vpop.f32.mrf.mxu1  ;;  %v459_v15 = vadd.f32 %v1285_v60, %v458_v13 }
  0xb1   :  { %v603_v17 = vadd.f32 %v602_v0, %v554_v12  ;;  %v508_v19 = vadd.f32 %v507_v14, %v459_v15 }
  0xb3   :  { %v641_v18 = vmax.f32 %v603_v17, 0.0  ;;  %v610_v24 = vpop.f32.mrf.mxu3 }
  0xb5   :  { %658 = vst.msk [vmem:[%s1370_s3 + $0x8] sm:$0xff] %vm656_vm1, %v641_v18 }
  0xb6   :  { %v556_v20 = vpop.f32.mrf.mxu2  ;;  %v460_v22 = vpop.f32.mrf.mxu0 }
  0xb7   :  { %v557_v21 = vadd.f32 %v556_v20, %v508_v19  ;;  %v509_v23 = vpop.f32.mrf.mxu1  ;;  %v461_v26 = vadd.f32 %v1285_v60, %v460_v22 }
  0xb9   :  { %v606_v25 = vadd.f32 %v605_v6, %v557_v21  ;;  %v510_v28 = vadd.f32 %v509_v23, %v461_v26 }
  0xbb   :  { %v642_v27 = vmax.f32 %v606_v25, 0.0  ;;  %v612_v34 = vpop.f32.mrf.mxu3 }
  0xbd   :  { %659 = vst.msk [vmem:[%s1370_s3 + $0x10] sm:$0xff] %vm656_vm1, %v642_v27 }
  0xbe   :  { %v558_v29 = vpop.f32.mrf.mxu2  ;;  %v463_v31 = vpop.f32.mrf.mxu0 }
  0xbf   :  { %v559_v30 = vadd.f32 %v558_v29, %v510_v28  ;;  %v512_v32 = vpop.f32.mrf.mxu1  ;;  %v464_v33 = vadd.f32 %v1285_v60, %v463_v31 }
  0xc1   :  { %v608_v35 = vadd.f32 %v607_v16, %v559_v30  ;;  %v513_v37 = vadd.f32 %v512_v32, %v464_v33 }
  0xc3   :  { %v643_v36 = vmax.f32 %v608_v35, 0.0  ;;  %v615_v42 = vpop.f32.mrf.mxu3 }
  0xc5   :  { %660 = vst.msk [vmem:[%s1370_s3 + $0x18] sm:$0xff] %vm656_vm1, %v643_v36 }
  0xc6   :  { %v561_v38 = vpop.f32.mrf.mxu2  ;;  %v465_v40 = vpop.f32.mrf.mxu0 }
  0xc7   :  { %v562_v39 = vadd.f32 %v561_v38, %v513_v37  ;;  %v514_v41 = vpop.f32.mrf.mxu1  ;;  %v466_v44 = vadd.f32 %v1285_v60, %v465_v40 }
  0xc9   :  { %v611_v43 = vadd.f32 %v610_v24, %v562_v39  ;;  %v515_v46 = vadd.f32 %v514_v41, %v466_v44 }
  0xcb   :  { %v644_v45 = vmax.f32 %v611_v43, 0.0  ;;  %v617_v52 = vpop.f32.mrf.mxu3 }
  0xcd   :  { %661 = vst.msk [vmem:[%s1370_s3 + $0x20] sm:$0xff] %vm656_vm1, %v644_v45 }
  0xce   :  { %v563_v47 = vpop.f32.mrf.mxu2  ;;  %v468_v49 = vpop.f32.mrf.mxu0 }
  0xcf   :  { %v564_v48 = vadd.f32 %v563_v47, %v515_v46  ;;  %v517_v50 = vpop.f32.mrf.mxu1  ;;  %v469_v51 = vadd.f32 %v1285_v60, %v468_v49 }
  0xd1   :  { %v613_v53 = vadd.f32 %v612_v34, %v564_v48  ;;  %v518_v55 = vadd.f32 %v517_v50, %v469_v51 }
  0xd3   :  { %v645_v54 = vmax.f32 %v613_v53, 0.0  ;;  %v620_v63 = vpop.f32.mrf.mxu3 }
  0xd5   :  { %662 = vst.msk [vmem:[%s1370_s3 + $0x28] sm:$0xff] %vm656_vm1, %v645_v54 }
  0xd6   :  { %v566_v56 = vpop.f32.mrf.mxu2  ;;  %v470_v58 = vpop.f32.mrf.mxu0 }
  0xd7   :  { %v567_v57 = vadd.f32 %v566_v56, %v518_v55  ;;  %v519_v59 = vpop.f32.mrf.mxu1  ;;  %v471_v62 = vadd.f32 %v1285_v60, %v470_v58 }
  0xd9   :  { %v616_v61 = vadd.f32 %v615_v42, %v567_v57  ;;  %v520_v1 = vadd.f32 %v519_v59, %v471_v62 }
  0xdb   :  { %v646_v0 = vmax.f32 %v616_v61, 0.0  ;;  %v622_v10 = vpop.f32.mrf.mxu3 }
  0xdd   :  { %663 = vst.msk [vmem:[%s1370_s3 + $0x30] sm:$0xff] %vm656_vm1, %v646_v0 }
  0xde   :  { %v568_v2 = vpop.f32.mrf.mxu2  ;;  %v473_v4 = vpop.f32.mrf.mxu0 }
  0xdf   :  { %v569_v3 = vadd.f32 %v568_v2, %v520_v1  ;;  %v522_v5 = vpop.f32.mrf.mxu1  ;;  %v474_v6 = vadd.f32 %v1285_v60, %v473_v4 }
  0xe1   :  { %v618_v7 = vadd.f32 %v617_v52, %v569_v3  ;;  %v523_v9 = vadd.f32 %v522_v5, %v474_v6 }
  0xe3   :  { %v647_v8 = vmax.f32 %v618_v7, 0.0  ;;  %v625_v20 = vpop.f32.mrf.mxu3 }
  0xe5   :  { %664 = vst.msk [vmem:[%s1370_s3 + $0x38] sm:$0xff] %vm656_vm1, %v647_v8 }
  0xe6   :  { %v571_v11 = vpop.f32.mrf.mxu2  ;;  %v475_v13 = vpop.f32.mrf.mxu0 }
  0xe7   :  { %v572_v12 = vadd.f32 %v571_v11, %v523_v9  ;;  %v524_v14 = vpop.f32.mrf.mxu1  ;;  %v476_v16 = vadd.f32 %v1285_v60, %v475_v13 }
  0xe9   :  { %v621_v15 = vadd.f32 %v620_v63, %v572_v12  ;;  %v525_v18 = vadd.f32 %v524_v14, %v476_v16 }
  0xeb   :  { %v648_v17 = vmax.f32 %v621_v15, 0.0  ;;  %v627_v32 = vpop.f32.mrf.mxu3 }
  0xed   :  { %665 = vst.msk [vmem:[%s1370_s3 + $0x40] sm:$0xff] %vm656_vm1, %v648_v17 }
  0xee   :  { %v573_v19 = vpop.f32.mrf.mxu2  ;;  %v478_v22 = vpop.f32.mrf.mxu0 }
  0xef   :  { %v574_v21 = vadd.f32 %v573_v19, %v525_v18  ;;  %v527_v23 = vpop.f32.mrf.mxu1  ;;  %v479_v24 = vadd.f32 %v1285_v60, %v478_v22 }
  0xf1   :  { %v623_v25 = vadd.f32 %v622_v10, %v574_v21  ;;  %v528_v27 = vadd.f32 %v527_v23, %v479_v24 }
  0xf3   :  { %v649_v26 = vmax.f32 %v623_v25, 0.0  ;;  %v630_v43 = vpop.f32.mrf.mxu3 }
  0xf5   :  { %666 = vst.msk [vmem:[%s1370_s3 + $0x48] sm:$0xff] %vm656_vm1, %v649_v26 }
  0xf6   :  { %v576_v28 = vpop.f32.mrf.mxu2  ;;  %v480_v30 = vpop.f32.mrf.mxu0 }
  0xf7   :  { %v577_v29 = vadd.f32 %v576_v28, %v528_v27  ;;  %v529_v31 = vpop.f32.mrf.mxu1  ;;  %v481_v34 = vadd.f32 %v1285_v60, %v480_v30 }
  0xf9   :  { %v626_v33 = vadd.f32 %v625_v20, %v577_v29  ;;  %v530_v36 = vadd.f32 %v529_v31, %v481_v34 }
  0xfb   :  { %v650_v35 = vmax.f32 %v626_v33, 0.0  ;;  %v632_v53 = vpop.f32.mrf.mxu3 }
  0xfd   :  { %667 = vst.msk [vmem:[%s1370_s3 + $0x50] sm:$0xff] %vm656_vm1, %v650_v35 }
  0xfe   :  { %v578_v37 = vpop.f32.mrf.mxu2  ;;  %v483_v39 = vpop.f32.mrf.mxu0 }
  0xff   :  { %v579_v38 = vadd.f32 %v578_v37, %v530_v36  ;;  %v532_v40 = vpop.f32.mrf.mxu1  ;;  %v484_v41 = vadd.f32 %v1285_v60, %v483_v39 }
 0x101   :  { %v628_v42 = vadd.f32 %v627_v32, %v579_v38  ;;  %v533_v45 = vadd.f32 %v532_v40, %v484_v41 }
 0x103   :  { %v651_v44 = vmax.f32 %v628_v42, 0.0  ;;  %v635_v0 = vpop.f32.mrf.mxu3 }
 0x105   :  { %668 = vst.msk [vmem:[%s1370_s3 + $0x58] sm:$0xff] %vm656_vm1, %v651_v44 }
 0x106   :  { %v581_v46 = vpop.f32.mrf.mxu2  ;;  %v485_v48 = vpop.f32.mrf.mxu0 }
 0x107   :  { %v582_v47 = vadd.f32 %v581_v46, %v533_v45  ;;  %v534_v49 = vpop.f32.mrf.mxu1  ;;  %v486_v51 = vadd.f32 %v1285_v60, %v485_v48 }
 0x109   :  { %v631_v50 = vadd.f32 %v630_v43, %v582_v47  ;;  %v535_v54 = vadd.f32 %v534_v49, %v486_v51 }
 0x10b   :  { %v652_v52 = vmax.f32 %v631_v50, 0.0  ;;  %v637_v11 = vpop.f32.mrf.mxu3 }
 0x10d   :  { %669 = vst.msk [vmem:[%s1370_s3 + $0x60] sm:$0xff] %vm656_vm1, %v652_v52 }
 0x10e   :  { %v583_v55 = vpop.f32.mrf.mxu2  ;;  %v488_v57 = vpop.f32.mrf.mxu0 }
 0x10f   :  { %v584_v56 = vadd.f32 %v583_v55, %v535_v54  ;;  %v489_v58 = vadd.f32 %v1285_v60, %v488_v57  ;;  %v537_v61 = vpop.f32.mrf.mxu1 }
 0x111   :  { %v633_v59 = vadd.f32 %v632_v53, %v584_v56  ;;  %v538_v63 = vadd.f32 %v537_v61, %v489_v58 }
 0x113   :  { %v653_v62 = vmax.f32 %v633_v59, 0.0 }
 0x115   :  { %670 = vst.msk [vmem:[%s1370_s3 + $0x68] sm:$0xff] %vm656_vm1, %v653_v62 }
 0x116   :  { %v586_v1 = vpop.f32.mrf.mxu2  ;;  %v490_v3 = vpop.f32.mrf.mxu0 }
 0x117   :  { %v587_v2 = vadd.f32 %v586_v1, %v538_v63  ;;  %v491_v5 = vadd.f32 %v1285_v60, %v490_v3  ;;  %v539_v7 = vpop.f32.mrf.mxu1 }
 0x119   :  { %v636_v4 = vadd.f32 %v635_v0, %v587_v2  ;;  %v540_v8 = vadd.f32 %v539_v7, %v491_v5 }
 0x11b   :  { %v654_v6 = vmax.f32 %v636_v4, 0.0 }
 0x11d   :  { %671 = vst.msk [vmem:[%s1370_s3 + $0x70] sm:$0xff] %vm656_vm1, %v654_v6 }
 0x11e   :  { %v588_v9 = vpop.f32.mrf.mxu2 }
 0x11f   :  { %v589_v10 = vadd.f32 %v588_v9, %v540_v8 }
 0x121   :  { %v638_v12 = vadd.f32 %v637_v11, %v589_v10 }
 0x123   :  { %v655_v13 = vmax.f32 %v638_v12, 0.0 }
 0x125   :  { %672 = vst.msk [vmem:[%s1370_s3 + $0x78] sm:$0xff] %vm656_vm1, %v655_v13 }

// kernel: tile.28
= control target key start
LH: loop header
LB: loop body
LE: loop exit
PB: predicated region body
PF: predicated region fallthrough
CT: control target
= control target key end

     0   :  { %s22_s0 = inlined_call_operand.vmem [shape: f32[16], index: 0, kind: input, shape index: {}]   ;;  %s23_s1 = inlined_call_operand.vmem [shape: f32[4,16], index: 1, kind: output, shape index: {}]  }
   0x1   :  { %v4_v0 = vld [vmem:[%s22_s0] ss:$0 sm:$0xff] }
   0x2   :  { %5 = vst [vmem:[%s23_s1] sm:$0xf] %v4_v0 }

// kernel: tile.29
= control target key start
LH: loop header
LB: loop body
LE: loop exit
PB: predicated region body
PF: predicated region fallthrough
CT: control target
= control target key end

     0   :  { %s37_s8 = smov 16   ;;  %s38_s9 = smov 32   ;;  %vm7_vm0 = vcmask 130048   ;;  %vm13_vm1 = vcmask 523648   ;;  %vm19_vm2 = vcmask 392448   ;;  %vm25_vm3 = vcmask 261248   ;;  %s55_s0 = inlined_call_operand.vmem [shape: f32[4,16], index: 0, kind: input, shape index: {}]   ;;  %s56_s1 = inlined_call_operand.vmem [shape: f32[1,64], index: 1, kind: output, shape index: {}]  }
   0x1   :  { %v4_v0 = vld [vmem:[%s55_s0] sm:$0xf]  ;;  %s36_s0 = smov 48  }
   0x2   :  { %5 = vst [vmem:[#allocation1] sm:$0xf] %v4_v0 }
   0x9   :  { %v10_v1 = vld [vmem:[#allocation1 + $0x3] sm:$0x1]   ;;  %v22_v2 = vld [vmem:[#allocation1 + $0x1] sm:$0x1]   ;;  %v16_v3 = vld [vmem:[#allocation1 + $0x2] sm:$0x1]  }
   0xa   :  { %11 = vrot.lane.b32.xlu0 %v10_v1, %s36_s0  ;;  %23 = vrot.lane.b32.xlu1 %v22_v2, %s37_s8  ;;  %v6_v4 = vld [vmem:[#allocation1] sm:$0x1]  }
   0xb   :  { %8 = vst.msk [vmem:[#allocation0] sm:$0x1] %vm7_vm0, %v6_v4  }
  0x12   :  { %17 = vrot.lane.b32.xlu0 %v16_v3, %s38_s9 }
  0x7c   :  { %v12_v5 = vpop.permute.xlu0 %11   ;;  %v24_v6 = vpop.permute.xlu1 %23  }
  0x7d   :  { %14 = vst.msk [vmem:[#allocation0] sm:$0x1] %vm13_vm1, %v12_v5  }
  0x84   :  { %v18_v7 = vpop.permute.xlu0 %17  }
  0x85   :  { %20 = vst.msk [vmem:[#allocation0] sm:$0x1] %vm19_vm2, %v18_v7  }
  0x86   :  { %26 = vst.msk [vmem:[#allocation0] sm:$0x1] %vm25_vm3, %v24_v6  }
  0x8d   :  { %v29_v8 = vld [vmem:[#allocation0] sm:$0x1] }
  0x8e   :  { %32 = vst [vmem:[%s56_s1] sm:$0x1] %v29_v8 }

// kernel: efficient_lite_seg.43
= control target key start
LH: loop header
LB: loop body
LE: loop exit
PB: predicated region body
PF: predicated region fallthrough
CT: control target
= control target key end

     0   :  { %vm315_vm0 = vcmask 261120   ;;  %vm487_vm1 = vcmask 523264   ;;  %s1054_s1 = inlined_call_operand.vmem [shape: bf16[288,64], index: 1, kind: input, shape index: {}]   ;;  %s1055_s0 = inlined_call_operand.vmem [shape: bf16[128,288], index: 0, kind: input, shape index: {}]   ;;  %s1056_s2 = inlined_call_operand.vmem [shape: f32[1,64], index: 2, kind: input, shape index: {}]   ;;  %s1057_s3 = inlined_call_operand.vmem [shape: f32[128,64], index: 3, kind: output, shape index: {}]  }
   0x1   :  { %v715_v0 = vld [vmem:[%s1054_s1 + $0x38] sm:$0xff]  ;;  %v725_v1 = vld [vmem:[%s1054_s1 + $0x88] sm:$0xff]  ;;  %v714_v3 = vld [vmem:[%s1054_s1 + $0x30] sm:$0xff] }
   0x2   :  { %v723_v2 = vld [vmem:[%s1054_s1 + $0x78] sm:$0xff]  ;;  %340 = vmatpush.bf16.msra.mxu0 %v715_v0  ;;  %726 = vmatpush.bf16.msra.mxu3 %v715_v0  ;;  %v724_v4 = vld [vmem:[%s1054_s1 + $0x80] sm:$0xff]  ;;  %v722_v5 = vld [vmem:[%s1054_s1 + $0x70] sm:$0xff] }
   0x3   :  { %444 = vmatpush.bf16.msra.mxu2 %v725_v1  ;;  %389 = vmatpush.bf16.msra.mxu1 %v723_v2  ;;  %v518_v6 = vld [vmem:[%s1055_s0 + $0x8] sm:$0xf]  ;;  %v686_v7 = vld [vmem:[%s1055_s0 + $0x10] sm:$0xf0]  ;;  %v712_v11 = vld [vmem:[%s1054_s1 + $0x20] sm:$0xff] }
   0x4   :  { %v519_v8 = vor.u32 %v686_v7, %v518_v6  ;;  %v713_v9 = vld [vmem:[%s1054_s1 + $0x28] sm:$0xff]  ;;  %v720_v12 = vld [vmem:[%s1054_s1 + $0x60] sm:$0xff]  ;;  %v711_v13 = vld [vmem:[%s1054_s1 + $0x18] sm:$0xff] }
   0x5   :  { %v721_v10 = vld [vmem:[%s1054_s1 + $0x68] sm:$0xff]  ;;  %v719_v14 = vld [vmem:[%s1054_s1 + $0x58] sm:$0xff]  ;;  %v710_v15 = vld [vmem:[%s1054_s1 + $0x10] sm:$0xff] }
   0x6   :  { %341 = vmatpush.bf16.msra.mxu0 %v714_v3  ;;  %727 = vmatpush.bf16.msra.mxu3 %v714_v3  ;;  %v718_v16 = vld [vmem:[%s1054_s1 + $0x50] sm:$0xff]  ;;  %v530_v17 = vld [vmem:[%s1055_s0 + $0x20] sm:$0xf]  ;;  %v689_v18 = vld [vmem:[%s1055_s0 + $0x28] sm:$0xf0] }
   0x7   :  { %445 = vmatpush.bf16.msra.mxu2 %v724_v4  ;;  %390 = vmatpush.bf16.msra.mxu1 %v722_v5  ;;  %v531_v19 = vor.u32 %v689_v18, %v530_v17  ;;  %v709_v20 = vld [vmem:[%s1054_s1 + $0x8] sm:$0xff]  ;;  %v708_v22 = vld [vmem:[%s1054_s1] sm:$0xff]  ;;  %v582_v26 = vld [vmem:[%s1055_s0 + $0x90] sm:$0xf] }
   0x8   :  { %v717_v21 = vld [vmem:[%s1054_s1 + $0x48] sm:$0xff]  ;;  %v716_v23 = vld [vmem:[%s1054_s1 + $0x40] sm:$0xff]  ;;  %v703_v27 = vld [vmem:[%s1055_s0 + $0x98] sm:$0xf0] }
   0x9   :  { %v510_v24 = vld [vmem:[%s1055_s0] sm:$0xf]  ;;  %v685_v25 = vld [vmem:[%s1055_s0 + $0x8] sm:$0xf0]  ;;  %v684_v28 = vld [vmem:[%s1055_s0 + $0x4] sm:$0xf]  ;;  %v583_v31 = vor.u32 %v703_v27, %v582_v26 }
   0xa   :  { %676 = vmatmul.msk.bf16.vlgmr.msra.gmra.mxu2 %vm315_vm0, %v519_v8  ;;  %342 = vmatpush.bf16.msra.mxu0 %v713_v9  ;;  %v512_v29 = vld [vmem:[%s1055_s0 + $0xc] sm:$0xf0]  ;;  %v511_v30 = vor.u32 %v685_v25, %v510_v24  ;;  %v542_v33 = vld [vmem:[%s1055_s0 + $0x38] sm:$0xf]  ;;  %v692_v34 = vld [vmem:[%s1055_s0 + $0x40] sm:$0xf0] }
   0xb   :  { %728 = vmatpush.bf16.msra.mxu3 %v713_v9  ;;  %391 = vmatpush.bf16.msra.mxu1 %v721_v10  ;;  %v515_v32 = vor.u32 %v684_v28, %v512_v29  ;;  %v543_v35 = vor.u32 %v692_v34, %v542_v33  ;;  %v522_v36 = vld [vmem:[%s1055_s0 + $0x18] sm:$0xf]  ;;  %v688_v37 = vld [vmem:[%s1055_s0 + $0x20] sm:$0xf0]  ;;  %v594_v38 = vld [vmem:[%s1055_s0 + $0xa8] sm:$0xf] }
   0xc   :  { %v706_v39 = vld [vmem:[%s1055_s0 + $0xb0] sm:$0xf0]  ;;  %v687_v40 = vld [vmem:[%s1055_s0 + $0x1c] sm:$0xf]  ;;  %v524_v41 = vld [vmem:[%s1055_s0 + $0x24] sm:$0xf0]  ;;  %v523_v42 = vor.u32 %v688_v37, %v522_v36 }
   0xd   :  { %v595_v43 = vor.u32 %v706_v39, %v594_v38  ;;  %v527_v44 = vor.u32 %v687_v40, %v524_v41  ;;  %v554_v45 = vld [vmem:[%s1055_s0 + $0x50] sm:$0xf]  ;;  %v695_v46 = vld [vmem:[%s1055_s0 + $0x58] sm:$0xf0]  ;;  %v702_v50 = vld [vmem:[%s1055_s0 + $0x94] sm:$0xf] }
   0xe   :  { %343 = vmatpush.bf16.msra.mxu0 %v712_v11  ;;  %v555_v47 = vor.u32 %v695_v46, %v554_v45  ;;  %v534_v48 = vld [vmem:[%s1055_s0 + $0x30] sm:$0xf]  ;;  %v691_v49 = vld [vmem:[%s1055_s0 + $0x38] sm:$0xf0]  ;;  %v584_v51 = vld [vmem:[%s1055_s0 + $0x9c] sm:$0xf0] }
   0xf   :  { %729 = vmatpush.bf16.msra.mxu3 %v712_v11  ;;  %392 = vmatpush.bf16.msra.mxu1 %v720_v12  ;;  %v690_v52 = vld [vmem:[%s1055_s0 + $0x34] sm:$0xf]  ;;  %v536_v53 = vld [vmem:[%s1055_s0 + $0x3c] sm:$0xf0]  ;;  %v535_v54 = vor.u32 %v691_v49, %v534_v48  ;;  %v587_v55 = vor.u32 %v702_v50, %v584_v51  ;;  %v566_v57 = vld [vmem:[%s1055_s0 + $0x68] sm:$0xf] }
  0x10   :  { %v539_v56 = vor.u32 %v690_v52, %v536_v53  ;;  %v698_v58 = vld [vmem:[%s1055_s0 + $0x70] sm:$0xf0]  ;;  %v546_v60 = vld [vmem:[%s1055_s0 + $0x48] sm:$0xf]  ;;  %v705_v62 = vld [vmem:[%s1055_s0 + $0xac] sm:$0xf] }
  0x11   :  { %v567_v59 = vor.u32 %v698_v58, %v566_v57  ;;  %v694_v61 = vld [vmem:[%s1055_s0 + $0x50] sm:$0xf0]  ;;  %v596_v63 = vld [vmem:[%s1055_s0 + $0xb4] sm:$0xf0]  ;;  %v693_v0 = vld [vmem:[%s1055_s0 + $0x4c] sm:$0xf] }
  0x12   :  { %344 = vmatpush.bf16.msra.mxu0 %v711_v13  ;;  %v548_v1 = vld [vmem:[%s1055_s0 + $0x54] sm:$0xf0]  ;;  %v599_v3 = vor.u32 %v705_v62, %v596_v63  ;;  %v701_v6 = vld [vmem:[%s1055_s0 + $0x88] sm:$0xf0]  ;;  %v558_v8 = vld [vmem:[%s1055_s0 + $0x60] sm:$0xf] }
  0x13   :  { %730 = vmatpush.bf16.msra.mxu3 %v711_v13  ;;  %393 = vmatpush.bf16.msra.mxu1 %v719_v14  ;;  %v551_v4 = vor.u32 %v693_v0, %v548_v1  ;;  %v697_v9 = vld [vmem:[%s1055_s0 + $0x68] sm:$0xf0]  ;;  %v560_v11 = vld [vmem:[%s1055_s0 + $0x6c] sm:$0xf0]  ;;  %v570_v17 = vld [vmem:[%s1055_s0 + $0x78] sm:$0xf] }
  0x14   :  { %v700_v18 = vld [vmem:[%s1055_s0 + $0x80] sm:$0xf0]  ;;  %v707_v24 = vld [vmem:[%s1055_s0 + $0xb8] sm:$0xf0]  ;;  %v972_v28 = vld [vmem:[%s1056_s2] ss:$0 sm:$0xff] }
  0x16   :  { %345 = vmatpush.bf16.msra.mxu0 %v710_v15 }
  0x17   :  { %731 = vmatpush.bf16.msra.mxu3 %v710_v15  ;;  %394 = vmatpush.bf16.msra.mxu1 %v718_v16  ;;  %v704_v15 = vld [vmem:[%s1055_s0 + $0xa0] sm:$0xf0] }
  0x1a   :  { %677 = vmatmul.msk.bf16.gmra.mxu2 %vm315_vm0, %v531_v19  ;;  %346 = vmatpush.bf16.msra.mxu0 %v709_v20  ;;  %v699_v19 = vld [vmem:[%s1055_s0 + $0x7c] sm:$0xf] }
  0x1b   :  { %732 = vmatpush.bf16.msra.mxu3 %v709_v20  ;;  %395 = vmatpush.bf16.msra.mxu1 %v717_v21  ;;  %v572_v20 = vld [vmem:[%s1055_s0 + $0x84] sm:$0xf0] }
  0x1e   :  { %347 = vmatpush.bf16.msra.mxu0 %v708_v22 }
  0x1f   :  { %733 = vmatpush.bf16.msra.mxu3 %v708_v22  ;;  %396 = vmatpush.bf16.msra.mxu1 %v716_v23  ;;  %v575_v22 = vor.u32 %v699_v19, %v572_v20 }
  0x21   :  { %348 = vmatmul.bf16.vlgmr.msra.gmra.mxu0 %v511_v30 }
  0x22   :  { %378 = vmatmul.bf16.vlgmr.msra.gmra.mxu3 %v583_v31  ;;  %397 = vmatmul.bf16.vlgmr.msra.gmra.mxu1 %v515_v32 }
  0x23   :  { %734 = vmatpush.bf16.msrb.mxu3 %v723_v2  ;;  %v547_v2 = vor.u32 %v694_v61, %v546_v60 }
  0x27   :  { %735 = vmatpush.bf16.msrb.mxu3 %v722_v5  ;;  %v578_v5 = vld [vmem:[%s1055_s0 + $0x80] sm:$0xf] }
  0x28   :  { %v579_v7 = vor.u32 %v701_v6, %v578_v5 }
  0x2a   :  { %678 = vmatmul.msk.bf16.gmra.mxu2 %vm315_vm0, %v543_v35 }
  0x2b   :  { %736 = vmatpush.bf16.msrb.mxu3 %v721_v10  ;;  %v696_v10 = vld [vmem:[%s1055_s0 + $0x64] sm:$0xf] }
  0x2c   :  { %v563_v13 = vor.u32 %v696_v10, %v560_v11 }
  0x2f   :  { %737 = vmatpush.bf16.msrb.mxu3 %v720_v12  ;;  %v559_v12 = vor.u32 %v697_v9, %v558_v8 }
  0x31   :  { %353 = vmatmul.bf16.gmra.mxu0 %v523_v42 }
  0x32   :  { %383 = vmatmul.bf16.gmra.mxu3 %v595_v43  ;;  %402 = vmatmul.bf16.gmra.mxu1 %v527_v44 }
  0x33   :  { %738 = vmatpush.bf16.msrb.mxu3 %v719_v14  ;;  %v590_v14 = vld [vmem:[%s1055_s0 + $0x98] sm:$0xf] }
  0x37   :  { %739 = vmatpush.bf16.msrb.mxu3 %v718_v16  ;;  %v591_v16 = vor.u32 %v704_v15, %v590_v14 }
  0x3a   :  { %679 = vmatmul.msk.bf16.gmra.mxu2 %vm315_vm0, %v555_v47 }
  0x3b   :  { %740 = vmatpush.bf16.msrb.mxu3 %v717_v21  ;;  %v571_v21 = vor.u32 %v700_v18, %v570_v17 }
  0x3f   :  { %741 = vmatpush.bf16.msrb.mxu3 %v716_v23  ;;  %v602_v23 = vld [vmem:[%s1055_s0 + $0xb0] sm:$0xf] }
  0x40   :  { %v603_v25 = vor.u32 %v707_v24, %v602_v23 }
  0x41   :  { %358 = vmatmul.bf16.gmra.mxu0 %v535_v54 }
  0x42   :  { %427 = vmatmul.bf16.vlgmr.msrb.gmra.mxu3 %v587_v55  ;;  %407 = vmatmul.bf16.gmra.mxu1 %v539_v56 }
  0x4a   :  { %680 = vmatmul.msk.bf16.gmra.mxu2 %vm315_vm0, %v567_v59 }
  0x51   :  { %363 = vmatmul.bf16.gmra.mxu0 %v547_v2 }
  0x52   :  { %432 = vmatmul.bf16.gmra.mxu3 %v599_v3  ;;  %412 = vmatmul.bf16.gmra.mxu1 %v551_v4 }
  0x5a   :  { %681 = vmatmul.msk.bf16.gmra.mxu2 %vm315_vm0, %v579_v7 }
  0x61   :  { %368 = vmatmul.bf16.gmra.mxu0 %v559_v12 }
  0x62   :  { %417 = vmatmul.bf16.gmra.mxu1 %v563_v13 }
  0x6a   :  { %682 = vmatmul.msk.bf16.gmra.mxu2 %vm315_vm0, %v591_v16 }
  0x71   :  { %373 = vmatmul.bf16.gmra.mxu0 %v571_v21 }
  0x72   :  { %422 = vmatmul.bf16.gmra.mxu1 %v575_v22 }
  0x7a   :  { %683 = vmatmul.msk.bf16.gmra.mxu2 %vm315_vm0, %v603_v25 }
  0x8d   :  { %v447_v26 = vpop.f32.mrf.mxu2 }
  0x95   :  { %v449_v27 = vpop.f32.mrf.mxu2 }
  0x9d   :  { %v452_v29 = vpop.f32.mrf.mxu2 }
  0x9e   :  { %v349_v30 = vpop.f32.mrf.mxu0 }
  0x9f   :  { %v350_v31 = vadd.f32 %v972_v28, %v349_v30  ;;  %v398_v32 = vpop.f32.mrf.mxu1 }
  0xa1   :  { %v399_v33 = vadd.f32 %v398_v32, %v350_v31 }
  0xa3   :  { %v448_v34 = vadd.f32 %v447_v26, %v399_v33 }
  0xa5   :  { %488 = vst.msk [vmem:[%s1057_s3] sm:$0xff] %vm487_vm1, %v448_v34  ;;  %v454_v35 = vpop.f32.mrf.mxu2  ;;  %v379_v52 = vpop.f32.mrf.mxu3 }
  0xa6   :  { %v351_v36 = vpop.f32.mrf.mxu0 }
  0xa7   :  { %v352_v37 = vadd.f32 %v972_v28, %v351_v36  ;;  %v400_v38 = vpop.f32.mrf.mxu1 }
  0xa9   :  { %v401_v39 = vadd.f32 %v400_v38, %v352_v37 }
  0xab   :  { %v450_v40 = vadd.f32 %v449_v27, %v401_v39 }
  0xad   :  { %489 = vst.msk [vmem:[%s1057_s3 + $0x8] sm:$0xff] %vm487_vm1, %v450_v40  ;;  %v457_v41 = vpop.f32.mrf.mxu2  ;;  %v381_v60 = vpop.f32.mrf.mxu3 }
  0xae   :  { %v354_v42 = vpop.f32.mrf.mxu0  ;;  %v382_v39 = vadd.f32 %v972_v28, %v381_v60 }
  0xaf   :  { %v355_v43 = vadd.f32 %v972_v28, %v354_v42  ;;  %v403_v44 = vpop.f32.mrf.mxu1 }
  0xb1   :  { %v404_v45 = vadd.f32 %v403_v44, %v355_v43 }
  0xb3   :  { %v453_v46 = vadd.f32 %v452_v29, %v404_v45  ;;  %v380_v29 = vadd.f32 %v972_v28, %v379_v52 }
  0xb5   :  { %490 = vst.msk [vmem:[%s1057_s3 + $0x10] sm:$0xff] %vm487_vm1, %v453_v46  ;;  %v459_v47 = vpop.f32.mrf.mxu2  ;;  %v384_v5 = vpop.f32.mrf.mxu3 }
  0xb6   :  { %v356_v48 = vpop.f32.mrf.mxu0 }
  0xb7   :  { %v357_v49 = vadd.f32 %v972_v28, %v356_v48  ;;  %v405_v50 = vpop.f32.mrf.mxu1 }
  0xb9   :  { %v406_v51 = vadd.f32 %v405_v50, %v357_v49  ;;  %v385_v49 = vadd.f32 %v972_v28, %v384_v5 }
  0xbb   :  { %v455_v53 = vadd.f32 %v454_v35, %v406_v51 }
  0xbd   :  { %491 = vst.msk [vmem:[%s1057_s3 + $0x18] sm:$0xff] %vm487_vm1, %v455_v53  ;;  %v462_v54 = vpop.f32.mrf.mxu2  ;;  %v386_v14 = vpop.f32.mrf.mxu3 }
  0xbe   :  { %v359_v55 = vpop.f32.mrf.mxu0 }
  0xbf   :  { %v360_v56 = vadd.f32 %v972_v28, %v359_v55  ;;  %v408_v57 = vpop.f32.mrf.mxu1  ;;  %v387_v55 = vadd.f32 %v972_v28, %v386_v14 }
  0xc1   :  { %v409_v58 = vadd.f32 %v408_v57, %v360_v56 }
  0xc3   :  { %v458_v59 = vadd.f32 %v457_v41, %v409_v58 }
  0xc5   :  { %492 = vst.msk [vmem:[%s1057_s3 + $0x20] sm:$0xff] %vm487_vm1, %v458_v59  ;;  %v464_v61 = vpop.f32.mrf.mxu2  ;;  %v428_v22 = vpop.f32.mrf.mxu3 }
  0xc6   :  { %v361_v62 = vpop.f32.mrf.mxu0  ;;  %v429_v32 = vadd.f32 %v428_v22, %v380_v29 }
  0xc7   :  { %v362_v63 = vadd.f32 %v972_v28, %v361_v62  ;;  %v410_v0 = vpop.f32.mrf.mxu1 }
  0xc9   :  { %v411_v1 = vadd.f32 %v410_v0, %v362_v63 }
  0xcb   :  { %v460_v2 = vadd.f32 %v459_v47, %v411_v1 }
  0xcd   :  { %493 = vst.msk [vmem:[%s1057_s3 + $0x28] sm:$0xff] %vm487_vm1, %v460_v2  ;;  %v467_v3 = vpop.f32.mrf.mxu2  ;;  %v430_v33 = vpop.f32.mrf.mxu3 }
  0xce   :  { %v364_v4 = vpop.f32.mrf.mxu0  ;;  %v431_v42 = vadd.f32 %v430_v33, %v382_v39 }
  0xcf   :  { %v365_v6 = vadd.f32 %v972_v28, %v364_v4  ;;  %v413_v7 = vpop.f32.mrf.mxu1 }
  0xd1   :  { %v414_v8 = vadd.f32 %v413_v7, %v365_v6 }
  0xd3   :  { %v463_v9 = vadd.f32 %v462_v54, %v414_v8 }
  0xd5   :  { %494 = vst.msk [vmem:[%s1057_s3 + $0x30] sm:$0xff] %vm487_vm1, %v463_v9  ;;  %v469_v10 = vpop.f32.mrf.mxu2  ;;  %v433_v46 = vpop.f32.mrf.mxu3 }
  0xd6   :  { %v366_v11 = vpop.f32.mrf.mxu0  ;;  %v434_v52 = vadd.f32 %v433_v46, %v385_v49 }
  0xd7   :  { %v367_v12 = vadd.f32 %v972_v28, %v366_v11  ;;  %v415_v13 = vpop.f32.mrf.mxu1 }
  0xd9   :  { %v416_v15 = vadd.f32 %v415_v13, %v367_v12 }
  0xdb   :  { %v465_v16 = vadd.f32 %v464_v61, %v416_v15 }
  0xdd   :  { %495 = vst.msk [vmem:[%s1057_s3 + $0x38] sm:$0xff] %vm487_vm1, %v465_v16  ;;  %v472_v17 = vpop.f32.mrf.mxu2  ;;  %v435_v56 = vpop.f32.mrf.mxu3 }
  0xde   :  { %v369_v18 = vpop.f32.mrf.mxu0  ;;  %v436_v57 = vadd.f32 %v435_v56, %v387_v55 }
  0xdf   :  { %v370_v19 = vadd.f32 %v972_v28, %v369_v18  ;;  %v418_v20 = vpop.f32.mrf.mxu1 }
  0xe1   :  { %v419_v21 = vadd.f32 %v418_v20, %v370_v19 }
  0xe3   :  { %v468_v23 = vadd.f32 %v467_v3, %v419_v21 }
  0xe5   :  { %496 = vst.msk [vmem:[%s1057_s3 + $0x40] sm:$0xff] %vm487_vm1, %v468_v23  ;;  %v474_v24 = vpop.f32.mrf.mxu2 }
  0xe6   :  { %v371_v25 = vpop.f32.mrf.mxu0 }
  0xe7   :  { %v372_v26 = vadd.f32 %v972_v28, %v371_v25  ;;  %v420_v27 = vpop.f32.mrf.mxu1 }
  0xe9   :  { %v421_v30 = vadd.f32 %v420_v27, %v372_v26 }
  0xeb   :  { %v470_v31 = vadd.f32 %v469_v10, %v421_v30 }
  0xed   :  { %497 = vst.msk [vmem:[%s1057_s3 + $0x48] sm:$0xff] %vm487_vm1, %v470_v31  ;;  %v477_v34 = vpop.f32.mrf.mxu2 }
  0xee   :  { %v478_v35 = vadd.f32 %v477_v34, %v429_v32  ;;  %v374_v36 = vpop.f32.mrf.mxu0 }
  0xef   :  { %v375_v37 = vadd.f32 %v972_v28, %v374_v36  ;;  %v423_v38 = vpop.f32.mrf.mxu1 }
  0xf0   :  { %500 = vst.msk [vmem:[%s1057_s3 + $0x60] sm:$0xff] %vm487_vm1, %v478_v35 }
  0xf1   :  { %v424_v40 = vadd.f32 %v423_v38, %v375_v37 }
  0xf3   :  { %v473_v41 = vadd.f32 %v472_v17, %v424_v40 }
  0xf5   :  { %498 = vst.msk [vmem:[%s1057_s3 + $0x50] sm:$0xff] %vm487_vm1, %v473_v41  ;;  %v479_v43 = vpop.f32.mrf.mxu2 }
  0xf6   :  { %v480_v44 = vadd.f32 %v479_v43, %v431_v42  ;;  %v376_v45 = vpop.f32.mrf.mxu0 }
  0xf7   :  { %v377_v47 = vadd.f32 %v972_v28, %v376_v45  ;;  %v425_v48 = vpop.f32.mrf.mxu1 }
  0xf8   :  { %501 = vst.msk [vmem:[%s1057_s3 + $0x68] sm:$0xff] %vm487_vm1, %v480_v44 }
  0xf9   :  { %v426_v50 = vadd.f32 %v425_v48, %v377_v47 }
  0xfb   :  { %v475_v51 = vadd.f32 %v474_v24, %v426_v50 }
  0xfd   :  { %499 = vst.msk [vmem:[%s1057_s3 + $0x58] sm:$0xff] %vm487_vm1, %v475_v51  ;;  %v482_v53 = vpop.f32.mrf.mxu2 }
  0xfe   :  { %v483_v54 = vadd.f32 %v482_v53, %v434_v52 }
 0x100   :  { %502 = vst.msk [vmem:[%s1057_s3 + $0x70] sm:$0xff] %vm487_vm1, %v483_v54 }
 0x105   :  { %v484_v58 = vpop.f32.mrf.mxu2 }
 0x106   :  { %v485_v59 = vadd.f32 %v484_v58, %v436_v57 }
 0x108   :  { %503 = vst.msk [vmem:[%s1057_s3 + $0x78] sm:$0xff] %vm487_vm1, %v485_v59 }

// kernel: efficient_lite_seg.44
= control target key start
LH: loop header
LB: loop body
LE: loop exit
PB: predicated region body
PF: predicated region fallthrough
CT: control target
= control target key end

     0   :  { %vm555_vm0 = vcmask 1044480   ;;  %vm556_vm1 = vcmask 1045504   ;;  %v1453_v3 = vmov 65535   ;;  %vm458_vm2 = vcmask 351232   ;;  %s2299_s1 = inlined_call_operand.vmem [shape: bf16[171,16], index: 1, kind: input, shape index: {}]   ;;  %s2300_s0 = inlined_call_operand.vmem [shape: bf16[512,171], index: 0, kind: input, shape index: {}]   ;;  %s2301_s2 = inlined_call_operand.vmem [shape: f32[1,16], index: 2, kind: input, shape index: {}]   ;;  %s2302_s3 = inlined_call_operand.vmem [shape: f32[512,16], index: 3, kind: output, shape index: {}]  }
   0x1   :  { %v1436_v0 = vld [vmem:[%s2299_s1 + $0x38] sm:$0xff]  ;;  %v1331_v1 = vld [vmem:[%s2299_s1 + $0x50] sm:$0xf]  ;;  %v1439_v2 = vld [vmem:[%s2299_s1 + $0x50] sm:$0x30]  ;;  %v557_v4 = vsel %vm555_vm0, 4294967295, %v1453_v3 }
   0x2   :  { %v1332_v5 = vor.u32 %v1439_v2, %v1331_v1  ;;  %v558_v6 = vsel %vm556_vm1, %v557_v4, 0  ;;  %562 = vmatpush.bf16.msra.mxu0 %v1436_v0  ;;  %1440 = vmatpush.bf16.msra.mxu2 %v1436_v0  ;;  %v1435_v7 = vld [vmem:[%s2299_s1 + $0x30] sm:$0xff]  ;;  %v1438_v9 = vld [vmem:[%s2299_s1 + $0x48] sm:$0xff]  ;;  %v1437_v11 = vld [vmem:[%s2299_s1 + $0x40] sm:$0xff]  ;;  %vm964_vm3 = vcmask 130048  }
   0x3   :  { %v1434_v10 = vld [vmem:[%s2299_s1 + $0x28] sm:$0xff]  ;;  %v1365_v12 = vld [vmem:[%s2300_s0 + $0x4] sm:$0xf]  ;;  %v1399_v14 = vld [vmem:[%s2300_s0 + $0x114] sm:$0xf] }
   0x4   :  { %v560_v8 = vand.u32 %v1332_v5, %v558_v6  ;;  %v1037_v13 = vld [vmem:[%s2300_s0 + $0x8] sm:$0xf0]  ;;  %v1173_v15 = vld [vmem:[%s2300_s0 + $0x118] sm:$0xf0]  ;;  %v1433_v16 = vld [vmem:[%s2299_s1 + $0x20] sm:$0xff] }
   0x5   :  { %v1040_v17 = vor.u32 %v1365_v12, %v1037_v13  ;;  %v1176_v18 = vor.u32 %v1399_v14, %v1173_v15  ;;  %v1432_v19 = vld [vmem:[%s2299_s1 + $0x18] sm:$0xff]  ;;  %v1431_v20 = vld [vmem:[%s2299_s1 + $0x10] sm:$0xff]  ;;  %v1430_v21 = vld [vmem:[%s2299_s1 + $0x8] sm:$0xff] }
   0x6   :  { %736 = vmatpush.bf16.msra.mxu1 %v560_v8  ;;  %1448 = vmatpush.bf16.msra.mxu3 %v560_v8  ;;  %v1429_v22 = vld [vmem:[%s2299_s1] sm:$0xff]  ;;  %v1367_v23 = vld [vmem:[%s2300_s0 + $0x14] sm:$0xf]  ;;  %v1045_v24 = vld [vmem:[%s2300_s0 + $0x18] sm:$0xf0] }
   0x7   :  { %563 = vmatpush.bf16.msra.mxu0 %v1435_v7  ;;  %1441 = vmatpush.bf16.msra.mxu2 %v1435_v7  ;;  %v1035_v25 = vld [vmem:[%s2300_s0] sm:$0xf]  ;;  %v1401_v26 = vld [vmem:[%s2300_s0 + $0x124] sm:$0xf]  ;;  %v1181_v27 = vld [vmem:[%s2300_s0 + $0x128] sm:$0xf0]  ;;  %v1048_v31 = vor.u32 %v1367_v23, %v1045_v24 }
   0x8   :  { %v1366_v28 = vld [vmem:[%s2300_s0 + $0x4] sm:$0xf0]  ;;  %v1163_v29 = vld [vmem:[%s2300_s0 + $0x100] sm:$0xf]  ;;  %v1184_v32 = vor.u32 %v1401_v26, %v1181_v27  ;;  %v1369_v35 = vld [vmem:[%s2300_s0 + $0x24] sm:$0xf] }
   0x9   :  { %v1398_v30 = vld [vmem:[%s2300_s0 + $0x104] sm:$0xf0]  ;;  %v1036_v33 = vor.u32 %v1366_v28, %v1035_v25  ;;  %v1053_v36 = vld [vmem:[%s2300_s0 + $0x28] sm:$0xf0]  ;;  %v1043_v37 = vld [vmem:[%s2300_s0 + $0x10] sm:$0xf] }
   0xa   :  { %737 = vmatpush.bf16.msra.mxu1 %v1438_v9  ;;  %1449 = vmatpush.bf16.msra.mxu3 %v1438_v9  ;;  %v1164_v34 = vor.u32 %v1398_v30, %v1163_v29  ;;  %v1403_v38 = vld [vmem:[%s2300_s0 + $0x134] sm:$0xf]  ;;  %v1189_v39 = vld [vmem:[%s2300_s0 + $0x138] sm:$0xf0]  ;;  %v1368_v40 = vld [vmem:[%s2300_s0 + $0x14] sm:$0xf0]  ;;  %v1056_v43 = vor.u32 %v1369_v35, %v1053_v36 }
   0xb   :  { %564 = vmatpush.bf16.msra.mxu0 %v1434_v10  ;;  %1442 = vmatpush.bf16.msra.mxu2 %v1434_v10  ;;  %v1171_v41 = vld [vmem:[%s2300_s0 + $0x110] sm:$0xf]  ;;  %v1400_v42 = vld [vmem:[%s2300_s0 + $0x114] sm:$0xf0]  ;;  %v1192_v44 = vor.u32 %v1403_v38, %v1189_v39  ;;  %v1044_v45 = vor.u32 %v1368_v40, %v1043_v37  ;;  %v1371_v47 = vld [vmem:[%s2300_s0 + $0x34] sm:$0xf] }
   0xc   :  { %v1172_v46 = vor.u32 %v1400_v42, %v1171_v41  ;;  %v1061_v48 = vld [vmem:[%s2300_s0 + $0x38] sm:$0xf0]  ;;  %v1051_v49 = vld [vmem:[%s2300_s0 + $0x20] sm:$0xf]  ;;  %v1405_v50 = vld [vmem:[%s2300_s0 + $0x144] sm:$0xf] }
   0xd   :  { %v1197_v51 = vld [vmem:[%s2300_s0 + $0x148] sm:$0xf0]  ;;  %v1370_v52 = vld [vmem:[%s2300_s0 + $0x24] sm:$0xf0]  ;;  %v1179_v53 = vld [vmem:[%s2300_s0 + $0x120] sm:$0xf]  ;;  %v1064_v55 = vor.u32 %v1371_v47, %v1061_v48 }
   0xe   :  { %738 = vmatpush.bf16.msra.mxu1 %v1437_v11  ;;  %1450 = vmatpush.bf16.msra.mxu3 %v1437_v11  ;;  %v1402_v54 = vld [vmem:[%s2300_s0 + $0x124] sm:$0xf0]  ;;  %v1200_v56 = vor.u32 %v1405_v50, %v1197_v51  ;;  %v1052_v57 = vor.u32 %v1370_v52, %v1051_v49  ;;  %v1373_v59 = vld [vmem:[%s2300_s0 + $0x44] sm:$0xf]  ;;  %v1069_v60 = vld [vmem:[%s2300_s0 + $0x48] sm:$0xf0] }
   0xf   :  { %565 = vmatpush.bf16.msra.mxu0 %v1433_v16  ;;  %1443 = vmatpush.bf16.msra.mxu2 %v1433_v16  ;;  %v1180_v58 = vor.u32 %v1402_v54, %v1179_v53  ;;  %v1059_v61 = vld [vmem:[%s2300_s0 + $0x30] sm:$0xf]  ;;  %v1407_v62 = vld [vmem:[%s2300_s0 + $0x154] sm:$0xf]  ;;  %v1205_v63 = vld [vmem:[%s2300_s0 + $0x158] sm:$0xf0]  ;;  %v1072_v3 = vor.u32 %v1373_v59, %v1069_v60 }
  0x10   :  { %v1372_v0 = vld [vmem:[%s2300_s0 + $0x34] sm:$0xf0]  ;;  %v1187_v1 = vld [vmem:[%s2300_s0 + $0x130] sm:$0xf]  ;;  %v1208_v4 = vor.u32 %v1407_v62, %v1205_v63  ;;  %v1375_v7 = vld [vmem:[%s2300_s0 + $0x54] sm:$0xf] }
  0x11   :  { %1333 = vmatmul.msk.bf16.vlgmr.msra.gmra.mxu1 %vm458_vm2, %v1040_v17  ;;  %1350 = vmatmul.msk.bf16.vlgmr.msra.gmra.mxu3 %vm458_vm2, %v1176_v18  ;;  %v1404_v2 = vld [vmem:[%s2300_s0 + $0x134] sm:$0xf0]  ;;  %v1060_v5 = vor.u32 %v1372_v0, %v1059_v61  ;;  %v1077_v8 = vld [vmem:[%s2300_s0 + $0x58] sm:$0xf0]  ;;  %v1067_v9 = vld [vmem:[%s2300_s0 + $0x40] sm:$0xf] }
  0x12   :  { %v1188_v6 = vor.u32 %v1404_v2, %v1187_v1  ;;  %v1409_v10 = vld [vmem:[%s2300_s0 + $0x164] sm:$0xf]  ;;  %v1213_v11 = vld [vmem:[%s2300_s0 + $0x168] sm:$0xf0]  ;;  %v1374_v12 = vld [vmem:[%s2300_s0 + $0x44] sm:$0xf0]  ;;  %v1080_v15 = vor.u32 %v1375_v7, %v1077_v8 }
  0x13   :  { %566 = vmatpush.bf16.msra.mxu0 %v1432_v19  ;;  %1444 = vmatpush.bf16.msra.mxu2 %v1432_v19  ;;  %v1195_v13 = vld [vmem:[%s2300_s0 + $0x140] sm:$0xf]  ;;  %v1406_v14 = vld [vmem:[%s2300_s0 + $0x144] sm:$0xf0]  ;;  %v1216_v16 = vor.u32 %v1409_v10, %v1213_v11  ;;  %v1068_v17 = vor.u32 %v1374_v12, %v1067_v9  ;;  %v1377_v19 = vld [vmem:[%s2300_s0 + $0x64] sm:$0xf] }
  0x14   :  { %v1196_v18 = vor.u32 %v1406_v14, %v1195_v13  ;;  %v1221_v23 = vld [vmem:[%s2300_s0 + $0x178] sm:$0xf0]  ;;  %v1376_v24 = vld [vmem:[%s2300_s0 + $0x54] sm:$0xf0]  ;;  %v1203_v25 = vld [vmem:[%s2300_s0 + $0x150] sm:$0xf] }
  0x15   :  { %v1408_v26 = vld [vmem:[%s2300_s0 + $0x154] sm:$0xf0]  ;;  %v1229_v35 = vld [vmem:[%s2300_s0 + $0x188] sm:$0xf0]  ;;  %v1378_v36 = vld [vmem:[%s2300_s0 + $0x64] sm:$0xf0] }
  0x16   :  { %v1204_v30 = vor.u32 %v1408_v26, %v1203_v25  ;;  %v1211_v37 = vld [vmem:[%s2300_s0 + $0x160] sm:$0xf]  ;;  %v1410_v38 = vld [vmem:[%s2300_s0 + $0x164] sm:$0xf0]  ;;  %v1237_v47 = vld [vmem:[%s2300_s0 + $0x198] sm:$0xf0] }
  0x17   :  { %567 = vmatpush.bf16.msra.mxu0 %v1431_v20  ;;  %1445 = vmatpush.bf16.msra.mxu2 %v1431_v20  ;;  %v1085_v20 = vld [vmem:[%s2300_s0 + $0x68] sm:$0xf0]  ;;  %v1212_v42 = vor.u32 %v1410_v38, %v1211_v37  ;;  %v1380_v48 = vld [vmem:[%s2300_s0 + $0x74] sm:$0xf0]  ;;  %v1219_v49 = vld [vmem:[%s2300_s0 + $0x170] sm:$0xf] }
  0x18   :  { %v1088_v27 = vor.u32 %v1377_v19, %v1085_v20  ;;  %v1412_v50 = vld [vmem:[%s2300_s0 + $0x174] sm:$0xf0]  ;;  %v1109_v59 = vld [vmem:[%s2300_s0 + $0x98] sm:$0xf0]  ;;  %v1099_v60 = vld [vmem:[%s2300_s0 + $0x80] sm:$0xf] }
  0x19   :  { %v1417_v61 = vld [vmem:[%s2300_s0 + $0x1a4] sm:$0xf]  ;;  %v1245_v62 = vld [vmem:[%s2300_s0 + $0x1a8] sm:$0xf0]  ;;  %v1382_v63 = vld [vmem:[%s2300_s0 + $0x84] sm:$0xf0] }
  0x1a   :  { %v1227_v0 = vld [vmem:[%s2300_s0 + $0x180] sm:$0xf]  ;;  %v1414_v1 = vld [vmem:[%s2300_s0 + $0x184] sm:$0xf0]  ;;  %v1100_v7 = vor.u32 %v1382_v63, %v1099_v60  ;;  %v1117_v19 = vld [vmem:[%s2300_s0 + $0xa8] sm:$0xf0] }
  0x1b   :  { %568 = vmatpush.bf16.msra.mxu0 %v1430_v21  ;;  %1446 = vmatpush.bf16.msra.mxu2 %v1430_v21  ;;  %v1075_v21 = vld [vmem:[%s2300_s0 + $0x50] sm:$0xf]  ;;  %v1761_v2 = vld [vmem:[%s2301_s2] ss:$0 sm:$0xff]  ;;  %v1228_v8 = vor.u32 %v1414_v1, %v1227_v0  ;;  %v1416_v26 = vld [vmem:[%s2300_s0 + $0x194] sm:$0xf0] }
  0x1c   :  { %v1076_v29 = vor.u32 %v1376_v24, %v1075_v21  ;;  %v1107_v21 = vld [vmem:[%s2300_s0 + $0x90] sm:$0xf]  ;;  %v1384_v24 = vld [vmem:[%s2300_s0 + $0x94] sm:$0xf0] }
  0x1d   :  { %v1235_v25 = vld [vmem:[%s2300_s0 + $0x190] sm:$0xf] }
  0x1f   :  { %569 = vmatpush.bf16.msra.mxu0 %v1429_v22  ;;  %1447 = vmatpush.bf16.msra.mxu2 %v1429_v22  ;;  %v1411_v22 = vld [vmem:[%s2300_s0 + $0x174] sm:$0xf] }
  0x20   :  { %v1224_v28 = vor.u32 %v1411_v22, %v1221_v23  ;;  %v1419_v22 = vld [vmem:[%s2300_s0 + $0x1b4] sm:$0xf]  ;;  %v1253_v23 = vld [vmem:[%s2300_s0 + $0x1b8] sm:$0xf0] }
  0x21   :  { %1334 = vmatmul.msk.bf16.gmra.mxu1 %vm458_vm2, %v1048_v31  ;;  %1351 = vmatmul.msk.bf16.gmra.mxu3 %vm458_vm2, %v1184_v32  ;;  %v1379_v31 = vld [vmem:[%s2300_s0 + $0x74] sm:$0xf]  ;;  %v1093_v32 = vld [vmem:[%s2300_s0 + $0x78] sm:$0xf0] }
  0x22   :  { %570 = vmatmul.bf16.vlgmr.msra.gmra.mxu0 %v1036_v33  ;;  %650 = vmatmul.bf16.vlgmr.msra.gmra.mxu2 %v1164_v34  ;;  %v1083_v33 = vld [vmem:[%s2300_s0 + $0x60] sm:$0xf]  ;;  %v1413_v34 = vld [vmem:[%s2300_s0 + $0x184] sm:$0xf]  ;;  %v1096_v39 = vor.u32 %v1379_v31, %v1093_v32  ;;  %v1256_v31 = vor.u32 %v1419_v22, %v1253_v23  ;;  %v1269_v22 = vld [vmem:[%s2300_s0 + $0x1d8] sm:$0xf0] }
  0x23   :  { %v1232_v40 = vor.u32 %v1413_v34, %v1229_v35  ;;  %v1084_v41 = vor.u32 %v1378_v36, %v1083_v33  ;;  %v1108_v33 = vor.u32 %v1384_v24, %v1107_v21  ;;  %v1236_v34 = vor.u32 %v1416_v26, %v1235_v25  ;;  %v1388_v23 = vld [vmem:[%s2300_s0 + $0xb4] sm:$0xf0]  ;;  %v1251_v24 = vld [vmem:[%s2300_s0 + $0x1b0] sm:$0xf] }
  0x24   :  { %v1420_v25 = vld [vmem:[%s2300_s0 + $0x1b4] sm:$0xf0] }
  0x31   :  { %1335 = vmatmul.msk.bf16.gmra.mxu1 %vm458_vm2, %v1056_v43  ;;  %1352 = vmatmul.msk.bf16.gmra.mxu3 %vm458_vm2, %v1192_v44  ;;  %v1381_v43 = vld [vmem:[%s2300_s0 + $0x84] sm:$0xf]  ;;  %v1101_v44 = vld [vmem:[%s2300_s0 + $0x88] sm:$0xf0] }
  0x32   :  { %575 = vmatmul.bf16.gmra.mxu0 %v1044_v45  ;;  %655 = vmatmul.bf16.gmra.mxu2 %v1172_v46  ;;  %v1091_v45 = vld [vmem:[%s2300_s0 + $0x70] sm:$0xf]  ;;  %v1415_v46 = vld [vmem:[%s2300_s0 + $0x194] sm:$0xf]  ;;  %v1104_v51 = vor.u32 %v1381_v43, %v1101_v44 }
  0x33   :  { %v1240_v52 = vor.u32 %v1415_v46, %v1237_v47  ;;  %v1092_v54 = vor.u32 %v1380_v48, %v1091_v45  ;;  %v1387_v46 = vld [vmem:[%s2300_s0 + $0xb4] sm:$0xf]  ;;  %v1125_v47 = vld [vmem:[%s2300_s0 + $0xb8] sm:$0xf0]  ;;  %v1115_v48 = vld [vmem:[%s2300_s0 + $0xa0] sm:$0xf] }
  0x41   :  { %1336 = vmatmul.msk.bf16.gmra.mxu1 %vm458_vm2, %v1064_v55  ;;  %1353 = vmatmul.msk.bf16.gmra.mxu3 %vm458_vm2, %v1200_v56  ;;  %v1220_v55 = vor.u32 %v1412_v50, %v1219_v49 }
  0x42   :  { %580 = vmatmul.bf16.gmra.mxu0 %v1052_v57  ;;  %660 = vmatmul.bf16.gmra.mxu2 %v1180_v58  ;;  %v1383_v58 = vld [vmem:[%s2300_s0 + $0x94] sm:$0xf] }
  0x51   :  { %1337 = vmatmul.msk.bf16.gmra.mxu1 %vm458_vm2, %v1072_v3  ;;  %1354 = vmatmul.msk.bf16.gmra.mxu3 %vm458_vm2, %v1208_v4  ;;  %v1112_v4 = vor.u32 %v1383_v58, %v1109_v59  ;;  %v1128_v59 = vor.u32 %v1387_v46, %v1125_v47 }
  0x52   :  { %585 = vmatmul.bf16.gmra.mxu0 %v1060_v5  ;;  %665 = vmatmul.bf16.gmra.mxu2 %v1188_v6  ;;  %v1248_v5 = vor.u32 %v1417_v61, %v1245_v62 }
  0x61   :  { %1338 = vmatmul.msk.bf16.gmra.mxu1 %vm458_vm2, %v1080_v15  ;;  %1355 = vmatmul.msk.bf16.gmra.mxu3 %vm458_vm2, %v1216_v16 }
  0x62   :  { %590 = vmatmul.bf16.gmra.mxu0 %v1068_v17  ;;  %670 = vmatmul.bf16.gmra.mxu2 %v1196_v18  ;;  %v1385_v18 = vld [vmem:[%s2300_s0 + $0xa4] sm:$0xf] }
  0x71   :  { %1339 = vmatmul.msk.bf16.gmra.mxu1 %vm458_vm2, %v1088_v27  ;;  %1356 = vmatmul.msk.bf16.gmra.mxu3 %vm458_vm2, %v1224_v28 }
  0x72   :  { %595 = vmatmul.bf16.gmra.mxu0 %v1076_v29  ;;  %675 = vmatmul.bf16.gmra.mxu2 %v1204_v30  ;;  %v1120_v30 = vor.u32 %v1385_v18, %v1117_v19  ;;  %v1133_v18 = vld [vmem:[%s2300_s0 + $0xc8] sm:$0xf0]  ;;  %v1123_v19 = vld [vmem:[%s2300_s0 + $0xb0] sm:$0xf] }
  0x81   :  { %1340 = vmatmul.msk.bf16.gmra.mxu1 %vm458_vm2, %v1096_v39  ;;  %1357 = vmatmul.msk.bf16.gmra.mxu3 %vm458_vm2, %v1232_v40 }
  0x82   :  { %600 = vmatmul.bf16.gmra.mxu0 %v1084_v41  ;;  %680 = vmatmul.bf16.gmra.mxu2 %v1212_v42 }
  0x8e   :  { %v740_v53 = vpop.f32.mrf.mxu1 }
  0x91   :  { %1341 = vmatmul.msk.bf16.gmra.mxu1 %vm458_vm2, %v1104_v51  ;;  %1358 = vmatmul.msk.bf16.gmra.mxu3 %vm458_vm2, %v1240_v52  ;;  %v1421_v51 = vld [vmem:[%s2300_s0 + $0x1c4] sm:$0xf]  ;;  %v1261_v52 = vld [vmem:[%s2300_s0 + $0x1c8] sm:$0xf0] }
  0x92   :  { %605 = vmatmul.bf16.gmra.mxu0 %v1092_v54  ;;  %685 = vmatmul.bf16.gmra.mxu2 %v1220_v55  ;;  %v1243_v54 = vld [vmem:[%s2300_s0 + $0x1a0] sm:$0xf]  ;;  %v1418_v55 = vld [vmem:[%s2300_s0 + $0x1a4] sm:$0xf0]  ;;  %v1264_v60 = vor.u32 %v1421_v51, %v1261_v52  ;;  %v1141_v51 = vld [vmem:[%s2300_s0 + $0xd8] sm:$0xf0] }
  0x93   :  { %v1244_v0 = vor.u32 %v1418_v55, %v1243_v54  ;;  %v1131_v52 = vld [vmem:[%s2300_s0 + $0xc0] sm:$0xf]  ;;  %v1277_v55 = vld [vmem:[%s2300_s0 + $0x1e8] sm:$0xf0] }
  0x94   :  { %v1732_v56 = vpop.f32.mrf.mxu3 }
  0x96   :  { %v742_v57 = vpop.f32.mrf.mxu1 }
  0x9c   :  { %v1763_v3 = vpop.f32.mrf.mxu3 }
  0x9e   :  { %v745_v6 = vpop.f32.mrf.mxu1 }
  0x9f   :  { %v571_v9 = vpop.f32.mrf.mxu0 }
  0xa0   :  { %v572_v10 = vadd.f32 %v1761_v2, %v571_v9 }
  0xa1   :  { %1342 = vmatmul.msk.bf16.gmra.mxu1 %vm458_vm2, %v1112_v4  ;;  %1359 = vmatmul.msk.bf16.gmra.mxu3 %vm458_vm2, %v1248_v5 }
  0xa2   :  { %v741_v11 = vadd.f32 %v740_v53, %v572_v10  ;;  %610 = vmatmul.bf16.gmra.mxu0 %v1100_v7  ;;  %690 = vmatmul.bf16.gmra.mxu2 %v1228_v8  ;;  %v1386_v53 = vld [vmem:[%s2300_s0 + $0xa4] sm:$0xf0] }
  0xa3   :  { %v1116_v63 = vor.u32 %v1386_v53, %v1115_v48 }
  0xa4   :  { %v900_v12 = vmax.f32 %v741_v11, 0.0  ;;  %v1768_v13 = vpop.f32.mrf.mxu3 }
  0xa5   :  { %v1770_v14 = vpop.f32.mrf.mxu2 }
  0xa6   :  { %965 = vst.msk [vmem:[%s2302_s3] sm:$0xff] %vm964_vm3, %v900_v12  ;;  %v747_v15 = vpop.f32.mrf.mxu1 }
  0xa7   :  { %v573_v16 = vpop.f32.mrf.mxu0 }
  0xa8   :  { %v574_v17 = vadd.f32 %v1761_v2, %v573_v16 }
  0xaa   :  { %v743_v20 = vadd.f32 %v742_v57, %v574_v17  ;;  %v1389_v17 = vld [vmem:[%s2300_s0 + $0xc4] sm:$0xf] }
  0xac   :  { %v901_v27 = vmax.f32 %v743_v20, 0.0  ;;  %v1801_v28 = vpop.f32.mrf.mxu3 }
  0xad   :  { %v1803_v29 = vpop.f32.mrf.mxu2 }
  0xae   :  { %966 = vst.msk [vmem:[%s2302_s3 + $0x8] sm:$0xff] %vm964_vm3, %v901_v27  ;;  %v750_v32 = vpop.f32.mrf.mxu1 }
  0xaf   :  { %v576_v35 = vpop.f32.mrf.mxu0 }
  0xb0   :  { %v577_v36 = vadd.f32 %v1761_v2, %v576_v35  ;;  %v1124_v35 = vor.u32 %v1388_v23, %v1123_v19 }
  0xb1   :  { %1343 = vmatmul.msk.bf16.gmra.mxu1 %vm458_vm2, %v1120_v30  ;;  %1360 = vmatmul.msk.bf16.gmra.mxu3 %vm458_vm2, %v1256_v31  ;;  %v1136_v31 = vor.u32 %v1389_v17, %v1133_v18 }
  0xb2   :  { %v746_v37 = vadd.f32 %v745_v6, %v577_v36  ;;  %615 = vmatmul.bf16.gmra.mxu0 %v1108_v33  ;;  %695 = vmatmul.bf16.gmra.mxu2 %v1236_v34  ;;  %v1252_v36 = vor.u32 %v1420_v25, %v1251_v24  ;;  %v1285_v25 = vld [vmem:[%s2300_s0 + $0x1f8] sm:$0xf0] }
  0xb4   :  { %v902_v38 = vmax.f32 %v746_v37, 0.0  ;;  %v1812_v39 = vpop.f32.mrf.mxu3 }
  0xb5   :  { %v656_v40 = vpop.f32.mrf.mxu2 }
  0xb6   :  { %967 = vst.msk [vmem:[%s2302_s3 + $0x10] sm:$0xff] %vm964_vm3, %v902_v38  ;;  %v657_v41 = vadd.f32 %v1761_v2, %v656_v40  ;;  %v752_v42 = vpop.f32.mrf.mxu1 }
  0xb7   :  { %v578_v43 = vpop.f32.mrf.mxu0 }
  0xb8   :  { %v826_v44 = vadd.f32 %v1732_v56, %v657_v41  ;;  %v579_v45 = vadd.f32 %v1761_v2, %v578_v43 }
  0xba   :  { %v934_v49 = vmax.f32 %v826_v44, 0.0  ;;  %v748_v50 = vadd.f32 %v747_v15, %v579_v45 }
  0xbc   :  { %999 = vst.msk [vmem:[%s2302_s3 + $0x110] sm:$0xff] %vm964_vm3, %v934_v49  ;;  %v903_v56 = vmax.f32 %v748_v50, 0.0  ;;  %v1849_v57 = vpop.f32.mrf.mxu3  ;;  %v1391_v50 = vld [vmem:[%s2300_s0 + $0xd4] sm:$0xf] }
  0xbd   :  { %v658_v58 = vpop.f32.mrf.mxu2 }
  0xbe   :  { %968 = vst.msk [vmem:[%s2302_s3 + $0x18] sm:$0xff] %vm964_vm3, %v903_v56  ;;  %v659_v61 = vadd.f32 %v1761_v2, %v658_v58  ;;  %v755_v62 = vpop.f32.mrf.mxu1  ;;  %v1390_v56 = vld [vmem:[%s2300_s0 + $0xc4] sm:$0xf0]  ;;  %v1259_v58 = vld [vmem:[%s2300_s0 + $0x1c0] sm:$0xf] }
  0xbf   :  { %v581_v1 = vpop.f32.mrf.mxu0 }
  0xc0   :  { %v828_v4 = vadd.f32 %v1763_v3, %v659_v61  ;;  %v582_v5 = vadd.f32 %v1761_v2, %v581_v1 }
  0xc1   :  { %1344 = vmatmul.msk.bf16.gmra.mxu1 %vm458_vm2, %v1128_v59  ;;  %1361 = vmatmul.msk.bf16.gmra.mxu3 %vm458_vm2, %v1264_v60  ;;  %v1422_v59 = vld [vmem:[%s2300_s0 + $0x1c4] sm:$0xf0] }
  0xc2   :  { %v935_v6 = vmax.f32 %v828_v4, 0.0  ;;  %v751_v7 = vadd.f32 %v750_v32, %v582_v5  ;;  %620 = vmatmul.bf16.gmra.mxu0 %v1116_v63  ;;  %700 = vmatmul.bf16.gmra.mxu2 %v1244_v0  ;;  %v1144_v63 = vor.u32 %v1391_v50, %v1141_v51  ;;  %v1132_v5 = vor.u32 %v1390_v56, %v1131_v52  ;;  %v1157_v56 = vld [vmem:[%s2300_s0 + $0xf8] sm:$0xf0] }
  0xc4   :  { %1000 = vst.msk [vmem:[%s2302_s3 + $0x118] sm:$0xff] %vm964_vm3, %v935_v6  ;;  %v904_v8 = vmax.f32 %v751_v7, 0.0  ;;  %v1864_v9 = vpop.f32.mrf.mxu3  ;;  %v1260_v6 = vor.u32 %v1422_v59, %v1259_v58  ;;  %v1147_v58 = vld [vmem:[%s2300_s0 + $0xe0] sm:$0xf] }
  0xc5   :  { %v661_v10 = vpop.f32.mrf.mxu2  ;;  %v1275_v59 = vld [vmem:[%s2300_s0 + $0x1e0] sm:$0xf] }
  0xc6   :  { %969 = vst.msk [vmem:[%s2302_s3 + $0x20] sm:$0xff] %vm964_vm3, %v904_v8  ;;  %v662_v3 = vadd.f32 %v1761_v2, %v661_v10  ;;  %v757_v11 = vpop.f32.mrf.mxu1 }
  0xc7   :  { %v583_v12 = vpop.f32.mrf.mxu0 }
  0xc8   :  { %v831_v15 = vadd.f32 %v1768_v13, %v662_v3  ;;  %v584_v16 = vadd.f32 %v1761_v2, %v583_v12  ;;  %v1423_v13 = vld [vmem:[%s2300_s0 + $0x1d4] sm:$0xf] }
  0xc9   :  { %v1272_v32 = vor.u32 %v1423_v13, %v1269_v22  ;;  %v1149_v13 = vld [vmem:[%s2300_s0 + $0xe8] sm:$0xf0]  ;;  %v1139_v22 = vld [vmem:[%s2300_s0 + $0xd0] sm:$0xf] }
  0xca   :  { %v936_v20 = vmax.f32 %v831_v15, 0.0  ;;  %v753_v21 = vadd.f32 %v752_v42, %v584_v16 }
  0xcc   :  { %1001 = vst.msk [vmem:[%s2302_s3 + $0x120] sm:$0xff] %vm964_vm3, %v936_v20  ;;  %v905_v26 = vmax.f32 %v753_v21, 0.0  ;;  %v1901_v27 = vpop.f32.mrf.mxu3  ;;  %v1393_v21 = vld [vmem:[%s2300_s0 + $0xe4] sm:$0xf] }
  0xcd   :  { %v663_v30 = vpop.f32.mrf.mxu2 }
  0xce   :  { %970 = vst.msk [vmem:[%s2302_s3 + $0x28] sm:$0xff] %vm964_vm3, %v905_v26  ;;  %v664_v33 = vadd.f32 %v1761_v2, %v663_v30  ;;  %v760_v34 = vpop.f32.mrf.mxu1  ;;  %v1392_v26 = vld [vmem:[%s2300_s0 + $0xd4] sm:$0xf0]  ;;  %v1267_v30 = vld [vmem:[%s2300_s0 + $0x1d0] sm:$0xf] }
  0xcf   :  { %v586_v37 = vpop.f32.mrf.mxu0 }
  0xd0   :  { %v833_v38 = vadd.f32 %v1801_v28, %v664_v33  ;;  %v587_v40 = vadd.f32 %v1761_v2, %v586_v37 }
  0xd1   :  { %1345 = vmatmul.msk.bf16.gmra.mxu1 %vm458_vm2, %v1136_v31  ;;  %1362 = vmatmul.msk.bf16.gmra.mxu3 %vm458_vm2, %v1272_v32  ;;  %v1424_v31 = vld [vmem:[%s2300_s0 + $0x1d4] sm:$0xf0] }
  0xd2   :  { %v937_v41 = vmax.f32 %v833_v38, 0.0  ;;  %v756_v42 = vadd.f32 %v755_v62, %v587_v40  ;;  %625 = vmatmul.bf16.gmra.mxu0 %v1124_v35  ;;  %705 = vmatmul.bf16.gmra.mxu2 %v1252_v36  ;;  %v1152_v35 = vor.u32 %v1393_v21, %v1149_v13  ;;  %v1140_v40 = vor.u32 %v1392_v26, %v1139_v22  ;;  %v1397_v21 = vld [vmem:[%s2300_s0 + $0x104] sm:$0xf]  ;;  %v1428_v26 = vld [vmem:[%s2300_s0 + $0x1f4] sm:$0xf0] }
  0xd4   :  { %1002 = vst.msk [vmem:[%s2302_s3 + $0x128] sm:$0xff] %vm964_vm3, %v937_v41  ;;  %v906_v43 = vmax.f32 %v756_v42, 0.0  ;;  %v1916_v44 = vpop.f32.mrf.mxu3  ;;  %v1268_v41 = vor.u32 %v1424_v31, %v1267_v30 }
  0xd5   :  { %v666_v45 = vpop.f32.mrf.mxu2 }
  0xd6   :  { %971 = vst.msk [vmem:[%s2302_s3 + $0x30] sm:$0xff] %vm964_vm3, %v906_v43  ;;  %v667_v28 = vadd.f32 %v1761_v2, %v666_v45  ;;  %v762_v46 = vpop.f32.mrf.mxu1 }
  0xd7   :  { %v588_v47 = vpop.f32.mrf.mxu0 }
  0xd8   :  { %v836_v48 = vadd.f32 %v1812_v39, %v667_v28  ;;  %v589_v49 = vadd.f32 %v1761_v2, %v588_v47  ;;  %v1425_v39 = vld [vmem:[%s2300_s0 + $0x1e4] sm:$0xf] }
  0xd9   :  { %v1280_v0 = vor.u32 %v1425_v39, %v1277_v55 }
  0xda   :  { %v938_v53 = vmax.f32 %v836_v48, 0.0  ;;  %v758_v54 = vadd.f32 %v757_v11, %v589_v49 }
  0xdc   :  { %1003 = vst.msk [vmem:[%s2302_s3 + $0x130] sm:$0xff] %vm964_vm3, %v938_v53  ;;  %v907_v60 = vmax.f32 %v758_v54, 0.0  ;;  %v1953_v61 = vpop.f32.mrf.mxu3  ;;  %v1395_v54 = vld [vmem:[%s2300_s0 + $0xf4] sm:$0xf] }
  0xdd   :  { %v668_v62 = vpop.f32.mrf.mxu2 }
  0xde   :  { %972 = vst.msk [vmem:[%s2302_s3 + $0x38] sm:$0xff] %vm964_vm3, %v907_v60  ;;  %v669_v1 = vadd.f32 %v1761_v2, %v668_v62  ;;  %v765_v4 = vpop.f32.mrf.mxu1  ;;  %v1426_v60 = vld [vmem:[%s2300_s0 + $0x1e4] sm:$0xf0] }
  0xdf   :  { %v591_v7 = vpop.f32.mrf.mxu0 }
  0xe0   :  { %v838_v8 = vadd.f32 %v1849_v57, %v669_v1  ;;  %v592_v10 = vadd.f32 %v1761_v2, %v591_v7 }
  0xe1   :  { %1346 = vmatmul.msk.bf16.gmra.mxu1 %vm458_vm2, %v1144_v63  ;;  %1363 = vmatmul.msk.bf16.gmra.mxu3 %vm458_vm2, %v1280_v0  ;;  %v1160_v0 = vor.u32 %v1395_v54, %v1157_v56 }
  0xe2   :  { %v939_v3 = vmax.f32 %v838_v8, 0.0  ;;  %v761_v11 = vadd.f32 %v760_v34, %v592_v10  ;;  %630 = vmatmul.bf16.gmra.mxu0 %v1132_v5  ;;  %710 = vmatmul.bf16.gmra.mxu2 %v1260_v6  ;;  %v1276_v6 = vor.u32 %v1426_v60, %v1275_v59 }
  0xe4   :  { %1004 = vst.msk [vmem:[%s2302_s3 + $0x138] sm:$0xff] %vm964_vm3, %v939_v3  ;;  %v908_v12 = vmax.f32 %v761_v11, 0.0  ;;  %v1968_v15 = vpop.f32.mrf.mxu3 }
  0xe5   :  { %v671_v16 = vpop.f32.mrf.mxu2 }
  0xe6   :  { %973 = vst.msk [vmem:[%s2302_s3 + $0x40] sm:$0xff] %vm964_vm3, %v908_v12  ;;  %v672_v57 = vadd.f32 %v1761_v2, %v671_v16  ;;  %v767_v17 = vpop.f32.mrf.mxu1 }
  0xe7   :  { %v593_v18 = vpop.f32.mrf.mxu0 }
  0xe8   :  { %v841_v19 = vadd.f32 %v1864_v9, %v672_v57  ;;  %v594_v20 = vadd.f32 %v1761_v2, %v593_v18  ;;  %v1427_v9 = vld [vmem:[%s2300_s0 + $0x1f4] sm:$0xf] }
  0xe9   :  { %v1288_v36 = vor.u32 %v1427_v9, %v1285_v25  ;;  %v1155_v9 = vld [vmem:[%s2300_s0 + $0xf0] sm:$0xf] }
  0xea   :  { %v940_v23 = vmax.f32 %v841_v19, 0.0  ;;  %v763_v24 = vadd.f32 %v762_v46, %v594_v20  ;;  %v1283_v25 = vld [vmem:[%s2300_s0 + $0x1f0] sm:$0xf] }
  0xec   :  { %1005 = vst.msk [vmem:[%s2302_s3 + $0x140] sm:$0xff] %vm964_vm3, %v940_v23  ;;  %v909_v32 = vmax.f32 %v763_v24, 0.0  ;;  %v2005_v33 = vpop.f32.mrf.mxu3  ;;  %v1165_v24 = vld [vmem:[%s2300_s0 + $0x108] sm:$0xf0] }
  0xed   :  { %v673_v34 = vpop.f32.mrf.mxu2 }
  0xee   :  { %974 = vst.msk [vmem:[%s2302_s3 + $0x48] sm:$0xff] %vm964_vm3, %v909_v32  ;;  %v674_v37 = vadd.f32 %v1761_v2, %v673_v34  ;;  %v770_v38 = vpop.f32.mrf.mxu1  ;;  %v1168_v32 = vor.u32 %v1397_v21, %v1165_v24 }
  0xef   :  { %v596_v42 = vpop.f32.mrf.mxu0 }
  0xf0   :  { %v843_v43 = vadd.f32 %v1901_v27, %v674_v37  ;;  %v597_v45 = vadd.f32 %v1761_v2, %v596_v42  ;;  %v1284_v37 = vor.u32 %v1428_v26, %v1283_v25 }
  0xf1   :  { %1347 = vmatmul.msk.bf16.gmra.mxu1 %vm458_vm2, %v1152_v35  ;;  %1364 = vmatmul.msk.bf16.gmra.mxu3 %vm458_vm2, %v1288_v36 }
  0xf2   :  { %v941_v28 = vmax.f32 %v843_v43, 0.0  ;;  %v766_v46 = vadd.f32 %v765_v4, %v597_v45  ;;  %635 = vmatmul.bf16.gmra.mxu0 %v1140_v40  ;;  %715 = vmatmul.bf16.gmra.mxu2 %v1268_v41 }
  0xf4   :  { %1006 = vst.msk [vmem:[%s2302_s3 + $0x148] sm:$0xff] %vm964_vm3, %v941_v28  ;;  %v910_v47 = vmax.f32 %v766_v46, 0.0  ;;  %v2020_v49 = vpop.f32.mrf.mxu3 }
  0xf5   :  { %v676_v48 = vpop.f32.mrf.mxu2 }
  0xf6   :  { %975 = vst.msk [vmem:[%s2302_s3 + $0x50] sm:$0xff] %vm964_vm3, %v910_v47  ;;  %v677_v27 = vadd.f32 %v1761_v2, %v676_v48  ;;  %v772_v50 = vpop.f32.mrf.mxu1 }
  0xf7   :  { %v598_v51 = vpop.f32.mrf.mxu0 }
  0xf8   :  { %v846_v52 = vadd.f32 %v1916_v44, %v677_v27  ;;  %v599_v53 = vadd.f32 %v1761_v2, %v598_v51  ;;  %v1394_v44 = vld [vmem:[%s2300_s0 + $0xe4] sm:$0xf0] }
  0xf9   :  { %v1148_v5 = vor.u32 %v1394_v44, %v1147_v58 }
  0xfa   :  { %v942_v39 = vmax.f32 %v846_v52, 0.0  ;;  %v768_v55 = vadd.f32 %v767_v17, %v599_v53 }
  0xfc   :  { %1007 = vst.msk [vmem:[%s2302_s3 + $0x150] sm:$0xff] %vm964_vm3, %v942_v39  ;;  %v911_v62 = vmax.f32 %v768_v55, 0.0  ;;  %v2056_v8 = vpop.f32.mrf.mxu3 }
  0xfd   :  { %v678_v63 = vpop.f32.mrf.mxu2 }
  0xfe   :  { %976 = vst.msk [vmem:[%s2302_s3 + $0x58] sm:$0xff] %vm964_vm3, %v911_v62  ;;  %v679_v1 = vadd.f32 %v1761_v2, %v678_v63  ;;  %v775_v4 = vpop.f32.mrf.mxu1 }
  0xff   :  { %v601_v7 = vpop.f32.mrf.mxu0 }
 0x100   :  { %v848_v10 = vadd.f32 %v1953_v61, %v679_v1  ;;  %v602_v3 = vadd.f32 %v1761_v2, %v601_v7 }
 0x101   :  { %1348 = vmatmul.msk.bf16.gmra.mxu1 %vm458_vm2, %v1160_v0 }
 0x102   :  { %v943_v11 = vmax.f32 %v848_v10, 0.0  ;;  %v771_v12 = vadd.f32 %v770_v38, %v602_v3  ;;  %640 = vmatmul.bf16.gmra.mxu0 %v1148_v5  ;;  %720 = vmatmul.bf16.gmra.mxu2 %v1276_v6 }
 0x104   :  { %1008 = vst.msk [vmem:[%s2302_s3 + $0x158] sm:$0xff] %vm964_vm3, %v943_v11  ;;  %v912_v16 = vmax.f32 %v771_v12, 0.0  ;;  %v860_v13 = vpop.f32.mrf.mxu3 }
 0x105   :  { %v681_v57 = vpop.f32.mrf.mxu2 }
 0x106   :  { %977 = vst.msk [vmem:[%s2302_s3 + $0x60] sm:$0xff] %vm964_vm3, %v912_v16  ;;  %v682_v61 = vadd.f32 %v1761_v2, %v681_v57  ;;  %v777_v17 = vpop.f32.mrf.mxu1 }
 0x107   :  { %v603_v18 = vpop.f32.mrf.mxu0 }
 0x108   :  { %v851_v19 = vadd.f32 %v1968_v15, %v682_v61  ;;  %v604_v20 = vadd.f32 %v1761_v2, %v603_v18  ;;  %v1396_v15 = vld [vmem:[%s2300_s0 + $0xf4] sm:$0xf0] }
 0x109   :  { %v1156_v36 = vor.u32 %v1396_v15, %v1155_v9 }
 0x10a   :  { %v944_v22 = vmax.f32 %v851_v19, 0.0  ;;  %v773_v23 = vadd.f32 %v772_v50, %v604_v20 }
 0x10c   :  { %1009 = vst.msk [vmem:[%s2302_s3 + $0x160] sm:$0xff] %vm964_vm3, %v944_v22  ;;  %v913_v30 = vmax.f32 %v773_v23, 0.0  ;;  %v862_v45 = vpop.f32.mrf.mxu3 }
 0x10d   :  { %v683_v31 = vpop.f32.mrf.mxu2 }
 0x10e   :  { %978 = vst.msk [vmem:[%s2302_s3 + $0x68] sm:$0xff] %vm964_vm3, %v913_v30  ;;  %v684_v34 = vadd.f32 %v1761_v2, %v683_v31  ;;  %v780_v35 = vpop.f32.mrf.mxu1 }
 0x10f   :  { %v606_v38 = vpop.f32.mrf.mxu0 }
 0x110   :  { %v853_v40 = vadd.f32 %v2005_v33, %v684_v34  ;;  %v607_v41 = vadd.f32 %v1761_v2, %v606_v38 }
 0x111   :  { %1349 = vmatmul.msk.bf16.gmra.mxu1 %vm458_vm2, %v1168_v32 }
 0x112   :  { %v945_v42 = vmax.f32 %v853_v40, 0.0  ;;  %v776_v43 = vadd.f32 %v775_v4, %v607_v41  ;;  %645 = vmatmul.bf16.gmra.mxu0 %v1156_v36  ;;  %725 = vmatmul.bf16.gmra.mxu2 %v1284_v37 }
 0x114   :  { %1010 = vst.msk [vmem:[%s2302_s3 + $0x168] sm:$0xff] %vm964_vm3, %v945_v42  ;;  %v914_v28 = vmax.f32 %v776_v43, 0.0  ;;  %v865_v39 = vpop.f32.mrf.mxu3 }
 0x115   :  { %v686_v46 = vpop.f32.mrf.mxu2 }
 0x116   :  { %979 = vst.msk [vmem:[%s2302_s3 + $0x70] sm:$0xff] %vm964_vm3, %v914_v28  ;;  %v687_v33 = vadd.f32 %v1761_v2, %v686_v46  ;;  %v782_v47 = vpop.f32.mrf.mxu1 }
 0x117   :  { %v608_v48 = vpop.f32.mrf.mxu0 }
 0x118   :  { %v856_v27 = vadd.f32 %v2020_v49, %v687_v33  ;;  %v609_v50 = vadd.f32 %v1761_v2, %v608_v48 }
 0x11a   :  { %v946_v51 = vmax.f32 %v856_v27, 0.0  ;;  %v778_v52 = vadd.f32 %v777_v17, %v609_v50 }
 0x11c   :  { %1011 = vst.msk [vmem:[%s2302_s3 + $0x170] sm:$0xff] %vm964_vm3, %v946_v51  ;;  %v915_v53 = vmax.f32 %v778_v52, 0.0  ;;  %v867_v5 = vpop.f32.mrf.mxu3 }
 0x11d   :  { %v688_v54 = vpop.f32.mrf.mxu2 }
 0x11e   :  { %980 = vst.msk [vmem:[%s2302_s3 + $0x78] sm:$0xff] %vm964_vm3, %v915_v53  ;;  %v689_v55 = vadd.f32 %v1761_v2, %v688_v54  ;;  %v785_v49 = vpop.f32.mrf.mxu1 }
 0x11f   :  { %v611_v56 = vpop.f32.mrf.mxu0 }
 0x120   :  { %v858_v58 = vadd.f32 %v2056_v8, %v689_v55  ;;  %v612_v44 = vadd.f32 %v1761_v2, %v611_v56 }
 0x122   :  { %v947_v59 = vmax.f32 %v858_v58, 0.0  ;;  %v781_v60 = vadd.f32 %v780_v35, %v612_v44 }
 0x124   :  { %1012 = vst.msk [vmem:[%s2302_s3 + $0x178] sm:$0xff] %vm964_vm3, %v947_v59  ;;  %v916_v62 = vmax.f32 %v781_v60, 0.0  ;;  %v870_v18 = vpop.f32.mrf.mxu3 }
 0x125   :  { %v691_v63 = vpop.f32.mrf.mxu2 }
 0x126   :  { %981 = vst.msk [vmem:[%s2302_s3 + $0x80] sm:$0xff] %vm964_vm3, %v916_v62  ;;  %v692_v0 = vadd.f32 %v1761_v2, %v691_v63  ;;  %v787_v1 = vpop.f32.mrf.mxu1 }
 0x127   :  { %v613_v4 = vpop.f32.mrf.mxu0 }
 0x128   :  { %v861_v6 = vadd.f32 %v860_v13, %v692_v0  ;;  %v614_v7 = vadd.f32 %v1761_v2, %v613_v4 }
 0x12a   :  { %v948_v8 = vmax.f32 %v861_v6, 0.0  ;;  %v783_v10 = vadd.f32 %v782_v47, %v614_v7 }
 0x12c   :  { %1013 = vst.msk [vmem:[%s2302_s3 + $0x180] sm:$0xff] %vm964_vm3, %v948_v8  ;;  %v917_v3 = vmax.f32 %v783_v10, 0.0  ;;  %v872_v30 = vpop.f32.mrf.mxu3 }
 0x12d   :  { %v693_v11 = vpop.f32.mrf.mxu2 }
 0x12e   :  { %982 = vst.msk [vmem:[%s2302_s3 + $0x88] sm:$0xff] %vm964_vm3, %v917_v3  ;;  %v694_v12 = vadd.f32 %v1761_v2, %v693_v11  ;;  %v790_v16 = vpop.f32.mrf.mxu1 }
 0x12f   :  { %v616_v57 = vpop.f32.mrf.mxu0 }
 0x130   :  { %v863_v61 = vadd.f32 %v862_v45, %v694_v12  ;;  %v617_v17 = vadd.f32 %v1761_v2, %v616_v57 }
 0x132   :  { %v949_v19 = vmax.f32 %v863_v61, 0.0  ;;  %v786_v20 = vadd.f32 %v785_v49, %v617_v17 }
 0x134   :  { %1014 = vst.msk [vmem:[%s2302_s3 + $0x188] sm:$0xff] %vm964_vm3, %v949_v19  ;;  %v918_v21 = vmax.f32 %v786_v20, 0.0  ;;  %v875_v45 = vpop.f32.mrf.mxu3 }
 0x135   :  { %v696_v13 = vpop.f32.mrf.mxu2 }
 0x136   :  { %983 = vst.msk [vmem:[%s2302_s3 + $0x90] sm:$0xff] %vm964_vm3, %v918_v21  ;;  %v697_v22 = vadd.f32 %v1761_v2, %v696_v13  ;;  %v792_v23 = vpop.f32.mrf.mxu1 }
 0x137   :  { %v618_v24 = vpop.f32.mrf.mxu0 }
 0x138   :  { %v866_v9 = vadd.f32 %v865_v39, %v697_v22  ;;  %v619_v15 = vadd.f32 %v1761_v2, %v618_v24 }
 0x13a   :  { %v950_v25 = vmax.f32 %v866_v9, 0.0  ;;  %v788_v26 = vadd.f32 %v787_v1, %v619_v15 }
 0x13c   :  { %1015 = vst.msk [vmem:[%s2302_s3 + $0x190] sm:$0xff] %vm964_vm3, %v950_v25  ;;  %v919_v31 = vmax.f32 %v788_v26, 0.0  ;;  %v877_v55 = vpop.f32.mrf.mxu3 }
 0x13d   :  { %v698_v32 = vpop.f32.mrf.mxu2 }
 0x13e   :  { %984 = vst.msk [vmem:[%s2302_s3 + $0x98] sm:$0xff] %vm964_vm3, %v919_v31  ;;  %v699_v34 = vadd.f32 %v1761_v2, %v698_v32  ;;  %v795_v35 = vpop.f32.mrf.mxu1 }
 0x13f   :  { %v621_v36 = vpop.f32.mrf.mxu0 }
 0x140   :  { %v868_v37 = vadd.f32 %v867_v5, %v699_v34  ;;  %v622_v38 = vadd.f32 %v1761_v2, %v621_v36 }
 0x142   :  { %v951_v40 = vmax.f32 %v868_v37, 0.0  ;;  %v791_v41 = vadd.f32 %v790_v16, %v622_v38 }
 0x144   :  { %1016 = vst.msk [vmem:[%s2302_s3 + $0x198] sm:$0xff] %vm964_vm3, %v951_v40  ;;  %v920_v42 = vmax.f32 %v791_v41, 0.0  ;;  %v880_v5 = vpop.f32.mrf.mxu3 }
 0x145   :  { %v701_v43 = vpop.f32.mrf.mxu2 }
 0x146   :  { %985 = vst.msk [vmem:[%s2302_s3 + $0xa0] sm:$0xff] %vm964_vm3, %v920_v42  ;;  %v702_v28 = vadd.f32 %v1761_v2, %v701_v43  ;;  %v797_v46 = vpop.f32.mrf.mxu1 }
 0x147   :  { %v623_v33 = vpop.f32.mrf.mxu0 }
 0x148   :  { %v871_v47 = vadd.f32 %v870_v18, %v702_v28  ;;  %v624_v48 = vadd.f32 %v1761_v2, %v623_v33 }
 0x14a   :  { %v952_v27 = vmax.f32 %v871_v47, 0.0  ;;  %v793_v50 = vadd.f32 %v792_v23, %v624_v48 }
 0x14c   :  { %1017 = vst.msk [vmem:[%s2302_s3 + $0x1a0] sm:$0xff] %vm964_vm3, %v952_v27  ;;  %v921_v51 = vmax.f32 %v793_v50, 0.0  ;;  %v882_v18 = vpop.f32.mrf.mxu3 }
 0x14d   :  { %v703_v52 = vpop.f32.mrf.mxu2 }
 0x14e   :  { %986 = vst.msk [vmem:[%s2302_s3 + $0xa8] sm:$0xff] %vm964_vm3, %v921_v51  ;;  %v704_v53 = vadd.f32 %v1761_v2, %v703_v52  ;;  %v800_v54 = vpop.f32.mrf.mxu1 }
 0x14f   :  { %v626_v39 = vpop.f32.mrf.mxu0 }
 0x150   :  { %v873_v49 = vadd.f32 %v872_v30, %v704_v53  ;;  %v627_v56 = vadd.f32 %v1761_v2, %v626_v39 }
 0x152   :  { %v953_v58 = vmax.f32 %v873_v49, 0.0  ;;  %v796_v44 = vadd.f32 %v795_v35, %v627_v56 }
 0x154   :  { %1018 = vst.msk [vmem:[%s2302_s3 + $0x1a8] sm:$0xff] %vm964_vm3, %v953_v58  ;;  %v922_v59 = vmax.f32 %v796_v44, 0.0  ;;  %v885_v30 = vpop.f32.mrf.mxu3 }
 0x155   :  { %v706_v60 = vpop.f32.mrf.mxu2 }
 0x156   :  { %987 = vst.msk [vmem:[%s2302_s3 + $0xb0] sm:$0xff] %vm964_vm3, %v922_v59  ;;  %v707_v62 = vadd.f32 %v1761_v2, %v706_v60  ;;  %v802_v63 = vpop.f32.mrf.mxu1 }
 0x157   :  { %v628_v0 = vpop.f32.mrf.mxu0 }
 0x158   :  { %v876_v1 = vadd.f32 %v875_v45, %v707_v62  ;;  %v629_v4 = vadd.f32 %v1761_v2, %v628_v0 }
 0x15a   :  { %v954_v6 = vmax.f32 %v876_v1, 0.0  ;;  %v798_v7 = vadd.f32 %v797_v46, %v629_v4 }
 0x15c   :  { %1019 = vst.msk [vmem:[%s2302_s3 + $0x1b0] sm:$0xff] %vm964_vm3, %v954_v6  ;;  %v923_v8 = vmax.f32 %v798_v7, 0.0  ;;  %v887_v28 = vpop.f32.mrf.mxu3  ;;  %v652_v7 = vadd.f32 %v1761_v2, %v1770_v14 }
 0x15d   :  { %v708_v10 = vpop.f32.mrf.mxu2 }
 0x15e   :  { %988 = vst.msk [vmem:[%s2302_s3 + $0xb8] sm:$0xff] %vm964_vm3, %v923_v8  ;;  %v709_v3 = vadd.f32 %v1761_v2, %v708_v10  ;;  %v805_v11 = vpop.f32.mrf.mxu1 }
 0x15f   :  { %v631_v12 = vpop.f32.mrf.mxu0 }
 0x160   :  { %v878_v16 = vadd.f32 %v877_v55, %v709_v3  ;;  %v632_v57 = vadd.f32 %v1761_v2, %v631_v12 }
 0x162   :  { %v955_v61 = vmax.f32 %v878_v16, 0.0  ;;  %v801_v17 = vadd.f32 %v800_v54, %v632_v57 }
 0x164   :  { %1020 = vst.msk [vmem:[%s2302_s3 + $0x1b8] sm:$0xff] %vm964_vm3, %v955_v61  ;;  %v924_v19 = vmax.f32 %v801_v17, 0.0  ;;  %v890_v55 = vpop.f32.mrf.mxu3 }
 0x165   :  { %v711_v20 = vpop.f32.mrf.mxu2 }
 0x166   :  { %989 = vst.msk [vmem:[%s2302_s3 + $0xc0] sm:$0xff] %vm964_vm3, %v924_v19  ;;  %v712_v21 = vadd.f32 %v1761_v2, %v711_v20  ;;  %v807_v13 = vpop.f32.mrf.mxu1  ;;  %v654_v19 = vadd.f32 %v1761_v2, %v1803_v29 }
 0x167   :  { %v633_v22 = vpop.f32.mrf.mxu0 }
 0x168   :  { %v881_v23 = vadd.f32 %v880_v5, %v712_v21  ;;  %v634_v24 = vadd.f32 %v1761_v2, %v633_v22 }
 0x16a   :  { %v956_v9 = vmax.f32 %v881_v23, 0.0  ;;  %v803_v15 = vadd.f32 %v802_v63, %v634_v24 }
 0x16c   :  { %1021 = vst.msk [vmem:[%s2302_s3 + $0x1c0] sm:$0xff] %vm964_vm3, %v956_v9  ;;  %v925_v25 = vmax.f32 %v803_v15, 0.0  ;;  %v892_v5 = vpop.f32.mrf.mxu3 }
 0x16d   :  { %v713_v26 = vpop.f32.mrf.mxu2 }
 0x16e   :  { %990 = vst.msk [vmem:[%s2302_s3 + $0xc8] sm:$0xff] %vm964_vm3, %v925_v25  ;;  %v714_v31 = vadd.f32 %v1761_v2, %v713_v26  ;;  %v810_v32 = vpop.f32.mrf.mxu1 }
 0x16f   :  { %v636_v34 = vpop.f32.mrf.mxu0 }
 0x170   :  { %v883_v35 = vadd.f32 %v882_v18, %v714_v31  ;;  %v637_v36 = vadd.f32 %v1761_v2, %v636_v34 }
 0x172   :  { %v957_v37 = vmax.f32 %v883_v35, 0.0  ;;  %v806_v38 = vadd.f32 %v805_v11, %v637_v36 }
 0x174   :  { %1022 = vst.msk [vmem:[%s2302_s3 + $0x1c8] sm:$0xff] %vm964_vm3, %v957_v37  ;;  %v926_v40 = vmax.f32 %v806_v38, 0.0  ;;  %v895_v20 = vpop.f32.mrf.mxu3 }
 0x175   :  { %v716_v41 = vpop.f32.mrf.mxu2 }
 0x176   :  { %991 = vst.msk [vmem:[%s2302_s3 + $0xd0] sm:$0xff] %vm964_vm3, %v926_v40  ;;  %v717_v42 = vadd.f32 %v1761_v2, %v716_v41  ;;  %v812_v43 = vpop.f32.mrf.mxu1 }
 0x177   :  { %v638_v45 = vpop.f32.mrf.mxu0 }
 0x178   :  { %v886_v46 = vadd.f32 %v885_v30, %v717_v42  ;;  %v639_v33 = vadd.f32 %v1761_v2, %v638_v45 }
 0x17a   :  { %v958_v47 = vmax.f32 %v886_v46, 0.0  ;;  %v808_v48 = vadd.f32 %v807_v13, %v639_v33 }
 0x17c   :  { %1023 = vst.msk [vmem:[%s2302_s3 + $0x1d0] sm:$0xff] %vm964_vm3, %v958_v47  ;;  %v927_v27 = vmax.f32 %v808_v48, 0.0  ;;  %v897_v34 = vpop.f32.mrf.mxu3 }
 0x17d   :  { %v718_v50 = vpop.f32.mrf.mxu2 }
 0x17e   :  { %992 = vst.msk [vmem:[%s2302_s3 + $0xd8] sm:$0xff] %vm964_vm3, %v927_v27  ;;  %v719_v51 = vadd.f32 %v1761_v2, %v718_v50  ;;  %v815_v52 = vpop.f32.mrf.mxu1 }
 0x17f   :  { %v641_v53 = vpop.f32.mrf.mxu0 }
 0x180   :  { %v888_v54 = vadd.f32 %v887_v28, %v719_v51  ;;  %v642_v39 = vadd.f32 %v1761_v2, %v641_v53 }
 0x182   :  { %v959_v49 = vmax.f32 %v888_v54, 0.0  ;;  %v811_v56 = vadd.f32 %v810_v32, %v642_v39 }
 0x184   :  { %1024 = vst.msk [vmem:[%s2302_s3 + $0x1d8] sm:$0xff] %vm964_vm3, %v959_v49  ;;  %v928_v58 = vmax.f32 %v811_v56, 0.0 }
 0x185   :  { %v721_v44 = vpop.f32.mrf.mxu2 }
 0x186   :  { %993 = vst.msk [vmem:[%s2302_s3 + $0xe0] sm:$0xff] %vm964_vm3, %v928_v58  ;;  %v722_v59 = vadd.f32 %v1761_v2, %v721_v44  ;;  %v817_v60 = vpop.f32.mrf.mxu1 }
 0x187   :  { %v643_v62 = vpop.f32.mrf.mxu0 }
 0x188   :  { %v891_v63 = vadd.f32 %v890_v55, %v722_v59  ;;  %v644_v0 = vadd.f32 %v1761_v2, %v643_v62 }
 0x18a   :  { %v960_v1 = vmax.f32 %v891_v63, 0.0  ;;  %v813_v4 = vadd.f32 %v812_v43, %v644_v0 }
 0x18c   :  { %1025 = vst.msk [vmem:[%s2302_s3 + $0x1e0] sm:$0xff] %vm964_vm3, %v960_v1  ;;  %v929_v6 = vmax.f32 %v813_v4, 0.0 }
 0x18d   :  { %v723_v8 = vpop.f32.mrf.mxu2 }
 0x18e   :  { %994 = vst.msk [vmem:[%s2302_s3 + $0xe8] sm:$0xff] %vm964_vm3, %v929_v6  ;;  %v724_v10 = vadd.f32 %v1761_v2, %v723_v8  ;;  %v820_v3 = vpop.f32.mrf.mxu1 }
 0x18f   :  { %v821_v11 = vadd.f32 %v820_v3, %v652_v7  ;;  %v646_v12 = vpop.f32.mrf.mxu0 }
 0x190   :  { %v893_v16 = vadd.f32 %v892_v5, %v724_v10  ;;  %v647_v57 = vadd.f32 %v1761_v2, %v646_v12 }
 0x191   :  { %v932_v61 = vmax.f32 %v821_v11, 0.0 }
 0x192   :  { %v961_v17 = vmax.f32 %v893_v16, 0.0  ;;  %v816_v18 = vadd.f32 %v815_v52, %v647_v57 }
 0x193   :  { %997 = vst.msk [vmem:[%s2302_s3 + $0x100] sm:$0xff] %vm964_vm3, %v932_v61 }
 0x194   :  { %1026 = vst.msk [vmem:[%s2302_s3 + $0x1e8] sm:$0xff] %vm964_vm3, %v961_v17  ;;  %v930_v14 = vmax.f32 %v816_v18, 0.0 }
 0x195   :  { %v726_v21 = vpop.f32.mrf.mxu2 }
 0x196   :  { %995 = vst.msk [vmem:[%s2302_s3 + $0xf0] sm:$0xff] %vm964_vm3, %v930_v14  ;;  %v727_v13 = vadd.f32 %v1761_v2, %v726_v21  ;;  %v822_v22 = vpop.f32.mrf.mxu1 }
 0x197   :  { %v823_v23 = vadd.f32 %v822_v22, %v654_v19  ;;  %v648_v24 = vpop.f32.mrf.mxu0 }
 0x198   :  { %v896_v9 = vadd.f32 %v895_v20, %v727_v13  ;;  %v649_v15 = vadd.f32 %v1761_v2, %v648_v24 }
 0x199   :  { %v933_v25 = vmax.f32 %v823_v23, 0.0 }
 0x19a   :  { %v962_v26 = vmax.f32 %v896_v9, 0.0  ;;  %v818_v30 = vadd.f32 %v817_v60, %v649_v15 }
 0x19b   :  { %998 = vst.msk [vmem:[%s2302_s3 + $0x108] sm:$0xff] %vm964_vm3, %v933_v25 }
 0x19c   :  { %1027 = vst.msk [vmem:[%s2302_s3 + $0x1f0] sm:$0xff] %vm964_vm3, %v962_v26  ;;  %v931_v29 = vmax.f32 %v818_v30, 0.0 }
 0x19d   :  { %v728_v31 = vpop.f32.mrf.mxu2 }
 0x19e   :  { %996 = vst.msk [vmem:[%s2302_s3 + $0xf8] sm:$0xff] %vm964_vm3, %v931_v29  ;;  %v729_v32 = vadd.f32 %v1761_v2, %v728_v31 }
 0x1a0   :  { %v898_v35 = vadd.f32 %v897_v34, %v729_v32 }
 0x1a2   :  { %v963_v36 = vmax.f32 %v898_v35, 0.0 }
 0x1a4   :  { %1028 = vst.msk [vmem:[%s2302_s3 + $0x1f8] sm:$0xff] %vm964_vm3, %v963_v36 }

// kernel: efficient_lite_seg.45
= control target key start
LH: loop header
LB: loop body
LE: loop exit
PB: predicated region body
PF: predicated region fallthrough
CT: control target
= control target key end

     0   :  { %vm251_vm0 = vcmask 130048   ;;  %s1198_s1 = inlined_call_operand.vmem [shape: bf16[16,128], index: 1, kind: input, shape index: {}]   ;;  %s1199_s0 = inlined_call_operand.vmem [shape: bf16[512,16], index: 0, kind: input, shape index: {}]   ;;  %s1200_s2 = inlined_call_operand.vmem [shape: f32[1,128], index: 2, kind: input, shape index: {}]   ;;  %s1201_s3 = inlined_call_operand.vmem [shape: f32[512,128], index: 3, kind: output, shape index: {}]  }
   0x1   :  { %v781_v0 = vld [vmem:[%s1198_s1] sm:$0xff]  ;;  %v750_v5 = vld [vmem:[%s1199_s0 + $0x8] sm:$0xff]  ;;  %v751_v9 = vld [vmem:[%s1199_s0 + $0x10] sm:$0xff] }
   0x2   :  { %v749_v1 = vld [vmem:[%s1199_s0] sm:$0xff]  ;;  %355 = vmatpush.bf16.msra.mxu0 %v781_v0  ;;  %782 = vmatpush.bf16.msra.mxu1 %v781_v0  ;;  %v758_v6 = vld [vmem:[%s1199_s0 + $0x48] sm:$0xff]  ;;  %v759_v10 = vld [vmem:[%s1199_s0 + $0x50] sm:$0xff] }
   0x3   :  { %v757_v2 = vld [vmem:[%s1199_s0 + $0x40] sm:$0xff]  ;;  %783 = vmatpush.bf16.msra.mxu2 %v781_v0  ;;  %784 = vmatpush.bf16.msra.mxu3 %v781_v0  ;;  %v766_v7 = vld [vmem:[%s1199_s0 + $0x88] sm:$0xff]  ;;  %v767_v11 = vld [vmem:[%s1199_s0 + $0x90] sm:$0xff] }
   0x4   :  { %v765_v3 = vld [vmem:[%s1199_s0 + $0x80] sm:$0xff]  ;;  %v774_v8 = vld [vmem:[%s1199_s0 + $0xc8] sm:$0xff]  ;;  %v775_v12 = vld [vmem:[%s1199_s0 + $0xd0] sm:$0xff] }
   0x5   :  { %v773_v4 = vld [vmem:[%s1199_s0 + $0xc0] sm:$0xff]  ;;  %717 = vmatmul.msk.bf16.vlgmr.msra.gmra.mxu0 %vm251_vm0, %v749_v1  ;;  %725 = vmatmul.msk.bf16.vlgmr.msra.gmra.mxu1 %vm251_vm0, %v757_v2  ;;  %v752_v13 = vld [vmem:[%s1199_s0 + $0x18] sm:$0xff]  ;;  %v754_v21 = vld [vmem:[%s1199_s0 + $0x28] sm:$0xff] }
   0x6   :  { %733 = vmatmul.msk.bf16.vlgmr.msra.gmra.mxu2 %vm251_vm0, %v765_v3  ;;  %741 = vmatmul.msk.bf16.vlgmr.msra.gmra.mxu3 %vm251_vm0, %v773_v4  ;;  %v760_v14 = vld [vmem:[%s1199_s0 + $0x58] sm:$0xff]  ;;  %v753_v17 = vld [vmem:[%s1199_s0 + $0x20] sm:$0xff]  ;;  %v762_v22 = vld [vmem:[%s1199_s0 + $0x68] sm:$0xff] }
   0x7   :  { %v768_v15 = vld [vmem:[%s1199_s0 + $0x98] sm:$0xff]  ;;  %v761_v18 = vld [vmem:[%s1199_s0 + $0x60] sm:$0xff]  ;;  %v770_v23 = vld [vmem:[%s1199_s0 + $0xa8] sm:$0xff] }
   0x8   :  { %v776_v16 = vld [vmem:[%s1199_s0 + $0xd8] sm:$0xff]  ;;  %v769_v19 = vld [vmem:[%s1199_s0 + $0xa0] sm:$0xff]  ;;  %v778_v24 = vld [vmem:[%s1199_s0 + $0xe8] sm:$0xff] }
   0x9   :  { %v777_v20 = vld [vmem:[%s1199_s0 + $0xe0] sm:$0xff]  ;;  %v755_v25 = vld [vmem:[%s1199_s0 + $0x30] sm:$0xff]  ;;  %v756_v29 = vld [vmem:[%s1199_s0 + $0x38] sm:$0xff] }
   0xa   :  { %v763_v26 = vld [vmem:[%s1199_s0 + $0x70] sm:$0xff]  ;;  %v764_v30 = vld [vmem:[%s1199_s0 + $0x78] sm:$0xff]  ;;  %v940_v33 = vld [vmem:[%s1200_s2] ss:$0 sm:$0xff] }
   0xb   :  { %v771_v27 = vld [vmem:[%s1199_s0 + $0xb0] sm:$0xff]  ;;  %v772_v31 = vld [vmem:[%s1199_s0 + $0xb8] sm:$0xff] }
   0xc   :  { %v779_v28 = vld [vmem:[%s1199_s0 + $0xf0] sm:$0xff]  ;;  %v780_v32 = vld [vmem:[%s1199_s0 + $0xf8] sm:$0xff] }
  0x15   :  { %718 = vmatmul.msk.bf16.gmra.mxu0 %vm251_vm0, %v750_v5  ;;  %726 = vmatmul.msk.bf16.gmra.mxu1 %vm251_vm0, %v758_v6 }
  0x16   :  { %734 = vmatmul.msk.bf16.gmra.mxu2 %vm251_vm0, %v766_v7  ;;  %742 = vmatmul.msk.bf16.gmra.mxu3 %vm251_vm0, %v774_v8 }
  0x25   :  { %719 = vmatmul.msk.bf16.gmra.mxu0 %vm251_vm0, %v751_v9  ;;  %727 = vmatmul.msk.bf16.gmra.mxu1 %vm251_vm0, %v759_v10 }
  0x26   :  { %735 = vmatmul.msk.bf16.gmra.mxu2 %vm251_vm0, %v767_v11  ;;  %743 = vmatmul.msk.bf16.gmra.mxu3 %vm251_vm0, %v775_v12 }
  0x35   :  { %720 = vmatmul.msk.bf16.gmra.mxu0 %vm251_vm0, %v752_v13  ;;  %728 = vmatmul.msk.bf16.gmra.mxu1 %vm251_vm0, %v760_v14 }
  0x36   :  { %736 = vmatmul.msk.bf16.gmra.mxu2 %vm251_vm0, %v768_v15  ;;  %744 = vmatmul.msk.bf16.gmra.mxu3 %vm251_vm0, %v776_v16 }
  0x45   :  { %721 = vmatmul.msk.bf16.gmra.mxu0 %vm251_vm0, %v753_v17  ;;  %729 = vmatmul.msk.bf16.gmra.mxu1 %vm251_vm0, %v761_v18 }
  0x46   :  { %737 = vmatmul.msk.bf16.gmra.mxu2 %vm251_vm0, %v769_v19  ;;  %745 = vmatmul.msk.bf16.gmra.mxu3 %vm251_vm0, %v777_v20 }
  0x55   :  { %722 = vmatmul.msk.bf16.gmra.mxu0 %vm251_vm0, %v754_v21  ;;  %730 = vmatmul.msk.bf16.gmra.mxu1 %vm251_vm0, %v762_v22 }
  0x56   :  { %738 = vmatmul.msk.bf16.gmra.mxu2 %vm251_vm0, %v770_v23  ;;  %746 = vmatmul.msk.bf16.gmra.mxu3 %vm251_vm0, %v778_v24 }
  0x65   :  { %723 = vmatmul.msk.bf16.gmra.mxu0 %vm251_vm0, %v755_v25  ;;  %731 = vmatmul.msk.bf16.gmra.mxu1 %vm251_vm0, %v763_v26 }
  0x66   :  { %739 = vmatmul.msk.bf16.gmra.mxu2 %vm251_vm0, %v771_v27  ;;  %747 = vmatmul.msk.bf16.gmra.mxu3 %vm251_vm0, %v779_v28 }
  0x75   :  { %724 = vmatmul.msk.bf16.gmra.mxu0 %vm251_vm0, %v756_v29  ;;  %732 = vmatmul.msk.bf16.gmra.mxu1 %vm251_vm0, %v764_v30 }
  0x76   :  { %740 = vmatmul.msk.bf16.gmra.mxu2 %vm251_vm0, %v772_v31  ;;  %748 = vmatmul.msk.bf16.gmra.mxu3 %vm251_vm0, %v780_v32 }
  0x82   :  { %v357_v34 = vpop.f32.mrf.mxu0  ;;  %v397_v35 = vpop.f32.mrf.mxu1 }
  0x83   :  { %v358_v36 = vadd.f32 %v940_v33, %v357_v34  ;;  %v398_v37 = vadd.f32 %v940_v33, %v397_v35 }
  0x85   :  { %517 = vst [vmem:[%s1201_s3] sm:$0xff] %v358_v36 }
  0x86   :  { %533 = vst [vmem:[%s1201_s3 + $0x80] sm:$0xff] %v398_v37 }
  0x89   :  { %v437_v38 = vpop.f32.mrf.mxu2  ;;  %v477_v39 = vpop.f32.mrf.mxu3 }
  0x8a   :  { %v438_v40 = vadd.f32 %v940_v33, %v437_v38  ;;  %v478_v41 = vadd.f32 %v940_v33, %v477_v39  ;;  %v359_v42 = vpop.f32.mrf.mxu0  ;;  %v399_v43 = vpop.f32.mrf.mxu1 }
  0x8b   :  { %v360_v44 = vadd.f32 %v940_v33, %v359_v42  ;;  %v400_v45 = vadd.f32 %v940_v33, %v399_v43 }
  0x8c   :  { %549 = vst [vmem:[%s1201_s3 + $0x100] sm:$0xff] %v438_v40 }
  0x8d   :  { %565 = vst [vmem:[%s1201_s3 + $0x180] sm:$0xff] %v478_v41 }
  0x8e   :  { %518 = vst [vmem:[%s1201_s3 + $0x8] sm:$0xff] %v360_v44 }
  0x8f   :  { %534 = vst [vmem:[%s1201_s3 + $0x88] sm:$0xff] %v400_v45 }
  0x91   :  { %v439_v46 = vpop.f32.mrf.mxu2  ;;  %v479_v47 = vpop.f32.mrf.mxu3 }
  0x92   :  { %v440_v48 = vadd.f32 %v940_v33, %v439_v46  ;;  %v480_v49 = vadd.f32 %v940_v33, %v479_v47  ;;  %v362_v50 = vpop.f32.mrf.mxu0  ;;  %v402_v51 = vpop.f32.mrf.mxu1 }
  0x93   :  { %v363_v52 = vadd.f32 %v940_v33, %v362_v50  ;;  %v403_v53 = vadd.f32 %v940_v33, %v402_v51 }
  0x94   :  { %550 = vst [vmem:[%s1201_s3 + $0x108] sm:$0xff] %v440_v48 }
  0x95   :  { %566 = vst [vmem:[%s1201_s3 + $0x188] sm:$0xff] %v480_v49 }
  0x96   :  { %519 = vst [vmem:[%s1201_s3 + $0x10] sm:$0xff] %v363_v52 }
  0x97   :  { %535 = vst [vmem:[%s1201_s3 + $0x90] sm:$0xff] %v403_v53 }
  0x99   :  { %v442_v54 = vpop.f32.mrf.mxu2  ;;  %v482_v55 = vpop.f32.mrf.mxu3 }
  0x9a   :  { %v443_v56 = vadd.f32 %v940_v33, %v442_v54  ;;  %v483_v57 = vadd.f32 %v940_v33, %v482_v55  ;;  %v364_v58 = vpop.f32.mrf.mxu0  ;;  %v404_v59 = vpop.f32.mrf.mxu1 }
  0x9b   :  { %v365_v60 = vadd.f32 %v940_v33, %v364_v58  ;;  %v405_v61 = vadd.f32 %v940_v33, %v404_v59 }
  0x9c   :  { %551 = vst [vmem:[%s1201_s3 + $0x110] sm:$0xff] %v443_v56 }
  0x9d   :  { %567 = vst [vmem:[%s1201_s3 + $0x190] sm:$0xff] %v483_v57 }
  0x9e   :  { %520 = vst [vmem:[%s1201_s3 + $0x18] sm:$0xff] %v365_v60 }
  0x9f   :  { %536 = vst [vmem:[%s1201_s3 + $0x98] sm:$0xff] %v405_v61 }
  0xa1   :  { %v444_v62 = vpop.f32.mrf.mxu2  ;;  %v484_v63 = vpop.f32.mrf.mxu3 }
  0xa2   :  { %v445_v0 = vadd.f32 %v940_v33, %v444_v62  ;;  %v485_v1 = vadd.f32 %v940_v33, %v484_v63  ;;  %v367_v2 = vpop.f32.mrf.mxu0  ;;  %v407_v3 = vpop.f32.mrf.mxu1 }
  0xa3   :  { %v368_v4 = vadd.f32 %v940_v33, %v367_v2  ;;  %v408_v5 = vadd.f32 %v940_v33, %v407_v3 }
  0xa4   :  { %552 = vst [vmem:[%s1201_s3 + $0x118] sm:$0xff] %v445_v0 }
  0xa5   :  { %568 = vst [vmem:[%s1201_s3 + $0x198] sm:$0xff] %v485_v1 }
  0xa6   :  { %521 = vst [vmem:[%s1201_s3 + $0x20] sm:$0xff] %v368_v4 }
  0xa7   :  { %537 = vst [vmem:[%s1201_s3 + $0xa0] sm:$0xff] %v408_v5 }
  0xa9   :  { %v447_v6 = vpop.f32.mrf.mxu2  ;;  %v487_v7 = vpop.f32.mrf.mxu3 }
  0xaa   :  { %v448_v8 = vadd.f32 %v940_v33, %v447_v6  ;;  %v488_v9 = vadd.f32 %v940_v33, %v487_v7  ;;  %v369_v10 = vpop.f32.mrf.mxu0  ;;  %v409_v11 = vpop.f32.mrf.mxu1 }
  0xab   :  { %v370_v12 = vadd.f32 %v940_v33, %v369_v10  ;;  %v410_v13 = vadd.f32 %v940_v33, %v409_v11 }
  0xac   :  { %553 = vst [vmem:[%s1201_s3 + $0x120] sm:$0xff] %v448_v8 }
  0xad   :  { %569 = vst [vmem:[%s1201_s3 + $0x1a0] sm:$0xff] %v488_v9 }
  0xae   :  { %522 = vst [vmem:[%s1201_s3 + $0x28] sm:$0xff] %v370_v12 }
  0xaf   :  { %538 = vst [vmem:[%s1201_s3 + $0xa8] sm:$0xff] %v410_v13 }
  0xb1   :  { %v449_v14 = vpop.f32.mrf.mxu2  ;;  %v489_v15 = vpop.f32.mrf.mxu3 }
  0xb2   :  { %v450_v16 = vadd.f32 %v940_v33, %v449_v14  ;;  %v490_v17 = vadd.f32 %v940_v33, %v489_v15  ;;  %v372_v18 = vpop.f32.mrf.mxu0  ;;  %v412_v19 = vpop.f32.mrf.mxu1 }
  0xb3   :  { %v373_v20 = vadd.f32 %v940_v33, %v372_v18  ;;  %v413_v21 = vadd.f32 %v940_v33, %v412_v19 }
  0xb4   :  { %554 = vst [vmem:[%s1201_s3 + $0x128] sm:$0xff] %v450_v16 }
  0xb5   :  { %570 = vst [vmem:[%s1201_s3 + $0x1a8] sm:$0xff] %v490_v17 }
  0xb6   :  { %523 = vst [vmem:[%s1201_s3 + $0x30] sm:$0xff] %v373_v20 }
  0xb7   :  { %539 = vst [vmem:[%s1201_s3 + $0xb0] sm:$0xff] %v413_v21 }
  0xb9   :  { %v452_v22 = vpop.f32.mrf.mxu2  ;;  %v492_v23 = vpop.f32.mrf.mxu3 }
  0xba   :  { %v453_v24 = vadd.f32 %v940_v33, %v452_v22  ;;  %v493_v25 = vadd.f32 %v940_v33, %v492_v23  ;;  %v374_v26 = vpop.f32.mrf.mxu0  ;;  %v414_v27 = vpop.f32.mrf.mxu1 }
  0xbb   :  { %v375_v28 = vadd.f32 %v940_v33, %v374_v26  ;;  %v415_v29 = vadd.f32 %v940_v33, %v414_v27 }
  0xbc   :  { %555 = vst [vmem:[%s1201_s3 + $0x130] sm:$0xff] %v453_v24 }
  0xbd   :  { %571 = vst [vmem:[%s1201_s3 + $0x1b0] sm:$0xff] %v493_v25 }
  0xbe   :  { %524 = vst [vmem:[%s1201_s3 + $0x38] sm:$0xff] %v375_v28 }
  0xbf   :  { %540 = vst [vmem:[%s1201_s3 + $0xb8] sm:$0xff] %v415_v29 }
  0xc1   :  { %v454_v30 = vpop.f32.mrf.mxu2  ;;  %v494_v31 = vpop.f32.mrf.mxu3 }
  0xc2   :  { %v455_v32 = vadd.f32 %v940_v33, %v454_v30  ;;  %v495_v34 = vadd.f32 %v940_v33, %v494_v31  ;;  %v377_v35 = vpop.f32.mrf.mxu0  ;;  %v417_v36 = vpop.f32.mrf.mxu1 }
  0xc3   :  { %v378_v37 = vadd.f32 %v940_v33, %v377_v35  ;;  %v418_v38 = vadd.f32 %v940_v33, %v417_v36 }
  0xc4   :  { %556 = vst [vmem:[%s1201_s3 + $0x138] sm:$0xff] %v455_v32 }
  0xc5   :  { %572 = vst [vmem:[%s1201_s3 + $0x1b8] sm:$0xff] %v495_v34 }
  0xc6   :  { %525 = vst [vmem:[%s1201_s3 + $0x40] sm:$0xff] %v378_v37 }
  0xc7   :  { %541 = vst [vmem:[%s1201_s3 + $0xc0] sm:$0xff] %v418_v38 }
  0xc9   :  { %v457_v39 = vpop.f32.mrf.mxu2  ;;  %v497_v40 = vpop.f32.mrf.mxu3 }
  0xca   :  { %v458_v41 = vadd.f32 %v940_v33, %v457_v39  ;;  %v498_v42 = vadd.f32 %v940_v33, %v497_v40  ;;  %v379_v43 = vpop.f32.mrf.mxu0  ;;  %v419_v44 = vpop.f32.mrf.mxu1 }
  0xcb   :  { %v380_v45 = vadd.f32 %v940_v33, %v379_v43  ;;  %v420_v46 = vadd.f32 %v940_v33, %v419_v44 }
  0xcc   :  { %557 = vst [vmem:[%s1201_s3 + $0x140] sm:$0xff] %v458_v41 }
  0xcd   :  { %573 = vst [vmem:[%s1201_s3 + $0x1c0] sm:$0xff] %v498_v42 }
  0xce   :  { %526 = vst [vmem:[%s1201_s3 + $0x48] sm:$0xff] %v380_v45 }
  0xcf   :  { %542 = vst [vmem:[%s1201_s3 + $0xc8] sm:$0xff] %v420_v46 }
  0xd1   :  { %v459_v47 = vpop.f32.mrf.mxu2  ;;  %v499_v48 = vpop.f32.mrf.mxu3 }
  0xd2   :  { %v460_v49 = vadd.f32 %v940_v33, %v459_v47  ;;  %v500_v50 = vadd.f32 %v940_v33, %v499_v48  ;;  %v382_v51 = vpop.f32.mrf.mxu0  ;;  %v422_v52 = vpop.f32.mrf.mxu1 }
  0xd3   :  { %v383_v53 = vadd.f32 %v940_v33, %v382_v51  ;;  %v423_v54 = vadd.f32 %v940_v33, %v422_v52 }
  0xd4   :  { %558 = vst [vmem:[%s1201_s3 + $0x148] sm:$0xff] %v460_v49 }
  0xd5   :  { %574 = vst [vmem:[%s1201_s3 + $0x1c8] sm:$0xff] %v500_v50 }
  0xd6   :  { %527 = vst [vmem:[%s1201_s3 + $0x50] sm:$0xff] %v383_v53 }
  0xd7   :  { %543 = vst [vmem:[%s1201_s3 + $0xd0] sm:$0xff] %v423_v54 }
  0xd9   :  { %v462_v55 = vpop.f32.mrf.mxu2  ;;  %v502_v56 = vpop.f32.mrf.mxu3 }
  0xda   :  { %v463_v57 = vadd.f32 %v940_v33, %v462_v55  ;;  %v503_v58 = vadd.f32 %v940_v33, %v502_v56  ;;  %v384_v59 = vpop.f32.mrf.mxu0  ;;  %v424_v60 = vpop.f32.mrf.mxu1 }
  0xdb   :  { %v385_v61 = vadd.f32 %v940_v33, %v384_v59  ;;  %v425_v62 = vadd.f32 %v940_v33, %v424_v60 }
  0xdc   :  { %559 = vst [vmem:[%s1201_s3 + $0x150] sm:$0xff] %v463_v57 }
  0xdd   :  { %575 = vst [vmem:[%s1201_s3 + $0x1d0] sm:$0xff] %v503_v58 }
  0xde   :  { %528 = vst [vmem:[%s1201_s3 + $0x58] sm:$0xff] %v385_v61 }
  0xdf   :  { %544 = vst [vmem:[%s1201_s3 + $0xd8] sm:$0xff] %v425_v62 }
  0xe1   :  { %v464_v63 = vpop.f32.mrf.mxu2  ;;  %v504_v0 = vpop.f32.mrf.mxu3 }
  0xe2   :  { %v465_v1 = vadd.f32 %v940_v33, %v464_v63  ;;  %v505_v2 = vadd.f32 %v940_v33, %v504_v0  ;;  %v387_v3 = vpop.f32.mrf.mxu0  ;;  %v427_v4 = vpop.f32.mrf.mxu1 }
  0xe3   :  { %v388_v5 = vadd.f32 %v940_v33, %v387_v3  ;;  %v428_v6 = vadd.f32 %v940_v33, %v427_v4 }
  0xe4   :  { %560 = vst [vmem:[%s1201_s3 + $0x158] sm:$0xff] %v465_v1 }
  0xe5   :  { %576 = vst [vmem:[%s1201_s3 + $0x1d8] sm:$0xff] %v505_v2 }
  0xe6   :  { %529 = vst [vmem:[%s1201_s3 + $0x60] sm:$0xff] %v388_v5 }
  0xe7   :  { %545 = vst [vmem:[%s1201_s3 + $0xe0] sm:$0xff] %v428_v6 }
  0xe9   :  { %v467_v7 = vpop.f32.mrf.mxu2  ;;  %v507_v8 = vpop.f32.mrf.mxu3 }
  0xea   :  { %v468_v9 = vadd.f32 %v940_v33, %v467_v7  ;;  %v508_v10 = vadd.f32 %v940_v33, %v507_v8  ;;  %v389_v11 = vpop.f32.mrf.mxu0  ;;  %v429_v12 = vpop.f32.mrf.mxu1 }
  0xeb   :  { %v390_v13 = vadd.f32 %v940_v33, %v389_v11  ;;  %v430_v14 = vadd.f32 %v940_v33, %v429_v12 }
  0xec   :  { %561 = vst [vmem:[%s1201_s3 + $0x160] sm:$0xff] %v468_v9 }
  0xed   :  { %577 = vst [vmem:[%s1201_s3 + $0x1e0] sm:$0xff] %v508_v10 }
  0xee   :  { %530 = vst [vmem:[%s1201_s3 + $0x68] sm:$0xff] %v390_v13 }
  0xef   :  { %546 = vst [vmem:[%s1201_s3 + $0xe8] sm:$0xff] %v430_v14 }
  0xf1   :  { %v469_v15 = vpop.f32.mrf.mxu2  ;;  %v509_v16 = vpop.f32.mrf.mxu3 }
  0xf2   :  { %v470_v17 = vadd.f32 %v940_v33, %v469_v15  ;;  %v510_v18 = vadd.f32 %v940_v33, %v509_v16  ;;  %v392_v19 = vpop.f32.mrf.mxu0  ;;  %v432_v20 = vpop.f32.mrf.mxu1 }
  0xf3   :  { %v393_v21 = vadd.f32 %v940_v33, %v392_v19  ;;  %v433_v22 = vadd.f32 %v940_v33, %v432_v20 }
  0xf4   :  { %562 = vst [vmem:[%s1201_s3 + $0x168] sm:$0xff] %v470_v17 }
  0xf5   :  { %578 = vst [vmem:[%s1201_s3 + $0x1e8] sm:$0xff] %v510_v18 }
  0xf6   :  { %531 = vst [vmem:[%s1201_s3 + $0x70] sm:$0xff] %v393_v21 }
  0xf7   :  { %547 = vst [vmem:[%s1201_s3 + $0xf0] sm:$0xff] %v433_v22 }
  0xf9   :  { %v472_v23 = vpop.f32.mrf.mxu2  ;;  %v512_v24 = vpop.f32.mrf.mxu3 }
  0xfa   :  { %v473_v25 = vadd.f32 %v940_v33, %v472_v23  ;;  %v513_v26 = vadd.f32 %v940_v33, %v512_v24  ;;  %v394_v27 = vpop.f32.mrf.mxu0  ;;  %v434_v28 = vpop.f32.mrf.mxu1 }
  0xfb   :  { %v395_v29 = vadd.f32 %v940_v33, %v394_v27  ;;  %v435_v30 = vadd.f32 %v940_v33, %v434_v28 }
  0xfc   :  { %563 = vst [vmem:[%s1201_s3 + $0x170] sm:$0xff] %v473_v25 }
  0xfd   :  { %579 = vst [vmem:[%s1201_s3 + $0x1f0] sm:$0xff] %v513_v26 }
  0xfe   :  { %532 = vst [vmem:[%s1201_s3 + $0x78] sm:$0xff] %v395_v29 }
  0xff   :  { %548 = vst [vmem:[%s1201_s3 + $0xf8] sm:$0xff] %v435_v30 }
 0x101   :  { %v474_v31 = vpop.f32.mrf.mxu2  ;;  %v514_v32 = vpop.f32.mrf.mxu3 }
 0x102   :  { %v475_v34 = vadd.f32 %v940_v33, %v474_v31  ;;  %v515_v35 = vadd.f32 %v940_v33, %v514_v32 }
 0x104   :  { %564 = vst [vmem:[%s1201_s3 + $0x178] sm:$0xff] %v475_v34 }
 0x105   :  { %580 = vst [vmem:[%s1201_s3 + $0x1f8] sm:$0xff] %v515_v35 }

</bundles_post_ra>
